<compile_context>
chip_gen: v5e
topology: v5e:2x2
jax: 0.10.0
libtpu: 0.0.40
codegen_flags: <defaults>
</compile_context>

<pallas_src>
import jax
import jax.numpy as jnp
from jax.experimental import pallas as pl
from jax.experimental.pallas import tpu as pltpu

INPUT_DIM = 2
HIDDEN_DIM = 1024
BATCH_TILE = 512          # per-step MXU work >> per-step overhead; fits v7x VMEM
OUT_PACK = 8              # packed output lanes: [z0, z1, logdet, 0, 0, 0, 0, 0]


def _affine_coupling_kernel(
    x_ref, mask_ref,
    w1_ref, b1_ref,                               # fused [scale | translation] layer 1
    ws2_ref, ws2_scale_ref, bs2_ref,              # layer 2 scale branch (int8 + scales)
    wt2_ref, wt2_scale_ref, bt2_ref,              # layer 2 translation branch (int8 + scales)
    ws3_ref, bs3_ref, wt3_ref, bt3_ref,           # small output heads
    out_ref,
):
    x = x_ref[...]                                # (TB, D) f32
    mask = mask_ref[...]                          # (1, D) broadcast over batch
    one_minus_mask = 1.0 - mask
    x_masked = x * mask

    # --- layer 1, fused: one K=2 matmul producing both hidden activations ---
    h = jnp.dot(x_masked, w1_ref[...], preferred_element_type=jnp.float32) + b1_ref[...]
    h = jnp.maximum(h, 0.0)                       # (TB, 2H)
    h_s = h[:, :HIDDEN_DIM].astype(jnp.bfloat16)  # scale branch hidden       (TB, H)
    h_t = h[:, HIDDEN_DIM:].astype(jnp.bfloat16)  # translation branch hidden (TB, H)

    # --- layer 2: int8 weights streamed from HBM (dominant traffic).
    # Exact int8->bf16 cast on the VPU (hidden under MXU/DMA work); the
    # per-output-channel scale is applied AFTER the matmul on the (TB,H) result.
    w2s = ws2_ref[...].astype(jnp.bfloat16)
    acc_s = jnp.dot(h_s, w2s, preferred_element_type=jnp.float32)
    h2_s = jnp.maximum(acc_s * ws2_scale_ref[...] + bs2_ref[...], 0.0)

    w2t = wt2_ref[...].astype(jnp.bfloat16)
    acc_t = jnp.dot(h_t, w2t, preferred_element_type=jnp.float32)
    h2_t = jnp.maximum(acc_t * wt2_scale_ref[...] + bt2_ref[...], 0.0)

    # --- layer 3 heads (tiny N=2 matmuls, f32) ---
    s_raw = jnp.dot(h2_s, ws3_ref[...], preferred_element_type=jnp.float32) + bs3_ref[...]
    t_raw = jnp.dot(h2_t, wt3_ref[...], preferred_element_type=jnp.float32) + bt3_ref[...]

    s = jnp.tanh(s_raw) * one_minus_mask          # (TB, D)
    t = t_raw * one_minus_mask                    # (TB, D)

    z = x * jnp.exp(s) + t                        # (TB, D)
    logdet = jnp.sum(s, axis=1, keepdims=True)    # (TB, 1)

    pad_cols = OUT_PACK - INPUT_DIM - 1
    out_ref[...] = jnp.concatenate(
        [z, logdet, jnp.zeros((z.shape[0], pad_cols), jnp.float32)], axis=-1)


@jax.jit
def affine_coupling_forward(x, mask, pp):
    """x: (B, INPUT_DIM) f32, mask: (INPUT_DIM,) f32, pp: packed params dict."""
    B = x.shape[0]
    B_pad = max(8, ((B + 7) // 8) * 8)                       # sublane alignment
    if B_pad > BATCH_TILE:
        # pad up to a multiple of the tile (never a single huge tile -> VMEM blowup)
        B_pad = ((B_pad + BATCH_TILE - 1) // BATCH_TILE) * BATCH_TILE
        TB = BATCH_TILE
    else:
        TB = B_pad
    n_steps = B_pad // TB
    grid = (n_steps,)

    x_p = x.astype(jnp.float32)
    if B_pad != B:
        x_p = jnp.pad(x_p, ((0, B_pad - B), (0, 0)))
    mask2d = mask.reshape(1, INPUT_DIM).astype(jnp.float32)

    const = lambda i: (0, 0)
    # Weights/biases never change block index -> single-buffer them (reclaims VMEM).
    cspec = lambda shape: pl.BlockSpec(shape, const, pipeline_mode=pl.Buffered(1))

    in_specs = [
        pl.BlockSpec((TB, INPUT_DIM), lambda i: (i, 0)),       # x
        cspec((1, INPUT_DIM)),                                 # mask
        cspec((INPUT_DIM, 2 * HIDDEN_DIM)),                    # w1 (fused, f32)
        cspec((1, 2 * HIDDEN_DIM)),                            # b1 (fused, f32)
        cspec((HIDDEN_DIM, HIDDEN_DIM)),                       # ws2_q (int8)
        cspec((1, HIDDEN_DIM)),                                # ws2_scale
        cspec((1, HIDDEN_DIM)),                                # bs2
        cspec((HIDDEN_DIM, HIDDEN_DIM)),                       # wt2_q (int8)
        cspec((1, HIDDEN_DIM)),                                # wt2_scale
        cspec((1, HIDDEN_DIM)),                                # bt2
        cspec((HIDDEN_DIM, INPUT_DIM)),                        # ws3
        cspec((1, INPUT_DIM)),                                 # bs3
        cspec((HIDDEN_DIM, INPUT_DIM)),                        # wt3
        cspec((1, INPUT_DIM)),                                 # bt3
    ]
    out_specs = pl.BlockSpec((TB, OUT_PACK), lambda i: (i, 0))

    # Advisory cost hint so XLA can schedule neighboring work around the call.
    weight_bytes = (
        2 * HIDDEN_DIM * HIDDEN_DIM                                   # int8 ws2 + wt2
        + 4 * (INPUT_DIM * 2 * HIDDEN_DIM + 2 * HIDDEN_DIM            # w1 + b1
               + 4 * HIDDEN_DIM                                       # scales + biases
               + 2 * HIDDEN_DIM * INPUT_DIM + 2 * INPUT_DIM)          # ws3/wt3 + bs3/bt3
    )
    cost = pl.CostEstimate(
        flops=4 * B_pad * HIDDEN_DIM * HIDDEN_DIM + 16 * B_pad * HIDDEN_DIM,
        transcendentals=4 * B_pad,
        bytes_accessed=weight_bytes + B_pad * 4 * (INPUT_DIM + OUT_PACK),
    )

    # Large grids are MXU-bound -> shard the batch across v7x's 2 TensorCores.
    # Small grids are HBM weight-stream-bound -> keep on one core so the ~2 MiB
    # int8 weight read is not duplicated. (No measured effect on v5e/v6e.)
    dims = ("parallel",) if n_steps >= 4 else ("arbitrary",)

    packed = pl.pallas_call(
        _affine_coupling_kernel,
        out_shape=jax.ShapeDtypeStruct((B_pad, OUT_PACK), jnp.float32),
        grid=grid,
        in_specs=in_specs,
        out_specs=out_specs,
        cost_estimate=cost,
        compiler_params=pltpu.CompilerParams(
            dimension_semantics=dims,
            vmem_limit_bytes=32 << 20,
        ),
    )(
        x_p, mask2d,
        pp["w1"], pp["b1"],
        pp["ws2_q"], pp["ws2_scale"], pp["bs2"],
        pp["wt2_q"], pp["wt2_scale"], pp["bt2"],
        pp["ws3"], pp["bs3"], pp["wt3"], pp["bt3"],
    )
    z = packed[:B, :INPUT_DIM]
    log_det = packed[:B, INPUT_DIM]
    return z, log_det


def init_params(key):
    """Deterministic init mimicking nn.Linear's U(-1/sqrt(fan_in), 1/sqrt(fan_in))."""
    def linear(key, fan_in, fan_out):
        kw, kb = jax.random.split(key)
        bound = 1.0 / jnp.sqrt(jnp.float32(fan_in))
        w = jax.random.uniform(kw, (fan_in, fan_out), jnp.float32, -bound, bound)
        b = jax.random.uniform(kb, (1, fan_out), jnp.float32, -bound, bound)
        return w, b

    keys = jax.random.split(key, 6)
    ws1, bs1 = linear(keys[0], INPUT_DIM, HIDDEN_DIM)
    ws2, bs2 = linear(keys[1], HIDDEN_DIM, HIDDEN_DIM)
    ws3, bs3 = linear(keys[2], HIDDEN_DIM, INPUT_DIM)
    wt1, bt1 = linear(keys[3], INPUT_DIM, HIDDEN_DIM)
    wt2, bt2 = linear(keys[4], HIDDEN_DIM, HIDDEN_DIM)
    wt3, bt3 = linear(keys[5], HIDDEN_DIM, INPUT_DIM)
    return dict(ws1=ws1, bs1=bs1, ws2=ws2, bs2=bs2, ws3=ws3, bs3=bs3,
                wt1=wt1, bt1=bt1, wt2=wt2, bt2=bt2, wt3=wt3, bt3=bt3)


def pack_params(p):
    """One-time host-side packing: fuse layer-1 weights, int8-quantize layer-2."""
    def quant_int8(w):
        # symmetric per-output-channel (column) int8 quantization
        max_abs = jnp.max(jnp.abs(w), axis=0, keepdims=True)          # (1, H)
        scale = jnp.maximum(max_abs, 1e-12) / 127.0
        q = jnp.clip(jnp.round(w / scale), -127.0, 127.0).astype(jnp.int8)
        return q, scale.astype(jnp.float32)

    ws2_q, ws2_scale = quant_int8(p["ws2"])
    wt2_q, wt2_scale = quant_int8(p["wt2"])
    return dict(
        w1=jnp.concatenate([p["ws1"], p["wt1"]], axis=1),             # (D, 2H) f32
        b1=jnp.concatenate([p["bs1"], p["bt1"]], axis=1),             # (1, 2H) f32
        ws2_q=ws2_q, ws2_scale=ws2_scale, bs2=p["bs2"],
        wt2_q=wt2_q, wt2_scale=wt2_scale, bt2=p["bt2"],
        ws3=p["ws3"], bs3=p["bs3"],
        wt3=p["wt3"], bt3=p["bt3"],
    )


def reference_forward_quant(x, mask, pp):
    """Pure-JAX reference mirroring the kernel's exact (int8 + bf16) math."""
    mask = mask.reshape(1, INPUT_DIM)
    xm = x * mask
    h = jnp.maximum(xm @ pp["w1"] + pp["b1"], 0.0)
    h_s, h_t = h[:, :HIDDEN_DIM], h[:, HIDDEN_DIM:]

    def layer2(hh, wq, sc, b):
        acc = jnp.dot(hh.astype(jnp.bfloat16), wq.astype(jnp.bfloat16),
                      preferred_element_type=jnp.float32)
        return jnp.maximum(acc * sc + b, 0.0)

    h2_s = layer2(h_s, pp["ws2_q"], pp["ws2_scale"], pp["bs2"])
    h2_t = layer2(h_t, pp["wt2_q"], pp["wt2_scale"], pp["bt2"])
    s = jnp.tanh(h2_s @ pp["ws3"] + pp["bs3"]) * (1.0 - mask)
    t = (h2_t @ pp["wt3"] + pp["bt3"]) * (1.0 - mask)
    z = x * jnp.exp(s) + t
    return z, jnp.sum(s, axis=1)


def reference_forward_f32(x, mask, p):
    """Original nn.Module math in full f32 (checks int8/bf16 accuracy loss)."""
    mask = mask.reshape(1, INPUT_DIM)
    xm = x * mask

    def mlp(w1, b1, w2, b2, w3, b3):
        h = jnp.maximum(xm @ w1 + b1, 0.0)
        h = jnp.maximum(h @ w2 + b2, 0.0)
        return h @ w3 + b3

    s = jnp.tanh(mlp(p["ws1"], p["bs1"], p["ws2"], p["bs2"],
                     p["ws3"], p["bs3"])) * (1.0 - mask)
    t = mlp(p["wt1"], p["bt1"], p["wt2"], p["bt2"],
            p["wt3"], p["bt3"]) * (1.0 - mask)
    z = x * jnp.exp(s) + t
    return z, jnp.sum(s, axis=1)


if __name__ == "__main__":
    key = jax.random.PRNGKey(0)
    k_params, k_x1, k_x2 = jax.random.split(key, 3)

    raw_params = init_params(k_params)
    params = pack_params(raw_params)
    mask = jnp.array([1.0, 0.0], dtype=jnp.float32)   # checkerboard-style coupling mask

    # --- small batch: single grid step, weight-stream-bound regime ---
    B1 = 8
    x1 = jax.random.normal(k_x1, (B1, INPUT_DIM), jnp.float32)
    z1, ld1 = affine_coupling_forward(x1, mask, params)
    jax.block_until_ready((z1, ld1))

    zq1, ldq1 = reference_forward_quant(x1, mask, params)
    zf1, ldf1 = reference_forward_f32(x1, mask, raw_params)
    assert z1.shape == (B1, INPUT_DIM) and ld1.shape == (B1,)
    # exact-math check (kernel vs identical-quantization reference)
    assert jnp.allclose(z1, zq1, atol=1e-3, rtol=1e-3)
    assert jnp.allclose(ld1, ldq1, atol=1e-3, rtol=1e-3)
    # accuracy check vs the original f32 module (bounds int8/bf16 compression error)
    assert jnp.allclose(z1, zf1, atol=1e-1)
    assert jnp.allclose(ld1, ldf1, atol=1e-1)

    # --- batch not a multiple of the tile: exercises padding + multi-step grid ---
    B2 = 600
    x2 = jax.random.normal(k_x2, (B2, INPUT_DIM), jnp.float32)
    z2, ld2 = affine_coupling_forward(x2, mask, params)
    jax.block_until_ready((z2, ld2))
    zq2, ldq2 = reference_forward_quant(x2, mask, params)
    assert z2.shape == (B2, INPUT_DIM) and ld2.shape == (B2,)
    assert jnp.allclose(z2, zq2, atol=1e-3, rtol=1e-3)
    assert jnp.allclose(ld2, ldq2, atol=1e-3, rtol=1e-3)

    print("KERNEL_OK")
</pallas_src>

<mosaic_0001>
module attributes {stable_mosaic.version = 11 : i64} {
  func.func @_affine_coupling_kernel(%arg0: i32, %arg1: memref<8x2xf32, #tpu.memory_space<vmem>>, %arg2: memref<1x2xf32, #tpu.memory_space<vmem>>, %arg3: memref<2x2048xf32, #tpu.memory_space<vmem>>, %arg4: memref<1x2048xf32, #tpu.memory_space<vmem>>, %arg5: memref<1024x1024xi8, #tpu.memory_space<vmem>>, %arg6: memref<1x1024xf32, #tpu.memory_space<vmem>>, %arg7: memref<1x1024xf32, #tpu.memory_space<vmem>>, %arg8: memref<1024x1024xi8, #tpu.memory_space<vmem>>, %arg9: memref<1x1024xf32, #tpu.memory_space<vmem>>, %arg10: memref<1x1024xf32, #tpu.memory_space<vmem>>, %arg11: memref<1024x2xf32, #tpu.memory_space<vmem>>, %arg12: memref<1x2xf32, #tpu.memory_space<vmem>>, %arg13: memref<1024x2xf32, #tpu.memory_space<vmem>>, %arg14: memref<1x2xf32, #tpu.memory_space<vmem>>, %arg15: memref<8x8xf32, #tpu.memory_space<vmem>>) attributes {dimension_semantics = [#tpu.dimension_semantics<arbitrary>], iteration_bounds = array<i64: 1>, scalar_prefetch = 0 : i64, scratch_operands = 0 : i64, tpu.core_type = #tpu.core_type<tc>, window_params = [{transform_indices = @transform_0, window_bounds = array<i64: 8, 2>}, {pipeline_mode = #tpu.pipeline_mode<synchronous>, transform_indices = @transform_1, window_bounds = array<i64: 1, 2>}, {pipeline_mode = #tpu.pipeline_mode<synchronous>, transform_indices = @transform_2, window_bounds = array<i64: 2, 2048>}, {pipeline_mode = #tpu.pipeline_mode<synchronous>, transform_indices = @transform_3, window_bounds = array<i64: 1, 2048>}, {pipeline_mode = #tpu.pipeline_mode<synchronous>, transform_indices = @transform_4, window_bounds = array<i64: 1024, 1024>}, {pipeline_mode = #tpu.pipeline_mode<synchronous>, transform_indices = @transform_5, window_bounds = array<i64: 1, 1024>}, {pipeline_mode = #tpu.pipeline_mode<synchronous>, transform_indices = @transform_6, window_bounds = array<i64: 1, 1024>}, {pipeline_mode = #tpu.pipeline_mode<synchronous>, transform_indices = @transform_7, window_bounds = array<i64: 1024, 1024>}, {pipeline_mode = #tpu.pipeline_mode<synchronous>, transform_indices = @transform_8, window_bounds = array<i64: 1, 1024>}, {pipeline_mode = #tpu.pipeline_mode<synchronous>, transform_indices = @transform_9, window_bounds = array<i64: 1, 1024>}, {pipeline_mode = #tpu.pipeline_mode<synchronous>, transform_indices = @transform_10, window_bounds = array<i64: 1024, 2>}, {pipeline_mode = #tpu.pipeline_mode<synchronous>, transform_indices = @transform_11, window_bounds = array<i64: 1, 2>}, {pipeline_mode = #tpu.pipeline_mode<synchronous>, transform_indices = @transform_12, window_bounds = array<i64: 1024, 2>}, {pipeline_mode = #tpu.pipeline_mode<synchronous>, transform_indices = @transform_13, window_bounds = array<i64: 1, 2>}, {transform_indices = @transform_14, window_bounds = array<i64: 8, 8>}]} {
    %c0 = arith.constant 0 : index
    %c0_0 = arith.constant 0 : index
    %0 = vector.load %arg1[%c0, %c0_0] : memref<8x2xf32, #tpu.memory_space<vmem>>, vector<8x2xf32>
    %c0_1 = arith.constant 0 : index
    %c0_2 = arith.constant 0 : index
    %1 = vector.load %arg2[%c0_1, %c0_2] : memref<1x2xf32, #tpu.memory_space<vmem>>, vector<1x2xf32>
    %cst = arith.constant 1.000000e+00 : f32
    %2 = vector.broadcast %cst : f32 to vector<1x2xf32>
    %3 = arith.subf %2, %1 : vector<1x2xf32>
    %4 = vector.broadcast %1 : vector<1x2xf32> to vector<8x2xf32>
    %5 = arith.mulf %0, %4 : vector<8x2xf32>
    %c0_3 = arith.constant 0 : index
    %c0_4 = arith.constant 0 : index
    %6 = vector.load %arg3[%c0_3, %c0_4] : memref<2x2048xf32, #tpu.memory_space<vmem>>, vector<2x2048xf32>
    %cst_5 = arith.constant dense<0.000000e+00> : vector<8x2048xf32>
    %7 = tpu.matmul %5, %6, %cst_5 {dimension_numbers = #tpu.dot_dimension_numbers<[1], [0], [0], [1], [0, 0, 1, 1], [], []>} : vector<8x2xf32>, vector<2x2048xf32>, vector<8x2048xf32> -> vector<8x2048xf32>
    %c0_6 = arith.constant 0 : index
    %c0_7 = arith.constant 0 : index
    %8 = vector.load %arg4[%c0_6, %c0_7] : memref<1x2048xf32, #tpu.memory_space<vmem>>, vector<1x2048xf32>
    %9 = vector.broadcast %8 : vector<1x2048xf32> to vector<8x2048xf32>
    %10 = arith.addf %7, %9 : vector<8x2048xf32>
    %cst_8 = arith.constant 0.000000e+00 : f32
    %11 = vector.broadcast %cst_8 : f32 to vector<8x2048xf32>
    %12 = arith.maximumf %10, %11 : vector<8x2048xf32>
    %13 = vector.extract_strided_slice %12 {offsets = [0, 0], sizes = [8, 1024], strides = [1, 1]} : vector<8x2048xf32> to vector<8x1024xf32>
    %14 = arith.truncf %13 : vector<8x1024xf32> to vector<8x1024xbf16>
    %15 = vector.extract_strided_slice %12 {offsets = [0, 1024], sizes = [8, 1024], strides = [1, 1]} : vector<8x2048xf32> to vector<8x1024xf32>
    %16 = arith.truncf %15 : vector<8x1024xf32> to vector<8x1024xbf16>
    %c0_9 = arith.constant 0 : index
    %c0_10 = arith.constant 0 : index
    %17 = vector.load %arg5[%c0_9, %c0_10] : memref<1024x1024xi8, #tpu.memory_space<vmem>>, vector<1024x1024xi8>
    %18 = arith.sitofp %17 : vector<1024x1024xi8> to vector<1024x1024xbf16>
    %cst_11 = arith.constant dense<0.000000e+00> : vector<8x1024xf32>
    %19 = tpu.matmul %14, %18, %cst_11 {dimension_numbers = #tpu.dot_dimension_numbers<[1], [0], [0], [1], [0, 0, 1, 1], [], []>} : vector<8x1024xbf16>, vector<1024x1024xbf16>, vector<8x1024xf32> -> vector<8x1024xf32>
    %c0_12 = arith.constant 0 : index
    %c0_13 = arith.constant 0 : index
    %20 = vector.load %arg6[%c0_12, %c0_13] : memref<1x1024xf32, #tpu.memory_space<vmem>>, vector<1x1024xf32>
    %21 = vector.broadcast %20 : vector<1x1024xf32> to vector<8x1024xf32>
    %22 = arith.mulf %19, %21 : vector<8x1024xf32>
    %c0_14 = arith.constant 0 : index
    %c0_15 = arith.constant 0 : index
    %23 = vector.load %arg7[%c0_14, %c0_15] : memref<1x1024xf32, #tpu.memory_space<vmem>>, vector<1x1024xf32>
    %24 = vector.broadcast %23 : vector<1x1024xf32> to vector<8x1024xf32>
    %25 = arith.addf %22, %24 : vector<8x1024xf32>
    %cst_16 = arith.constant 0.000000e+00 : f32
    %26 = vector.broadcast %cst_16 : f32 to vector<8x1024xf32>
    %27 = arith.maximumf %25, %26 : vector<8x1024xf32>
    %c0_17 = arith.constant 0 : index
    %c0_18 = arith.constant 0 : index
    %28 = vector.load %arg8[%c0_17, %c0_18] : memref<1024x1024xi8, #tpu.memory_space<vmem>>, vector<1024x1024xi8>
    %29 = arith.sitofp %28 : vector<1024x1024xi8> to vector<1024x1024xbf16>
    %cst_19 = arith.constant dense<0.000000e+00> : vector<8x1024xf32>
    %30 = tpu.matmul %16, %29, %cst_19 {dimension_numbers = #tpu.dot_dimension_numbers<[1], [0], [0], [1], [0, 0, 1, 1], [], []>} : vector<8x1024xbf16>, vector<1024x1024xbf16>, vector<8x1024xf32> -> vector<8x1024xf32>
    %c0_20 = arith.constant 0 : index
    %c0_21 = arith.constant 0 : index
    %31 = vector.load %arg9[%c0_20, %c0_21] : memref<1x1024xf32, #tpu.memory_space<vmem>>, vector<1x1024xf32>
    %32 = vector.broadcast %31 : vector<1x1024xf32> to vector<8x1024xf32>
    %33 = arith.mulf %30, %32 : vector<8x1024xf32>
    %c0_22 = arith.constant 0 : index
    %c0_23 = arith.constant 0 : index
    %34 = vector.load %arg10[%c0_22, %c0_23] : memref<1x1024xf32, #tpu.memory_space<vmem>>, vector<1x1024xf32>
    %35 = vector.broadcast %34 : vector<1x1024xf32> to vector<8x1024xf32>
    %36 = arith.addf %33, %35 : vector<8x1024xf32>
    %cst_24 = arith.constant 0.000000e+00 : f32
    %37 = vector.broadcast %cst_24 : f32 to vector<8x1024xf32>
    %38 = arith.maximumf %36, %37 : vector<8x1024xf32>
    %c0_25 = arith.constant 0 : index
    %c0_26 = arith.constant 0 : index
    %39 = vector.load %arg11[%c0_25, %c0_26] : memref<1024x2xf32, #tpu.memory_space<vmem>>, vector<1024x2xf32>
    %cst_27 = arith.constant dense<0.000000e+00> : vector<8x2xf32>
    %40 = tpu.matmul %27, %39, %cst_27 {dimension_numbers = #tpu.dot_dimension_numbers<[1], [0], [0], [1], [0, 0, 1, 1], [], []>} : vector<8x1024xf32>, vector<1024x2xf32>, vector<8x2xf32> -> vector<8x2xf32>
    %c0_28 = arith.constant 0 : index
    %c0_29 = arith.constant 0 : index
    %41 = vector.load %arg12[%c0_28, %c0_29] : memref<1x2xf32, #tpu.memory_space<vmem>>, vector<1x2xf32>
    %42 = vector.broadcast %41 : vector<1x2xf32> to vector<8x2xf32>
    %43 = arith.addf %40, %42 : vector<8x2xf32>
    %c0_30 = arith.constant 0 : index
    %c0_31 = arith.constant 0 : index
    %44 = vector.load %arg13[%c0_30, %c0_31] : memref<1024x2xf32, #tpu.memory_space<vmem>>, vector<1024x2xf32>
    %cst_32 = arith.constant dense<0.000000e+00> : vector<8x2xf32>
    %45 = tpu.matmul %38, %44, %cst_32 {dimension_numbers = #tpu.dot_dimension_numbers<[1], [0], [0], [1], [0, 0, 1, 1], [], []>} : vector<8x1024xf32>, vector<1024x2xf32>, vector<8x2xf32> -> vector<8x2xf32>
    %c0_33 = arith.constant 0 : index
    %c0_34 = arith.constant 0 : index
    %46 = vector.load %arg14[%c0_33, %c0_34] : memref<1x2xf32, #tpu.memory_space<vmem>>, vector<1x2xf32>
    %47 = vector.broadcast %46 : vector<1x2xf32> to vector<8x2xf32>
    %48 = arith.addf %45, %47 : vector<8x2xf32>
    %49 = math.tanh %43 : vector<8x2xf32>
    %50 = vector.broadcast %3 : vector<1x2xf32> to vector<8x2xf32>
    %51 = arith.mulf %49, %50 : vector<8x2xf32>
    %52 = vector.broadcast %3 : vector<1x2xf32> to vector<8x2xf32>
    %53 = arith.mulf %48, %52 : vector<8x2xf32>
    %54 = math.exp %51 : vector<8x2xf32>
    %55 = arith.mulf %0, %54 : vector<8x2xf32>
    %56 = arith.addf %55, %53 : vector<8x2xf32>
    %cst_35 = arith.constant dense<0.000000e+00> : vector<8xf32>
    %57 = vector.multi_reduction <add>, %51, %cst_35 [1] : vector<8x2xf32> to vector<8xf32>
    %58 = vector.shape_cast %57 : vector<8xf32> to vector<8x1xf32>
    %cst_36 = arith.constant 0.000000e+00 : f32
    %59 = vector.broadcast %cst_36 : f32 to vector<8x5xf32>
    %60 = tpu.concatenate %56, %58, %59 in 1 : vector<8x2xf32>, vector<8x1xf32>, vector<8x5xf32> -> vector<8x8xf32>
    %c0_37 = arith.constant 0 : index
    %c0_38 = arith.constant 0 : index
    %61 = vector.load %arg15[%c0_37, %c0_38] : memref<8x8xf32, #tpu.memory_space<vmem>>, vector<8x8xf32>
    tpu.vector_store %arg15[%c0_37, %c0_38], %60 {strides = array<i32>} : memref<8x8xf32, #tpu.memory_space<vmem>>, vector<8x8xf32>,
    return
  }
  func.func @transform_0(%arg0: i32) -> (i32, i32) {
    %c0_i32 = arith.constant 0 : i32
    %c0_i32_0 = arith.constant 0 : i32
    return %arg0, %c0_i32 : i32, i32
  }
  func.func @transform_1(%arg0: i32) -> (i32, i32) {
    %c0_i32 = arith.constant 0 : i32
    %c0_i32_0 = arith.constant 0 : i32
    %c0_i32_1 = arith.constant 0 : i32
    return %c0_i32, %c0_i32_0 : i32, i32
  }
  func.func @transform_2(%arg0: i32) -> (i32, i32) {
    %c0_i32 = arith.constant 0 : i32
    %c0_i32_0 = arith.constant 0 : i32
    %c0_i32_1 = arith.constant 0 : i32
    return %c0_i32, %c0_i32_0 : i32, i32
  }
  func.func @transform_3(%arg0: i32) -> (i32, i32) {
    %c0_i32 = arith.constant 0 : i32
    %c0_i32_0 = arith.constant 0 : i32
    %c0_i32_1 = arith.constant 0 : i32
    return %c0_i32, %c0_i32_0 : i32, i32
  }
  func.func @transform_4(%arg0: i32) -> (i32, i32) {
    %c0_i32 = arith.constant 0 : i32
    %c0_i32_0 = arith.constant 0 : i32
    %c0_i32_1 = arith.constant 0 : i32
    return %c0_i32, %c0_i32_0 : i32, i32
  }
  func.func @transform_5(%arg0: i32) -> (i32, i32) {
    %c0_i32 = arith.constant 0 : i32
    %c0_i32_0 = arith.constant 0 : i32
    %c0_i32_1 = arith.constant 0 : i32
    return %c0_i32, %c0_i32_0 : i32, i32
  }
  func.func @transform_6(%arg0: i32) -> (i32, i32) {
    %c0_i32 = arith.constant 0 : i32
    %c0_i32_0 = arith.constant 0 : i32
    %c0_i32_1 = arith.constant 0 : i32
    return %c0_i32, %c0_i32_0 : i32, i32
  }
  func.func @transform_7(%arg0: i32) -> (i32, i32) {
    %c0_i32 = arith.constant 0 : i32
    %c0_i32_0 = arith.constant 0 : i32
    %c0_i32_1 = arith.constant 0 : i32
    return %c0_i32, %c0_i32_0 : i32, i32
  }
  func.func @transform_8(%arg0: i32) -> (i32, i32) {
    %c0_i32 = arith.constant 0 : i32
    %c0_i32_0 = arith.constant 0 : i32
    %c0_i32_1 = arith.constant 0 : i32
    return %c0_i32, %c0_i32_0 : i32, i32
  }
  func.func @transform_9(%arg0: i32) -> (i32, i32) {
    %c0_i32 = arith.constant 0 : i32
    %c0_i32_0 = arith.constant 0 : i32
    %c0_i32_1 = arith.constant 0 : i32
    return %c0_i32, %c0_i32_0 : i32, i32
  }
  func.func @transform_10(%arg0: i32) -> (i32, i32) {
    %c0_i32 = arith.constant 0 : i32
    %c0_i32_0 = arith.constant 0 : i32
    %c0_i32_1 = arith.constant 0 : i32
    return %c0_i32, %c0_i32_0 : i32, i32
  }
  func.func @transform_11(%arg0: i32) -> (i32, i32) {
    %c0_i32 = arith.constant 0 : i32
    %c0_i32_0 = arith.constant 0 : i32
    %c0_i32_1 = arith.constant 0 : i32
    return %c0_i32, %c0_i32_0 : i32, i32
  }
  func.func @transform_12(%arg0: i32) -> (i32, i32) {
    %c0_i32 = arith.constant 0 : i32
    %c0_i32_0 = arith.constant 0 : i32
    %c0_i32_1 = arith.constant 0 : i32
    return %c0_i32, %c0_i32_0 : i32, i32
  }
  func.func @transform_13(%arg0: i32) -> (i32, i32) {
    %c0_i32 = arith.constant 0 : i32
    %c0_i32_0 = arith.constant 0 : i32
    %c0_i32_1 = arith.constant 0 : i32
    return %c0_i32, %c0_i32_0 : i32, i32
  }
  func.func @transform_14(%arg0: i32) -> (i32, i32) {
    %c0_i32 = arith.constant 0 : i32
    %c0_i32_0 = arith.constant 0 : i32
    return %arg0, %c0_i32 : i32, i32
  }
}

</mosaic_0001>

<bundles_post_ra>
// kernel: affine_coupling_forward.1
= control target key start
LH: loop header
LB: loop body
LE: loop exit
PB: predicated region body
PF: predicated region fallthrough
CT: control target
= control target key end

     0   :  { %19 = vsyncpa [#allocation3], 0  ;;  %s12145_s0 = inlined_call_operand.vmem [shape: f32[8,2], index: 0, kind: input, shape index: {}]   ;;  %s12146_s1 = inlined_call_operand.vmem [shape: f32[1,2], index: 1, kind: input, shape index: {}]   ;;  %s12147_s2 = inlined_call_operand.vmem [shape: f32[2,2048], index: 2, kind: input, shape index: {}]   ;;  %s12148_s3 = inlined_call_operand.hbm [shape: f32[1,2048], index: 3, kind: input, shape index: {}]   ;;  %s12149_s4 = inlined_call_operand.vmem [shape: s8[1024,1024], index: 4, kind: input, shape index: {}]   ;;  %s12150_s5 = inlined_call_operand.hbm [shape: f32[1,1024], index: 5, kind: input, shape index: {}]   ;;  %s12151_s6 = inlined_call_operand.hbm [shape: f32[1,1024], index: 6, kind: input, shape index: {}]   ;;  %s12152_s7 = inlined_call_operand.hbm [shape: s8[1024,1024], index: 7, kind: input, shape index: {}]   ;;  %s12153_s8 = inlined_call_operand.hbm [shape: f32[1,1024], index: 8, kind: input, shape index: {}]   ;;  %s12154_s9 = inlined_call_operand.hbm [shape: f32[1,1024], index: 9, kind: input, shape index: {}]   ;;  %s12155_s10 = inlined_call_operand.vmem [shape: f32[1024,2], index: 10, kind: input, shape index: {}]   ;;  %s12156_s11 = inlined_call_operand.vmem [shape: f32[1,2], index: 11, kind: input, shape index: {}]   ;;  %s12157_s12 = inlined_call_operand.vmem [shape: f32[1024,2], index: 12, kind: input, shape index: {}]   ;;  %s12158_s13 = inlined_call_operand.vmem [shape: f32[1,2], index: 13, kind: input, shape index: {}]   ;;  %s12159_s14 = inlined_call_operand.vmem [shape: f32[8,8], index: 14, kind: output, shape index: {}]  }
   0x1   :  { %20 = vsyncpa [#allocation5], 0 }
   0x2   :  { %21 = vsyncpa [#allocation8], 0  ;;  %s47_s15 = sshll.u32 %s12150_s5, 4  ;;  %s48_s15 = int_to_ptr.hbm [resolvable:$true] %s47_s15 }
   0x3   :  { %22 = vsyncpa [#allocation11], 0  ;;  %s8820_s16 = smov [#allocation4]   ;;  %s68_s20 = sshll.u32 %s12152_s7, 4  ;;  %s69_s20 = int_to_ptr.hbm [resolvable:$true] %s68_s20 }
   0x4   :  { %s49_s17 = sshll.u32 %s8820_s16, 4  ;;  %s8821_s21 = smov [#allocation7]   ;;  %s50_s17 = int_to_ptr.vmem [resolvable:$true] %s49_s17 }
   0x5   :  { %52 = dma.hbm_to_vmem [thread:$0]  %s48_s15, 128, %s50_s17, [#allocation5]  }
   0x6   :  { %s70_s22 = sshll.u32 %s8821_s21, 4  ;;  %s8822_s23 = smov 1024   ;;  %s71_s22 = int_to_ptr.vmem [resolvable:$true] %s70_s22 }
   0x7   :  { %s8823_s24 = smov 64   ;;  %s34_s5 = sshll.u32 %s12148_s3, 4  ;;  %s35_s5 = int_to_ptr.hbm [resolvable:$true] %s34_s5 }
   0x8   :  { %76 = dma.hbm_to_vmem [thread:$0]  %s69_s20, 32768, %s71_s22, [#allocation8], %s8822_s23, %s8822_s23, %s8823_s24  }
   0x9   :  { %s8824_s27 = smov [#allocation2]   ;;  %s58_s7 = sshll.u32 %s12151_s6, 4  ;;  %s59_s7 = int_to_ptr.hbm [resolvable:$true] %s58_s7 }
   0xa   :  { %s36_s28 = sshll.u32 %s8824_s27, 4  ;;  %s8825_s15 = smov [#allocation6]   ;;  %s37_s28 = int_to_ptr.vmem [resolvable:$true] %s36_s28 }
   0xb   :  { %39 = dma.hbm_to_vmem [thread:$0]  %s35_s5, 256, %s37_s28, [#allocation3]  }
   0xc   :  { %s60_s16 = sshll.u32 %s8825_s15, 4  ;;  %s82_s19 = sshll.u32 %s12153_s8, 4  ;;  %s61_s16 = int_to_ptr.vmem [resolvable:$true] %s60_s16  ;;  %s83_s19 = int_to_ptr.hbm [resolvable:$true] %s82_s19 }
   0xd   :  { %63 = dma.hbm_to_vmem [thread:$0]  %s59_s7, 128, %s61_s16, [#allocation5]  }
   0xe   :  { %s93_s21 = sshll.u32 %s12154_s9, 4  ;;  %s8826_s22 = smov [#allocation9]   ;;  %s94_s21 = int_to_ptr.hbm [resolvable:$true] %s93_s21 }
   0xf   :  { %s84_s23 = sshll.u32 %s8826_s22, 4  ;;  %s8827_s6 = smov [#allocation10]   ;;  %s85_s23 = int_to_ptr.vmem [resolvable:$true] %s84_s23 }
  0x10   :  { %87 = dma.hbm_to_vmem [thread:$0]  %s83_s19, 128, %s85_s23, [#allocation8]  }
  0x11   :  { %s95_s24 = sshll.u32 %s8827_s6, 4  ;;  %s96_s24 = int_to_ptr.vmem [resolvable:$true] %s95_s24 }
  0x12   :  { %98 = dma.hbm_to_vmem [thread:$0]  %s94_s21, 128, %s96_s24, [#allocation11]  }
  0x13   :  { %8812 = dma.done.wait [#allocation3], 256  }
  0x14   :  { %8813 = vsyncadd [#allocation3], 4294967040 }
  0x15   :  { %8814 = dma.done.wait [#allocation5], 256  }
  0x16   :  { %8815 = vsyncadd [#allocation5], 4294967040 }
  0x17   :  { %8816 = dma.done.wait [#allocation8], 32896  }
  0x18   :  { %8817 = vsyncadd [#allocation8], 4294934400 }
  0x19   :  { %8818 = dma.done.wait [#allocation11], 128  }
  0x1a   :  { %8819 = vsyncadd [#allocation11], 4294967168  ;;  %v138_v0 = vld [vmem:[%s12147_s2] sm:$0xff]  ;;  %v139_v1 = vld [vmem:[%s12147_s2 + $0x8] sm:$0xff]  ;;  %vm207_vm0 = vcmask 1041408   ;;  %vm203_vm1 = vcmask 15360  }
  0x1b   :  { %182 = vst [vmem:[#allocation1] ss:$4 sm:$0xff] %v138_v0  ;;  %v616_v2 = vld [vmem:[%s12149_s4 + $0xc0] sm:$0xff]  ;;  %v140_v23 = vld [vmem:[%s12147_s2 + $0x10] sm:$0xff]  ;;  %v141_v42 = vld [vmem:[%s12147_s2 + $0x18] sm:$0xff]  ;;  %vm8606_vm2 = vcmask 23552  }
  0x1c   :  { %v8658_v3 = vld [vmem:[%s12146_s1] ss:$0 sm:$0xff]  ;;  %184 = vst [vmem:[#allocation1 + $0x20] ss:$4 sm:$0xff] %v139_v1  ;;  %v960_v4 = vunpack.c.2.s8 %v616_v2  ;;  %v968_v5 = vunpack.c.3.s8 %v616_v2  ;;  %v944_v7 = vunpack.c.0.s8 %v616_v2  ;;  %v952_v11 = vunpack.c.1.s8 %v616_v2 }
  0x1d   :  { %v648_v6 = vld [vmem:[%s12149_s4 + $0x1c0] sm:$0xff]  ;;  %vm8608_vm3 = vcmask 64512  }
  0x1e   :  { %v131_v8 = vld [vmem:[%s12145_s0] sm:$0xff]  ;;  %v1088_v9 = vunpack.c.2.s8 %v648_v6  ;;  %v1096_v10 = vunpack.c.3.s8 %v648_v6  ;;  %v1072_v12 = vunpack.c.0.s8 %v648_v6  ;;  %v8944_v14 = vcvt.s32.f32 %v960_v4 }
  0x1f   :  { %v8942_v13 = vld [vmem:[%s12149_s4 + $0x2c0] sm:$0xff]  ;;  %v8946_v15 = vcvt.s32.f32 %v968_v5  ;;  %v8948_v16 = vcvt.s32.f32 %v944_v7  ;;  %v1080_v17 = vunpack.c.1.s8 %v648_v6  ;;  %v8959_v21 = vcvt.s32.f32 %v952_v11 }
  0x20   :  { %v8953_v18 = vld [vmem:[%s12149_s4 + $0x3c0] sm:$0xff]  ;;  %v8955_v19 = vcvt.s32.f32 %v1088_v9  ;;  %v8957_v20 = vcvt.s32.f32 %v1096_v10  ;;  %v8969_v24 = vmul.f32 %v8658_v3, %v131_v8  ;;  %v8971_v25 = vcvt.s32.f32 %v1072_v12 }
  0x21   :  { %v8964_v22 = vld [vmem:[%s12149_s4 + $0x80] sm:$0xff]  ;;  %v1216_v26 = vunpack.c.2.s8 %v8942_v13  ;;  %v1224_v27 = vunpack.c.3.s8 %v8942_v13  ;;  %v2952_v31 = vpack.c.bf16 %v8946_v15, %v8944_v14  ;;  %v8982_v32 = vcvt.s32.f32 %v1080_v17 }
  0x22   :  { %v8978_v28 = vld [vmem:[%s12149_s4 + $0x180] sm:$0xff]  ;;  %v186_v30 = vld.sshfl [vmem:[#allocation1 + $0x8] sm:$0xff pattern:$0x73625140]  ;;  %v1344_v33 = vunpack.c.2.s8 %v8953_v18  ;;  %v1352_v34 = vunpack.c.3.s8 %v8953_v18  ;;  %v3016_v37 = vpack.c.bf16 %v8957_v20, %v8955_v19  ;;  %v2944_v38 = vpack.c.bf16 %v8959_v21, %v8948_v16 }
  0x23   :  { %v185_v29 = vld.sshfl [vmem:[#allocation1] sm:$0xff pattern:$0x73625140]  ;;  %8620 = vmatpush.msk.msra.mxu1 %vm207_vm0, %v186_v30  ;;  %v187_v35 = vld.sshfl [vmem:[#allocation1 + $0x10] sm:$0xff pattern:$0x73625140]  ;;  %v8992_v39 = vcvt.s32.f32 %v1216_v26  ;;  %v928_v40 = vunpack.c.2.s8 %v8964_v22  ;;  %v9000_v43 = vcvt.s32.f32 %v1224_v27  ;;  %v936_v45 = vunpack.c.3.s8 %v8964_v22 }
  0x24   :  { %8618 = vmatpush.msk.msra.mxu0 %vm207_vm0, %v185_v29  ;;  %v188_v36 = vld.sshfl [vmem:[#allocation1 + $0x18] sm:$0xff pattern:$0x73625140]  ;;  %8622 = vmatpush.msk.msra.mxu2 %vm207_vm0, %v187_v35  ;;  %v189_v41 = vld.sshfl [vmem:[#allocation1 + $0x20] sm:$0xff pattern:$0x73625140]  ;;  %v9002_v44 = vcvt.s32.f32 %v1344_v33  ;;  %v1056_v46 = vunpack.c.2.s8 %v8978_v28  ;;  %v9010_v49 = vcvt.s32.f32 %v1352_v34  ;;  %v1064_v51 = vunpack.c.3.s8 %v8978_v28 }
  0x25   :  { %193 = vst [vmem:[#allocation1] ss:$4 sm:$0xff] %v140_v23  ;;  %8624 = vmatpush.msk.msra.mxu3 %vm207_vm0, %v188_v36  ;;  %8619 = vmatmul.msk.f32.vlgmr.msra.gmra.mxu0 %vm203_vm1, %v8969_v24  ;;  %v190_v47 = vld.sshfl [vmem:[#allocation1 + $0x28] sm:$0xff pattern:$0x73625140]  ;;  %v9012_v50 = vcvt.s32.f32 %v928_v40  ;;  %v1200_v52 = vunpack.c.0.s8 %v8942_v13  ;;  %v3008_v54 = vpack.c.bf16 %v8982_v32, %v8971_v25  ;;  %v9022_v55 = vcvt.s32.f32 %v936_v45  ;;  %v672_v2 = vld [vmem:[%s12149_s4 + $0x280] sm:$0xff] }
  0x26   :  { %8621 = vmatmul.msk.f32.vlgmr.msra.gmra.mxu1 %vm203_vm1, %v8969_v24  ;;  %v191_v48 = vld.sshfl [vmem:[#allocation1 + $0x30] sm:$0xff pattern:$0x73625140]  ;;  %8623 = vmatmul.msk.f32.vlgmr.msra.gmra.mxu2 %vm203_vm1, %v8969_v24  ;;  %v192_v53 = vld.sshfl [vmem:[#allocation1 + $0x38] sm:$0xff pattern:$0x73625140]  ;;  %v9024_v56 = vcvt.s32.f32 %v1056_v46  ;;  %v1208_v57 = vunpack.c.1.s8 %v8942_v13  ;;  %v9029_v58 = vcvt.s32.f32 %v1064_v51  ;;  %v1328_v60 = vunpack.c.0.s8 %v8953_v18 }
  0x27   :  { %8625 = vmatmul.msk.f32.vlgmr.msra.gmra.mxu3 %vm203_vm1, %v8969_v24  ;;  %8626 = vmatpush.msk.msrb.mxu0 %vm207_vm0, %v189_v41  ;;  %194 = vst [vmem:[#allocation1 + $0x20] ss:$4 sm:$0xff] %v141_v42  ;;  %v9031_v59 = vcvt.s32.f32 %v1200_v52  ;;  %v1336_v61 = vunpack.c.1.s8 %v8953_v18  ;;  %v3080_v62 = vpack.c.bf16 %v9000_v43, %v8992_v39  ;;  %v912_v0 = vunpack.c.0.s8 %v8964_v22  ;;  %v9056_v7 = vld [vmem:[%s12149_s4 + $0x380] sm:$0xff] }
  0x28   :  { %8628 = vmatpush.msk.msrb.mxu1 %vm207_vm0, %v190_v47  ;;  %8630 = vmatpush.msk.msrb.mxu2 %vm207_vm0, %v191_v48  ;;  %v9039_v63 = vcvt.s32.f32 %v1208_v57  ;;  %v920_v1 = vunpack.c.1.s8 %v8964_v22  ;;  %v3144_v3 = vpack.c.bf16 %v9010_v49, %v9002_v44  ;;  %v2936_v4 = vpack.c.bf16 %v9022_v55, %v9012_v50  ;;  %v600_v12 = vld [vmem:[%s12149_s4 + $0x40] sm:$0xff] }
  0x29   :  { %8632 = vmatpush.msk.msrb.mxu3 %vm207_vm0, %v192_v53  ;;  %v9050_v5 = vcvt.s32.f32 %v1328_v60  ;;  %v1040_v6 = vunpack.c.0.s8 %v8978_v28  ;;  %v9058_v8 = vcvt.s32.f32 %v1336_v61  ;;  %v9060_v9 = vcvt.s32.f32 %v912_v0  ;;  %v9071_v13 = vld [vmem:[%s12149_s4 + $0x140] sm:$0xff] }
  0x2a   :  { %v9062_v10 = vcvt.s32.f32 %v920_v1  ;;  %v1048_v11 = vunpack.c.1.s8 %v8978_v28  ;;  %v3000_v22 = vpack.c.bf16 %v9029_v58, %v9024_v56  ;;  %v3072_v23 = vpack.c.bf16 %v9039_v63, %v9031_v59 }
  0x2b   :  { %v1184_v26 = vunpack.c.2.s8 %v672_v2  ;;  %v1192_v27 = vunpack.c.3.s8 %v672_v2  ;;  %v9079_v28 = vcvt.s32.f32 %v1040_v6  ;;  %v1312_v30 = vunpack.c.2.s8 %v9056_v7 }
  0x2c   :  { %v195_v17 = vld.sshfl [vmem:[#allocation1] sm:$0xff pattern:$0x73625140]  ;;  %v196_v18 = vld.sshfl [vmem:[#allocation1 + $0x8] sm:$0xff pattern:$0x73625140]  ;;  %v9081_v29 = vcvt.s32.f32 %v1048_v11  ;;  %v1320_v33 = vunpack.c.3.s8 %v9056_v7  ;;  %v896_v41 = vunpack.c.2.s8 %v600_v12  ;;  %v904_v42 = vunpack.c.3.s8 %v600_v12 }
  0x2d   :  { %8634 = vmatpush.msk.msra.mxu0 %vm207_vm0, %v195_v17  ;;  %8636 = vmatpush.msk.msra.mxu1 %vm207_vm0, %v196_v18  ;;  %v197_v34 = vld.sshfl [vmem:[#allocation1 + $0x10] sm:$0xff pattern:$0x73625140]  ;;  %v198_v35 = vld.sshfl [vmem:[#allocation1 + $0x18] sm:$0xff pattern:$0x73625140]  ;;  %v9089_v36 = vcvt.s32.f32 %v1184_v26  ;;  %v9091_v40 = vcvt.s32.f32 %v1192_v27  ;;  %v3136_v47 = vpack.c.bf16 %v9058_v8, %v9050_v5  ;;  %v9101_v51 = vcvt.s32.f32 %v1312_v30 }
  0x2e   :  { %8627 = vmatmul.msk.f32.vlgmr.msrb.gmra.mxu0 %vm203_vm1, %v8969_v24  ;;  %8629 = vmatmul.msk.f32.vlgmr.msrb.gmra.mxu1 %vm203_vm1, %v8969_v24  ;;  %v199_v45 = vld.sshfl [vmem:[#allocation1 + $0x20] sm:$0xff pattern:$0x73625140]  ;;  %v200_v46 = vld.sshfl [vmem:[#allocation1 + $0x28] sm:$0xff pattern:$0x73625140]  ;;  %v1024_v52 = vunpack.c.2.s8 %v9071_v13  ;;  %v9106_v60 = vcvt.s32.f32 %v1320_v33  ;;  %v9108_v61 = vcvt.s32.f32 %v896_v41  ;;  %v9110_v0 = vcvt.s32.f32 %v904_v42 }
  0x2f   :  { %8631 = vmatmul.msk.f32.vlgmr.msrb.gmra.mxu2 %vm203_vm1, %v8969_v24  ;;  %8633 = vmatmul.msk.f32.vlgmr.msrb.gmra.mxu3 %vm203_vm1, %v8969_v24  ;;  %v201_v53 = vld.sshfl [vmem:[#allocation1 + $0x30] sm:$0xff pattern:$0x73625140]  ;;  %v202_v57 = vld.sshfl [vmem:[#allocation1 + $0x38] sm:$0xff pattern:$0x73625140]  ;;  %v1032_v1 = vunpack.c.3.s8 %v9071_v13  ;;  %v3064_v11 = vpack.c.bf16 %v9091_v40, %v9089_v36  ;;  %v1168_v17 = vunpack.c.0.s8 %v672_v2  ;;  %v1176_v18 = vunpack.c.1.s8 %v672_v2 }
  0x30   :  { %8642 = vmatpush.msk.msrb.mxu0 %vm207_vm0, %v199_v45  ;;  %8644 = vmatpush.msk.msrb.mxu1 %vm207_vm0, %v200_v46  ;;  %v9121_v26 = vcvt.s32.f32 %v1024_v52  ;;  %v1296_v30 = vunpack.c.0.s8 %v9056_v7  ;;  %v1304_v33 = vunpack.c.1.s8 %v9056_v7  ;;  %v880_v41 = vunpack.c.0.s8 %v600_v12  ;;  %v664_v2 = vld [vmem:[%s12149_s4 + $0x240] sm:$0xff] }
  0x31   :  { %8638 = vmatpush.msk.msra.mxu2 %vm207_vm0, %v197_v34  ;;  %8640 = vmatpush.msk.msra.mxu3 %vm207_vm0, %v198_v35  ;;  %v9123_v27 = vcvt.s32.f32 %v1032_v1  ;;  %v9127_v34 = vcvt.s32.f32 %v1168_v17  ;;  %v9129_v35 = vcvt.s32.f32 %v1176_v18  ;;  %v888_v42 = vunpack.c.1.s8 %v600_v12  ;;  %v592_v18 = vld [vmem:[%s12149_s4] sm:$0xff] }
  0x32   :  { %v3128_v45 = vpack.c.bf16 %v9106_v60, %v9101_v51  ;;  %v9138_v52 = vcvt.s32.f32 %v1296_v30  ;;  %v1008_v7 = vunpack.c.0.s8 %v9071_v13  ;;  %v9146_v12 = vcvt.s32.f32 %v880_v41  ;;  %v776_v8 = vld [vmem:[%s12149_s4 + $0x5c0] sm:$0xff] }
  0x33   :  { %8646 = vmatpush.msk.msrb.mxu2 %vm207_vm0, %v201_v53  ;;  %8648 = vmatpush.msk.msrb.mxu3 %vm207_vm0, %v202_v57  ;;  %v696_v53 = vld [vmem:[%s12149_s4 + $0x340] sm:$0xff]  ;;  %v9144_v57 = vcvt.s32.f32 %v1304_v33  ;;  %v9148_v1 = vcvt.s32.f32 %v888_v42  ;;  %v1016_v17 = vunpack.c.1.s8 %v9071_v13  ;;  %v1152_v41 = vunpack.c.2.s8 %v664_v2 }
  0x34   :  { %v1160_v42 = vunpack.c.3.s8 %v664_v2  ;;  %v9165_v13 = vld [vmem:[%s12149_s4 + $0x100] sm:$0xff]  ;;  %v9173_v46 = vcvt.s32.f32 %v1008_v7  ;;  %v1280_v33 = vunpack.c.2.s8 %v696_v53  ;;  %v1288_v6 = vunpack.c.3.s8 %v696_v53 }
  0x35   :  { %v9175_v30 = vcvt.s32.f32 %v1016_v17  ;;  %v9181_v48 = vcvt.s32.f32 %v1152_v41  ;;  %v864_v15 = vunpack.c.2.s8 %v592_v18  ;;  %v3120_v19 = vpack.c.bf16 %v9144_v57, %v9138_v52 }
  0x36   :  { %8635 = vmatmul.msk.f32.vlgmr.msra.gmra.mxu0 %vm203_vm1, %v8969_v24  ;;  %8637 = vmatmul.msk.f32.vlgmr.msra.gmra.mxu1 %vm203_vm1, %v8969_v24  ;;  %v9183_v14 = vcvt.s32.f32 %v1160_v42  ;;  %v2912_v20 = vpack.c.bf16 %v9148_v1, %v9146_v12  ;;  %v992_v7 = vunpack.c.2.s8 %v9165_v13  ;;  %v9198_v17 = vcvt.s32.f32 %v1288_v6 }
  0x37   :  { %3408 = vmatpush.bf16.msra.mxu0 %v2952_v31  ;;  %3421 = vmatpush.bf16.msra.mxu1 %v3016_v37  ;;  %v872_v31 = vunpack.c.3.s8 %v592_v18  ;;  %v9195_v37 = vcvt.s32.f32 %v1280_v33  ;;  %v9200_v41 = vcvt.s32.f32 %v864_v15  ;;  %v1000_v43 = vunpack.c.3.s8 %v9165_v13 }
  0x38   :  { %8639 = vmatmul.msk.f32.vlgmr.msra.gmra.mxu2 %vm203_vm1, %v8969_v24  ;;  %8641 = vmatmul.msk.f32.vlgmr.msra.gmra.mxu3 %vm203_vm1, %v8969_v24  ;;  %v2976_v44 = vpack.c.bf16 %v9175_v30, %v9173_v46  ;;  %v3048_v49 = vpack.c.bf16 %v9183_v14, %v9181_v48  ;;  %v9215_v6 = vcvt.s32.f32 %v992_v7  ;;  %v1264_v42 = vunpack.c.0.s8 %v696_v53  ;;  %v768_v14 = vld [vmem:[%s12149_s4 + $0x580] sm:$0xff] }
  0x39   :  { %3434 = vmatpush.bf16.msra.mxu2 %v3080_v62  ;;  %3447 = vmatpush.bf16.msra.mxu3 %v3144_v3  ;;  %v9202_v39 = vcvt.s32.f32 %v872_v31  ;;  %v1136_v62 = vunpack.c.0.s8 %v664_v2  ;;  %v1144_v3 = vunpack.c.1.s8 %v664_v2  ;;  %v9217_v33 = vcvt.s32.f32 %v1000_v43 }
  0x3a   :  { %v1272_v15 = vunpack.c.1.s8 %v696_v53  ;;  %v848_v25 = vunpack.c.0.s8 %v592_v18  ;;  %v856_v32 = vunpack.c.1.s8 %v592_v18  ;;  %v9236_v63 = vcvt.s32.f32 %v1264_v42  ;;  %v656_v18 = vld [vmem:[%s12149_s4 + $0x200] sm:$0xff] }
  0x3b   :  { %3409 = vmatpush.bf16.msra.mxu0 %v2944_v38  ;;  %3422 = vmatpush.bf16.msra.mxu1 %v3008_v54  ;;  %v9225_v16 = vcvt.s32.f32 %v1136_v62  ;;  %v9227_v21 = vcvt.s32.f32 %v1144_v3  ;;  %v744_v38 = vld [vmem:[%s12149_s4 + $0x4c0] sm:$0xff]  ;;  %v3112_v54 = vpack.c.bf16 %v9198_v17, %v9195_v37  ;;  %v2904_v59 = vpack.c.bf16 %v9202_v39, %v9200_v41 }
  0x3c   :  { %v976_v5 = vunpack.c.0.s8 %v9165_v13  ;;  %v9256_v2 = vcvt.s32.f32 %v856_v32  ;;  %v984_v53 = vunpack.c.1.s8 %v9165_v13  ;;  %v2968_v50 = vpack.c.bf16 %v9217_v33, %v9215_v6  ;;  %v800_v39 = vld [vmem:[%s12149_s4 + $0x680] sm:$0xff] }
  0x3d   :  { %3435 = vmatpush.bf16.msra.mxu2 %v3072_v23  ;;  %3448 = vmatpush.bf16.msra.mxu3 %v3136_v47  ;;  %v9252_v23 = vcvt.s32.f32 %v1272_v15  ;;  %v9254_v47 = vcvt.s32.f32 %v848_v25  ;;  %v3040_v55 = vpack.c.bf16 %v9227_v21, %v9225_v16  ;;  %v1472_v56 = vunpack.c.2.s8 %v744_v38 }
  0x3e   :  { %8643 = vmatmul.msk.f32.vlgmr.msrb.gmra.mxu0 %vm203_vm1, %v8969_v24  ;;  %8645 = vmatmul.msk.f32.vlgmr.msrb.gmra.mxu1 %vm203_vm1, %v8969_v24  ;;  %v1480_v58 = vunpack.c.3.s8 %v744_v38  ;;  %v9281_v13 = vcvt.s32.f32 %v984_v53  ;;  %v1600_v31 = vunpack.c.2.s8 %v776_v8  ;;  %v1608_v7 = vunpack.c.3.s8 %v776_v8 }
  0x3f   :  { %3410 = vmatpush.bf16.msra.mxu0 %v2936_v4  ;;  %3423 = vmatpush.bf16.msra.mxu1 %v3000_v22  ;;  %v688_v4 = vld [vmem:[%s12149_s4 + $0x300] sm:$0xff]  ;;  %v9279_v22 = vcvt.s32.f32 %v976_v5  ;;  %v9283_v43 = vcvt.s32.f32 %v1472_v56  ;;  %v1120_v3 = vunpack.c.2.s8 %v656_v18  ;;  %v12160_v36 = vpack.c.bf16 %v9062_v10, %v9060_v9 }
  0x40   :  { %8647 = vmatmul.msk.f32.vlgmr.msrb.gmra.mxu2 %vm203_vm1, %v8969_v24  ;;  %8649 = vmatmul.msk.f32.vlgmr.msrb.gmra.mxu3 %vm203_vm1, %v8969_v24  ;;  %v9285_v62 = vcvt.s32.f32 %v1480_v58  ;;  %v1128_v24 = vunpack.c.3.s8 %v656_v18  ;;  %v12161_v40 = vpack.c.bf16 %v9081_v29, %v9079_v28  ;;  %v3104_v51 = vpack.c.bf16 %v9252_v23, %v9236_v63  ;;  %v808_v58 = vld [vmem:[%s12149_s4 + $0x6c0] sm:$0xff] }
  0x41   :  { %3436 = vmatpush.bf16.msra.mxu2 %v3064_v11  ;;  %3449 = vmatpush.bf16.msra.mxu3 %v3128_v45  ;;  %v2896_v60 = vpack.c.bf16 %v9256_v2, %v9254_v47  ;;  %v9297_v11 = vcvt.s32.f32 %v1600_v31  ;;  %v1248_v45 = vunpack.c.2.s8 %v688_v4  ;;  %v9299_v42 = vcvt.s32.f32 %v1608_v7 }
  0x42   :  { %v9301_v15 = vcvt.s32.f32 %v1120_v3  ;;  %v9303_v25 = vcvt.s32.f32 %v1128_v24  ;;  %v1256_v9 = vunpack.c.3.s8 %v688_v4  ;;  %v12162_v10 = vpack.c.bf16 %v9129_v35, %v9127_v34  ;;  %v736_v24 = vld [vmem:[%s12149_s4 + $0x480] sm:$0xff] }
  0x43   :  { %3411 = vmatpush.bf16.msra.mxu0 %v12160_v36  ;;  %3424 = vmatpush.bf16.msra.mxu1 %v12161_v40  ;;  %v2960_v28 = vpack.c.bf16 %v9281_v13, %v9279_v22  ;;  %v2272_v29 = vcvt.s32.f32 %v1248_v45  ;;  %v1456_v32 = vunpack.c.0.s8 %v744_v38  ;;  %v1464_v63 = vunpack.c.1.s8 %v744_v38 }
  0x44   :  { %v3208_v5 = vpack.c.bf16 %v9285_v62, %v9283_v43  ;;  %v2280_v23 = vcvt.s32.f32 %v1256_v9  ;;  %v1584_v53 = vunpack.c.0.s8 %v776_v8  ;;  %v1592_v56 = vunpack.c.1.s8 %v776_v8 }
  0x45   :  { %3437 = vmatpush.bf16.msra.mxu2 %v12162_v10  ;;  %3450 = vmatpush.bf16.msra.mxu3 %v3120_v19  ;;  %v12163_v34 = vpack.c.bf16 %v9110_v0, %v9108_v61  ;;  %v12164_v35 = vpack.c.bf16 %v9123_v27, %v9121_v26  ;;  %v9321_v52 = vcvt.s32.f32 %v1456_v32  ;;  %v9323_v57 = vcvt.s32.f32 %v1464_v63  ;;  %v840_v26 = vld [vmem:[%s12149_s4 + $0x7c0] sm:$0xff] }
  0x46   :  { %v1104_v19 = vunpack.c.0.s8 %v656_v18  ;;  %v1112_v38 = vunpack.c.1.s8 %v656_v18  ;;  %v3272_v8 = vpack.c.bf16 %v9299_v42, %v9297_v11  ;;  %v3032_v61 = vpack.c.bf16 %v9303_v25, %v9301_v15 }
  0x47   :  { %3412 = vmatpush.bf16.msra.mxu0 %v12163_v34  ;;  %3425 = vmatpush.bf16.msra.mxu1 %v12164_v35  ;;  %v3096_v0 = vpack.c.bf16 %v2280_v23, %v2272_v29  ;;  %v1232_v31 = vunpack.c.0.s8 %v688_v4  ;;  %v9341_v27 = vcvt.s32.f32 %v1584_v53  ;;  %v9343_v18 = vcvt.s32.f32 %v1592_v56 }
  0x48   :  { %v9345_v7 = vcvt.s32.f32 %v1104_v19  ;;  %v1240_v3 = vunpack.c.1.s8 %v688_v4  ;;  %v2136_v36 = vcvt.s32.f32 %v1112_v38  ;;  %v1728_v45 = vunpack.c.2.s8 %v808_v58  ;;  %v832_v19 = vld [vmem:[%s12149_s4 + $0x780] sm:$0xff] }
  0x49   :  { %3438 = vmatpush.bf16.msra.mxu2 %v3048_v49  ;;  %3451 = vmatpush.bf16.msra.mxu3 %v3112_v54  ;;  %v2256_v40 = vcvt.s32.f32 %v1232_v31  ;;  %v1736_v48 = vunpack.c.3.s8 %v808_v58  ;;  %v3200_v37 = vpack.c.bf16 %v9323_v57, %v9321_v52  ;;  %v1856_v49 = vunpack.c.2.s8 %v840_v26  ;;  %v728_v31 = vld [vmem:[%s12149_s4 + $0x440] sm:$0xff] }
  0x4a   :  { %v2264_v17 = vcvt.s32.f32 %v1240_v3  ;;  %v1864_v54 = vunpack.c.3.s8 %v840_v26  ;;  %v2752_v4 = vcvt.s32.f32 %v1728_v45  ;;  %v1440_v25 = vunpack.c.2.s8 %v736_v24 }
  0x4b   :  { %3413 = vmatpush.bf16.msra.mxu0 %v2912_v20  ;;  %3426 = vmatpush.bf16.msra.mxu1 %v2976_v44  ;;  %v2760_v15 = vcvt.s32.f32 %v1736_v48  ;;  %v1448_v9 = vunpack.c.3.s8 %v736_v24  ;;  %v3264_v12 = vpack.c.bf16 %v9343_v18, %v9341_v27  ;;  %v2880_v46 = vcvt.s32.f32 %v1856_v49 }
  0x4c   :  { %v2888_v1 = vcvt.s32.f32 %v1864_v54  ;;  %v1568_v30 = vunpack.c.2.s8 %v768_v14  ;;  %v3024_v20 = vpack.c.bf16 %v2136_v36, %v9345_v7  ;;  %v3088_v44 = vpack.c.bf16 %v2264_v17, %v2256_v40 }
  0x4d   :  { %3439 = vmatpush.bf16.msra.mxu2 %v3040_v55  ;;  %3452 = vmatpush.bf16.msra.mxu3 %v3104_v51  ;;  %v9367_v10 = vcvt.s32.f32 %v1440_v25  ;;  %v9369_v29 = vcvt.s32.f32 %v1448_v9  ;;  %v3336_v16 = vpack.c.bf16 %v2760_v15, %v2752_v4  ;;  %v1576_v21 = vunpack.c.3.s8 %v768_v14 }
  0x4e   :  { %v1712_v55 = vunpack.c.0.s8 %v808_v58  ;;  %v1720_v51 = vunpack.c.1.s8 %v808_v58  ;;  %v3400_v32 = vpack.c.bf16 %v2888_v1, %v2880_v46  ;;  %v9377_v63 = vcvt.s32.f32 %v1568_v30 }
  0x4f   :  { %3414 = vmatpush.bf16.msra.mxu0 %v2904_v59  ;;  %3427 = vmatpush.bf16.msra.mxu1 %v2968_v50  ;;  %v1840_v23 = vunpack.c.0.s8 %v840_v26  ;;  %v1848_v53 = vunpack.c.1.s8 %v840_v26  ;;  %v1424_v35 = vunpack.c.0.s8 %v736_v24  ;;  %v1432_v41 = vunpack.c.1.s8 %v736_v24 }
  0x50   :  { %v2736_v56 = vcvt.s32.f32 %v1712_v55  ;;  %v2744_v34 = vcvt.s32.f32 %v1720_v51  ;;  %v3192_v6 = vpack.c.bf16 %v9369_v29, %v9367_v10  ;;  %v1552_v50 = vunpack.c.0.s8 %v768_v14 }
  0x51   :  { %3440 = vmatpush.bf16.msra.mxu2 %v3032_v61  ;;  %3453 = vmatpush.bf16.msra.mxu3 %v3096_v0  ;;  %v2864_v33 = vcvt.s32.f32 %v1840_v23  ;;  %v2872_v59 = vcvt.s32.f32 %v1848_v53  ;;  %v2600_v38 = vcvt.s32.f32 %v1576_v21  ;;  %v2448_v61 = vcvt.s32.f32 %v1424_v35  ;;  %v9409_v53 = vld [vmem:[#allocation2] sm:$0xff] }
  0x52   :  { %v3328_v58 = vpack.c.bf16 %v2744_v34, %v2736_v56  ;;  %v1560_v0 = vunpack.c.1.s8 %v768_v14  ;;  %v2456_v47 = vcvt.s32.f32 %v1432_v41  ;;  %v2576_v2 = vcvt.s32.f32 %v1552_v50  ;;  %v792_v56 = vld [vmem:[%s12149_s4 + $0x640] sm:$0xff] }
  0x53   :  { %3415 = vmatpush.bf16.msra.mxu0 %v2896_v60  ;;  %3428 = vmatpush.bf16.msra.mxu1 %v2960_v28  ;;  %v1696_v22 = vunpack.c.2.s8 %v800_v39  ;;  %v1704_v13 = vunpack.c.3.s8 %v800_v39  ;;  %v760_v60 = vld [vmem:[%s12149_s4 + $0x540] sm:$0xff]  ;;  %v3392_v28 = vpack.c.bf16 %v2872_v59, %v2864_v33  ;;  %v1824_v27 = vunpack.c.2.s8 %v832_v19 }
  0x54   :  { %v2584_v26 = vcvt.s32.f32 %v1560_v0  ;;  %v1832_v18 = vunpack.c.3.s8 %v832_v19  ;;  %v1408_v11 = vunpack.c.2.s8 %v728_v31  ;;  %v1416_v42 = vunpack.c.3.s8 %v728_v31  ;;  %v824_v34 = vld [vmem:[%s12149_s4 + $0x740] sm:$0xff] }
  0x55   :  { %3441 = vmatpush.bf16.msra.mxu2 %v3024_v20  ;;  %3454 = vmatpush.bf16.msra.mxu3 %v3088_v44  ;;  %v2720_v43 = vcvt.s32.f32 %v1696_v22  ;;  %v2728_v62 = vcvt.s32.f32 %v1704_v13  ;;  %v1536_v3 = vunpack.c.2.s8 %v760_v60  ;;  %v3184_v24 = vpack.c.bf16 %v2456_v47, %v2448_v61  ;;  %v720_v59 = vld [vmem:[%s12149_s4 + $0x400] sm:$0xff] }
  0x56   :  { %v2856_v7 = vcvt.s32.f32 %v1832_v18  ;;  %v3248_v36 = vpack.c.bf16 %v2584_v26, %v2576_v2  ;;  %v1544_v45 = vunpack.c.3.s8 %v760_v60  ;;  %v2432_v48 = vcvt.s32.f32 %v1408_v11  ;;  %v752_v50 = vld [vmem:[%s12149_s4 + $0x500] sm:$0xff] }
  0x57   :  { %3460 = vmatpush.bf16.msrb.mxu0 %v3208_v5  ;;  %3473 = vmatpush.bf16.msrb.mxu1 %v3272_v8  ;;  %v3256_v5 = vpack.c.bf16 %v2600_v38, %v9377_v63  ;;  %v2848_v8 = vcvt.s32.f32 %v1824_v27  ;;  %v3320_v40 = vpack.c.bf16 %v2728_v62, %v2720_v43  ;;  %v2440_v14 = vcvt.s32.f32 %v1416_v42 }
  0x58   :  { %v1680_v17 = vunpack.c.0.s8 %v800_v39  ;;  %v1688_v49 = vunpack.c.1.s8 %v800_v39  ;;  %v2560_v4 = vcvt.s32.f32 %v1536_v3  ;;  %v1808_v15 = vunpack.c.0.s8 %v832_v19 }
  0x59   :  { %3486 = vmatpush.bf16.msrb.mxu2 %v3336_v16  ;;  %3499 = vmatpush.bf16.msrb.mxu3 %v3400_v32  ;;  %v3384_v54 = vpack.c.bf16 %v2856_v7, %v2848_v8  ;;  %v1816_v25 = vunpack.c.1.s8 %v832_v19  ;;  %v2568_v9 = vcvt.s32.f32 %v1544_v45  ;;  %v1392_v52 = vunpack.c.0.s8 %v728_v31 }
  0x5a   :  { %v2704_v46 = vcvt.s32.f32 %v1680_v17  ;;  %v2712_v1 = vcvt.s32.f32 %v1688_v49  ;;  %v2832_v57 = vcvt.s32.f32 %v1808_v15  ;;  %v1520_v30 = vunpack.c.0.s8 %v760_v60  ;;  %v649_v15 = vld [vmem:[%s12149_s4 + $0x1c8] sm:$0xff] }
  0x5b   :  { %3461 = vmatpush.bf16.msrb.mxu0 %v3200_v37  ;;  %3474 = vmatpush.bf16.msrb.mxu1 %v3264_v12  ;;  %v2840_v37 = vcvt.s32.f32 %v1816_v25  ;;  %v1400_v12 = vunpack.c.1.s8 %v728_v31  ;;  %v1528_v20 = vunpack.c.1.s8 %v760_v60  ;;  %v3176_v29 = vpack.c.bf16 %v2440_v14, %v2432_v48 }
  0x5c   :  { %v3312_v44 = vpack.c.bf16 %v2712_v1, %v2704_v46  ;;  %v3240_v16 = vpack.c.bf16 %v2568_v9, %v2560_v4  ;;  %v2416_v21 = vcvt.s32.f32 %v1392_v52  ;;  %v2544_v51 = vcvt.s32.f32 %v1520_v30  ;;  %v784_v52 = vld [vmem:[%s12149_s4 + $0x600] sm:$0xff] }
  0x5d   :  { %3487 = vmatpush.bf16.msrb.mxu2 %v3328_v58  ;;  %3500 = vmatpush.bf16.msrb.mxu3 %v3392_v28  ;;  %v3376_v10 = vpack.c.bf16 %v2840_v37, %v2832_v57  ;;  %v2424_v55 = vcvt.s32.f32 %v1400_v12  ;;  %v2552_v32 = vcvt.s32.f32 %v1528_v20  ;;  %v1664_v35 = vunpack.c.2.s8 %v792_v56  ;;  %v816_v57 = vld [vmem:[%s12149_s4 + $0x700] sm:$0xff] }
  0x5e   :  { %v1672_v41 = vunpack.c.3.s8 %v792_v56  ;;  %v1792_v39 = vunpack.c.2.s8 %v824_v34  ;;  %v146_v33 = vperm.slane %v9409_v53, 0  ;;  %v1376_v0 = vunpack.c.2.s8 %v720_v59 }
  0x5f   :  { %3462 = vmatpush.bf16.msrb.mxu0 %v3192_v6  ;;  %3475 = vmatpush.bf16.msrb.mxu1 %v3256_v5  ;;  %v3168_v63 = vpack.c.bf16 %v2424_v55, %v2416_v21  ;;  %v3232_v23 = vpack.c.bf16 %v2552_v32, %v2544_v51  ;;  %v1800_v6 = vunpack.c.3.s8 %v824_v34  ;;  %v2688_v19 = vcvt.s32.f32 %v1664_v35 }
  0x60   :  { %v2696_v38 = vcvt.s32.f32 %v1672_v41  ;;  %v2816_v58 = vcvt.s32.f32 %v1792_v39  ;;  %v1384_v31 = vunpack.c.3.s8 %v720_v59  ;;  %v1504_v47 = vunpack.c.2.s8 %v752_v50 }
  0x61   :  { %3488 = vmatpush.bf16.msrb.mxu2 %v3320_v40  ;;  %3501 = vmatpush.bf16.msrb.mxu3 %v3384_v54  ;;  %v2824_v61 = vcvt.s32.f32 %v1800_v6  ;;  %v1512_v2 = vunpack.c.3.s8 %v752_v50  ;;  %v1648_v60 = vunpack.c.0.s8 %v792_v56  ;;  %v1656_v28 = vunpack.c.1.s8 %v792_v56 }
  0x62   :  { %v3304_v22 = vpack.c.bf16 %v2696_v38, %v2688_v19  ;;  %v147_v26 = vperm.slane %v9409_v53, 1  ;;  %v2400_v27 = vcvt.s32.f32 %v1376_v0  ;;  %v2408_v18 = vcvt.s32.f32 %v1384_v31 }
  0x63   :  { %3463 = vmatpush.bf16.msrb.mxu0 %v3184_v24  ;;  %3476 = vmatpush.bf16.msrb.mxu1 %v3248_v36  ;;  %v3368_v13 = vpack.c.bf16 %v2824_v61, %v2816_v58  ;;  %v2528_v43 = vcvt.s32.f32 %v1504_v47  ;;  %v2536_v62 = vcvt.s32.f32 %v1512_v2  ;;  %v2672_v11 = vcvt.s32.f32 %v1648_v60  ;;  %v617_v36 = vld [vmem:[%s12149_s4 + $0xc8] sm:$0xff] }
  0x64   :  { %v2680_v42 = vcvt.s32.f32 %v1656_v28  ;;  %v1776_v5 = vunpack.c.0.s8 %v824_v34  ;;  %v3160_v8 = vpack.c.bf16 %v2408_v18, %v2400_v27  ;;  %v1784_v7 = vunpack.c.1.s8 %v824_v34  ;;  %v681_v47 = vld [vmem:[%s12149_s4 + $0x2c8] sm:$0xff] }
  0x65   :  { %3489 = vmatpush.bf16.msrb.mxu2 %v3312_v44  ;;  %3502 = vmatpush.bf16.msrb.mxu3 %v3376_v10  ;;  %v1360_v3 = vunpack.c.0.s8 %v720_v59  ;;  %v1368_v24 = vunpack.c.1.s8 %v720_v59  ;;  %v3224_v40 = vpack.c.bf16 %v2536_v62, %v2528_v43  ;;  %v1488_v14 = vunpack.c.0.s8 %v752_v50  ;;  %v713_v28 = vld [vmem:[%s12149_s4 + $0x3c8] sm:$0xff] }
  0x66   :  { %v3296_v45 = vpack.c.bf16 %v2680_v42, %v2672_v11  ;;  %v2800_v48 = vcvt.s32.f32 %v1776_v5  ;;  %v2808_v17 = vcvt.s32.f32 %v1784_v7  ;;  %v1496_v4 = vunpack.c.1.s8 %v752_v50  ;;  %v609_v7 = vld [vmem:[%s12149_s4 + $0x88] sm:$0xff] }
  0x67   :  { %3464 = vmatpush.bf16.msrb.mxu0 %v3176_v29  ;;  %3477 = vmatpush.bf16.msrb.mxu1 %v3240_v16  ;;  %v2384_v49 = vcvt.s32.f32 %v1360_v3  ;;  %v2392_v54 = vcvt.s32.f32 %v1368_v24  ;;  %v148_v25 = vperm.slane %v9409_v53, 2  ;;  %v2512_v9 = vcvt.s32.f32 %v1488_v14 }
  0x68   :  { %v961_v46 = vunpack.c.2.s8 %v617_v36  ;;  %v969_v1 = vunpack.c.3.s8 %v617_v36  ;;  %v3360_v37 = vpack.c.bf16 %v2808_v17, %v2800_v48  ;;  %v149_v12 = vperm.slane %v9409_v53, 3 }
  0x69   :  { %3490 = vmatpush.bf16.msrb.mxu2 %v3304_v22  ;;  %3503 = vmatpush.bf16.msrb.mxu3 %v3368_v13  ;;  %v3152_v30 = vpack.c.bf16 %v2392_v54, %v2384_v49  ;;  %v2520_v20 = vcvt.s32.f32 %v1496_v4  ;;  %v1089_v29 = vunpack.c.2.s8 %v649_v15  ;;  %v1097_v16 = vunpack.c.3.s8 %v649_v15 }
  0x6a   :  { %v9439_v44 = vcvt.s32.f32 %v961_v46  ;;  %v9441_v10 = vcvt.s32.f32 %v969_v1  ;;  %v1632_v55 = vunpack.c.2.s8 %v784_v52  ;;  %v1640_v51 = vunpack.c.3.s8 %v784_v52 }
  0x6b   :  { %3465 = vmatpush.bf16.msrb.mxu0 %v3168_v63  ;;  %3478 = vmatpush.bf16.msrb.mxu1 %v3232_v23  ;;  %v3216_v21 = vpack.c.bf16 %v2520_v20, %v2512_v9  ;;  %v1760_v32 = vunpack.c.2.s8 %v816_v57  ;;  %v9445_v23 = vcvt.s32.f32 %v1089_v29  ;;  %v9447_v56 = vcvt.s32.f32 %v1097_v16 }
  0x6c   :  { %v2953_v63 = vpack.c.bf16 %v9441_v10, %v9439_v44  ;;  %v1768_v34 = vunpack.c.3.s8 %v816_v57  ;;  %v2656_v35 = vcvt.s32.f32 %v1632_v55  ;;  %v2664_v41 = vcvt.s32.f32 %v1640_v51 }
  0x6d   :  { %3491 = vmatpush.bf16.msrb.mxu2 %v3296_v45  ;;  %3504 = vmatpush.bf16.msrb.mxu3 %v3360_v37  ;;  %v2784_v39 = vcvt.s32.f32 %v1760_v32  ;;  %v945_v6 = vunpack.c.0.s8 %v617_v36  ;;  %v3017_v59 = vpack.c.bf16 %v9447_v56, %v9445_v23  ;;  %v953_v19 = vunpack.c.1.s8 %v617_v36  ;;  %v641_v45 = vld [vmem:[%s12149_s4 + $0x188] sm:$0xff] }
  0x6e   :  { %v2792_v50 = vcvt.s32.f32 %v1768_v34  ;;  %v1073_v38 = vunpack.c.0.s8 %v649_v15  ;;  %v3288_v58 = vpack.c.bf16 %v2664_v41, %v2656_v35  ;;  %v1081_v0 = vunpack.c.1.s8 %v649_v15 }
  0x6f   :  { %3466 = vmatpush.bf16.msrb.mxu0 %v3160_v8  ;;  %3479 = vmatpush.bf16.msrb.mxu1 %v3224_v40  ;;  %v9451_v61 = vcvt.s32.f32 %v945_v6  ;;  %v1616_v31 = vunpack.c.0.s8 %v784_v52  ;;  %v9456_v22 = vcvt.s32.f32 %v953_v19  ;;  %v1624_v60 = vunpack.c.1.s8 %v784_v52 }
  0x70   :  { %v3352_v2 = vpack.c.bf16 %v2792_v50, %v2784_v39  ;;  %v9458_v13 = vcvt.s32.f32 %v1073_v38  ;;  %v9463_v27 = vcvt.s32.f32 %v1081_v0  ;;  %v1744_v43 = vunpack.c.0.s8 %v816_v57  ;;  %v673_v39 = vld [vmem:[%s12149_s4 + $0x288] sm:$0xff] }
  0x71   :  { %3492 = vmatpush.bf16.msrb.mxu2 %v3288_v58  ;;  %v2640_v18 = vcvt.s32.f32 %v1616_v31  ;;  %v1752_v62 = vunpack.c.1.s8 %v816_v57  ;;  %v2648_v42 = vcvt.s32.f32 %v1624_v60  ;;  %v1217_v5 = vunpack.c.2.s8 %v681_v47 }
  0x72   :  { %3505 = vmatpush.bf16.msrb.mxu3 %v3352_v2  ;;  %v1225_v8 = vunpack.c.3.s8 %v681_v47  ;;  %v2768_v24 = vcvt.s32.f32 %v1744_v43  ;;  %v1345_v40 = vunpack.c.2.s8 %v713_v28  ;;  %v1353_v49 = vunpack.c.3.s8 %v713_v28  ;;  %v705_v2 = vld [vmem:[%s12149_s4 + $0x388] sm:$0xff] }
  0x73   :  { %3467 = vmatpush.bf16.msrb.mxu0 %v3152_v30  ;;  %3480 = vmatpush.bf16.msrb.mxu1 %v3216_v21  ;;  %v2776_v36 = vcvt.s32.f32 %v1752_v62  ;;  %v3280_v48 = vpack.c.bf16 %v2648_v42, %v2640_v18  ;;  %v9475_v14 = vcvt.s32.f32 %v1217_v5  ;;  %v929_v15 = vunpack.c.2.s8 %v609_v7 }
  0x74   :  { %v9477_v17 = vcvt.s32.f32 %v1225_v8  ;;  %v9479_v4 = vcvt.s32.f32 %v1345_v40  ;;  %v937_v9 = vunpack.c.3.s8 %v609_v7  ;;  %v9483_v1 = vcvt.s32.f32 %v1353_v49 }
  0x75   :  { %v3344_v54 = vpack.c.bf16 %v2776_v36, %v2768_v24  ;;  %3493 = vmatpush.bf16.msrb.mxu2 %v3280_v48  ;;  %v1057_v52 = vunpack.c.2.s8 %v641_v45  ;;  %v1065_v57 = vunpack.c.3.s8 %v641_v45  ;;  %v9485_v37 = vcvt.s32.f32 %v929_v15  ;;  %v633_v48 = vld [vmem:[%s12149_s4 + $0x148] sm:$0xff] }
  0x76   :  { %v9487_v30 = vcvt.s32.f32 %v937_v9  ;;  %v150_v20 = vperm.slane %v9409_v53, 4  ;;  %v151_v29 = vperm.slane %v9409_v53, 5  ;;  %v1201_v51 = vunpack.c.0.s8 %v681_v47 }
  0x77   :  { %3506 = vmatpush.bf16.msrb.mxu3 %v3344_v54  ;;  %v9493_v21 = vcvt.s32.f32 %v1057_v52  ;;  %v9495_v55 = vcvt.s32.f32 %v1065_v57  ;;  %v1209_v34 = vunpack.c.1.s8 %v681_v47  ;;  %v1329_v35 = vunpack.c.0.s8 %v713_v28 }
  0x78   :  { %v1337_v41 = vunpack.c.1.s8 %v713_v28  ;;  %v9504_v50 = vcvt.s32.f32 %v1201_v51  ;;  %v913_v19 = vunpack.c.0.s8 %v609_v7  ;;  %v921_v38 = vunpack.c.1.s8 %v609_v7  ;;  %v601_v7 = vld [vmem:[%s12149_s4 + $0x48] sm:$0xff] }
  0x79   :  { %v9506_v58 = vcvt.s32.f32 %v1209_v34  ;;  %v9508_v0 = vcvt.s32.f32 %v1329_v35  ;;  %v1041_v47 = vunpack.c.0.s8 %v641_v45  ;;  %v1049_v18 = vunpack.c.1.s8 %v641_v45 }
  0x7a   :  { %v9510_v31 = vcvt.s32.f32 %v1337_v41  ;;  %v9515_v60 = vcvt.s32.f32 %v913_v19  ;;  %v9517_v28 = vcvt.s32.f32 %v921_v38  ;;  %v1185_v43 = vunpack.c.2.s8 %v673_v39 }
  0x7b   :  { %v9523_v5 = vcvt.s32.f32 %v1041_v47  ;;  %v1193_v8 = vunpack.c.3.s8 %v673_v39  ;;  %v9530_v36 = vcvt.s32.f32 %v1049_v18  ;;  %v1313_v45 = vunpack.c.2.s8 %v705_v2 }
  0x7c   :  { %v9532_v40 = vcvt.s32.f32 %v1185_v43  ;;  %v1321_v54 = vunpack.c.3.s8 %v705_v2  ;;  %v897_v51 = vunpack.c.2.s8 %v601_v7  ;;  %v905_v34 = vunpack.c.3.s8 %v601_v7 }
  0x7d   :  { %v9537_v49 = vcvt.s32.f32 %v1193_v8  ;;  %v9543_v57 = vcvt.s32.f32 %v1313_v45  ;;  %v1025_v19 = vunpack.c.2.s8 %v633_v48  ;;  %v1033_v38 = vunpack.c.3.s8 %v633_v48 }
  0x7e   :  { %v9547_v41 = vcvt.s32.f32 %v1321_v54  ;;  %v9549_v47 = vcvt.s32.f32 %v897_v51  ;;  %v9551_v18 = vcvt.s32.f32 %v905_v34  ;;  %v1169_v43 = vunpack.c.0.s8 %v673_v39 }
  0x7f   :  { %v1177_v8 = vunpack.c.1.s8 %v673_v39  ;;  %v9555_v52 = vcvt.s32.f32 %v1025_v19  ;;  %v9557_v62 = vcvt.s32.f32 %v1033_v38  ;;  %v1297_v35 = vunpack.c.0.s8 %v705_v2 }
  0x80   :  { %v9565_v39 = vcvt.s32.f32 %v1169_v43  ;;  %v1305_v19 = vunpack.c.1.s8 %v705_v2  ;;  %v881_v32 = vunpack.c.0.s8 %v601_v7  ;;  %v1009_v43 = vunpack.c.0.s8 %v633_v48  ;;  %v9585_v2 = vld [vmem:[%s12149_s4 + $0x348] sm:$0xff] }
  0x81   :  { %v9569_v45 = vcvt.s32.f32 %v1177_v8  ;;  %v9571_v38 = vcvt.s32.f32 %v1297_v35  ;;  %v1017_v8 = vunpack.c.1.s8 %v633_v48 }
  0x83   :  { %v9599_v9 = vcvt.s32.f32 %v1017_v8 }
  0xa2   :  { %v257_v24 = vpop.f32.mrf.mxu0 }
  0xa3   :  { %v277_v42 = vpop.f32.mrf.mxu1  ;;  %v258_v54 = vadd.f32 %v257_v24, %v146_v33  ;;  %v889_v33 = vunpack.c.1.s8 %v601_v7  ;;  %v9580_v24 = vcvt.s32.f32 %v1305_v19  ;;  %v9597_v19 = vcvt.s32.f32 %v1009_v43  ;;  %v9612_v43 = vld [vmem:[%s12149_s4 + $0x8] sm:$0xff] }
  0xa4   :  { %v278_v51 = vadd.f32 %v277_v42, %v147_v26  ;;  %v9576_v26 = vld [vmem:[%s12149_s4 + $0x248] sm:$0xff]  ;;  %v865_v56 = vunpack.c.2.s8 %v9612_v43 }
  0xa5   :  { %v560_v15 = vmax.f32 %v258_v54, 0.0  ;;  %v9591_v54 = vcvt.s32.f32 %v881_v32  ;;  %v1153_v48 = vunpack.c.2.s8 %v9576_v26  ;;  %v2977_v3 = vpack.c.bf16 %v9599_v9, %v9597_v19 }
  0xa6   :  { %v561_v6 = vmax.f32 %v278_v51, 0.0  ;;  %v9593_v51 = vcvt.s32.f32 %v889_v33  ;;  %v1289_v33 = vunpack.c.3.s8 %v9585_v2 }
  0xa7   :  { %v9587_v35 = vpack.c.bf16 %v560_v15, %v560_v15  ;;  %v1281_v15 = vunpack.c.2.s8 %v9585_v2  ;;  %v9626_v11 = vcvt.s32.f32 %v1153_v48 }
  0xa8   :  { %v9589_v7 = vpack.c.bf16 %v561_v6, %v561_v6  ;;  %v1161_v6 = vunpack.c.3.s8 %v9576_v26  ;;  %v9636_v23 = vcvt.s32.f32 %v1289_v33  ;;  %v9659_v33 = vcvt.s32.f32 %v865_v56 }
  0xa9   :  { %v297_v34 = vpop.f32.mrf.mxu2  ;;  %3416 = vmatmul.bf16.vlgmr.msra.gmra.mxu0 %v9587_v35  ;;  %v9634_v44 = vcvt.s32.f32 %v1281_v15  ;;  %v12168_v56 = vpack.c.bf16 %v9483_v1, %v9479_v4  ;;  %v12169_v15 = vpack.c.bf16 %v9487_v30, %v9485_v37  ;;  %v12172_v1 = vperm.slane %v9409_v53, 7 }
  0xaa   :  { %v317_v16 = vpop.f32.mrf.mxu3  ;;  %3429 = vmatmul.bf16.vlgmr.msra.gmra.mxu1 %v9589_v7  ;;  %v298_v8 = vadd.f32 %v297_v34, %v148_v25  ;;  %3512 = vmatpush.bf16.msra.mxu0 %v2953_v63  ;;  %v857_v30 = vunpack.c.1.s8 %v9612_v43 }
  0xab   :  { %v318_v42 = vadd.f32 %v317_v16, %v149_v12  ;;  %3525 = vmatpush.bf16.msra.mxu1 %v3017_v59  ;;  %v337_v32 = vpop.f32.mrf.mxu0  ;;  %v357_v46 = vpop.f32.mrf.mxu1  ;;  %v9632_v16 = vcvt.s32.f32 %v1161_v6  ;;  %v9642_v59 = vld [vmem:[%s12149_s4 + $0x108] sm:$0xff]  ;;  %v12166_v6 = vpack.c.bf16 %v9463_v27, %v9458_v13  ;;  %v1145_v13 = vunpack.c.1.s8 %v9576_v26 }
  0xac   :  { %v338_v25 = vadd.f32 %v337_v32, %v150_v20  ;;  %v358_v12 = vadd.f32 %v357_v46, %v151_v29  ;;  %v562_v10 = vmax.f32 %v298_v8, 0.0  ;;  %v873_v29 = vunpack.c.3.s8 %v9612_v43 }
  0xad   :  { %v563_v63 = vmax.f32 %v318_v42, 0.0  ;;  %v3049_v46 = vpack.c.bf16 %v9632_v16, %v9626_v11  ;;  %v12165_v42 = vpack.c.bf16 %v9456_v22, %v9451_v61  ;;  %v1001_v61 = vunpack.c.3.s8 %v9642_v59 }
  0xae   :  { %v564_v34 = vmax.f32 %v338_v25, 0.0  ;;  %v565_v20 = vmax.f32 %v358_v12, 0.0  ;;  %v9647_v48 = vpack.c.bf16 %v562_v10, %v562_v10  ;;  %v9665_v12 = vcvt.s32.f32 %v873_v29 }
  0xaf   :  { %v9649_v32 = vpack.c.bf16 %v563_v63, %v563_v63  ;;  %3513 = vmatpush.bf16.msra.mxu0 %v12165_v42  ;;  %3526 = vmatpush.bf16.msra.mxu1 %v12166_v6  ;;  %v993_v10 = vunpack.c.2.s8 %v9642_v59  ;;  %v1137_v22 = vunpack.c.0.s8 %v9576_v26  ;;  %v1265_v27 = vunpack.c.0.s8 %v9585_v2 }
  0xb0   :  { %v9661_v8 = vpack.c.bf16 %v564_v34, %v564_v34  ;;  %v9663_v25 = vpack.c.bf16 %v565_v20, %v565_v20  ;;  %3442 = vmatmul.bf16.vlgmr.msra.gmra.mxu2 %v9647_v48  ;;  %v12167_v63 = vpack.c.bf16 %v9477_v17, %v9475_v14  ;;  %v1273_v6 = vunpack.c.1.s8 %v9585_v2 }
  0xb1   :  { %3455 = vmatmul.bf16.vlgmr.msra.gmra.mxu3 %v9649_v32  ;;  %v9682_v42 = vcvt.s32.f32 %v993_v10  ;;  %v849_v26 = vunpack.c.0.s8 %v9612_v43  ;;  %v12170_v14 = vpack.c.bf16 %v9495_v55, %v9493_v21  ;;  %v12171_v17 = vperm.slane %v9409_v53, 6  ;;  %v745_v21 = vld [vmem:[%s12149_s4 + $0x4c8] sm:$0xff] }
  0xb2   :  { %3538 = vmatpush.bf16.msra.mxu2 %v12167_v63  ;;  %3551 = vmatpush.bf16.msra.mxu3 %v12168_v56  ;;  %v377_v34 = vpop.f32.mrf.mxu2  ;;  %v397_v20 = vpop.f32.mrf.mxu3  ;;  %v9696_v10 = vcvt.s32.f32 %v1001_v61  ;;  %v9698_v56 = vcvt.s32.f32 %v1137_v22  ;;  %v9700_v2 = vcvt.s32.f32 %v1145_v13  ;;  %v9702_v29 = vcvt.s32.f32 %v1265_v27  ;;  %v777_v22 = vld [vmem:[%s12149_s4 + $0x5c8] sm:$0xff] }
  0xb3   :  { %3514 = vmatpush.bf16.msra.mxu0 %v12169_v15  ;;  %3527 = vmatpush.bf16.msra.mxu1 %v12170_v14  ;;  %v378_v4 = vadd.f32 %v377_v34, %v12171_v17  ;;  %v398_v63 = vadd.f32 %v397_v20, %v12172_v1  ;;  %v9704_v37 = vcvt.s32.f32 %v1273_v6  ;;  %v9712_v61 = vcvt.s32.f32 %v849_v26  ;;  %v657_v26 = vld [vmem:[%s12149_s4 + $0x208] sm:$0xff] }
  0xb4   :  { %v2969_v53 = vpack.c.bf16 %v9696_v10, %v9682_v42  ;;  %v12173_v13 = vpack.c.bf16 %v9506_v58, %v9504_v50  ;;  %v12174_v43 = vpack.c.bf16 %v9510_v31, %v9508_v0  ;;  %v3041_v27 = vpack.c.bf16 %v9700_v2, %v9698_v56 }
  0xb5   :  { %v566_v55 = vmax.f32 %v378_v4, 0.0  ;;  %v567_v15 = vmax.f32 %v398_v63, 0.0  ;;  %v3105_v34 = vpack.c.bf16 %v9704_v37, %v9702_v29  ;;  %v9727_v20 = vcvt.s32.f32 %v857_v30  ;;  %v689_v4 = vld [vmem:[%s12149_s4 + $0x308] sm:$0xff] }
  0xb6   :  { %3539 = vmatpush.bf16.msra.mxu2 %v12173_v13  ;;  %3552 = vmatpush.bf16.msra.mxu3 %v12174_v43  ;;  %v977_v6 = vunpack.c.0.s8 %v9642_v59  ;;  %v12175_v50 = vpack.c.bf16 %v9517_v28, %v9515_v60  ;;  %v12176_v58 = vpack.c.bf16 %v9530_v36, %v9523_v5  ;;  %v985_v14 = vunpack.c.1.s8 %v9642_v59 }
  0xb7   :  { %v9739_v0 = vpack.c.bf16 %v566_v55, %v566_v55  ;;  %v9741_v31 = vpack.c.bf16 %v567_v15, %v567_v15  ;;  %v1473_v17 = vunpack.c.2.s8 %v745_v21  ;;  %v2897_v1 = vpack.c.bf16 %v9727_v20, %v9712_v61 }
  0xb8   :  { %3515 = vmatpush.bf16.msra.mxu0 %v12175_v50  ;;  %3528 = vmatpush.bf16.msra.mxu1 %v12176_v58  ;;  %v9749_v60 = vcvt.s32.f32 %v977_v6  ;;  %v1481_v28 = vunpack.c.3.s8 %v745_v21  ;;  %v1601_v63 = vunpack.c.2.s8 %v777_v22  ;;  %v9751_v5 = vcvt.s32.f32 %v985_v14 }
  0xb9   :  { %v9753_v36 = vcvt.s32.f32 %v1473_v17  ;;  %v1609_v30 = vunpack.c.3.s8 %v777_v22  ;;  %v1121_v55 = vunpack.c.2.s8 %v657_v26  ;;  %v12177_v59 = vpack.c.bf16 %v9537_v49, %v9532_v40  ;;  %3468 = vmatmul.bf16.vlgmr.msrb.gmra.mxu0 %v9661_v8 }
  0xba   :  { %v12178_v15 = vpack.c.bf16 %v9547_v41, %v9543_v57  ;;  %v9761_v13 = vcvt.s32.f32 %v1481_v28  ;;  %v9763_v43 = vcvt.s32.f32 %v1601_v63  ;;  %v1129_v6 = vunpack.c.3.s8 %v657_v26  ;;  %3481 = vmatmul.bf16.vlgmr.msrb.gmra.mxu1 %v9663_v25 }
  0xbb   :  { %3540 = vmatpush.bf16.msra.mxu2 %v12177_v59  ;;  %v1249_v50 = vunpack.c.2.s8 %v689_v4  ;;  %v2961_v58 = vpack.c.bf16 %v9751_v5, %v9749_v60  ;;  %v9769_v14 = vcvt.s32.f32 %v1609_v30  ;;  %v9771_v40 = vcvt.s32.f32 %v1121_v55  ;;  %v833_v60 = vld [vmem:[%s12149_s4 + $0x788] sm:$0xff] }
  0xbc   :  { %3553 = vmatpush.bf16.msra.mxu3 %v12178_v15  ;;  %v1257_v49 = vunpack.c.3.s8 %v689_v4  ;;  %v12179_v57 = vpack.c.bf16 %v9551_v18, %v9549_v47  ;;  %v12180_v41 = vpack.c.bf16 %v9557_v62, %v9555_v52  ;;  %v3209_v17 = vpack.c.bf16 %v9761_v13, %v9753_v36 }
  0xbd   :  { %v9781_v28 = vcvt.s32.f32 %v1129_v6  ;;  %v9783_v63 = vcvt.s32.f32 %v1249_v50  ;;  %v1457_v30 = vunpack.c.0.s8 %v745_v21  ;;  %v3273_v55 = vpack.c.bf16 %v9769_v14, %v9763_v43 }
  0xbe   :  { %3516 = vmatpush.bf16.msra.mxu0 %v12179_v57  ;;  %3529 = vmatpush.bf16.msra.mxu1 %v12180_v41  ;;  %v9787_v59 = vcvt.s32.f32 %v1257_v49  ;;  %v1465_v15 = vunpack.c.1.s8 %v745_v21  ;;  %v1585_v47 = vunpack.c.0.s8 %v777_v22  ;;  %v12181_v18 = vpack.c.bf16 %v9569_v45, %v9565_v39  ;;  %v809_v21 = vld [vmem:[%s12149_s4 + $0x6c8] sm:$0xff] }
  0xbf   :  { %v12182_v62 = vpack.c.bf16 %v9580_v24, %v9571_v38  ;;  %v3033_v52 = vpack.c.bf16 %v9781_v28, %v9771_v40  ;;  %v9797_v6 = vcvt.s32.f32 %v1457_v30  ;;  %v1593_v50 = vunpack.c.1.s8 %v777_v22  ;;  %v841_v24 = vld [vmem:[%s12149_s4 + $0x7c8] sm:$0xff] }
  0xc0   :  { %3541 = vmatpush.bf16.msra.mxu2 %v12181_v18  ;;  %v1105_v57 = vunpack.c.0.s8 %v657_v26  ;;  %v3097_v49 = vpack.c.bf16 %v9787_v59, %v9783_v63  ;;  %v9804_v45 = vcvt.s32.f32 %v1465_v15  ;;  %v9806_v39 = vcvt.s32.f32 %v1585_v47  ;;  %v729_v40 = vld [vmem:[%s12149_s4 + $0x448] sm:$0xff] }
  0xc1   :  { %3554 = vmatpush.bf16.msra.mxu3 %v12182_v62  ;;  %v1113_v38 = vunpack.c.1.s8 %v657_v26  ;;  %v12183_v22 = vpack.c.bf16 %v9593_v51, %v9591_v54  ;;  %v9817_v41 = vcvt.s32.f32 %v1593_v50  ;;  %v1233_v15 = vunpack.c.0.s8 %v689_v4  ;;  %3494 = vmatmul.bf16.vlgmr.msrb.gmra.mxu2 %v9739_v0 }
  0xc2   :  { %3530 = vmatpush.bf16.msra.mxu1 %v2977_v3  ;;  %v9819_v30 = vcvt.s32.f32 %v1105_v57  ;;  %v1241_v47 = vunpack.c.1.s8 %v689_v4  ;;  %3507 = vmatmul.bf16.vlgmr.msrb.gmra.mxu3 %v9741_v31  ;;  %v3201_v26 = vpack.c.bf16 %v9804_v45, %v9797_v6  ;;  %v1729_v54 = vunpack.c.2.s8 %v809_v21  ;;  %v737_v3 = vld [vmem:[%s12149_s4 + $0x488] sm:$0xff] }
  0xc3   :  { %3517 = vmatpush.bf16.msra.mxu0 %v12183_v22  ;;  %v9825_v18 = vcvt.s32.f32 %v1113_v38  ;;  %v1737_v51 = vunpack.c.3.s8 %v809_v21  ;;  %v12184_v9 = vpack.c.bf16 %v9636_v23, %v9634_v44  ;;  %v3265_v19 = vpack.c.bf16 %v9817_v41, %v9806_v39  ;;  %v769_v57 = vld [vmem:[%s12149_s4 + $0x588] sm:$0xff] }
  0xc4   :  { %3542 = vmatpush.bf16.msra.mxu2 %v3049_v46  ;;  %v9838_v4 = vcvt.s32.f32 %v1233_v15  ;;  %v9840_v62 = vcvt.s32.f32 %v1241_v47  ;;  %v1857_v50 = vunpack.c.2.s8 %v841_v24  ;;  %v9847_v16 = vcvt.s32.f32 %v1729_v54 }
  0xc5   :  { %3555 = vmatpush.bf16.msra.mxu3 %v12184_v9  ;;  %v3025_v11 = vpack.c.bf16 %v9825_v18, %v9819_v30  ;;  %v9849_v46 = vcvt.s32.f32 %v1737_v51  ;;  %v1865_v44 = vunpack.c.3.s8 %v841_v24  ;;  %v12185_v23 = vpack.c.bf16 %v9665_v12, %v9659_v33 }
  0xc6   :  { %3531 = vmatpush.bf16.msra.mxu1 %v2969_v53  ;;  %v3089_v39 = vpack.c.bf16 %v9840_v62, %v9838_v4  ;;  %v2881_v38 = vcvt.s32.f32 %v1857_v50  ;;  %v1441_v22 = vunpack.c.2.s8 %v737_v3  ;;  %v1449_v41 = vunpack.c.3.s8 %v737_v3 }
  0xc7   :  { %3518 = vmatpush.bf16.msra.mxu0 %v12185_v23  ;;  %v3337_v30 = vpack.c.bf16 %v9849_v46, %v9847_v16  ;;  %v2889_v15 = vcvt.s32.f32 %v1865_v44  ;;  %v1569_v47 = vunpack.c.2.s8 %v769_v57  ;;  %v1577_v18 = vunpack.c.3.s8 %v769_v57 }
  0xc8   :  { %3543 = vmatpush.bf16.msra.mxu2 %v3041_v27  ;;  %v2465_v33 = vcvt.s32.f32 %v1441_v22  ;;  %v2473_v12 = vcvt.s32.f32 %v1449_v41  ;;  %v1713_v42 = vunpack.c.0.s8 %v809_v21  ;;  %v1721_v10 = vunpack.c.1.s8 %v809_v21  ;;  %v801_v27 = vld [vmem:[%s12149_s4 + $0x688] sm:$0xff] }
  0xc9   :  { %3556 = vmatpush.bf16.msra.mxu3 %v3105_v34  ;;  %v3401_v53 = vpack.c.bf16 %v2889_v15, %v2881_v38  ;;  %v2593_v54 = vcvt.s32.f32 %v1569_v47  ;;  %v2601_v51 = vcvt.s32.f32 %v1577_v18  ;;  %v1841_v9 = vunpack.c.0.s8 %v841_v24  ;;  %v761_v21 = vld [vmem:[%s12149_s4 + $0x548] sm:$0xff] }
  0xca   :  { %3532 = vmatpush.bf16.msra.mxu1 %v2961_v58  ;;  %v3193_v56 = vpack.c.bf16 %v2473_v12, %v2465_v33  ;;  %v9873_v2 = vcvt.s32.f32 %v1713_v42  ;;  %v9875_v29 = vcvt.s32.f32 %v1721_v10  ;;  %v1849_v37 = vunpack.c.1.s8 %v841_v24  ;;  %v793_v33 = vld [vmem:[%s12149_s4 + $0x648] sm:$0xff] }
  0xcb   :  { %3519 = vmatpush.bf16.msra.mxu0 %v2897_v1  ;;  %v3257_v61 = vpack.c.bf16 %v2601_v51, %v2593_v54  ;;  %v2865_v34 = vcvt.s32.f32 %v1841_v9  ;;  %v1425_v20 = vunpack.c.0.s8 %v737_v3  ;;  %v1433_v1 = vunpack.c.1.s8 %v737_v3  ;;  %v825_v54 = vld [vmem:[%s12149_s4 + $0x748] sm:$0xff] }
  0xcc   :  { %3544 = vmatpush.bf16.msra.mxu2 %v3033_v52  ;;  %v3329_v5 = vpack.c.bf16 %v9875_v29, %v9873_v2  ;;  %v2873_v36 = vcvt.s32.f32 %v1849_v37  ;;  %v1553_v13 = vunpack.c.0.s8 %v769_v57  ;;  %v1561_v43 = vunpack.c.1.s8 %v769_v57 }
  0xcd   :  { %3557 = vmatpush.bf16.msra.mxu3 %v3097_v49  ;;  %3533 = vmatmul.bf16.vlgmr.msra.gmra.mxu1 %v9589_v7  ;;  %v2449_v58 = vcvt.s32.f32 %v1425_v20  ;;  %v2457_v14 = vcvt.s32.f32 %v1433_v1  ;;  %v1825_v52 = vunpack.c.2.s8 %v833_v60  ;;  %v1833_v4 = vunpack.c.3.s8 %v833_v60 }
  0xce   :  { %3577 = vmatpush.bf16.msrb.mxu1 %v3273_v55  ;;  %3520 = vmatmul.bf16.vlgmr.msra.gmra.mxu0 %v9587_v35  ;;  %v1705_v55 = vunpack.c.3.s8 %v801_v27  ;;  %v3393_v28 = vpack.c.bf16 %v2873_v36, %v2865_v34  ;;  %v2577_v63 = vcvt.s32.f32 %v1553_v13  ;;  %v2585_v59 = vcvt.s32.f32 %v1561_v43  ;;  %v721_v34 = vld [vmem:[%s12149_s4 + $0x408] sm:$0xff] }
  0xcf   :  { %3564 = vmatpush.bf16.msrb.mxu0 %v3209_v17  ;;  %v1697_v17 = vunpack.c.2.s8 %v801_v27  ;;  %v3185_v49 = vpack.c.bf16 %v2457_v14, %v2449_v58  ;;  %v2849_v50 = vcvt.s32.f32 %v1825_v52  ;;  %v1409_v57 = vunpack.c.2.s8 %v729_v40  ;;  %v753_v36 = vld [vmem:[%s12149_s4 + $0x508] sm:$0xff] }
  0xd0   :  { %v2729_v3 = vcvt.s32.f32 %v1705_v55  ;;  %3545 = vmatpush.bf16.msra.mxu2 %v3025_v11  ;;  %v3249_v62 = vpack.c.bf16 %v2585_v59, %v2577_v63  ;;  %v1417_v16 = vunpack.c.3.s8 %v729_v40  ;;  %v2857_v44 = vcvt.s32.f32 %v1833_v4 }
  0xd1   :  { %v2721_v24 = vcvt.s32.f32 %v1697_v17  ;;  %3558 = vmatpush.bf16.msra.mxu3 %v3089_v39  ;;  %v1537_v23 = vunpack.c.2.s8 %v761_v21  ;;  %v1545_v38 = vunpack.c.3.s8 %v761_v21  ;;  %v2433_v22 = vcvt.s32.f32 %v1409_v57 }
  0xd2   :  { %3578 = vmatpush.bf16.msrb.mxu1 %v3265_v19  ;;  %v2441_v6 = vcvt.s32.f32 %v1417_v16  ;;  %v1681_v45 = vunpack.c.0.s8 %v801_v27  ;;  %v3385_v19 = vpack.c.bf16 %v2857_v44, %v2849_v50  ;;  %v1809_v39 = vunpack.c.0.s8 %v833_v60 }
  0xd3   :  { %3565 = vmatpush.bf16.msrb.mxu0 %v3201_v26  ;;  %v3321_v46 = vpack.c.bf16 %v2729_v3, %v2721_v24  ;;  %v1689_v26 = vunpack.c.1.s8 %v801_v27  ;;  %v2561_v41 = vcvt.s32.f32 %v1537_v23  ;;  %v2569_v11 = vcvt.s32.f32 %v1545_v38  ;;  %3546 = vmatmul.bf16.vlgmr.msra.gmra.mxu2 %v9647_v48 }
  0xd4   :  { %3590 = vmatpush.bf16.msrb.mxu2 %v3337_v30  ;;  %3559 = vmatmul.bf16.vlgmr.msra.gmra.mxu3 %v9649_v32  ;;  %v3177_v30 = vpack.c.bf16 %v2441_v6, %v2433_v22  ;;  %v2705_v15 = vcvt.s32.f32 %v1681_v45  ;;  %v1817_v18 = vunpack.c.1.s8 %v833_v60  ;;  %v2833_v42 = vcvt.s32.f32 %v1809_v39  ;;  %v618_v22 = vld [vmem:[%s12149_s4 + $0xd0] sm:$0xff] }
  0xd5   :  { %3603 = vmatpush.bf16.msrb.mxu3 %v3401_v53  ;;  %v2713_v47 = vcvt.s32.f32 %v1689_v26  ;;  %v3241_v12 = vpack.c.bf16 %v2569_v11, %v2561_v41  ;;  %v1393_v10 = vunpack.c.0.s8 %v729_v40  ;;  %v1401_v53 = vunpack.c.1.s8 %v729_v40  ;;  %v650_v41 = vld [vmem:[%s12149_s4 + $0x1d0] sm:$0xff] }
  0xd6   :  { %3579 = vmatpush.bf16.msrb.mxu1 %v3257_v61  ;;  %v2841_v9 = vcvt.s32.f32 %v1817_v18  ;;  %v1529_v2 = vunpack.c.1.s8 %v761_v21  ;;  %v1665_v27 = vunpack.c.2.s8 %v793_v33  ;;  %v1673_v61 = vunpack.c.3.s8 %v793_v33 }
  0xd7   :  { %3566 = vmatpush.bf16.msrb.mxu0 %v3193_v56  ;;  %v3313_v51 = vpack.c.bf16 %v2713_v47, %v2705_v15  ;;  %v1521_v56 = vunpack.c.0.s8 %v761_v21  ;;  %v2417_v29 = vcvt.s32.f32 %v1393_v10  ;;  %v2425_v37 = vcvt.s32.f32 %v1401_v53 }
  0xd8   :  { %3591 = vmatpush.bf16.msrb.mxu2 %v3329_v5  ;;  %v3377_v20 = vpack.c.bf16 %v2841_v9, %v2833_v42  ;;  %v2553_v60 = vcvt.s32.f32 %v1529_v2  ;;  %v1793_v5 = vunpack.c.2.s8 %v825_v54  ;;  %v2689_v43 = vcvt.s32.f32 %v1665_v27  ;;  %v785_v42 = vld [vmem:[%s12149_s4 + $0x608] sm:$0xff] }
  0xd9   :  { %3604 = vmatpush.bf16.msrb.mxu3 %v3393_v28  ;;  %v2545_v1 = vcvt.s32.f32 %v1521_v56  ;;  %v3169_v13 = vpack.c.bf16 %v2425_v37, %v2417_v29  ;;  %v2697_v58 = vcvt.s32.f32 %v1673_v61  ;;  %v1801_v14 = vunpack.c.3.s8 %v825_v54  ;;  %v817_v9 = vld [vmem:[%s12149_s4 + $0x708] sm:$0xff] }
  0xda   :  { %3580 = vmatpush.bf16.msrb.mxu1 %v3249_v62  ;;  %v2817_v55 = vcvt.s32.f32 %v1793_v5  ;;  %v1377_v40 = vunpack.c.2.s8 %v721_v34  ;;  %v1385_v28 = vunpack.c.3.s8 %v721_v34  ;;  %v1505_v52 = vunpack.c.2.s8 %v753_v36 }
  0xdb   :  { %3567 = vmatpush.bf16.msrb.mxu0 %v3185_v49  ;;  %v3233_v17 = vpack.c.bf16 %v2553_v60, %v2545_v1  ;;  %v3305_v63 = vpack.c.bf16 %v2697_v58, %v2689_v43  ;;  %v2825_v59 = vcvt.s32.f32 %v1801_v14  ;;  %v1513_v21 = vunpack.c.3.s8 %v753_v36 }
  0xdc   :  { %3592 = vmatpush.bf16.msrb.mxu2 %v3321_v46  ;;  %v2401_v49 = vcvt.s32.f32 %v1377_v40  ;;  %v2409_v24 = vcvt.s32.f32 %v1385_v28  ;;  %v1649_v3 = vunpack.c.0.s8 %v793_v33  ;;  %v1657_v4 = vunpack.c.1.s8 %v793_v33 }
  0xdd   :  { %3605 = vmatpush.bf16.msrb.mxu3 %v3385_v19  ;;  %v3369_v62 = vpack.c.bf16 %v2825_v59, %v2817_v55  ;;  %v2529_v50 = vcvt.s32.f32 %v1505_v52  ;;  %v2537_v57 = vcvt.s32.f32 %v1513_v21  ;;  %v1777_v16 = vunpack.c.0.s8 %v825_v54 }
  0xde   :  { %3581 = vmatpush.bf16.msrb.mxu1 %v3241_v12  ;;  %v3161_v46 = vpack.c.bf16 %v2409_v24, %v2401_v49  ;;  %v2673_v44 = vcvt.s32.f32 %v1649_v3  ;;  %v2681_v23 = vcvt.s32.f32 %v1657_v4  ;;  %v1785_v38 = vunpack.c.1.s8 %v825_v54  ;;  %v682_v49 = vld [vmem:[%s12149_s4 + $0x2d0] sm:$0xff] }
  0xdf   :  { %3568 = vmatpush.bf16.msrb.mxu0 %v3177_v30  ;;  %v3225_v6 = vpack.c.bf16 %v2537_v57, %v2529_v50  ;;  %v2801_v45 = vcvt.s32.f32 %v1777_v16  ;;  %v1361_v26 = vunpack.c.0.s8 %v721_v34  ;;  %v1369_v19 = vunpack.c.1.s8 %v721_v34  ;;  %v714_v50 = vld [vmem:[%s12149_s4 + $0x3d0] sm:$0xff] }
  0xe0   :  { %3593 = vmatpush.bf16.msrb.mxu2 %v3313_v51  ;;  %v3297_v11 = vpack.c.bf16 %v2681_v23, %v2673_v44  ;;  %v2809_v39 = vcvt.s32.f32 %v1785_v38  ;;  %v1489_v30 = vunpack.c.0.s8 %v753_v36  ;;  %v1497_v15 = vunpack.c.1.s8 %v753_v36 }
  0xe1   :  { %3606 = vmatpush.bf16.msrb.mxu3 %v3377_v20  ;;  %v2385_v47 = vcvt.s32.f32 %v1361_v26  ;;  %v2393_v18 = vcvt.s32.f32 %v1369_v19  ;;  %v962_v33 = vunpack.c.2.s8 %v618_v22  ;;  %v970_v12 = vunpack.c.3.s8 %v618_v22 }
  0xe2   :  { %3582 = vmatpush.bf16.msrb.mxu1 %v3233_v17  ;;  %v3361_v10 = vpack.c.bf16 %v2809_v39, %v2801_v45  ;;  %v2513_v53 = vcvt.s32.f32 %v1489_v30  ;;  %v2521_v54 = vcvt.s32.f32 %v1497_v15  ;;  %v1090_v51 = vunpack.c.2.s8 %v650_v41  ;;  %v610_v45 = vld [vmem:[%s12149_s4 + $0x90] sm:$0xff] }
  0xe3   :  { %3569 = vmatpush.bf16.msrb.mxu0 %v3169_v13  ;;  %v3153_v56 = vpack.c.bf16 %v2393_v18, %v2385_v47  ;;  %v1986_v2 = vcvt.s32.f32 %v962_v33  ;;  %v1994_v29 = vcvt.s32.f32 %v970_v12  ;;  %v1098_v37 = vunpack.c.3.s8 %v650_v41  ;;  %v642_v39 = vld [vmem:[%s12149_s4 + $0x190] sm:$0xff] }
  0xe4   :  { %3594 = vmatpush.bf16.msrb.mxu2 %v3305_v63  ;;  %v3217_v27 = vpack.c.bf16 %v2521_v54, %v2513_v53  ;;  %v2114_v61 = vcvt.s32.f32 %v1090_v51  ;;  %v1633_v34 = vunpack.c.2.s8 %v785_v42  ;;  %v1641_v20 = vunpack.c.3.s8 %v785_v42 }
  0xe5   :  { %3607 = vmatpush.bf16.msrb.mxu3 %v3369_v62  ;;  %v2954_v1 = vpack.c.bf16 %v1994_v29, %v1986_v2  ;;  %v2122_v60 = vcvt.s32.f32 %v1098_v37  ;;  %v1761_v5 = vunpack.c.2.s8 %v817_v9  ;;  %v1769_v36 = vunpack.c.3.s8 %v817_v9 }
  0xe6   :  { %3583 = vmatpush.bf16.msrb.mxu1 %v3225_v6  ;;  %v2657_v13 = vcvt.s32.f32 %v1633_v34  ;;  %v2665_v43 = vcvt.s32.f32 %v1641_v20  ;;  %v946_v58 = vunpack.c.0.s8 %v618_v22  ;;  %v954_v14 = vunpack.c.1.s8 %v618_v22 }
  0xe7   :  { %3570 = vmatpush.bf16.msrb.mxu0 %v3161_v46  ;;  %v3018_v17 = vpack.c.bf16 %v2122_v60, %v2114_v61  ;;  %v2785_v55 = vcvt.s32.f32 %v1761_v5  ;;  %v2793_v40 = vcvt.s32.f32 %v1769_v36  ;;  %v1074_v28 = vunpack.c.0.s8 %v650_v41 }
  0xe8   :  { %3595 = vmatpush.bf16.msrb.mxu2 %v3297_v11  ;;  %v3289_v63 = vpack.c.bf16 %v2665_v43, %v2657_v13  ;;  %v1970_v59 = vcvt.s32.f32 %v946_v58  ;;  %v1978_v52 = vcvt.s32.f32 %v954_v14  ;;  %v1082_v21 = vunpack.c.1.s8 %v650_v41  ;;  %v674_v13 = vld [vmem:[%s12149_s4 + $0x290] sm:$0xff] }
  0xe9   :  { %3608 = vmatpush.bf16.msrb.mxu3 %v3361_v10  ;;  %v3353_v24 = vpack.c.bf16 %v2793_v40, %v2785_v55  ;;  %v2098_v3 = vcvt.s32.f32 %v1074_v28  ;;  %v1617_v4 = vunpack.c.0.s8 %v785_v42  ;;  %v1625_v62 = vunpack.c.1.s8 %v785_v42  ;;  %v706_v55 = vld [vmem:[%s12149_s4 + $0x390] sm:$0xff] }
  0xea   :  { %3584 = vmatpush.bf16.msrb.mxu1 %v3217_v27  ;;  %v2946_v57 = vpack.c.bf16 %v1978_v52, %v1970_v59  ;;  %v2106_v16 = vcvt.s32.f32 %v1082_v21  ;;  %v1745_v46 = vunpack.c.0.s8 %v817_v9  ;;  %v1753_v44 = vunpack.c.1.s8 %v817_v9 }
  0xeb   :  { %3571 = vmatpush.bf16.msrb.mxu0 %v3153_v56  ;;  %v2641_v23 = vcvt.s32.f32 %v1617_v4  ;;  %v2649_v38 = vcvt.s32.f32 %v1625_v62  ;;  %v1218_v22 = vunpack.c.2.s8 %v682_v49  ;;  %v1226_v6 = vunpack.c.3.s8 %v682_v49 }
  0xec   :  { %3596 = vmatpush.bf16.msrb.mxu2 %v3289_v63  ;;  %v3010_v26 = vpack.c.bf16 %v2106_v16, %v2098_v3  ;;  %v2769_v19 = vcvt.s32.f32 %v1745_v46  ;;  %v2777_v41 = vcvt.s32.f32 %v1753_v44  ;;  %v1346_v11 = vunpack.c.2.s8 %v714_v50  ;;  %v602_v3 = vld [vmem:[%s12149_s4 + $0x50] sm:$0xff] }
  0xed   :  { %3609 = vmatpush.bf16.msrb.mxu3 %v3353_v24  ;;  %3585 = vmatmul.bf16.vlgmr.msrb.gmra.mxu1 %v9663_v25  ;;  %v3281_v30 = vpack.c.bf16 %v2649_v38, %v2641_v23  ;;  %v2242_v15 = vcvt.s32.f32 %v1218_v22  ;;  %v2250_v47 = vcvt.s32.f32 %v1226_v6  ;;  %v1354_v18 = vunpack.c.3.s8 %v714_v50  ;;  %v634_v16 = vld [vmem:[%s12149_s4 + $0x150] sm:$0xff] }
  0xee   :  { %3629 = vmatpush.bf16.msra.mxu1 %v3018_v17  ;;  %3572 = vmatmul.bf16.vlgmr.msrb.gmra.mxu0 %v9661_v8  ;;  %v3345_v33 = vpack.c.bf16 %v2777_v41, %v2769_v19  ;;  %v2370_v12 = vcvt.s32.f32 %v1346_v11  ;;  %v930_v42 = vunpack.c.2.s8 %v610_v45  ;;  %v938_v10 = vunpack.c.3.s8 %v610_v45 }
  0xef   :  { %3616 = vmatpush.bf16.msra.mxu0 %v2954_v1  ;;  %v3082_v53 = vpack.c.bf16 %v2250_v47, %v2242_v15  ;;  %v2378_v54 = vcvt.s32.f32 %v1354_v18  ;;  %v1058_v51 = vunpack.c.2.s8 %v642_v39  ;;  %v1066_v9 = vunpack.c.3.s8 %v642_v39 }
  0xf0   :  { %3597 = vmatpush.bf16.msrb.mxu2 %v3281_v30  ;;  %v1954_v56 = vcvt.s32.f32 %v930_v42  ;;  %v1962_v2 = vcvt.s32.f32 %v938_v10  ;;  %v1202_v29 = vunpack.c.0.s8 %v682_v49  ;;  %v1210_v37 = vunpack.c.1.s8 %v682_v49 }
  0xf1   :  { %3610 = vmatpush.bf16.msrb.mxu3 %v3345_v33  ;;  %v3146_v27 = vpack.c.bf16 %v2378_v54, %v2370_v12  ;;  %v2082_v61 = vcvt.s32.f32 %v1058_v51  ;;  %v2090_v34 = vcvt.s32.f32 %v1066_v9  ;;  %v1330_v20 = vunpack.c.0.s8 %v714_v50 }
  0xf2   :  { %3630 = vmatpush.bf16.msra.mxu1 %v3010_v26  ;;  %v2938_v1 = vpack.c.bf16 %v1962_v2, %v1954_v56  ;;  %v2226_v60 = vcvt.s32.f32 %v1202_v29  ;;  %v2234_v5 = vcvt.s32.f32 %v1210_v37  ;;  %v1338_v36 = vunpack.c.1.s8 %v714_v50 }
  0xf3   :  { %3617 = vmatpush.bf16.msra.mxu0 %v2946_v57  ;;  %3598 = vmatmul.bf16.vlgmr.msrb.gmra.mxu2 %v9739_v0  ;;  %v3002_v43 = vpack.c.bf16 %v2090_v34, %v2082_v61  ;;  %v2354_v58 = vcvt.s32.f32 %v1330_v20  ;;  %v914_v14 = vunpack.c.0.s8 %v610_v45  ;;  %v922_v17 = vunpack.c.1.s8 %v610_v45  ;;  %v666_v20 = vld [vmem:[%s12149_s4 + $0x250] sm:$0xff] }
  0xf4   :  { %3642 = vmatpush.bf16.msra.mxu2 %v3082_v53  ;;  %3611 = vmatmul.bf16.vlgmr.msrb.gmra.mxu3 %v9741_v31  ;;  %v3074_v40 = vpack.c.bf16 %v2234_v5, %v2226_v60  ;;  %v2362_v28 = vcvt.s32.f32 %v1338_v36  ;;  %v1042_v63 = vunpack.c.0.s8 %v642_v39  ;;  %v1050_v59 = vunpack.c.1.s8 %v642_v39  ;;  %v698_v36 = vld [vmem:[%s12149_s4 + $0x350] sm:$0xff] }
  0xf5   :  { %3655 = vmatpush.bf16.msra.mxu3 %v3146_v27  ;;  %v1938_v52 = vcvt.s32.f32 %v914_v14  ;;  %v1946_v21 = vcvt.s32.f32 %v922_v17  ;;  %v1186_v49 = vunpack.c.2.s8 %v674_v13  ;;  %v1194_v24 = vunpack.c.3.s8 %v674_v13 }
  0xf6   :  { %3631 = vmatpush.bf16.msra.mxu1 %v3002_v43  ;;  %v3138_v4 = vpack.c.bf16 %v2362_v28, %v2354_v58  ;;  %v2066_v62 = vcvt.s32.f32 %v1042_v63  ;;  %v2074_v50 = vcvt.s32.f32 %v1050_v59  ;;  %v1314_v57 = vunpack.c.2.s8 %v706_v55  ;;  %v626_v59 = vld [vmem:[%s12149_s4 + $0x110] sm:$0xff] }
  0xf7   :  { %3618 = vmatpush.bf16.msra.mxu0 %v2938_v1  ;;  %v2930_v46 = vpack.c.bf16 %v1946_v21, %v1938_v52  ;;  %v2210_v44 = vcvt.s32.f32 %v1186_v49  ;;  %v2218_v23 = vcvt.s32.f32 %v1194_v24  ;;  %v1322_v38 = vunpack.c.3.s8 %v706_v55 }
  0xf8   :  { %3643 = vmatpush.bf16.msra.mxu2 %v3074_v40  ;;  %v2994_v22 = vpack.c.bf16 %v2074_v50, %v2066_v62  ;;  %v2338_v6 = vcvt.s32.f32 %v1314_v57  ;;  %v898_v45 = vunpack.c.2.s8 %v602_v3  ;;  %v906_v26 = vunpack.c.3.s8 %v602_v3  ;;  %v594_v40 = vld [vmem:[%s12149_s4 + $0x10] sm:$0xff] }
  0xf9   :  { %3656 = vmatpush.bf16.msra.mxu3 %v3138_v4  ;;  %v3066_v19 = vpack.c.bf16 %v2218_v23, %v2210_v44  ;;  %v2346_v41 = vcvt.s32.f32 %v1322_v38  ;;  %v1026_v11 = vunpack.c.2.s8 %v634_v16  ;;  %v1034_v39 = vunpack.c.3.s8 %v634_v16 }
  0xfa   :  { %3632 = vmatpush.bf16.msra.mxu1 %v2994_v22  ;;  %v1922_v30 = vcvt.s32.f32 %v898_v45  ;;  %v1930_v15 = vcvt.s32.f32 %v906_v26  ;;  %v1170_v47 = vunpack.c.0.s8 %v674_v13  ;;  %v1178_v42 = vunpack.c.1.s8 %v674_v13 }
  0xfb   :  { %3619 = vmatpush.bf16.msra.mxu0 %v2930_v46  ;;  %v3130_v18 = vpack.c.bf16 %v2346_v41, %v2338_v6  ;;  %v2050_v33 = vcvt.s32.f32 %v1026_v11  ;;  %v2058_v12 = vcvt.s32.f32 %v1034_v39  ;;  %v1298_v54 = vunpack.c.0.s8 %v706_v55 }
  0xfc   :  { %3644 = vmatpush.bf16.msra.mxu2 %v3066_v19  ;;  %v2922_v10 = vpack.c.bf16 %v1930_v15, %v1922_v30  ;;  %v2194_v53 = vcvt.s32.f32 %v1170_v47  ;;  %v2202_v9 = vcvt.s32.f32 %v1178_v42  ;;  %v1306_v56 = vunpack.c.1.s8 %v706_v55  ;;  %v746_v30 = vld [vmem:[%s12149_s4 + $0x4d0] sm:$0xff] }
  0xfd   :  { %3657 = vmatpush.bf16.msra.mxu3 %v3130_v18  ;;  %v2986_v51 = vpack.c.bf16 %v2058_v12, %v2050_v33  ;;  %v2322_v2 = vcvt.s32.f32 %v1298_v54  ;;  %v882_v29 = vunpack.c.0.s8 %v602_v3  ;;  %v890_v37 = vunpack.c.1.s8 %v602_v3  ;;  %v778_v12 = vld [vmem:[%s12149_s4 + $0x5d0] sm:$0xff] }
  0xfe   :  { %v3058_v27 = vpack.c.bf16 %v2202_v9, %v2194_v53  ;;  %v2330_v61 = vcvt.s32.f32 %v1306_v56  ;;  %v1010_v34 = vunpack.c.0.s8 %v634_v16  ;;  %v1018_v5 = vunpack.c.1.s8 %v634_v16 }
  0xff   :  { %3620 = vmatpush.bf16.msra.mxu0 %v2922_v10  ;;  %3633 = vmatpush.bf16.msra.mxu1 %v2986_v51  ;;  %v1906_v1 = vcvt.s32.f32 %v882_v29  ;;  %v1914_v60 = vcvt.s32.f32 %v890_v37  ;;  %v1154_v17 = vunpack.c.2.s8 %v666_v20  ;;  %v1162_v55 = vunpack.c.3.s8 %v666_v20  ;;  %v658_v51 = vld [vmem:[%s12149_s4 + $0x210] sm:$0xff] }
 0x100   :  { %3645 = vmatpush.bf16.msra.mxu2 %v3058_v27  ;;  %v3122_v13 = vpack.c.bf16 %v2330_v61, %v2322_v2  ;;  %v2034_v43 = vcvt.s32.f32 %v1010_v34  ;;  %v2042_v14 = vcvt.s32.f32 %v1018_v5  ;;  %v1282_v28 = vunpack.c.2.s8 %v698_v36 }
 0x101   :  { %v2914_v58 = vpack.c.bf16 %v1914_v60, %v1906_v1  ;;  %v1290_v63 = vunpack.c.3.s8 %v698_v36  ;;  %v2178_v21 = vcvt.s32.f32 %v1154_v17  ;;  %v2186_v49 = vcvt.s32.f32 %v1162_v55 }
 0x102   :  { %3658 = vmatpush.bf16.msra.mxu3 %v3122_v13  ;;  %v2978_v52 = vpack.c.bf16 %v2042_v14, %v2034_v43  ;;  %v2306_v24 = vcvt.s32.f32 %v1282_v28  ;;  %v866_v4 = vunpack.c.2.s8 %v594_v40  ;;  %v874_v50 = vunpack.c.3.s8 %v594_v40 }
 0x103   :  { %3621 = vmatpush.bf16.msra.mxu0 %v2914_v58  ;;  %v2314_v3 = vcvt.s32.f32 %v1290_v63  ;;  %v3050_v62 = vpack.c.bf16 %v2186_v49, %v2178_v21  ;;  %v994_v57 = vunpack.c.2.s8 %v626_v59  ;;  %v1002_v44 = vunpack.c.3.s8 %v626_v59 }
 0x104   :  { %3634 = vmatpush.bf16.msra.mxu1 %v2978_v52  ;;  %v1890_v46 = vcvt.s32.f32 %v866_v4  ;;  %v1898_v23 = vcvt.s32.f32 %v874_v50  ;;  %v1138_v22 = vunpack.c.0.s8 %v666_v20  ;;  %v1146_v45 = vunpack.c.1.s8 %v666_v20  ;;  %v690_v20 = vld [vmem:[%s12149_s4 + $0x310] sm:$0xff] }
 0x105   :  { %v3114_v16 = vpack.c.bf16 %v2314_v3, %v2306_v24  ;;  %3646 = vmatpush.bf16.msra.mxu2 %v3050_v62  ;;  %v2018_v38 = vcvt.s32.f32 %v994_v57  ;;  %v2026_v6 = vcvt.s32.f32 %v1002_v44  ;;  %v1266_v26 = vunpack.c.0.s8 %v698_v36 }
 0x106   :  { %v1274_v19 = vunpack.c.1.s8 %v698_v36  ;;  %v2906_v41 = vpack.c.bf16 %v1898_v23, %v1890_v46  ;;  %v2162_v11 = vcvt.s32.f32 %v1138_v22  ;;  %v850_v39 = vunpack.c.0.s8 %v594_v40  ;;  %v810_v46 = vld [vmem:[%s12149_s4 + $0x6d0] sm:$0xff] }
 0x107   :  { %3659 = vmatpush.bf16.msra.mxu3 %v3114_v16  ;;  %v2970_v15 = vpack.c.bf16 %v2026_v6, %v2018_v38  ;;  %v2170_v47 = vcvt.s32.f32 %v1146_v45  ;;  %v2290_v18 = vcvt.s32.f32 %v1266_v26  ;;  %v858_v42 = vunpack.c.1.s8 %v594_v40  ;;  %v842_v6 = vld [vmem:[%s12149_s4 + $0x7d0] sm:$0xff] }
 0x108   :  { %v2298_v33 = vcvt.s32.f32 %v1274_v19  ;;  %3622 = vmatpush.bf16.msra.mxu0 %v2906_v41  ;;  %v1874_v10 = vcvt.s32.f32 %v850_v39  ;;  %v978_v53 = vunpack.c.0.s8 %v626_v59  ;;  %v986_v54 = vunpack.c.1.s8 %v626_v59 }
 0x109   :  { %3635 = vmatpush.bf16.msra.mxu1 %v2970_v15  ;;  %v3042_v9 = vpack.c.bf16 %v2170_v47, %v2162_v11  ;;  %v1474_v2 = vunpack.c.2.s8 %v746_v30  ;;  %v1482_v29 = vunpack.c.3.s8 %v746_v30  ;;  %v1882_v37 = vcvt.s32.f32 %v858_v42  ;;  %v738_v11 = vld [vmem:[%s12149_s4 + $0x490] sm:$0xff] }
 0x10a   :  { %v3106_v56 = vpack.c.bf16 %v2298_v33, %v2290_v18  ;;  %v2002_v27 = vcvt.s32.f32 %v978_v53  ;;  %v2010_v61 = vcvt.s32.f32 %v986_v54  ;;  %v1602_v34 = vunpack.c.2.s8 %v778_v12 }
 0x10b   :  { %3647 = vmatpush.bf16.msra.mxu2 %v3042_v9  ;;  %v2498_v1 = vcvt.s32.f32 %v1474_v2  ;;  %v2506_v60 = vcvt.s32.f32 %v1482_v29  ;;  %v1610_v5 = vunpack.c.3.s8 %v778_v12  ;;  %v1122_v36 = vunpack.c.2.s8 %v658_v51 }
 0x10c   :  { %3660 = vmatpush.bf16.msra.mxu3 %v3106_v56  ;;  %v2898_v13 = vpack.c.bf16 %v1882_v37, %v1874_v10  ;;  %v2962_v43 = vpack.c.bf16 %v2010_v61, %v2002_v27  ;;  %v2626_v58 = vcvt.s32.f32 %v1602_v34  ;;  %v1130_v14 = vunpack.c.3.s8 %v658_v51  ;;  %v770_v10 = vld [vmem:[%s12149_s4 + $0x590] sm:$0xff] }
 0x10d   :  { %v3210_v17 = vpack.c.bf16 %v2506_v60, %v2498_v1  ;;  %v2634_v55 = vcvt.s32.f32 %v1610_v5  ;;  %v2146_v40 = vcvt.s32.f32 %v1122_v36  ;;  %v1250_v28 = vunpack.c.2.s8 %v690_v20 }
 0x10e   :  { %3623 = vmatpush.bf16.msra.mxu0 %v2898_v13  ;;  %3636 = vmatpush.bf16.msra.mxu1 %v2962_v43  ;;  %v2154_v63 = vcvt.s32.f32 %v1130_v14  ;;  %v1258_v59 = vunpack.c.3.s8 %v690_v20  ;;  %v1458_v52 = vunpack.c.0.s8 %v746_v30  ;;  %v1466_v21 = vunpack.c.1.s8 %v746_v30  ;;  %v10000_v13 = vpop.f32.mrf.mxu0  ;;  %v10002_v43 = vpop.f32.mrf.mxu1 }
 0x10f   :  { %v3274_v49 = vpack.c.bf16 %v2634_v55, %v2626_v58  ;;  %v2274_v24 = vcvt.s32.f32 %v1250_v28  ;;  %v1586_v3 = vunpack.c.0.s8 %v778_v12  ;;  %v1594_v4 = vunpack.c.1.s8 %v778_v12 }
 0x110   :  { %v3034_v62 = vpack.c.bf16 %v2154_v63, %v2146_v40  ;;  %v2282_v50 = vcvt.s32.f32 %v1258_v59  ;;  %v2482_v57 = vcvt.s32.f32 %v1458_v52  ;;  %v2490_v16 = vcvt.s32.f32 %v1466_v21  ;;  %v802_v52 = vld [vmem:[%s12149_s4 + $0x690] sm:$0xff] }
 0x111   :  { %3624 = vmatmul.bf16.vlgmr.msra.gmra.mxu0 %v9587_v35  ;;  %v2610_v44 = vcvt.s32.f32 %v1586_v3  ;;  %v2618_v23 = vcvt.s32.f32 %v1594_v4  ;;  %v1106_v38 = vunpack.c.0.s8 %v658_v51  ;;  %v1114_v22 = vunpack.c.1.s8 %v658_v51  ;;  %3637 = vmatmul.bf16.vlgmr.msra.gmra.mxu1 %v9589_v7  ;;  %v834_v4 = vld [vmem:[%s12149_s4 + $0x790] sm:$0xff] }
 0x112   :  { %3668 = vmatpush.bf16.msrb.mxu0 %v3210_v17  ;;  %3681 = vmatpush.bf16.msrb.mxu1 %v3274_v49  ;;  %v3098_v45 = vpack.c.bf16 %v2282_v50, %v2274_v24  ;;  %v3202_v26 = vpack.c.bf16 %v2490_v16, %v2482_v57  ;;  %v1234_v19 = vunpack.c.0.s8 %v690_v20  ;;  %v1242_v41 = vunpack.c.1.s8 %v690_v20 }
 0x113   :  { %3648 = vmatpush.bf16.msra.mxu2 %v3034_v62  ;;  %v3266_v39 = vpack.c.bf16 %v2618_v23, %v2610_v44  ;;  %v2130_v30 = vcvt.s32.f32 %v1106_v38  ;;  %v2138_v15 = vcvt.s32.f32 %v1114_v22  ;;  %v1730_v47 = vunpack.c.2.s8 %v810_v46  ;;  %v730_v22 = vld [vmem:[%s12149_s4 + $0x450] sm:$0xff] }
 0x114   :  { %3661 = vmatpush.bf16.msra.mxu3 %v3098_v45  ;;  %v2258_v18 = vcvt.s32.f32 %v1234_v19  ;;  %v2266_v33 = vcvt.s32.f32 %v1242_v41  ;;  %v1738_v12 = vunpack.c.3.s8 %v810_v46  ;;  %v1858_v42 = vunpack.c.2.s8 %v842_v6  ;;  %v762_v41 = vld [vmem:[%s12149_s4 + $0x550] sm:$0xff] }
 0x115   :  { %v3026_v53 = vpack.c.bf16 %v2138_v15, %v2130_v30  ;;  %v2754_v54 = vcvt.s32.f32 %v1730_v47  ;;  %v1866_v51 = vunpack.c.3.s8 %v842_v6  ;;  %v1442_v9 = vunpack.c.2.s8 %v738_v11 }
 0x116   :  { %3669 = vmatpush.bf16.msrb.mxu0 %v3202_v26  ;;  %3682 = vmatpush.bf16.msrb.mxu1 %v3266_v39  ;;  %v3090_v56 = vpack.c.bf16 %v2266_v33, %v2258_v18  ;;  %v2762_v2 = vcvt.s32.f32 %v1738_v12  ;;  %v2882_v29 = vcvt.s32.f32 %v1858_v42  ;;  %v1450_v37 = vunpack.c.3.s8 %v738_v11 }
 0x117   :  { %3649 = vmatpush.bf16.msra.mxu2 %v3026_v53  ;;  %v2890_v27 = vcvt.s32.f32 %v1866_v51  ;;  %v2466_v61 = vcvt.s32.f32 %v1442_v9  ;;  %v1570_v34 = vunpack.c.2.s8 %v770_v10  ;;  %v1578_v20 = vunpack.c.3.s8 %v770_v10  ;;  %v10018_v51 = vpop.f32.mrf.mxu0  ;;  %v10020_v9 = vpop.f32.mrf.mxu1 }
 0x118   :  { %3662 = vmatpush.bf16.msra.mxu3 %v3090_v56  ;;  %v3338_v1 = vpack.c.bf16 %v2762_v2, %v2754_v54  ;;  %v2474_v60 = vcvt.s32.f32 %v1450_v37  ;;  %v1714_v5 = vunpack.c.0.s8 %v810_v46  ;;  %v1722_v36 = vunpack.c.1.s8 %v810_v46 }
 0x119   :  { %v3402_v58 = vpack.c.bf16 %v2890_v27, %v2882_v29  ;;  %v2594_v14 = vcvt.s32.f32 %v1570_v34  ;;  %v2602_v17 = vcvt.s32.f32 %v1578_v20  ;;  %v1842_v55 = vunpack.c.0.s8 %v842_v6 }
 0x11a   :  { %v3194_v40 = vpack.c.bf16 %v2474_v60, %v2466_v61  ;;  %v2738_v28 = vcvt.s32.f32 %v1714_v5  ;;  %v2746_v63 = vcvt.s32.f32 %v1722_v36  ;;  %v1850_v59 = vunpack.c.1.s8 %v842_v6  ;;  %3650 = vmatmul.bf16.vlgmr.msra.gmra.mxu2 %v9647_v48 }
 0x11b   :  { %3694 = vmatpush.bf16.msrb.mxu2 %v3338_v1  ;;  %v3258_v21 = vpack.c.bf16 %v2602_v17, %v2594_v14  ;;  %v2866_v49 = vcvt.s32.f32 %v1842_v55  ;;  %v1426_v24 = vunpack.c.0.s8 %v738_v11  ;;  %v1434_v3 = vunpack.c.1.s8 %v738_v11  ;;  %3663 = vmatmul.bf16.vlgmr.msra.gmra.mxu3 %v9649_v32 }
 0x11c   :  { %3707 = vmatpush.bf16.msrb.mxu3 %v3402_v58  ;;  %3670 = vmatpush.bf16.msrb.mxu0 %v3194_v40  ;;  %v3330_v62 = vpack.c.bf16 %v2746_v63, %v2738_v28  ;;  %v2874_v50 = vcvt.s32.f32 %v1850_v59  ;;  %v1554_v57 = vunpack.c.0.s8 %v770_v10  ;;  %v1562_v16 = vunpack.c.1.s8 %v770_v10  ;;  %v794_v59 = vld [vmem:[%s12149_s4 + $0x650] sm:$0xff] }
 0x11d   :  { %3683 = vmatpush.bf16.msrb.mxu1 %v3258_v21  ;;  %v2450_v46 = vcvt.s32.f32 %v1426_v24  ;;  %v2458_v44 = vcvt.s32.f32 %v1434_v3  ;;  %v1698_v23 = vunpack.c.2.s8 %v802_v52  ;;  %v1706_v38 = vunpack.c.3.s8 %v802_v52  ;;  %v10027_v21 = vpop.f32.mrf.mxu3 }
 0x11e   :  { %v3394_v6 = vpack.c.bf16 %v2874_v50, %v2866_v49  ;;  %v2578_v45 = vcvt.s32.f32 %v1554_v57  ;;  %v2586_v26 = vcvt.s32.f32 %v1562_v16  ;;  %v1826_v19 = vunpack.c.2.s8 %v834_v4 }
 0x11f   :  { %3695 = vmatpush.bf16.msrb.mxu2 %v3330_v62  ;;  %v3186_v11 = vpack.c.bf16 %v2458_v44, %v2450_v46  ;;  %v2722_v39 = vcvt.s32.f32 %v1698_v23  ;;  %v2730_v30 = vcvt.s32.f32 %v1706_v38  ;;  %v1834_v15 = vunpack.c.3.s8 %v834_v4 }
 0x120   :  { %3708 = vmatpush.bf16.msrb.mxu3 %v3394_v6  ;;  %v3250_v47 = vpack.c.bf16 %v2586_v26, %v2578_v45  ;;  %v2850_v18 = vcvt.s32.f32 %v1826_v19  ;;  %v1410_v33 = vunpack.c.2.s8 %v730_v22  ;;  %v1418_v12 = vunpack.c.3.s8 %v730_v22  ;;  %v10039_v6 = vld [vmem:[#allocation2 + $0x8] sm:$0xff] }
 0x121   :  { %3671 = vmatpush.bf16.msrb.mxu0 %v3186_v11  ;;  %v3322_v42 = vpack.c.bf16 %v2730_v30, %v2722_v39  ;;  %v2858_v10 = vcvt.s32.f32 %v1834_v15  ;;  %v1538_v53 = vunpack.c.2.s8 %v762_v41  ;;  %v1546_v54 = vunpack.c.3.s8 %v762_v41  ;;  %v754_v19 = vld [vmem:[%s12149_s4 + $0x510] sm:$0xff] }
 0x122   :  { %3684 = vmatpush.bf16.msrb.mxu1 %v3250_v47  ;;  %v2434_v56 = vcvt.s32.f32 %v1410_v33  ;;  %v2442_v2 = vcvt.s32.f32 %v1418_v12  ;;  %v1682_v29 = vunpack.c.0.s8 %v802_v52  ;;  %v1690_v34 = vunpack.c.1.s8 %v802_v52  ;;  %v10025_v52 = vpop.f32.mrf.mxu2 }
 0x123   :  { %3696 = vmatpush.bf16.msrb.mxu2 %v3322_v42  ;;  %v3386_v37 = vpack.c.bf16 %v2858_v10, %v2850_v18  ;;  %v2562_v27 = vcvt.s32.f32 %v1538_v53  ;;  %v2570_v61 = vcvt.s32.f32 %v1546_v54  ;;  %v1810_v60 = vunpack.c.0.s8 %v834_v4 }
 0x124   :  { %v3178_v20 = vpack.c.bf16 %v2442_v2, %v2434_v56  ;;  %v2706_v1 = vcvt.s32.f32 %v1682_v29  ;;  %v2714_v36 = vcvt.s32.f32 %v1690_v34  ;;  %v1818_v58 = vunpack.c.1.s8 %v834_v4  ;;  %v826_v4 = vld [vmem:[%s12149_s4 + $0x750] sm:$0xff] }
 0x125   :  { %3709 = vmatpush.bf16.msrb.mxu3 %v3386_v37  ;;  %v3242_v5 = vpack.c.bf16 %v2570_v61, %v2562_v27  ;;  %v2834_v14 = vcvt.s32.f32 %v1810_v60  ;;  %v1394_v17 = vunpack.c.0.s8 %v730_v22  ;;  %v1402_v55 = vunpack.c.1.s8 %v730_v22  ;;  %v722_v22 = vld [vmem:[%s12149_s4 + $0x410] sm:$0xff]  ;;  %v10047_v2 = vpop.f32.mrf.mxu3 }
 0x126   :  { %3672 = vmatpush.bf16.msrb.mxu0 %v3178_v20  ;;  %v3314_v40 = vpack.c.bf16 %v2714_v36, %v2706_v1  ;;  %v2842_v28 = vcvt.s32.f32 %v1818_v58  ;;  %v1522_v63 = vunpack.c.0.s8 %v762_v41  ;;  %v1530_v3 = vunpack.c.1.s8 %v762_v41  ;;  %v10032_v57 = vpop.f32.mrf.mxu0 }
 0x127   :  { %3685 = vmatpush.bf16.msrb.mxu1 %v3242_v5  ;;  %v2418_v49 = vcvt.s32.f32 %v1394_v17  ;;  %v2426_v24 = vcvt.s32.f32 %v1402_v55  ;;  %v10034_v16 = vpop.f32.mrf.mxu1  ;;  %v1666_v23 = vunpack.c.2.s8 %v794_v59  ;;  %v1674_v38 = vunpack.c.3.s8 %v794_v59  ;;  %v619_v55 = vld [vmem:[%s12149_s4 + $0xd8] sm:$0xff] }
 0x128   :  { %3697 = vmatpush.bf16.msrb.mxu2 %v3314_v40  ;;  %v3378_v62 = vpack.c.bf16 %v2842_v28, %v2834_v14  ;;  %v2546_v50 = vcvt.s32.f32 %v1522_v63  ;;  %v2554_v44 = vcvt.s32.f32 %v1530_v3  ;;  %v1794_v45 = vunpack.c.2.s8 %v826_v4 }
 0x129   :  { %v3170_v46 = vpack.c.bf16 %v2426_v24, %v2418_v49  ;;  %v1802_v26 = vunpack.c.3.s8 %v826_v4  ;;  %v2690_v11 = vcvt.s32.f32 %v1666_v23  ;;  %v2698_v39 = vcvt.s32.f32 %v1674_v38 }
 0x12a   :  { %3710 = vmatpush.bf16.msrb.mxu3 %v3378_v62  ;;  %v3234_v41 = vpack.c.bf16 %v2554_v44, %v2546_v50  ;;  %v2818_v30 = vcvt.s32.f32 %v1794_v45  ;;  %v1378_v47 = vunpack.c.2.s8 %v722_v22  ;;  %v154_v18 = vperm.slane %v10039_v6, 0  ;;  %v10045_v56 = vpop.f32.mrf.mxu2  ;;  %v786_v62 = vld [vmem:[%s12149_s4 + $0x610] sm:$0xff] }
 0x12b   :  { %3673 = vmatpush.bf16.msrb.mxu0 %v3170_v46  ;;  %v2826_v15 = vcvt.s32.f32 %v1802_v26  ;;  %v3306_v33 = vpack.c.bf16 %v2698_v39, %v2690_v11  ;;  %v1386_v12 = vunpack.c.3.s8 %v722_v22  ;;  %v1506_v42 = vunpack.c.2.s8 %v754_v19 }
 0x12c   :  { %3686 = vmatpush.bf16.msrb.mxu1 %v3234_v41  ;;  %v2402_v53 = vcvt.s32.f32 %v1378_v47  ;;  %v1514_v54 = vunpack.c.3.s8 %v754_v19  ;;  %v1650_v27 = vunpack.c.0.s8 %v794_v59  ;;  %v1658_v34 = vunpack.c.1.s8 %v794_v59  ;;  %v651_v59 = vld [vmem:[%s12149_s4 + $0x1d8] sm:$0xff] }
 0x12d   :  { %v3370_v10 = vpack.c.bf16 %v2826_v15, %v2818_v30  ;;  %3698 = vmatpush.bf16.msrb.mxu2 %v3306_v33  ;;  %v2410_v29 = vcvt.s32.f32 %v1386_v12  ;;  %v2530_v37 = vcvt.s32.f32 %v1506_v42  ;;  %v1778_v20 = vunpack.c.0.s8 %v826_v4 }
 0x12e   :  { %v2538_v61 = vcvt.s32.f32 %v1514_v54  ;;  %v1786_v1 = vunpack.c.1.s8 %v826_v4  ;;  %v3419_v60 = vpop.f32.mrf.mxu0  ;;  %v10050_v36 = vadd.f32 %v10000_v13, %v154_v18  ;;  %v2674_v14 = vcvt.s32.f32 %v1650_v27 }
 0x12f   :  { %3711 = vmatpush.bf16.msrb.mxu3 %v3370_v10  ;;  %v3432_v5 = vpop.f32.mrf.mxu1  ;;  %v3162_v58 = vpack.c.bf16 %v2410_v29, %v2402_v53  ;;  %v1362_v17 = vunpack.c.0.s8 %v722_v22  ;;  %v2682_v28 = vcvt.s32.f32 %v1658_v34  ;;  %v2802_v63 = vcvt.s32.f32 %v1778_v20 }
 0x130   :  { %v3226_v40 = vpack.c.bf16 %v2538_v61, %v2530_v37  ;;  %v2810_v49 = vcvt.s32.f32 %v1786_v1  ;;  %v1370_v24 = vunpack.c.1.s8 %v722_v22  ;;  %v1490_v13 = vunpack.c.0.s8 %v754_v19  ;;  %v818_v22 = vld [vmem:[%s12149_s4 + $0x710] sm:$0xff] }
 0x131   :  { %3674 = vmatpush.bf16.msrb.mxu0 %v3162_v58  ;;  %v2386_v3 = vcvt.s32.f32 %v1362_v17  ;;  %v1498_v4 = vunpack.c.1.s8 %v754_v19  ;;  %v3298_v50 = vpack.c.bf16 %v2682_v28, %v2674_v14  ;;  %v963_v44 = vunpack.c.2.s8 %v619_v55  ;;  %v10071_v28 = vld [vmem:[%s12149_s4 + $0x2d8] sm:$0xff] }
 0x132   :  { %3687 = vmatpush.bf16.msrb.mxu1 %v3226_v40  ;;  %v3362_v46 = vpack.c.bf16 %v2810_v49, %v2802_v63  ;;  %v971_v23 = vunpack.c.3.s8 %v619_v55  ;;  %v2394_v38 = vcvt.s32.f32 %v1370_v24  ;;  %v2514_v45 = vcvt.s32.f32 %v1490_v13 }
 0x133   :  { %v2522_v26 = vcvt.s32.f32 %v1498_v4  ;;  %v1091_v41 = vunpack.c.2.s8 %v651_v59  ;;  %3699 = vmatpush.bf16.msrb.mxu2 %v3298_v50  ;;  %v1987_v19 = vcvt.s32.f32 %v963_v44  ;;  %v1099_v39 = vunpack.c.3.s8 %v651_v59  ;;  %v10064_v12 = vpop.f32.mrf.mxu2 }
 0x134   :  { %3712 = vmatpush.bf16.msrb.mxu3 %v3362_v46  ;;  %v1995_v11 = vcvt.s32.f32 %v971_v23  ;;  %v1634_v30 = vunpack.c.2.s8 %v786_v62  ;;  %v3154_v15 = vpack.c.bf16 %v2394_v38, %v2386_v3  ;;  %v1642_v33 = vunpack.c.3.s8 %v786_v62  ;;  %v10066_v42 = vpop.f32.mrf.mxu3  ;;  %v10083_v46 = vld [vmem:[%s12149_s4 + $0x98] sm:$0xff] }
 0x135   :  { %v3218_v47 = vpack.c.bf16 %v2522_v26, %v2514_v45  ;;  %v2115_v18 = vcvt.s32.f32 %v1091_v41  ;;  %v2123_v53 = vcvt.s32.f32 %v1099_v39  ;;  %v1762_v29 = vunpack.c.2.s8 %v818_v22  ;;  %v643_v39 = vld [vmem:[%s12149_s4 + $0x198] sm:$0xff] }
 0x136   :  { %v2955_v10 = vpack.c.bf16 %v1995_v11, %v1987_v19  ;;  %v2658_v54 = vcvt.s32.f32 %v1634_v30  ;;  %3675 = vmatpush.bf16.msrb.mxu0 %v3154_v15  ;;  %v2666_v37 = vcvt.s32.f32 %v1642_v33  ;;  %v1770_v27 = vunpack.c.3.s8 %v818_v22  ;;  %v10085_v44 = vpop.f32.mrf.mxu0 }
 0x137   :  { %3688 = vmatpush.bf16.msrb.mxu1 %v3218_v47  ;;  %v947_v61 = vunpack.c.0.s8 %v619_v55  ;;  %v955_v34 = vunpack.c.1.s8 %v619_v55  ;;  %v3019_v20 = vpack.c.bf16 %v2123_v53, %v2115_v18  ;;  %v2786_v1 = vcvt.s32.f32 %v1762_v29 }
 0x138   :  { %v1075_v60 = vunpack.c.0.s8 %v651_v59  ;;  %v1083_v5 = vunpack.c.1.s8 %v651_v59  ;;  %v3290_v58 = vpack.c.bf16 %v2666_v37, %v2658_v54  ;;  %v2794_v14 = vcvt.s32.f32 %v1770_v27  ;;  %v10077_v59 = vld [vmem:[%s12149_s4 + $0x3d8] sm:$0xff] }
 0x139   :  { %v1971_v17 = vcvt.s32.f32 %v947_v61  ;;  %v1979_v40 = vcvt.s32.f32 %v955_v34  ;;  %3676 = vmatmul.bf16.vlgmr.msrb.gmra.mxu0 %v9661_v8  ;;  %v1618_v55 = vunpack.c.0.s8 %v786_v62  ;;  %v1626_v24 = vunpack.c.1.s8 %v786_v62  ;;  %v10087_v62 = vpop.f32.mrf.mxu1 }
 0x13a   :  { %3720 = vmatpush.bf16.msra.mxu0 %v2955_v10  ;;  %v2099_v63 = vcvt.s32.f32 %v1075_v60  ;;  %v2107_v49 = vcvt.s32.f32 %v1083_v5  ;;  %3700 = vmatpush.bf16.msrb.mxu2 %v3290_v58  ;;  %v3354_v3 = vpack.c.bf16 %v2794_v14, %v2786_v1  ;;  %v1746_v4 = vunpack.c.0.s8 %v818_v22 }
 0x13b   :  { %3733 = vmatpush.bf16.msra.mxu1 %v3019_v20  ;;  %v2947_v13 = vpack.c.bf16 %v1979_v40, %v1971_v17  ;;  %v1754_v50 = vunpack.c.1.s8 %v818_v22  ;;  %v2642_v38 = vcvt.s32.f32 %v1618_v55  ;;  %v2650_v45 = vcvt.s32.f32 %v1626_v24  ;;  %v3445_v30 = vpop.f32.mrf.mxu2 }
 0x13c   :  { %3689 = vmatmul.bf16.vlgmr.msrb.gmra.mxu1 %v9663_v25  ;;  %v3011_v23 = vpack.c.bf16 %v2107_v49, %v2099_v63  ;;  %v1219_v26 = vunpack.c.2.s8 %v10071_v28  ;;  %3713 = vmatpush.bf16.msrb.mxu3 %v3354_v3  ;;  %v2770_v41 = vcvt.s32.f32 %v1746_v4  ;;  %v1227_v22 = vunpack.c.3.s8 %v10071_v28  ;;  %v3458_v15 = vpop.f32.mrf.mxu3 }
 0x13d   :  { %v2778_v19 = vcvt.s32.f32 %v1754_v50  ;;  %v1347_v11 = vunpack.c.2.s8 %v10077_v59  ;;  %v3282_v47 = vpack.c.bf16 %v2650_v45, %v2642_v38  ;;  %v1355_v33 = vunpack.c.3.s8 %v10077_v59 }
 0x13e   :  { %3721 = vmatpush.bf16.msra.mxu0 %v2947_v13  ;;  %v2243_v18 = vcvt.s32.f32 %v1219_v26  ;;  %v931_v10 = vunpack.c.2.s8 %v10083_v46  ;;  %v2251_v54 = vcvt.s32.f32 %v1227_v22  ;;  %v939_v37 = vunpack.c.3.s8 %v10083_v46  ;;  %v675_v13 = vld [vmem:[%s12149_s4 + $0x298] sm:$0xff] }
 0x13f   :  { %3734 = vmatpush.bf16.msra.mxu1 %v3011_v23  ;;  %v3346_v53 = vpack.c.bf16 %v2778_v19, %v2770_v41  ;;  %v2371_v29 = vcvt.s32.f32 %v1347_v11  ;;  %3701 = vmatpush.bf16.msrb.mxu2 %v3282_v47  ;;  %v2379_v27 = vcvt.s32.f32 %v1355_v33  ;;  %v1059_v34 = vunpack.c.2.s8 %v643_v39  ;;  %v707_v41 = vld [vmem:[%s12149_s4 + $0x398] sm:$0xff] }
 0x140   :  { %v1955_v61 = vcvt.s32.f32 %v931_v10  ;;  %v1067_v20 = vunpack.c.3.s8 %v643_v39  ;;  %v3083_v1 = vpack.c.bf16 %v2251_v54, %v2243_v18  ;;  %v1963_v60 = vcvt.s32.f32 %v939_v37 }
 0x141   :  { %3714 = vmatpush.bf16.msrb.mxu3 %v3346_v53  ;;  %v10100_v5 = vadd.f32 %v10034_v16, %v10032_v57  ;;  %v1203_v58 = vunpack.c.0.s8 %v10071_v28  ;;  %v3147_v14 = vpack.c.bf16 %v2379_v27, %v2371_v29  ;;  %v2083_v17 = vcvt.s32.f32 %v1059_v34  ;;  %v3471_v57 = vpop.f32.mrf.mxu0  ;;  %v3484_v16 = vpop.f32.mrf.mxu1 }
 0x142   :  { %v2091_v40 = vcvt.s32.f32 %v1067_v20  ;;  %v1211_v63 = vunpack.c.1.s8 %v10071_v28  ;;  %v2939_v49 = vpack.c.bf16 %v1963_v60, %v1955_v61  ;;  %v1331_v24 = vunpack.c.0.s8 %v10077_v59  ;;  %3702 = vmatmul.bf16.vlgmr.msrb.gmra.mxu2 %v9739_v0 }
 0x143   :  { %3746 = vmatpush.bf16.msra.mxu2 %v3083_v1  ;;  %v2227_v55 = vcvt.s32.f32 %v1203_v58  ;;  %v1339_v3 = vunpack.c.1.s8 %v10077_v59  ;;  %v915_v28 = vunpack.c.0.s8 %v10083_v46  ;;  %v923_v23 = vunpack.c.1.s8 %v10083_v46  ;;  %v603_v46 = vld [vmem:[%s12149_s4 + $0x58] sm:$0xff] }
 0x144   :  { %v3003_v4 = vpack.c.bf16 %v2091_v40, %v2083_v17  ;;  %v2235_v50 = vcvt.s32.f32 %v1211_v63  ;;  %3715 = vmatmul.bf16.vlgmr.msrb.gmra.mxu3 %v9741_v31  ;;  %3722 = vmatpush.bf16.msra.mxu0 %v2939_v49  ;;  %v2355_v38 = vcvt.s32.f32 %v1331_v24  ;;  %v1043_v45 = vunpack.c.0.s8 %v643_v39 }
 0x145   :  { %3759 = vmatpush.bf16.msra.mxu3 %v3147_v14  ;;  %v2363_v59 = vcvt.s32.f32 %v1339_v3  ;;  %v1051_v26 = vunpack.c.1.s8 %v643_v39  ;;  %v1939_v22 = vcvt.s32.f32 %v915_v28  ;;  %v1947_v11 = vcvt.s32.f32 %v923_v23  ;;  %v635_v39 = vld [vmem:[%s12149_s4 + $0x158] sm:$0xff]  ;;  %v10122_v28 = vpop.f32.mrf.mxu2  ;;  %v10124_v23 = vpop.f32.mrf.mxu3 }
 0x146   :  { %3735 = vmatpush.bf16.msra.mxu1 %v3003_v4  ;;  %v3075_v19 = vpack.c.bf16 %v2235_v50, %v2227_v55  ;;  %v1187_v30 = vunpack.c.2.s8 %v675_v13  ;;  %v2067_v47 = vcvt.s32.f32 %v1043_v45  ;;  %v1195_v33 = vunpack.c.3.s8 %v675_v13 }
 0x147   :  { %v3139_v15 = vpack.c.bf16 %v2363_v59, %v2355_v38  ;;  %v2075_v18 = vcvt.s32.f32 %v1051_v26  ;;  %v2931_v10 = vpack.c.bf16 %v1947_v11, %v1939_v22  ;;  %v1315_v54 = vunpack.c.2.s8 %v707_v41 }
 0x148   :  { %3747 = vmatpush.bf16.msra.mxu2 %v3075_v19  ;;  %v2211_v53 = vcvt.s32.f32 %v1187_v30  ;;  %v1323_v29 = vunpack.c.3.s8 %v707_v41  ;;  %v2219_v27 = vcvt.s32.f32 %v1195_v33  ;;  %v899_v61 = vunpack.c.2.s8 %v603_v46  ;;  %v667_v19 = vld [vmem:[%s12149_s4 + $0x258] sm:$0xff] }
 0x149   :  { %3760 = vmatpush.bf16.msra.mxu3 %v3139_v15  ;;  %v2995_v37 = vpack.c.bf16 %v2075_v18, %v2067_v47  ;;  %v907_v34 = vunpack.c.3.s8 %v603_v46  ;;  %3723 = vmatpush.bf16.msra.mxu0 %v2931_v10  ;;  %v2339_v20 = vcvt.s32.f32 %v1315_v54  ;;  %v1027_v60 = vunpack.c.2.s8 %v635_v39  ;;  %v595_v33 = vld [vmem:[%s12149_s4 + $0x18] sm:$0xff] }
 0x14a   :  { %v2347_v1 = vcvt.s32.f32 %v1323_v29  ;;  %v1035_v58 = vunpack.c.3.s8 %v635_v39  ;;  %v3067_v14 = vpack.c.bf16 %v2219_v27, %v2211_v53  ;;  %v1923_v17 = vcvt.s32.f32 %v899_v61 }
 0x14b   :  { %3736 = vmatpush.bf16.msra.mxu1 %v2995_v37  ;;  %v1931_v40 = vcvt.s32.f32 %v907_v34  ;;  %v1171_v63 = vunpack.c.0.s8 %v675_v13  ;;  %v2051_v55 = vcvt.s32.f32 %v1027_v60  ;;  %v1179_v3 = vunpack.c.1.s8 %v675_v13  ;;  %v10141_v60 = vpop.f32.mrf.mxu0 }
 0x14c   :  { %v3131_v49 = vpack.c.bf16 %v2347_v1, %v2339_v20  ;;  %v2059_v24 = vcvt.s32.f32 %v1035_v58  ;;  %3748 = vmatpush.bf16.msra.mxu2 %v3067_v14  ;;  %v1299_v4 = vunpack.c.0.s8 %v707_v41  ;;  %v1307_v50 = vunpack.c.1.s8 %v707_v41  ;;  %v699_v41 = vld [vmem:[%s12149_s4 + $0x358] sm:$0xff]  ;;  %v10143_v58 = vpop.f32.mrf.mxu1 }
 0x14d   :  { %v2923_v57 = vpack.c.bf16 %v1931_v40, %v1923_v17  ;;  %v2195_v16 = vcvt.s32.f32 %v1171_v63  ;;  %v2203_v59 = vcvt.s32.f32 %v1179_v3  ;;  %v883_v45 = vunpack.c.0.s8 %v603_v46  ;;  %v3497_v3 = vpop.f32.mrf.mxu2 }
 0x14e   :  { %3761 = vmatpush.bf16.msra.mxu3 %v3131_v49  ;;  %v2987_v38 = vpack.c.bf16 %v2059_v24, %v2051_v55  ;;  %v891_v26 = vunpack.c.1.s8 %v603_v46  ;;  %v2323_v13 = vcvt.s32.f32 %v1299_v4  ;;  %v2331_v22 = vcvt.s32.f32 %v1307_v50 }
 0x14f   :  { %3724 = vmatpush.bf16.msra.mxu0 %v2923_v57  ;;  %v1011_v11 = vunpack.c.0.s8 %v635_v39  ;;  %v1019_v30 = vunpack.c.1.s8 %v635_v39  ;;  %v3059_v15 = vpack.c.bf16 %v2203_v59, %v2195_v16  ;;  %v1907_v47 = vcvt.s32.f32 %v883_v45  ;;  %v627_v39 = vld [vmem:[%s12149_s4 + $0x118] sm:$0xff]  ;;  %v3510_v57 = vpop.f32.mrf.mxu3 }
 0x150   :  { %3737 = vmatpush.bf16.msra.mxu1 %v2987_v38  ;;  %v1915_v18 = vcvt.s32.f32 %v891_v26  ;;  %v3444_v46 = vadd.f32 %v10064_v12, %v10100_v5  ;;  %v3123_v10 = vpack.c.bf16 %v2331_v22, %v2323_v13  ;;  %v1155_v29 = vunpack.c.2.s8 %v667_v19 }
 0x151   :  { %v2035_v53 = vcvt.s32.f32 %v1011_v11  ;;  %v2043_v54 = vcvt.s32.f32 %v1019_v30  ;;  %3749 = vmatpush.bf16.msra.mxu2 %v3059_v15  ;;  %v1163_v61 = vunpack.c.3.s8 %v667_v19  ;;  %v1283_v34 = vunpack.c.2.s8 %v699_v41 }
 0x152   :  { %v2915_v37 = vpack.c.bf16 %v1915_v18, %v1907_v47  ;;  %v3457_v27 = vadd.f32 %v10066_v42, %v3444_v46  ;;  %3762 = vmatpush.bf16.msra.mxu3 %v3123_v10  ;;  %v2179_v5 = vcvt.s32.f32 %v1155_v29  ;;  %v1291_v20 = vunpack.c.3.s8 %v699_v41 }
 0x153   :  { %v2979_v12 = vpack.c.bf16 %v2043_v54, %v2035_v53  ;;  %v867_v1 = vunpack.c.2.s8 %v595_v33  ;;  %v2187_v14 = vcvt.s32.f32 %v1163_v61  ;;  %v2307_v17 = vcvt.s32.f32 %v1283_v34  ;;  %v659_v34 = vld [vmem:[%s12149_s4 + $0x218] sm:$0xff] }
 0x154   :  { %3725 = vmatpush.bf16.msra.mxu0 %v2915_v37  ;;  %v875_v40 = vunpack.c.3.s8 %v595_v33  ;;  %v995_v63 = vunpack.c.2.s8 %v627_v39  ;;  %v2315_v49 = vcvt.s32.f32 %v1291_v20  ;;  %v1003_v42 = vunpack.c.3.s8 %v627_v39 }
 0x155   :  { %3738 = vmatpush.bf16.msra.mxu1 %v2979_v12  ;;  %v1891_v55 = vcvt.s32.f32 %v867_v1  ;;  %v3470_v24 = vadd.f32 %v10085_v44, %v3457_v27  ;;  %v3051_v16 = vpack.c.bf16 %v2187_v14, %v2179_v5  ;;  %v1139_v38 = vunpack.c.0.s8 %v667_v19  ;;  %v747_v44 = vld [vmem:[%s12149_s4 + $0x4d8] sm:$0xff]  ;;  %v3523_v12 = vpop.f32.mrf.mxu0 }
 0x156   :  { %v1899_v4 = vcvt.s32.f32 %v875_v40  ;;  %v2019_v50 = vcvt.s32.f32 %v995_v63  ;;  %v3115_v59 = vpack.c.bf16 %v2315_v49, %v2307_v17  ;;  %v2027_v45 = vcvt.s32.f32 %v1003_v42 }
 0x157   :  { %v10147_v26 = vadd.f32 %v10087_v62, %v3470_v24  ;;  %v1147_v13 = vunpack.c.1.s8 %v667_v19  ;;  %3750 = vmatpush.bf16.msra.mxu2 %v3051_v16  ;;  %v2163_v11 = vcvt.s32.f32 %v1139_v38  ;;  %v1267_v30 = vunpack.c.0.s8 %v699_v41  ;;  %v779_v19 = vld [vmem:[%s12149_s4 + $0x5d8] sm:$0xff] }
 0x158   :  { %v2907_v22 = vpack.c.bf16 %v1899_v4, %v1891_v55  ;;  %v1275_v15 = vunpack.c.1.s8 %v699_v41  ;;  %3763 = vmatpush.bf16.msra.mxu3 %v3115_v59  ;;  %v2971_v47 = vpack.c.bf16 %v2027_v45, %v2019_v50  ;;  %v851_v46 = vunpack.c.0.s8 %v595_v33 }
 0x159   :  { %v2171_v18 = vcvt.s32.f32 %v1147_v13  ;;  %v859_v10 = vunpack.c.1.s8 %v595_v33  ;;  %v2291_v53 = vcvt.s32.f32 %v1267_v30  ;;  %v979_v62 = vunpack.c.0.s8 %v627_v39  ;;  %v3536_v33 = vpop.f32.mrf.mxu1 }
 0x15a   :  { %3726 = vmatpush.bf16.msra.mxu0 %v2907_v22  ;;  %v2299_v54 = vcvt.s32.f32 %v1275_v15  ;;  %v987_v29 = vunpack.c.1.s8 %v627_v39  ;;  %3739 = vmatpush.bf16.msra.mxu1 %v2971_v47  ;;  %v1875_v37 = vcvt.s32.f32 %v851_v46  ;;  %v1475_v61 = vunpack.c.2.s8 %v747_v44  ;;  %v691_v39 = vld [vmem:[%s12149_s4 + $0x318] sm:$0xff] }
 0x15b   :  { %v3043_v41 = vpack.c.bf16 %v2171_v18, %v2163_v11  ;;  %v1883_v27 = vcvt.s32.f32 %v859_v10  ;;  %v2003_v20 = vcvt.s32.f32 %v979_v62  ;;  %v1483_v14 = vunpack.c.3.s8 %v747_v44  ;;  %v843_v33 = vld [vmem:[%s12149_s4 + $0x7d8] sm:$0xff] }
 0x15c   :  { %v3107_v5 = vpack.c.bf16 %v2299_v54, %v2291_v53  ;;  %v2011_v1 = vcvt.s32.f32 %v987_v29  ;;  %v2499_v40 = vcvt.s32.f32 %v1475_v61  ;;  %v1603_v63 = vunpack.c.2.s8 %v779_v19  ;;  %v10164_v53 = vld [vmem:[%s12149_s4 + $0x6d8] sm:$0xff] }
 0x15d   :  { %3751 = vmatpush.bf16.msra.mxu2 %v3043_v41  ;;  %v2899_v17 = vpack.c.bf16 %v1883_v27, %v1875_v37  ;;  %v1611_v49 = vunpack.c.3.s8 %v779_v19  ;;  %v2507_v42 = vcvt.s32.f32 %v1483_v14  ;;  %v1123_v24 = vunpack.c.2.s8 %v659_v34  ;;  %v10167_v37 = vpop.f32.mrf.mxu2 }
 0x15e   :  { %3764 = vmatpush.bf16.msra.mxu3 %v3107_v5  ;;  %v2963_v55 = vpack.c.bf16 %v2011_v1, %v2003_v20  ;;  %v1131_v3 = vunpack.c.3.s8 %v659_v34  ;;  %v2627_v57 = vcvt.s32.f32 %v1603_v63  ;;  %v1251_v4 = vunpack.c.2.s8 %v691_v39 }
 0x15f   :  { %3727 = vmatpush.bf16.msra.mxu0 %v2899_v17  ;;  %v2635_v16 = vcvt.s32.f32 %v1611_v49  ;;  %v1259_v50 = vunpack.c.3.s8 %v691_v39  ;;  %v3211_v38 = vpack.c.bf16 %v2507_v42, %v2499_v40  ;;  %v2147_v59 = vcvt.s32.f32 %v1123_v24  ;;  %v739_v49 = vld [vmem:[%s12149_s4 + $0x498] sm:$0xff] }
 0x160   :  { %3740 = vmatpush.bf16.msra.mxu1 %v2963_v55  ;;  %v2155_v45 = vcvt.s32.f32 %v1131_v3  ;;  %v1459_v13 = vunpack.c.0.s8 %v747_v44  ;;  %v2275_v11 = vcvt.s32.f32 %v1251_v4  ;;  %v1467_v15 = vunpack.c.1.s8 %v747_v44  ;;  %v10169_v44 = vpop.f32.mrf.mxu3  ;;  %v771_v3 = vld [vmem:[%s12149_s4 + $0x598] sm:$0xff] }
 0x161   :  { %v3275_v22 = vpack.c.bf16 %v2635_v16, %v2627_v57  ;;  %v2283_v30 = vcvt.s32.f32 %v1259_v50  ;;  %v1587_v46 = vunpack.c.0.s8 %v779_v19  ;;  %v1595_v10 = vunpack.c.1.s8 %v779_v19 }
 0x162   :  { %v3035_v47 = vpack.c.bf16 %v2155_v45, %v2147_v59  ;;  %v2483_v18 = vcvt.s32.f32 %v1459_v13  ;;  %3728 = vmatmul.bf16.vlgmr.msra.gmra.mxu0 %v9587_v35  ;;  %v2491_v62 = vcvt.s32.f32 %v1467_v15  ;;  %v1107_v29 = vunpack.c.0.s8 %v659_v34 }
 0x163   :  { %3772 = vmatpush.bf16.msrb.mxu0 %v3211_v38  ;;  %v3099_v54 = vpack.c.bf16 %v2283_v30, %v2275_v11  ;;  %v1115_v41 = vunpack.c.1.s8 %v659_v34  ;;  %3741 = vmatmul.bf16.vlgmr.msra.gmra.mxu1 %v9589_v7  ;;  %v2611_v19 = vcvt.s32.f32 %v1587_v46  ;;  %v2619_v27 = vcvt.s32.f32 %v1595_v10 }
 0x164   :  { %3785 = vmatpush.bf16.msrb.mxu1 %v3275_v22  ;;  %3752 = vmatpush.bf16.msra.mxu2 %v3035_v47  ;;  %v1235_v61 = vunpack.c.0.s8 %v691_v39  ;;  %v1243_v12 = vunpack.c.1.s8 %v691_v39  ;;  %v3203_v5 = vpack.c.bf16 %v2491_v62, %v2483_v18  ;;  %v2131_v20 = vcvt.s32.f32 %v1107_v29 }
 0x165   :  { %3765 = vmatpush.bf16.msra.mxu3 %v3099_v54  ;;  %v2139_v1 = vcvt.s32.f32 %v1115_v41  ;;  %v1731_v34 = vunpack.c.2.s8 %v10164_v53  ;;  %v3267_v14 = vpack.c.bf16 %v2619_v27, %v2611_v19  ;;  %v1739_v63 = vunpack.c.3.s8 %v10164_v53  ;;  %v3549_v10 = vpop.f32.mrf.mxu2 }
 0x166   :  { %v2259_v17 = vcvt.s32.f32 %v1235_v61  ;;  %v2267_v40 = vcvt.s32.f32 %v1243_v12  ;;  %v1859_v42 = vunpack.c.2.s8 %v843_v33  ;;  %v1867_v24 = vunpack.c.3.s8 %v843_v33 }
 0x167   :  { %3773 = vmatpush.bf16.msrb.mxu0 %v3203_v5  ;;  %v3027_v39 = vpack.c.bf16 %v2139_v1, %v2131_v20  ;;  %v2755_v55 = vcvt.s32.f32 %v1731_v34  ;;  %v155_v57 = vperm.slane %v10039_v6, 1  ;;  %v2763_v4 = vcvt.s32.f32 %v1739_v63 }
 0x168   :  { %3786 = vmatpush.bf16.msrb.mxu1 %v3267_v14  ;;  %v3091_v16 = vpack.c.bf16 %v2267_v40, %v2259_v17  ;;  %v3496_v50 = vadd.f32 %v10122_v28, %v10147_v26  ;;  %v568_v38 = vmax.f32 %v10050_v36, 0.0  ;;  %v2883_v59 = vcvt.s32.f32 %v1859_v42  ;;  %v3562_v28 = vpop.f32.mrf.mxu3 }
 0x169   :  { %3753 = vmatpush.bf16.msra.mxu2 %v3027_v39  ;;  %v2891_v45 = vcvt.s32.f32 %v1867_v24  ;;  %v1443_v13 = vunpack.c.2.s8 %v739_v49  ;;  %v3339_v22 = vpack.c.bf16 %v2763_v4, %v2755_v55  ;;  %v1451_v30 = vunpack.c.3.s8 %v739_v49 }
 0x16a   :  { %3766 = vmatpush.bf16.msra.mxu3 %v3091_v16  ;;  %v10188_v11 = vadd.f32 %v10124_v23, %v3496_v50  ;;  %v1571_v15 = vunpack.c.2.s8 %v771_v3  ;;  %v1579_v18 = vunpack.c.3.s8 %v771_v3  ;;  %v1715_v46 = vunpack.c.0.s8 %v10164_v53  ;;  %v763_v50 = vld [vmem:[%s12149_s4 + $0x558] sm:$0xff] }
 0x16b   :  { %v3403_v6 = vpack.c.bf16 %v2891_v45, %v2883_v59  ;;  %v2467_v47 = vcvt.s32.f32 %v1443_v13  ;;  %v10192_v36 = vadd.f32 %v10002_v43, %v155_v57  ;;  %v2475_v26 = vcvt.s32.f32 %v1451_v30 }
 0x16c   :  { %v2595_v54 = vcvt.s32.f32 %v1571_v15  ;;  %v1723_v62 = vunpack.c.1.s8 %v10164_v53  ;;  %3754 = vmatmul.bf16.vlgmr.msra.gmra.mxu2 %v9647_v48  ;;  %v2603_v23 = vcvt.s32.f32 %v1579_v18  ;;  %v2739_v29 = vcvt.s32.f32 %v1715_v46  ;;  %v803_v53 = vld [vmem:[%s12149_s4 + $0x698] sm:$0xff] }
 0x16d   :  { %3798 = vmatpush.bf16.msrb.mxu2 %v3339_v22  ;;  %v1843_v41 = vunpack.c.0.s8 %v843_v33  ;;  %v1851_v19 = vunpack.c.1.s8 %v843_v33  ;;  %v10196_v27 = vpack.c.bf16 %v568_v38, %v568_v38  ;;  %3767 = vmatmul.bf16.vlgmr.msra.gmra.mxu3 %v9649_v32  ;;  %v3195_v61 = vpack.c.bf16 %v2475_v26, %v2467_v47  ;;  %v835_v33 = vld [vmem:[%s12149_s4 + $0x798] sm:$0xff] }
 0x16e   :  { %3811 = vmatpush.bf16.msrb.mxu3 %v3403_v6  ;;  %v2747_v12 = vcvt.s32.f32 %v1723_v62  ;;  %v10201_v43 = vadd.f32 %v10143_v58, %v10141_v60  ;;  %v3259_v5 = vpack.c.bf16 %v2603_v23, %v2595_v54  ;;  %v1427_v34 = vunpack.c.0.s8 %v739_v49  ;;  %v731_v60 = vld [vmem:[%s12149_s4 + $0x458] sm:$0xff] }
 0x16f   :  { %v2867_v20 = vcvt.s32.f32 %v1843_v41  ;;  %v2875_v1 = vcvt.s32.f32 %v1851_v19  ;;  %v569_v14 = vmax.f32 %v10192_v36, 0.0  ;;  %3774 = vmatpush.bf16.msrb.mxu0 %v3195_v61  ;;  %v1435_v40 = vunpack.c.1.s8 %v739_v49 }
 0x170   :  { %v3331_v17 = vpack.c.bf16 %v2747_v12, %v2739_v29  ;;  %v1555_v63 = vunpack.c.0.s8 %v771_v3  ;;  %3787 = vmatpush.bf16.msrb.mxu1 %v3259_v5  ;;  %v2451_v39 = vcvt.s32.f32 %v1427_v34  ;;  %v1563_v55 = vunpack.c.1.s8 %v771_v3  ;;  %v795_v5 = vld [vmem:[%s12149_s4 + $0x658] sm:$0xff] }
 0x171   :  { %v3395_v58 = vpack.c.bf16 %v2875_v1, %v2867_v20  ;;  %v1699_v42 = vunpack.c.2.s8 %v803_v53  ;;  %v2459_v24 = vcvt.s32.f32 %v1435_v40  ;;  %v1707_v16 = vunpack.c.3.s8 %v803_v53 }
 0x172   :  { %3799 = vmatpush.bf16.msrb.mxu2 %v3331_v17  ;;  %v2579_v57 = vcvt.s32.f32 %v1555_v63  ;;  %v1827_v4 = vunpack.c.2.s8 %v835_v33  ;;  %v2587_v49 = vcvt.s32.f32 %v1563_v55  ;;  %v1835_v59 = vunpack.c.3.s8 %v835_v33 }
 0x173   :  { %3812 = vmatpush.bf16.msrb.mxu3 %v3395_v58  ;;  %v2723_v38 = vcvt.s32.f32 %v1699_v42  ;;  %v1411_v45 = vunpack.c.2.s8 %v731_v60  ;;  %v3187_v13 = vpack.c.bf16 %v2459_v24, %v2451_v39  ;;  %v2731_v22 = vcvt.s32.f32 %v1707_v16  ;;  %v827_v39 = vld [vmem:[%s12149_s4 + $0x758] sm:$0xff] }
 0x174   :  { %v2851_v30 = vcvt.s32.f32 %v1827_v4  ;;  %v1419_v15 = vunpack.c.3.s8 %v731_v60  ;;  %v3251_v3 = vpack.c.bf16 %v2587_v49, %v2579_v57  ;;  %v2859_v6 = vcvt.s32.f32 %v1835_v59  ;;  %v723_v57 = vld [vmem:[%s12149_s4 + $0x418] sm:$0xff]  ;;  %v10230_v59 = vpop.f32.mrf.mxu1 }
 0x175   :  { %v2435_v47 = vcvt.s32.f32 %v1411_v45  ;;  %v1539_v18 = vunpack.c.2.s8 %v763_v50  ;;  %3775 = vmatpush.bf16.msrb.mxu0 %v3187_v13  ;;  %v3323_v46 = vpack.c.bf16 %v2731_v22, %v2723_v38  ;;  %v1547_v28 = vunpack.c.3.s8 %v763_v50  ;;  %v10228_v38 = vpop.f32.mrf.mxu0 }
 0x176   :  { %v2443_v10 = vcvt.s32.f32 %v1419_v15  ;;  %v1683_v26 = vunpack.c.0.s8 %v803_v53  ;;  %3788 = vmatpush.bf16.msrb.mxu1 %v3251_v3  ;;  %v3387_v54 = vpack.c.bf16 %v2859_v6, %v2851_v30  ;;  %v1691_v23 = vunpack.c.1.s8 %v803_v53 }
 0x177   :  { %v2563_v62 = vcvt.s32.f32 %v1539_v18  ;;  %v1811_v29 = vunpack.c.0.s8 %v835_v33  ;;  %3800 = vmatpush.bf16.msrb.mxu2 %v3323_v46  ;;  %v2571_v19 = vcvt.s32.f32 %v1547_v28  ;;  %v1819_v12 = vunpack.c.1.s8 %v835_v33 }
 0x178   :  { %v3179_v41 = vpack.c.bf16 %v2443_v10, %v2435_v47  ;;  %v2707_v61 = vcvt.s32.f32 %v1683_v26  ;;  %3813 = vmatpush.bf16.msrb.mxu3 %v3387_v54  ;;  %v2715_v20 = vcvt.s32.f32 %v1691_v23  ;;  %v1395_v34 = vunpack.c.0.s8 %v731_v60 }
 0x179   :  { %v2835_v1 = vcvt.s32.f32 %v1811_v29  ;;  %v1403_v17 = vunpack.c.1.s8 %v731_v60  ;;  %v3243_v40 = vpack.c.bf16 %v2571_v19, %v2563_v62  ;;  %v2843_v63 = vcvt.s32.f32 %v1819_v12 }
 0x17a   :  { %3776 = vmatpush.bf16.msrb.mxu0 %v3179_v41  ;;  %v1523_v58 = vunpack.c.0.s8 %v763_v50  ;;  %v1531_v53 = vunpack.c.1.s8 %v763_v50  ;;  %v3315_v55 = vpack.c.bf16 %v2715_v20, %v2707_v61  ;;  %v2419_v33 = vcvt.s32.f32 %v1395_v34  ;;  %v755_v50 = vld [vmem:[%s12149_s4 + $0x518] sm:$0xff] }
 0x17b   :  { %v2427_v42 = vcvt.s32.f32 %v1403_v17  ;;  %v1667_v24 = vunpack.c.2.s8 %v795_v5  ;;  %3789 = vmatpush.bf16.msrb.mxu1 %v3243_v40  ;;  %v3379_v16 = vpack.c.bf16 %v2843_v63, %v2835_v1  ;;  %v1675_v49 = vunpack.c.3.s8 %v795_v5 }
 0x17c   :  { %v2547_v60 = vcvt.s32.f32 %v1523_v58  ;;  %v2555_v4 = vcvt.s32.f32 %v1531_v53  ;;  %3801 = vmatpush.bf16.msrb.mxu2 %v3315_v55  ;;  %v1795_v22 = vunpack.c.2.s8 %v827_v39  ;;  %v1803_v30 = vunpack.c.3.s8 %v827_v39 }
 0x17d   :  { %v3171_v45 = vpack.c.bf16 %v2427_v42, %v2419_v33  ;;  %v2691_v13 = vcvt.s32.f32 %v1667_v24  ;;  %3814 = vmatpush.bf16.msrb.mxu3 %v3379_v16  ;;  %v2699_v3 = vcvt.s32.f32 %v1675_v49  ;;  %v3548_v6 = vadd.f32 %v10167_v37, %v10201_v43  ;;  %v652_v33 = vld [vmem:[%s12149_s4 + $0x1e0] sm:$0xff]  ;;  %v3588_v42 = vpop.f32.mrf.mxu1 }
 0x17e   :  { %v3235_v15 = vpack.c.bf16 %v2555_v4, %v2547_v60  ;;  %v1379_v47 = vunpack.c.2.s8 %v723_v57  ;;  %v2819_v18 = vcvt.s32.f32 %v1795_v22  ;;  %v2827_v46 = vcvt.s32.f32 %v1803_v30  ;;  %v819_v22 = vld [vmem:[%s12149_s4 + $0x718] sm:$0xff]  ;;  %v684_v42 = vld [vmem:[%s12149_s4 + $0x2e0] sm:$0xff] }
 0x17f   :  { %3777 = vmatpush.bf16.msrb.mxu0 %v3171_v45  ;;  %v1387_v10 = vunpack.c.3.s8 %v723_v57  ;;  %v1507_v28 = vunpack.c.2.s8 %v755_v50  ;;  %v3307_v26 = vpack.c.bf16 %v2699_v3, %v2691_v13  ;;  %v10235_v54 = vadd.f32 %v10169_v44, %v3548_v6  ;;  %v620_v44 = vld [vmem:[%s12149_s4 + $0xe0] sm:$0xff] }
 0x180   :  { %3790 = vmatpush.bf16.msrb.mxu1 %v3235_v15  ;;  %v2403_v62 = vcvt.s32.f32 %v1379_v47  ;;  %v1515_v23 = vunpack.c.3.s8 %v755_v50  ;;  %v3371_v29 = vpack.c.bf16 %v2827_v46, %v2819_v18  ;;  %v1651_v61 = vunpack.c.0.s8 %v795_v5 }
 0x181   :  { %v2411_v41 = vcvt.s32.f32 %v1387_v10  ;;  %v2531_v19 = vcvt.s32.f32 %v1507_v28  ;;  %3802 = vmatpush.bf16.msrb.mxu2 %v3307_v26  ;;  %v1659_v37 = vunpack.c.1.s8 %v795_v5  ;;  %v1779_v43 = vunpack.c.0.s8 %v827_v39  ;;  %v3575_v5 = vpop.f32.mrf.mxu0 }
 0x182   :  { %v2539_v12 = vcvt.s32.f32 %v1515_v23  ;;  %v1787_v20 = vunpack.c.1.s8 %v827_v39  ;;  %3815 = vmatpush.bf16.msrb.mxu3 %v3371_v29  ;;  %v2675_v34 = vcvt.s32.f32 %v1651_v61  ;;  %v1363_v17 = vunpack.c.0.s8 %v723_v57 }
 0x183   :  { %v3163_v1 = vpack.c.bf16 %v2411_v41, %v2403_v62  ;;  %v1371_v40 = vunpack.c.1.s8 %v723_v57  ;;  %v2683_v58 = vcvt.s32.f32 %v1659_v37  ;;  %v2803_v53 = vcvt.s32.f32 %v1779_v43  ;;  %v787_v57 = vld [vmem:[%s12149_s4 + $0x618] sm:$0xff] }
 0x184   :  { %v3227_v63 = vpack.c.bf16 %v2539_v12, %v2531_v19  ;;  %v2811_v55 = vcvt.s32.f32 %v1787_v20  ;;  %v2387_v39 = vcvt.s32.f32 %v1363_v17  ;;  %v1491_v16 = vunpack.c.0.s8 %v755_v50 }
 0x185   :  { %3778 = vmatpush.bf16.msrb.mxu0 %v3163_v1  ;;  %v2395_v24 = vcvt.s32.f32 %v1371_v40  ;;  %v1499_v60 = vunpack.c.1.s8 %v755_v50  ;;  %v3299_v4 = vpack.c.bf16 %v2683_v58, %v2675_v34  ;;  %v964_v45 = vunpack.c.2.s8 %v620_v44  ;;  %v10249_v40 = vpop.f32.mrf.mxu2 }
 0x186   :  { %3791 = vmatpush.bf16.msrb.mxu1 %v3227_v63  ;;  %v3363_v49 = vpack.c.bf16 %v2811_v55, %v2803_v53  ;;  %v972_v13 = vunpack.c.3.s8 %v620_v44  ;;  %v2515_v15 = vcvt.s32.f32 %v1491_v16  ;;  %v1092_v6 = vunpack.c.2.s8 %v652_v33  ;;  %v10251_v63 = vpop.f32.mrf.mxu3 }
 0x187   :  { %v3155_v30 = vpack.c.bf16 %v2395_v24, %v2387_v39  ;;  %v2523_v3 = vcvt.s32.f32 %v1499_v60  ;;  %3803 = vmatpush.bf16.msrb.mxu2 %v3299_v4  ;;  %v1988_v50 = vcvt.s32.f32 %v964_v45  ;;  %v1100_v18 = vunpack.c.3.s8 %v652_v33 }
 0x188   :  { %3816 = vmatpush.bf16.msrb.mxu3 %v3363_v49  ;;  %v1996_v47 = vcvt.s32.f32 %v972_v13  ;;  %v1635_v46 = vunpack.c.2.s8 %v787_v57  ;;  %v2116_v28 = vcvt.s32.f32 %v1092_v6  ;;  %v1643_v26 = vunpack.c.3.s8 %v787_v57  ;;  %v10264_v13 = vld [vmem:[%s12149_s4 + $0xa0] sm:$0xff] }
 0x189   :  { %3779 = vmatpush.bf16.msrb.mxu0 %v3155_v30  ;;  %v3219_v10 = vpack.c.bf16 %v2523_v3, %v2515_v15  ;;  %v1763_v62 = vunpack.c.2.s8 %v819_v22  ;;  %v2124_v29 = vcvt.s32.f32 %v1100_v18  ;;  %v1771_v19 = vunpack.c.3.s8 %v819_v22 }
 0x18a   :  { %v2956_v23 = vpack.c.bf16 %v1996_v47, %v1988_v50  ;;  %v2659_v41 = vcvt.s32.f32 %v1635_v46  ;;  %v2667_v61 = vcvt.s32.f32 %v1643_v26  ;;  %v948_v37 = vunpack.c.0.s8 %v620_v44  ;;  %v644_v46 = vld [vmem:[%s12149_s4 + $0x1a0] sm:$0xff] }
 0x18b   :  { %3792 = vmatpush.bf16.msrb.mxu1 %v3219_v10  ;;  %v2787_v12 = vcvt.s32.f32 %v1763_v62  ;;  %v956_v43 = vunpack.c.1.s8 %v620_v44  ;;  %v3020_v20 = vpack.c.bf16 %v2124_v29, %v2116_v28  ;;  %v2795_v1 = vcvt.s32.f32 %v1771_v19 }
 0x18c   :  { %v1076_v34 = vunpack.c.0.s8 %v652_v33  ;;  %v1084_v17 = vunpack.c.1.s8 %v652_v33  ;;  %v3291_v58 = vpack.c.bf16 %v2667_v61, %v2659_v41  ;;  %3780 = vmatmul.bf16.vlgmr.msrb.gmra.mxu0 %v9661_v8  ;;  %v1972_v53 = vcvt.s32.f32 %v948_v37  ;;  %v716_v33 = vld [vmem:[%s12149_s4 + $0x3e0] sm:$0xff] }
 0x18d   :  { %3824 = vmatpush.bf16.msra.mxu0 %v2956_v23  ;;  %v1980_v55 = vcvt.s32.f32 %v956_v43  ;;  %v1619_v5 = vunpack.c.0.s8 %v787_v57  ;;  %v3355_v44 = vpack.c.bf16 %v2795_v1, %v2787_v12  ;;  %v1627_v16 = vunpack.c.1.s8 %v787_v57  ;;  %v3601_v43 = vpop.f32.mrf.mxu2 }
 0x18e   :  { %v2100_v39 = vcvt.s32.f32 %v1076_v34  ;;  %v2108_v24 = vcvt.s32.f32 %v1084_v17  ;;  %3804 = vmatpush.bf16.msrb.mxu2 %v3291_v58  ;;  %3793 = vmatmul.bf16.vlgmr.msrb.gmra.mxu1 %v9663_v25  ;;  %v1747_v49 = vunpack.c.0.s8 %v819_v22  ;;  %v1755_v45 = vunpack.c.1.s8 %v819_v22 }
 0x18f   :  { %3837 = vmatpush.bf16.msra.mxu1 %v3020_v20  ;;  %v2948_v60 = vpack.c.bf16 %v1980_v55, %v1972_v53  ;;  %v2643_v4 = vcvt.s32.f32 %v1619_v5  ;;  %3817 = vmatpush.bf16.msrb.mxu3 %v3355_v44  ;;  %v2651_v15 = vcvt.s32.f32 %v1627_v16  ;;  %v1220_v57 = vunpack.c.2.s8 %v684_v42  ;;  %v3614_v20 = vpop.f32.mrf.mxu3 }
 0x190   :  { %v3012_v30 = vpack.c.bf16 %v2108_v24, %v2100_v39  ;;  %v1228_v3 = vunpack.c.3.s8 %v684_v42  ;;  %v2771_v6 = vcvt.s32.f32 %v1747_v49  ;;  %v2779_v50 = vcvt.s32.f32 %v1755_v45 }
 0x191   :  { %3825 = vmatpush.bf16.msra.mxu0 %v2948_v60  ;;  %v1348_v47 = vunpack.c.2.s8 %v716_v33  ;;  %v1356_v18 = vunpack.c.3.s8 %v716_v33  ;;  %v3283_v22 = vpack.c.bf16 %v2651_v15, %v2643_v4  ;;  %v2244_v10 = vcvt.s32.f32 %v1220_v57  ;;  %v676_v4 = vld [vmem:[%s12149_s4 + $0x2a0] sm:$0xff] }
 0x192   :  { %v2252_v28 = vcvt.s32.f32 %v1228_v3  ;;  %v932_v26 = vunpack.c.2.s8 %v10264_v13  ;;  %v3347_v62 = vpack.c.bf16 %v2779_v50, %v2771_v6  ;;  %v940_v41 = vunpack.c.3.s8 %v10264_v13  ;;  %v604_v3 = vld [vmem:[%s12149_s4 + $0x60] sm:$0xff] }
 0x193   :  { %3838 = vmatpush.bf16.msra.mxu1 %v3012_v30  ;;  %v2372_v23 = vcvt.s32.f32 %v1348_v47  ;;  %v2380_v29 = vcvt.s32.f32 %v1356_v18  ;;  %3805 = vmatpush.bf16.msrb.mxu2 %v3283_v22  ;;  %v1060_v12 = vunpack.c.2.s8 %v644_v46  ;;  %v1068_v37 = vunpack.c.3.s8 %v644_v46  ;;  %v708_v30 = vld [vmem:[%s12149_s4 + $0x3a0] sm:$0xff] }
 0x194   :  { %v3084_v19 = vpack.c.bf16 %v2252_v28, %v2244_v10  ;;  %v1956_v61 = vcvt.s32.f32 %v932_v26  ;;  %3818 = vmatpush.bf16.msrb.mxu3 %v3347_v62  ;;  %v1964_v34 = vcvt.s32.f32 %v940_v41  ;;  %v1204_v17 = vunpack.c.0.s8 %v684_v42 }
 0x195   :  { %v3148_v1 = vpack.c.bf16 %v2380_v29, %v2372_v23  ;;  %v1212_v58 = vunpack.c.1.s8 %v684_v42  ;;  %v2084_v53 = vcvt.s32.f32 %v1060_v12  ;;  %v2092_v55 = vcvt.s32.f32 %v1068_v37 }
 0x196   :  { %v1332_v5 = vunpack.c.0.s8 %v716_v33  ;;  %v1340_v44 = vunpack.c.1.s8 %v716_v33  ;;  %3806 = vmatmul.bf16.vlgmr.msrb.gmra.mxu2 %v9739_v0  ;;  %v2940_v39 = vpack.c.bf16 %v1964_v34, %v1956_v61  ;;  %v2228_v24 = vcvt.s32.f32 %v1204_v17 }
 0x197   :  { %3850 = vmatpush.bf16.msra.mxu2 %v3084_v19  ;;  %v2236_v16 = vcvt.s32.f32 %v1212_v58  ;;  %v3574_v60 = vadd.f32 %v10228_v38, %v10235_v54  ;;  %3819 = vmatmul.bf16.vlgmr.msrb.gmra.mxu3 %v9741_v31  ;;  %v3004_v42 = vpack.c.bf16 %v2092_v55, %v2084_v53  ;;  %v916_v33 = vunpack.c.0.s8 %v10264_v13 }
 0x198   :  { %3863 = vmatpush.bf16.msra.mxu3 %v3148_v1  ;;  %v2356_v49 = vcvt.s32.f32 %v1332_v5  ;;  %v2364_v45 = vcvt.s32.f32 %v1340_v44  ;;  %3826 = vmatpush.bf16.msra.mxu0 %v2940_v39  ;;  %v924_v38 = vunpack.c.1.s8 %v10264_v13  ;;  %v1044_v54 = vunpack.c.0.s8 %v644_v46 }
 0x199   :  { %v3076_v15 = vpack.c.bf16 %v2236_v16, %v2228_v24  ;;  %v10283_v57 = vadd.f32 %v10230_v59, %v3574_v60  ;;  %3839 = vmatpush.bf16.msra.mxu1 %v3004_v42  ;;  %v1940_v50 = vcvt.s32.f32 %v916_v33  ;;  %v1052_v47 = vunpack.c.1.s8 %v644_v46  ;;  %v636_v59 = vld [vmem:[%s12149_s4 + $0x160] sm:$0xff] }
 0x19a   :  { %v3140_v6 = vpack.c.bf16 %v2364_v45, %v2356_v49  ;;  %v1188_v18 = vunpack.c.2.s8 %v676_v4  ;;  %v1948_v22 = vcvt.s32.f32 %v924_v38  ;;  %v2068_v10 = vcvt.s32.f32 %v1044_v54  ;;  %v668_v42 = vld [vmem:[%s12149_s4 + $0x260] sm:$0xff] }
 0x19b   :  { %3851 = vmatpush.bf16.msra.mxu2 %v3076_v15  ;;  %v1196_v28 = vunpack.c.3.s8 %v676_v4  ;;  %v1316_v26 = vunpack.c.2.s8 %v708_v30  ;;  %v2076_v13 = vcvt.s32.f32 %v1052_v47  ;;  %v1324_v23 = vunpack.c.3.s8 %v708_v30 }
 0x19c   :  { %3864 = vmatpush.bf16.msra.mxu3 %v3140_v6  ;;  %v2212_v62 = vcvt.s32.f32 %v1188_v18  ;;  %v900_v29 = vunpack.c.2.s8 %v604_v3  ;;  %v2932_v41 = vpack.c.bf16 %v1948_v22, %v1940_v50  ;;  %v908_v12 = vunpack.c.3.s8 %v604_v3  ;;  %v700_v50 = vld [vmem:[%s12149_s4 + $0x360] sm:$0xff] }
 0x19d   :  { %v2220_v19 = vcvt.s32.f32 %v1196_v28  ;;  %v2340_v61 = vcvt.s32.f32 %v1316_v26  ;;  %v2996_v46 = vpack.c.bf16 %v2076_v13, %v2068_v10  ;;  %v2348_v37 = vcvt.s32.f32 %v1324_v23 }
 0x19e   :  { %v1924_v43 = vcvt.s32.f32 %v900_v29  ;;  %v1028_v20 = vunpack.c.2.s8 %v636_v59  ;;  %3827 = vmatpush.bf16.msra.mxu0 %v2932_v41  ;;  %v1932_v34 = vcvt.s32.f32 %v908_v12  ;;  %v1036_v17 = vunpack.c.3.s8 %v636_v59  ;;  %v10304_v41 = vld [vmem:[%s12149_s4 + $0x120] sm:$0xff] }
 0x19f   :  { %v3068_v1 = vpack.c.bf16 %v2220_v19, %v2212_v62  ;;  %v1172_v58 = vunpack.c.0.s8 %v676_v4  ;;  %3840 = vmatpush.bf16.msra.mxu1 %v2996_v46  ;;  %v3132_v53 = vpack.c.bf16 %v2348_v37, %v2340_v61  ;;  %v1180_v5 = vunpack.c.1.s8 %v676_v4  ;;  %v10306_v19 = vld [vmem:[#allocation2 + $0x8] sm:$0xff] }
 0x1a0   :  { %v2052_v55 = vcvt.s32.f32 %v1028_v20  ;;  %v1300_v44 = vunpack.c.0.s8 %v708_v30  ;;  %v2924_v39 = vpack.c.bf16 %v1932_v34, %v1924_v43  ;;  %v2060_v24 = vcvt.s32.f32 %v1036_v17  ;;  %v10311_v43 = vpop.f32.mrf.mxu0  ;;  %v10313_v20 = vpop.f32.mrf.mxu1 }
 0x1a1   :  { %3852 = vmatpush.bf16.msra.mxu2 %v3068_v1  ;;  %v2196_v16 = vcvt.s32.f32 %v1172_v58  ;;  %v1308_v60 = vunpack.c.1.s8 %v708_v30  ;;  %3865 = vmatpush.bf16.msra.mxu3 %v3132_v53  ;;  %v2204_v49 = vcvt.s32.f32 %v1180_v5  ;;  %v884_v33 = vunpack.c.0.s8 %v604_v3 }
 0x1a2   :  { %v2324_v45 = vcvt.s32.f32 %v1300_v44  ;;  %v892_v15 = vunpack.c.1.s8 %v604_v3  ;;  %3828 = vmatpush.bf16.msra.mxu0 %v2924_v39  ;;  %v2988_v38 = vpack.c.bf16 %v2060_v24, %v2052_v55  ;;  %v1012_v6 = vunpack.c.0.s8 %v636_v59  ;;  %v596_v3 = vld [vmem:[%s12149_s4 + $0x20] sm:$0xff] }
 0x1a3   :  { %v2332_v54 = vcvt.s32.f32 %v1308_v60  ;;  %v1020_v4 = vunpack.c.1.s8 %v636_v59  ;;  %v3060_v47 = vpack.c.bf16 %v2204_v49, %v2196_v16  ;;  %v1908_v30 = vcvt.s32.f32 %v884_v33 }
 0x1a4   :  { %v1916_v18 = vcvt.s32.f32 %v892_v15  ;;  %v1156_v22 = vunpack.c.2.s8 %v668_v42  ;;  %3841 = vmatpush.bf16.msra.mxu1 %v2988_v38  ;;  %v2036_v28 = vcvt.s32.f32 %v1012_v6  ;;  %v1164_v13 = vunpack.c.3.s8 %v668_v42 }
 0x1a5   :  { %v3124_v10 = vpack.c.bf16 %v2332_v54, %v2324_v45  ;;  %v2044_v26 = vcvt.s32.f32 %v1020_v4  ;;  %3853 = vmatpush.bf16.msra.mxu2 %v3060_v47  ;;  %v1284_v23 = vunpack.c.2.s8 %v700_v50  ;;  %v1292_v29 = vunpack.c.3.s8 %v700_v50  ;;  %v748_v4 = vld [vmem:[%s12149_s4 + $0x4e0] sm:$0xff] }
 0x1a6   :  { %v2916_v62 = vpack.c.bf16 %v1916_v18, %v1908_v30  ;;  %v2180_v59 = vcvt.s32.f32 %v1156_v22  ;;  %v156_v61 = vperm.slane %v10306_v19, 2  ;;  %v2188_v46 = vcvt.s32.f32 %v1164_v13 }
 0x1a7   :  { %3866 = vmatpush.bf16.msra.mxu3 %v3124_v10  ;;  %v2980_v12 = vpack.c.bf16 %v2044_v26, %v2036_v28  ;;  %v3600_v37 = vadd.f32 %v10249_v40, %v10283_v57  ;;  %v10318_v1 = vpack.c.bf16 %v569_v14, %v569_v14  ;;  %v2308_v34 = vcvt.s32.f32 %v1284_v23  ;;  %v660_v26 = vld [vmem:[%s12149_s4 + $0x220] sm:$0xff] }
 0x1a8   :  { %3829 = vmatpush.bf16.msra.mxu0 %v2916_v62  ;;  %v2316_v17 = vcvt.s32.f32 %v1292_v29  ;;  %v868_v58 = vunpack.c.2.s8 %v596_v3  ;;  %v3052_v53 = vpack.c.bf16 %v2188_v46, %v2180_v59  ;;  %v876_v5 = vunpack.c.3.s8 %v596_v3  ;;  %v3627_v13 = vpop.f32.mrf.mxu0  ;;  %v3640_v62 = vpop.f32.mrf.mxu1 }
 0x1a9   :  { %3842 = vmatpush.bf16.msra.mxu1 %v2980_v12  ;;  %v10321_v55 = vadd.f32 %v10251_v63, %v3600_v37  ;;  %v996_v40 = vunpack.c.2.s8 %v10304_v41  ;;  %v1004_v39 = vunpack.c.3.s8 %v10304_v41  ;;  %v1140_v36 = vunpack.c.0.s8 %v668_v42  ;;  %v692_v37 = vld [vmem:[%s12149_s4 + $0x320] sm:$0xff] }
 0x1aa   :  { %v3116_v57 = vpack.c.bf16 %v2316_v17, %v2308_v34  ;;  %v1892_v44 = vcvt.s32.f32 %v868_v58  ;;  %v157_v14 = vperm.slane %v10306_v19, 3  ;;  %3854 = vmatpush.bf16.msra.mxu2 %v3052_v53  ;;  %v1900_v24 = vcvt.s32.f32 %v876_v5  ;;  %v844_v62 = vld [vmem:[%s12149_s4 + $0x7e0] sm:$0xff] }
 0x1ab   :  { %v2020_v16 = vcvt.s32.f32 %v996_v40  ;;  %v1148_v60 = vunpack.c.1.s8 %v668_v42  ;;  %v2028_v49 = vcvt.s32.f32 %v1004_v39  ;;  %v2164_v45 = vcvt.s32.f32 %v1140_v36  ;;  %v780_v42 = vld [vmem:[%s12149_s4 + $0x5e0] sm:$0xff] }
 0x1ac   :  { %3867 = vmatpush.bf16.msra.mxu3 %v3116_v57  ;;  %v1268_v33 = vunpack.c.0.s8 %v700_v50  ;;  %v1276_v63 = vunpack.c.1.s8 %v700_v50  ;;  %v10327_v15 = vadd.f32 %v10025_v52, %v156_v61  ;;  %v2908_v38 = vpack.c.bf16 %v1900_v24, %v1892_v44 }
 0x1ad   :  { %v2172_v54 = vcvt.s32.f32 %v1148_v60  ;;  %v852_v6 = vunpack.c.0.s8 %v596_v3  ;;  %v2972_v47 = vpack.c.bf16 %v2028_v49, %v2020_v16  ;;  %v860_v22 = vunpack.c.1.s8 %v596_v3 }
 0x1ae   :  { %v2292_v30 = vcvt.s32.f32 %v1268_v33  ;;  %v2300_v18 = vcvt.s32.f32 %v1276_v63  ;;  %v10336_v50 = vadd.f32 %v10027_v21, %v157_v14  ;;  %3830 = vmatpush.bf16.msra.mxu0 %v2908_v38  ;;  %v980_v28 = vunpack.c.0.s8 %v10304_v41 }
 0x1af   :  { %v3044_v52 = vpack.c.bf16 %v2172_v54, %v2164_v45  ;;  %v1876_v10 = vcvt.s32.f32 %v852_v6  ;;  %3843 = vmatpush.bf16.msra.mxu1 %v2972_v47  ;;  %v1884_v59 = vcvt.s32.f32 %v860_v22  ;;  %v988_v23 = vunpack.c.1.s8 %v10304_v41  ;;  %v10346_v54 = vpop.f32.mrf.mxu2  ;;  %v10348_v6 = vpop.f32.mrf.mxu3 }
 0x1b0   :  { %v3108_v3 = vpack.c.bf16 %v2300_v18, %v2292_v30  ;;  %v1476_v29 = vunpack.c.2.s8 %v748_v4  ;;  %v2004_v21 = vcvt.s32.f32 %v980_v28  ;;  %v1484_v61 = vunpack.c.3.s8 %v748_v4 }
 0x1b1   :  { %3855 = vmatpush.bf16.msra.mxu2 %v3044_v52  ;;  %v1604_v12 = vunpack.c.2.s8 %v780_v42  ;;  %v1612_v46 = vunpack.c.3.s8 %v780_v42  ;;  %v2900_v34 = vpack.c.bf16 %v1884_v59, %v1876_v10  ;;  %v2012_v17 = vcvt.s32.f32 %v988_v23  ;;  %v812_v52 = vld [vmem:[%s12149_s4 + $0x6e0] sm:$0xff] }
 0x1b2   :  { %3868 = vmatpush.bf16.msra.mxu3 %v3108_v3  ;;  %v2500_v58 = vcvt.s32.f32 %v1476_v29  ;;  %v1124_v53 = vunpack.c.2.s8 %v660_v26  ;;  %v2508_v5 = vcvt.s32.f32 %v1484_v61  ;;  %v1132_v44 = vunpack.c.3.s8 %v660_v26 }
 0x1b3   :  { %v2628_v40 = vcvt.s32.f32 %v1604_v12  ;;  %v2636_v57 = vcvt.s32.f32 %v1612_v46  ;;  %3831 = vmatpush.bf16.msra.mxu0 %v2900_v34  ;;  %v2964_v41 = vpack.c.bf16 %v2012_v17, %v2004_v21  ;;  %v1252_v36 = vunpack.c.2.s8 %v692_v37 }
 0x1b4   :  { %v2148_v39 = vcvt.s32.f32 %v1124_v53  ;;  %v1260_v14 = vunpack.c.3.s8 %v692_v37  ;;  %v3212_v24 = vpack.c.bf16 %v2508_v5, %v2500_v58  ;;  %v2156_v60 = vcvt.s32.f32 %v1132_v44  ;;  %v772_v53 = vld [vmem:[%s12149_s4 + $0x5a0] sm:$0xff] }
 0x1b5   :  { %v3276_v16 = vpack.c.bf16 %v2636_v57, %v2628_v40  ;;  %v1460_v49 = vunpack.c.0.s8 %v748_v4  ;;  %3844 = vmatpush.bf16.msra.mxu1 %v2964_v41  ;;  %v2276_v45 = vcvt.s32.f32 %v1252_v36  ;;  %v1468_v63 = vunpack.c.1.s8 %v748_v4 }
 0x1b6   :  { %v2284_v33 = vcvt.s32.f32 %v1260_v14  ;;  %v1588_v38 = vunpack.c.0.s8 %v780_v42  ;;  %v3036_v47 = vpack.c.bf16 %v2156_v60, %v2148_v39  ;;  %v1596_v18 = vunpack.c.1.s8 %v780_v42  ;;  %3832 = vmatmul.bf16.vlgmr.msra.gmra.mxu0 %v9587_v35 }
 0x1b7   :  { %3876 = vmatpush.bf16.msrb.mxu0 %v3212_v24  ;;  %v2484_v30 = vcvt.s32.f32 %v1460_v49  ;;  %v1108_v22 = vunpack.c.0.s8 %v660_v26  ;;  %v2492_v28 = vcvt.s32.f32 %v1468_v63  ;;  %v1116_v13 = vunpack.c.1.s8 %v660_v26  ;;  %v740_v26 = vld [vmem:[%s12149_s4 + $0x4a0] sm:$0xff]  ;;  %v3653_v49 = vpop.f32.mrf.mxu2 }
 0x1b8   :  { %v3100_v10 = vpack.c.bf16 %v2284_v33, %v2276_v45  ;;  %v2612_v4 = vcvt.s32.f32 %v1588_v38  ;;  %3856 = vmatpush.bf16.msra.mxu2 %v3036_v47  ;;  %3845 = vmatmul.bf16.vlgmr.msra.gmra.mxu1 %v9589_v7  ;;  %v2620_v3 = vcvt.s32.f32 %v1596_v18  ;;  %v1236_v59 = vunpack.c.0.s8 %v692_v37  ;;  %v3666_v45 = vpop.f32.mrf.mxu3 }
 0x1b9   :  { %3889 = vmatpush.bf16.msrb.mxu1 %v3276_v16  ;;  %v2132_v42 = vcvt.s32.f32 %v1108_v22  ;;  %v1244_v23 = vunpack.c.1.s8 %v692_v37  ;;  %v3204_v29 = vpack.c.bf16 %v2492_v28, %v2484_v30  ;;  %v2140_v21 = vcvt.s32.f32 %v1116_v13 }
 0x1ba   :  { %3869 = vmatpush.bf16.msra.mxu3 %v3100_v10  ;;  %v1732_v61 = vunpack.c.2.s8 %v812_v52  ;;  %v1740_v12 = vunpack.c.3.s8 %v812_v52  ;;  %v3268_v46 = vpack.c.bf16 %v2620_v3, %v2612_v4  ;;  %v2260_v34 = vcvt.s32.f32 %v1236_v59 }
 0x1bb   :  { %v2268_v17 = vcvt.s32.f32 %v1244_v23  ;;  %v1860_v58 = vunpack.c.2.s8 %v844_v62  ;;  %3877 = vmatpush.bf16.msrb.mxu0 %v3204_v29  ;;  %v3028_v5 = vpack.c.bf16 %v2140_v21, %v2132_v42  ;;  %v1868_v57 = vunpack.c.3.s8 %v844_v62  ;;  %v804_v42 = vld [vmem:[%s12149_s4 + $0x6a0] sm:$0xff] }
 0x1bc   :  { %v2756_v37 = vcvt.s32.f32 %v1732_v61  ;;  %v2764_v40 = vcvt.s32.f32 %v1740_v12  ;;  %v1444_v39 = vunpack.c.2.s8 %v740_v26  ;;  %v1452_v36 = vunpack.c.3.s8 %v740_v26  ;;  %v836_v21 = vld [vmem:[%s12149_s4 + $0x7a0] sm:$0xff] }
 0x1bd   :  { %3890 = vmatpush.bf16.msrb.mxu1 %v3268_v46  ;;  %v3092_v44 = vpack.c.bf16 %v2268_v17, %v2260_v34  ;;  %v2884_v41 = vcvt.s32.f32 %v1860_v58  ;;  %3857 = vmatpush.bf16.msra.mxu2 %v3028_v5  ;;  %v2892_v24 = vcvt.s32.f32 %v1868_v57  ;;  %v1572_v16 = vunpack.c.2.s8 %v772_v53 }
 0x1be   :  { %v3340_v14 = vpack.c.bf16 %v2764_v40, %v2756_v37  ;;  %v1580_v60 = vunpack.c.3.s8 %v772_v53  ;;  %v2468_v33 = vcvt.s32.f32 %v1444_v39  ;;  %v2476_v63 = vcvt.s32.f32 %v1452_v36 }
 0x1bf   :  { %3870 = vmatpush.bf16.msra.mxu3 %v3092_v44  ;;  %v1716_v38 = vunpack.c.0.s8 %v812_v52  ;;  %v1724_v47 = vunpack.c.1.s8 %v812_v52  ;;  %v3404_v30 = vpack.c.bf16 %v2892_v24, %v2884_v41  ;;  %v2596_v18 = vcvt.s32.f32 %v1572_v16  ;;  %v764_v44 = vld [vmem:[%s12149_s4 + $0x560] sm:$0xff] }
 0x1c0   :  { %v2604_v22 = vcvt.s32.f32 %v1580_v60  ;;  %v1844_v10 = vunpack.c.0.s8 %v844_v62  ;;  %3858 = vmatmul.bf16.vlgmr.msra.gmra.mxu2 %v9647_v48  ;;  %v3196_v28 = vpack.c.bf16 %v2476_v63, %v2468_v33  ;;  %v1852_v3 = vunpack.c.1.s8 %v844_v62 }
 0x1c1   :  { %3902 = vmatpush.bf16.msrb.mxu2 %v3340_v14  ;;  %v2740_v4 = vcvt.s32.f32 %v1716_v38  ;;  %v2748_v13 = vcvt.s32.f32 %v1724_v47  ;;  %v10370_v52 = vadd.f32 %v10313_v20, %v10311_v43  ;;  %v1428_v29 = vunpack.c.0.s8 %v740_v26  ;;  %v732_v43 = vld [vmem:[%s12149_s4 + $0x460] sm:$0xff] }
 0x1c2   :  { %v3260_v59 = vpack.c.bf16 %v2604_v22, %v2596_v18  ;;  %v2868_v23 = vcvt.s32.f32 %v1844_v10  ;;  %3871 = vmatmul.bf16.vlgmr.msra.gmra.mxu3 %v9649_v32  ;;  %3878 = vmatpush.bf16.msrb.mxu0 %v3196_v28  ;;  %v2876_v61 = vcvt.s32.f32 %v1852_v3  ;;  %v1436_v12 = vunpack.c.1.s8 %v740_v26 }
 0x1c3   :  { %3915 = vmatpush.bf16.msrb.mxu3 %v3404_v30  ;;  %v3332_v62 = vpack.c.bf16 %v2748_v13, %v2740_v4  ;;  %v1556_v46 = vunpack.c.0.s8 %v772_v53  ;;  %v2452_v34 = vcvt.s32.f32 %v1428_v29  ;;  %v1564_v17 = vunpack.c.1.s8 %v772_v53 }
 0x1c4   :  { %3891 = vmatpush.bf16.msrb.mxu1 %v3260_v59  ;;  %v1700_v58 = vunpack.c.2.s8 %v804_v42  ;;  %v1708_v5 = vunpack.c.3.s8 %v804_v42  ;;  %v3396_v20 = vpack.c.bf16 %v2876_v61, %v2868_v23  ;;  %v2460_v37 = vcvt.s32.f32 %v1436_v12  ;;  %v796_v23 = vld [vmem:[%s12149_s4 + $0x660] sm:$0xff] }
 0x1c5   :  { %3903 = vmatpush.bf16.msrb.mxu2 %v3332_v62  ;;  %v2580_v40 = vcvt.s32.f32 %v1556_v46  ;;  %v1828_v57 = vunpack.c.2.s8 %v836_v21  ;;  %v2588_v26 = vcvt.s32.f32 %v1564_v17  ;;  %v1836_v36 = vunpack.c.3.s8 %v836_v21 }
 0x1c6   :  { %v2724_v41 = vcvt.s32.f32 %v1700_v58  ;;  %v2732_v39 = vcvt.s32.f32 %v1708_v5  ;;  %v3188_v53 = vpack.c.bf16 %v2460_v37, %v2452_v34  ;;  %v1412_v24 = vunpack.c.2.s8 %v732_v43 }
 0x1c7   :  { %3916 = vmatpush.bf16.msrb.mxu3 %v3396_v20  ;;  %v2852_v14 = vcvt.s32.f32 %v1828_v57  ;;  %v1420_v16 = vunpack.c.3.s8 %v732_v43  ;;  %v3252_v60 = vpack.c.bf16 %v2588_v26, %v2580_v40  ;;  %v2860_v45 = vcvt.s32.f32 %v1836_v36  ;;  %v724_v40 = vld [vmem:[%s12149_s4 + $0x420] sm:$0xff]  ;;  %v10396_v36 = vpop.f32.mrf.mxu1 }
 0x1c8   :  { %v3324_v49 = vpack.c.bf16 %v2732_v39, %v2724_v41  ;;  %v1540_v33 = vunpack.c.2.s8 %v764_v44  ;;  %3879 = vmatpush.bf16.msrb.mxu0 %v3188_v53  ;;  %v2436_v63 = vcvt.s32.f32 %v1412_v24  ;;  %v1548_v47 = vunpack.c.3.s8 %v764_v44  ;;  %v10394_v39 = vpop.f32.mrf.mxu0 }
 0x1c9   :  { %v2444_v38 = vcvt.s32.f32 %v1420_v16  ;;  %v1684_v30 = vunpack.c.0.s8 %v804_v42  ;;  %3892 = vmatpush.bf16.msrb.mxu1 %v3252_v60  ;;  %v3388_v18 = vpack.c.bf16 %v2860_v45, %v2852_v14  ;;  %v1692_v10 = vunpack.c.1.s8 %v804_v42  ;;  %v828_v42 = vld [vmem:[%s12149_s4 + $0x760] sm:$0xff] }
 0x1ca   :  { %3904 = vmatpush.bf16.msrb.mxu2 %v3324_v49  ;;  %v2564_v22 = vcvt.s32.f32 %v1540_v33  ;;  %v1812_v28 = vunpack.c.0.s8 %v836_v21  ;;  %v2572_v13 = vcvt.s32.f32 %v1548_v47  ;;  %v1820_v59 = vunpack.c.1.s8 %v836_v21 }
 0x1cb   :  { %v3180_v4 = vpack.c.bf16 %v2444_v38, %v2436_v63  ;;  %v2708_v3 = vcvt.s32.f32 %v1684_v30  ;;  %3917 = vmatpush.bf16.msrb.mxu3 %v3388_v18  ;;  %v2716_v29 = vcvt.s32.f32 %v1692_v10  ;;  %v1396_v61 = vunpack.c.0.s8 %v732_v43 }
 0x1cc   :  { %v2836_v62 = vcvt.s32.f32 %v1812_v28  ;;  %v1404_v12 = vunpack.c.1.s8 %v732_v43  ;;  %v3244_v46 = vpack.c.bf16 %v2572_v13, %v2564_v22  ;;  %v2844_v34 = vcvt.s32.f32 %v1820_v59 }
 0x1cd   :  { %3880 = vmatpush.bf16.msrb.mxu0 %v3180_v4  ;;  %v1524_v17 = vunpack.c.0.s8 %v764_v44  ;;  %v1532_v58 = vunpack.c.1.s8 %v764_v44  ;;  %v3316_v5 = vpack.c.bf16 %v2716_v29, %v2708_v3  ;;  %v2420_v21 = vcvt.s32.f32 %v1396_v61  ;;  %v756_v44 = vld [vmem:[%s12149_s4 + $0x520] sm:$0xff] }
 0x1ce   :  { %v2428_v20 = vcvt.s32.f32 %v1404_v12  ;;  %v1668_v37 = vunpack.c.2.s8 %v796_v23  ;;  %3893 = vmatpush.bf16.msrb.mxu1 %v3244_v46  ;;  %v3380_v57 = vpack.c.bf16 %v2844_v34, %v2836_v62  ;;  %v1676_v41 = vunpack.c.3.s8 %v796_v23 }
 0x1cf   :  { %v2548_v43 = vcvt.s32.f32 %v1524_v17  ;;  %v2556_v26 = vcvt.s32.f32 %v1532_v58  ;;  %3905 = vmatpush.bf16.msrb.mxu2 %v3316_v5  ;;  %v1796_v24 = vunpack.c.2.s8 %v828_v42  ;;  %v1804_v16 = vunpack.c.3.s8 %v828_v42 }
 0x1d0   :  { %v3172_v53 = vpack.c.bf16 %v2428_v20, %v2420_v21  ;;  %v2692_v14 = vcvt.s32.f32 %v1668_v37  ;;  %3918 = vmatpush.bf16.msrb.mxu3 %v3380_v57  ;;  %v2700_v49 = vcvt.s32.f32 %v1676_v41  ;;  %v3652_v45 = vadd.f32 %v10346_v54, %v10370_v52  ;;  %v653_v20 = vld [vmem:[%s12149_s4 + $0x1e8] sm:$0xff]  ;;  %v3692_v37 = vpop.f32.mrf.mxu1 }
 0x1d1   :  { %v3236_v60 = vpack.c.bf16 %v2556_v26, %v2548_v43  ;;  %v1380_v33 = vunpack.c.2.s8 %v724_v40  ;;  %v2820_v63 = vcvt.s32.f32 %v1796_v24  ;;  %v2828_v38 = vcvt.s32.f32 %v1804_v16  ;;  %v820_v16 = vld [vmem:[%s12149_s4 + $0x720] sm:$0xff] }
 0x1d2   :  { %3881 = vmatpush.bf16.msrb.mxu0 %v3172_v53  ;;  %v1388_v47 = vunpack.c.3.s8 %v724_v40  ;;  %v1508_v30 = vunpack.c.2.s8 %v756_v44  ;;  %v3308_v18 = vpack.c.bf16 %v2700_v49, %v2692_v14  ;;  %v10401_v22 = vadd.f32 %v10348_v6, %v3652_v45  ;;  %v621_v6 = vld [vmem:[%s12149_s4 + $0xe8] sm:$0xff] }
 0x1d3   :  { %3894 = vmatpush.bf16.msrb.mxu1 %v3236_v60  ;;  %v2404_v10 = vcvt.s32.f32 %v1380_v33  ;;  %v1516_v28 = vunpack.c.3.s8 %v756_v44  ;;  %v3372_v4 = vpack.c.bf16 %v2828_v38, %v2820_v63  ;;  %v1652_v59 = vunpack.c.0.s8 %v796_v23 }
 0x1d4   :  { %v2412_v13 = vcvt.s32.f32 %v1388_v47  ;;  %v2532_v3 = vcvt.s32.f32 %v1508_v30  ;;  %3906 = vmatpush.bf16.msrb.mxu2 %v3308_v18  ;;  %v1660_v54 = vunpack.c.1.s8 %v796_v23  ;;  %v1780_v52 = vunpack.c.0.s8 %v828_v42  ;;  %v3679_v23 = vpop.f32.mrf.mxu0 }
 0x1d5   :  { %v2540_v29 = vcvt.s32.f32 %v1516_v28  ;;  %v1788_v62 = vunpack.c.1.s8 %v828_v42  ;;  %3919 = vmatpush.bf16.msrb.mxu3 %v3372_v4  ;;  %v2676_v12 = vcvt.s32.f32 %v1652_v59  ;;  %v1364_v46 = vunpack.c.0.s8 %v724_v40 }
 0x1d6   :  { %v3164_v61 = vpack.c.bf16 %v2412_v13, %v2404_v10  ;;  %v1372_v34 = vunpack.c.1.s8 %v724_v40  ;;  %v2684_v58 = vcvt.s32.f32 %v1660_v54  ;;  %v2804_v5 = vcvt.s32.f32 %v1780_v52  ;;  %v788_v40 = vld [vmem:[%s12149_s4 + $0x620] sm:$0xff] }
 0x1d7   :  { %v3228_v17 = vpack.c.bf16 %v2540_v29, %v2532_v3  ;;  %v2812_v21 = vcvt.s32.f32 %v1788_v62  ;;  %v2388_v42 = vcvt.s32.f32 %v1364_v46  ;;  %v1492_v43 = vunpack.c.0.s8 %v756_v44 }
 0x1d8   :  { %3882 = vmatpush.bf16.msrb.mxu0 %v3164_v61  ;;  %v2396_v57 = vcvt.s32.f32 %v1372_v34  ;;  %v1500_v26 = vunpack.c.1.s8 %v756_v44  ;;  %v3300_v41 = vpack.c.bf16 %v2684_v58, %v2676_v12  ;;  %v965_v14 = vunpack.c.2.s8 %v621_v6  ;;  %v10417_v58 = vpop.f32.mrf.mxu3 }
 0x1d9   :  { %3895 = vmatpush.bf16.msrb.mxu1 %v3228_v17  ;;  %v3364_v53 = vpack.c.bf16 %v2812_v21, %v2804_v5  ;;  %v973_v24 = vunpack.c.3.s8 %v621_v6  ;;  %v2516_v49 = vcvt.s32.f32 %v1492_v43  ;;  %v1093_v33 = vunpack.c.2.s8 %v653_v20  ;;  %v10415_v17 = vpop.f32.mrf.mxu2 }
 0x1da   :  { %v3156_v60 = vpack.c.bf16 %v2396_v57, %v2388_v42  ;;  %v2524_v45 = vcvt.s32.f32 %v1500_v26  ;;  %3907 = vmatpush.bf16.msrb.mxu2 %v3300_v41  ;;  %v1989_v44 = vcvt.s32.f32 %v965_v14  ;;  %v1101_v38 = vunpack.c.3.s8 %v653_v20  ;;  %v685_v42 = vld [vmem:[%s12149_s4 + $0x2e8] sm:$0xff] }
 0x1db   :  { %3920 = vmatpush.bf16.msrb.mxu3 %v3364_v53  ;;  %v1997_v63 = vcvt.s32.f32 %v973_v24  ;;  %v1636_v47 = vunpack.c.2.s8 %v788_v40  ;;  %v2117_v18 = vcvt.s32.f32 %v1093_v33  ;;  %v1644_v10 = vunpack.c.3.s8 %v788_v40 }
 0x1dc   :  { %3883 = vmatpush.bf16.msrb.mxu0 %v3156_v60  ;;  %v3220_v30 = vpack.c.bf16 %v2524_v45, %v2516_v49  ;;  %v1764_v28 = vunpack.c.2.s8 %v820_v16  ;;  %v2125_v13 = vcvt.s32.f32 %v1101_v38  ;;  %v1772_v59 = vunpack.c.3.s8 %v820_v16  ;;  %v10430_v60 = vld [vmem:[%s12149_s4 + $0xa8] sm:$0xff] }
 0x1dd   :  { %v2957_v4 = vpack.c.bf16 %v1997_v63, %v1989_v44  ;;  %v2660_v3 = vcvt.s32.f32 %v1636_v47  ;;  %v2668_v29 = vcvt.s32.f32 %v1644_v10  ;;  %v949_v52 = vunpack.c.0.s8 %v621_v6 }
 0x1de   :  { %3896 = vmatpush.bf16.msrb.mxu1 %v3220_v30  ;;  %v2788_v54 = vcvt.s32.f32 %v1764_v28  ;;  %v957_v62 = vunpack.c.1.s8 %v621_v6  ;;  %v3021_v61 = vpack.c.bf16 %v2125_v13, %v2117_v18  ;;  %v2796_v12 = vcvt.s32.f32 %v1772_v59  ;;  %v645_v30 = vld [vmem:[%s12149_s4 + $0x1a8] sm:$0xff] }
 0x1df   :  { %v1077_v46 = vunpack.c.0.s8 %v653_v20  ;;  %v1085_v34 = vunpack.c.1.s8 %v653_v20  ;;  %v3292_v5 = vpack.c.bf16 %v2668_v29, %v2660_v3  ;;  %3884 = vmatmul.bf16.vlgmr.msrb.gmra.mxu0 %v9661_v8  ;;  %v1973_v21 = vcvt.s32.f32 %v949_v52  ;;  %v717_v20 = vld [vmem:[%s12149_s4 + $0x3e8] sm:$0xff] }
 0x1e0   :  { %3928 = vmatpush.bf16.msra.mxu0 %v2957_v4  ;;  %v1981_v23 = vcvt.s32.f32 %v957_v62  ;;  %v1620_v37 = vunpack.c.0.s8 %v788_v40  ;;  %v3356_v6 = vpack.c.bf16 %v2796_v12, %v2788_v54  ;;  %v1628_v26 = vunpack.c.1.s8 %v788_v40  ;;  %v3718_v12 = vpop.f32.mrf.mxu3 }
 0x1e1   :  { %v2101_v57 = vcvt.s32.f32 %v1077_v46  ;;  %v2109_v43 = vcvt.s32.f32 %v1085_v34  ;;  %3908 = vmatpush.bf16.msrb.mxu2 %v3292_v5  ;;  %3897 = vmatmul.bf16.vlgmr.msrb.gmra.mxu1 %v9663_v25  ;;  %v1748_v14 = vunpack.c.0.s8 %v820_v16  ;;  %v1756_v24 = vunpack.c.1.s8 %v820_v16 }
 0x1e2   :  { %3941 = vmatpush.bf16.msra.mxu1 %v3021_v61  ;;  %v2949_v41 = vpack.c.bf16 %v1981_v23, %v1973_v21  ;;  %v2644_v53 = vcvt.s32.f32 %v1620_v37  ;;  %3921 = vmatpush.bf16.msrb.mxu3 %v3356_v6  ;;  %v2652_v45 = vcvt.s32.f32 %v1628_v26  ;;  %v1221_v40 = vunpack.c.2.s8 %v685_v42  ;;  %v3705_v61 = vpop.f32.mrf.mxu2 }
 0x1e3   :  { %v3013_v49 = vpack.c.bf16 %v2109_v43, %v2101_v57  ;;  %v1229_v33 = vunpack.c.3.s8 %v685_v42  ;;  %v2772_v44 = vcvt.s32.f32 %v1748_v14  ;;  %v2780_v63 = vcvt.s32.f32 %v1756_v24  ;;  %v677_v14 = vld [vmem:[%s12149_s4 + $0x2a8] sm:$0xff] }
 0x1e4   :  { %3929 = vmatpush.bf16.msra.mxu0 %v2949_v41  ;;  %v1349_v38 = vunpack.c.2.s8 %v717_v20  ;;  %v1357_v47 = vunpack.c.3.s8 %v717_v20  ;;  %v3284_v16 = vpack.c.bf16 %v2652_v45, %v2644_v53  ;;  %v2245_v18 = vcvt.s32.f32 %v1221_v40  ;;  %v709_v45 = vld [vmem:[%s12149_s4 + $0x3a8] sm:$0xff] }
 0x1e5   :  { %v2253_v10 = vcvt.s32.f32 %v1229_v33  ;;  %v933_v28 = vunpack.c.2.s8 %v10430_v60  ;;  %v3348_v4 = vpack.c.bf16 %v2780_v63, %v2772_v44  ;;  %v941_v59 = vunpack.c.3.s8 %v10430_v60  ;;  %v605_v44 = vld [vmem:[%s12149_s4 + $0x68] sm:$0xff] }
 0x1e6   :  { %3942 = vmatpush.bf16.msra.mxu1 %v3013_v49  ;;  %v2373_v13 = vcvt.s32.f32 %v1349_v38  ;;  %v2381_v3 = vcvt.s32.f32 %v1357_v47  ;;  %3909 = vmatpush.bf16.msrb.mxu2 %v3284_v16  ;;  %v1061_v52 = vunpack.c.2.s8 %v645_v30  ;;  %v1069_v62 = vunpack.c.3.s8 %v645_v30 }
 0x1e7   :  { %v3085_v29 = vpack.c.bf16 %v2253_v10, %v2245_v18  ;;  %v1957_v54 = vcvt.s32.f32 %v933_v28  ;;  %3922 = vmatpush.bf16.msrb.mxu3 %v3348_v4  ;;  %v1965_v34 = vcvt.s32.f32 %v941_v59  ;;  %v1205_v5 = vunpack.c.0.s8 %v685_v42 }
 0x1e8   :  { %v3149_v46 = vpack.c.bf16 %v2381_v3, %v2373_v13  ;;  %v1213_v21 = vunpack.c.1.s8 %v685_v42  ;;  %v2085_v23 = vcvt.s32.f32 %v1061_v52  ;;  %v2093_v37 = vcvt.s32.f32 %v1069_v62 }
 0x1e9   :  { %v1333_v6 = vunpack.c.0.s8 %v717_v20  ;;  %v1341_v57 = vunpack.c.1.s8 %v717_v20  ;;  %3910 = vmatmul.bf16.vlgmr.msrb.gmra.mxu2 %v9739_v0  ;;  %v2941_v43 = vpack.c.bf16 %v1965_v34, %v1957_v54  ;;  %v2229_v26 = vcvt.s32.f32 %v1205_v5 }
 0x1ea   :  { %3954 = vmatpush.bf16.msra.mxu2 %v3085_v29  ;;  %v2237_v41 = vcvt.s32.f32 %v1213_v21  ;;  %v3678_v53 = vadd.f32 %v10394_v39, %v10401_v22  ;;  %3923 = vmatmul.bf16.vlgmr.msrb.gmra.mxu3 %v9741_v31  ;;  %v3005_v42 = vpack.c.bf16 %v2093_v37, %v2085_v23  ;;  %v917_v20 = vunpack.c.0.s8 %v10430_v60 }
 0x1eb   :  { %3967 = vmatpush.bf16.msra.mxu3 %v3149_v46  ;;  %v2357_v24 = vcvt.s32.f32 %v1333_v6  ;;  %v2365_v49 = vcvt.s32.f32 %v1341_v57  ;;  %3930 = vmatpush.bf16.msra.mxu0 %v2941_v43  ;;  %v925_v39 = vunpack.c.1.s8 %v10430_v60  ;;  %v1045_v22 = vunpack.c.0.s8 %v645_v30 }
 0x1ec   :  { %v3077_v40 = vpack.c.bf16 %v2237_v41, %v2229_v26  ;;  %v10449_v33 = vadd.f32 %v10396_v36, %v3678_v53  ;;  %3943 = vmatpush.bf16.msra.mxu1 %v3005_v42  ;;  %v1941_v38 = vcvt.s32.f32 %v917_v20  ;;  %v1053_v47 = vunpack.c.1.s8 %v645_v30  ;;  %v637_v36 = vld [vmem:[%s12149_s4 + $0x168] sm:$0xff] }
 0x1ed   :  { %v3141_v63 = vpack.c.bf16 %v2365_v49, %v2357_v24  ;;  %v1189_v16 = vunpack.c.2.s8 %v677_v14  ;;  %v1949_v18 = vcvt.s32.f32 %v925_v39  ;;  %v2069_v10 = vcvt.s32.f32 %v1045_v22  ;;  %v669_v24 = vld [vmem:[%s12149_s4 + $0x268] sm:$0xff] }
 0x1ee   :  { %3955 = vmatpush.bf16.msra.mxu2 %v3077_v40  ;;  %v1197_v28 = vunpack.c.3.s8 %v677_v14  ;;  %v1317_v4 = vunpack.c.2.s8 %v709_v45  ;;  %v2077_v60 = vcvt.s32.f32 %v1053_v47  ;;  %v1325_v3 = vunpack.c.3.s8 %v709_v45  ;;  %v701_v47 = vld [vmem:[%s12149_s4 + $0x368] sm:$0xff] }
 0x1ef   :  { %3968 = vmatpush.bf16.msra.mxu3 %v3141_v63  ;;  %v2213_v13 = vcvt.s32.f32 %v1189_v16  ;;  %v901_v59 = vunpack.c.2.s8 %v605_v44  ;;  %v2933_v29 = vpack.c.bf16 %v1949_v18, %v1941_v38  ;;  %v909_v62 = vunpack.c.3.s8 %v605_v44 }
 0x1f0   :  { %v2221_v54 = vcvt.s32.f32 %v1197_v28  ;;  %v2341_v52 = vcvt.s32.f32 %v1317_v4  ;;  %v2997_v30 = vpack.c.bf16 %v2077_v60, %v2069_v10  ;;  %v2349_v61 = vcvt.s32.f32 %v1325_v3 }
 0x1f1   :  { %v1925_v12 = vcvt.s32.f32 %v901_v59  ;;  %v1029_v46 = vunpack.c.2.s8 %v637_v36  ;;  %3931 = vmatpush.bf16.msra.mxu0 %v2933_v29  ;;  %v1933_v5 = vcvt.s32.f32 %v909_v62  ;;  %v1037_v21 = vunpack.c.3.s8 %v637_v36 }
 0x1f2   :  { %v3069_v34 = vpack.c.bf16 %v2221_v54, %v2213_v13  ;;  %v1173_v23 = vunpack.c.0.s8 %v677_v14  ;;  %3944 = vmatpush.bf16.msra.mxu1 %v2997_v30  ;;  %v3133_v37 = vpack.c.bf16 %v2349_v61, %v2341_v52  ;;  %v1181_v57 = vunpack.c.1.s8 %v677_v14  ;;  %v10470_v54 = vld [vmem:[%s12149_s4 + $0x128] sm:$0xff] }
 0x1f3   :  { %v2053_v6 = vcvt.s32.f32 %v1029_v46  ;;  %v1301_v43 = vunpack.c.0.s8 %v709_v45  ;;  %v2925_v26 = vpack.c.bf16 %v1933_v5, %v1925_v12  ;;  %v2061_v41 = vcvt.s32.f32 %v1037_v21  ;;  %v10475_v12 = vpop.f32.mrf.mxu0  ;;  %v10477_v46 = vpop.f32.mrf.mxu1 }
 0x1f4   :  { %3956 = vmatpush.bf16.msra.mxu2 %v3069_v34  ;;  %v2197_v53 = vcvt.s32.f32 %v1173_v23  ;;  %v1309_v42 = vunpack.c.1.s8 %v709_v45  ;;  %3969 = vmatpush.bf16.msra.mxu3 %v3133_v37  ;;  %v2205_v49 = vcvt.s32.f32 %v1181_v57  ;;  %v885_v40 = vunpack.c.0.s8 %v605_v44 }
 0x1f5   :  { %v2325_v20 = vcvt.s32.f32 %v1301_v43  ;;  %v893_v39 = vunpack.c.1.s8 %v605_v44  ;;  %3932 = vmatpush.bf16.msra.mxu0 %v2925_v26  ;;  %v2989_v22 = vpack.c.bf16 %v2061_v41, %v2053_v6  ;;  %v1013_v38 = vunpack.c.0.s8 %v637_v36  ;;  %v597_v44 = vld [vmem:[%s12149_s4 + $0x28] sm:$0xff] }
 0x1f6   :  { %v2333_v63 = vcvt.s32.f32 %v1309_v42  ;;  %v1021_v14 = vunpack.c.1.s8 %v637_v36  ;;  %v3061_v16 = vpack.c.bf16 %v2205_v49, %v2197_v53  ;;  %v1909_v45 = vcvt.s32.f32 %v885_v40 }
 0x1f7   :  { %v1917_v18 = vcvt.s32.f32 %v893_v39  ;;  %v1157_v10 = vunpack.c.2.s8 %v669_v24  ;;  %3945 = vmatpush.bf16.msra.mxu1 %v2989_v22  ;;  %v2037_v4 = vcvt.s32.f32 %v1013_v38  ;;  %v1165_v13 = vunpack.c.3.s8 %v669_v24 }
 0x1f8   :  { %v3125_v28 = vpack.c.bf16 %v2333_v63, %v2325_v20  ;;  %v2045_v60 = vcvt.s32.f32 %v1021_v14  ;;  %3957 = vmatpush.bf16.msra.mxu2 %v3061_v16  ;;  %v1285_v59 = vunpack.c.2.s8 %v701_v47  ;;  %v1293_v29 = vunpack.c.3.s8 %v701_v47  ;;  %v749_v14 = vld [vmem:[%s12149_s4 + $0x4e8] sm:$0xff] }
 0x1f9   :  { %v2917_v3 = vpack.c.bf16 %v1917_v18, %v1909_v45  ;;  %v2181_v36 = vcvt.s32.f32 %v1157_v10  ;;  %v570_v52 = vmax.f32 %v10327_v15, 0.0  ;;  %v2189_v30 = vcvt.s32.f32 %v1165_v13  ;;  %v661_v13 = vld [vmem:[%s12149_s4 + $0x228] sm:$0xff] }
 0x1fa   :  { %3970 = vmatpush.bf16.msra.mxu3 %v3125_v28  ;;  %v2981_v62 = vpack.c.bf16 %v2045_v60, %v2037_v4  ;;  %v3704_v61 = vadd.f32 %v10415_v17, %v10449_v33  ;;  %v571_v34 = vmax.f32 %v10336_v50, 0.0  ;;  %v2309_v5 = vcvt.s32.f32 %v1285_v59 }
 0x1fb   :  { %3933 = vmatpush.bf16.msra.mxu0 %v2917_v3  ;;  %v2317_v21 = vcvt.s32.f32 %v1293_v29  ;;  %v869_v23 = vunpack.c.2.s8 %v597_v44  ;;  %v3053_v37 = vpack.c.bf16 %v2189_v30, %v2181_v36  ;;  %v877_v6 = vunpack.c.3.s8 %v597_v44  ;;  %v3731_v3 = vpop.f32.mrf.mxu0  ;;  %v3744_v36 = vpop.f32.mrf.mxu1 }
 0x1fc   :  { %3946 = vmatpush.bf16.msra.mxu1 %v2981_v62  ;;  %v10481_v15 = vadd.f32 %v10417_v58, %v3704_v61  ;;  %v997_v57 = vunpack.c.2.s8 %v10470_v54  ;;  %v1005_v33 = vunpack.c.3.s8 %v10470_v54  ;;  %v1141_v26 = vunpack.c.0.s8 %v669_v24 }
 0x1fd   :  { %v3117_v43 = vpack.c.bf16 %v2317_v21, %v2309_v5  ;;  %v1893_v17 = vcvt.s32.f32 %v869_v23  ;;  %v10485_v41 = vpack.c.bf16 %v570_v52, %v570_v52  ;;  %3958 = vmatpush.bf16.msra.mxu2 %v3053_v37  ;;  %v1901_v50 = vcvt.s32.f32 %v877_v6  ;;  %v693_v5 = vld [vmem:[%s12149_s4 + $0x328] sm:$0xff] }
 0x1fe   :  { %v2021_v53 = vcvt.s32.f32 %v997_v57  ;;  %v1149_v42 = vunpack.c.1.s8 %v669_v24  ;;  %v2029_v49 = vcvt.s32.f32 %v1005_v33  ;;  %v2165_v20 = vcvt.s32.f32 %v1141_v26  ;;  %v781_v24 = vld [vmem:[%s12149_s4 + $0x5e8] sm:$0xff] }
 0x1ff   :  { %3971 = vmatpush.bf16.msra.mxu3 %v3117_v43  ;;  %v1269_v40 = vunpack.c.0.s8 %v701_v47  ;;  %v1277_v58 = vunpack.c.1.s8 %v701_v47  ;;  %v10487_v39 = vpack.c.bf16 %v571_v34, %v571_v34  ;;  %v2909_v22 = vpack.c.bf16 %v1901_v50, %v1893_v17 }
 0x200   :  { %v2173_v63 = vcvt.s32.f32 %v1149_v42  ;;  %v853_v38 = vunpack.c.0.s8 %v597_v44  ;;  %v2973_v16 = vpack.c.bf16 %v2029_v49, %v2021_v53  ;;  %v861_v10 = vunpack.c.1.s8 %v597_v44 }
 0x201   :  { %v2293_v45 = vcvt.s32.f32 %v1269_v40  ;;  %v2301_v18 = vcvt.s32.f32 %v1277_v58  ;;  %v158_v28 = vperm.slane %v10306_v19, 4  ;;  %3934 = vmatpush.bf16.msra.mxu0 %v2909_v22  ;;  %v981_v60 = vunpack.c.0.s8 %v10470_v54 }
 0x202   :  { %v3045_v47 = vpack.c.bf16 %v2173_v63, %v2165_v20  ;;  %v1877_v4 = vcvt.s32.f32 %v853_v38  ;;  %3947 = vmatpush.bf16.msra.mxu1 %v2973_v16  ;;  %v1885_v44 = vcvt.s32.f32 %v861_v10  ;;  %v989_v29 = vunpack.c.1.s8 %v10470_v54  ;;  %v10504_v16 = vpop.f32.mrf.mxu2 }
 0x203   :  { %v3109_v59 = vpack.c.bf16 %v2301_v18, %v2293_v45  ;;  %v1477_v52 = vunpack.c.2.s8 %v749_v14  ;;  %v2005_v62 = vcvt.s32.f32 %v981_v60  ;;  %v1485_v30 = vunpack.c.3.s8 %v749_v14  ;;  %v10506_v45 = vpop.f32.mrf.mxu3  ;;  %v813_v60 = vld [vmem:[%s12149_s4 + $0x6e8] sm:$0xff] }
 0x204   :  { %3959 = vmatpush.bf16.msra.mxu2 %v3045_v47  ;;  %v1605_v61 = vunpack.c.2.s8 %v781_v24  ;;  %v1613_v34 = vunpack.c.3.s8 %v781_v24  ;;  %v2901_v21 = vpack.c.bf16 %v1885_v44, %v1877_v4  ;;  %v2013_v23 = vcvt.s32.f32 %v989_v29  ;;  %v845_v44 = vld [vmem:[%s12149_s4 + $0x7e8] sm:$0xff] }
 0x205   :  { %3972 = vmatpush.bf16.msra.mxu3 %v3109_v59  ;;  %v2501_v37 = vcvt.s32.f32 %v1477_v52  ;;  %v1125_v6 = vunpack.c.2.s8 %v661_v13  ;;  %v2509_v57 = vcvt.s32.f32 %v1485_v30  ;;  %v1133_v33 = vunpack.c.3.s8 %v661_v13 }
 0x206   :  { %v2629_v43 = vcvt.s32.f32 %v1605_v61  ;;  %v2637_v17 = vcvt.s32.f32 %v1613_v34  ;;  %3935 = vmatpush.bf16.msra.mxu0 %v2901_v21  ;;  %v2965_v54 = vpack.c.bf16 %v2013_v23, %v2005_v62  ;;  %v1253_v50 = vunpack.c.2.s8 %v693_v5 }
 0x207   :  { %v2149_v26 = vcvt.s32.f32 %v1125_v6  ;;  %v1261_v53 = vunpack.c.3.s8 %v693_v5  ;;  %v3213_v42 = vpack.c.bf16 %v2509_v57, %v2501_v37  ;;  %v2157_v20 = vcvt.s32.f32 %v1133_v33 }
 0x208   :  { %v3277_v49 = vpack.c.bf16 %v2637_v17, %v2629_v43  ;;  %v1461_v40 = vunpack.c.0.s8 %v749_v14  ;;  %3948 = vmatpush.bf16.msra.mxu1 %v2965_v54  ;;  %v2277_v58 = vcvt.s32.f32 %v1253_v50  ;;  %v1469_v63 = vunpack.c.1.s8 %v749_v14  ;;  %v773_v43 = vld [vmem:[%s12149_s4 + $0x5a8] sm:$0xff] }
 0x209   :  { %v2285_v22 = vcvt.s32.f32 %v1261_v53  ;;  %v1589_v38 = vunpack.c.0.s8 %v781_v24  ;;  %v3037_v18 = vpack.c.bf16 %v2157_v20, %v2149_v26  ;;  %v1597_v47 = vunpack.c.1.s8 %v781_v24  ;;  %3936 = vmatmul.bf16.vlgmr.msra.gmra.mxu0 %v9587_v35 }
 0x20a   :  { %3980 = vmatpush.bf16.msrb.mxu0 %v3213_v42  ;;  %v2485_v10 = vcvt.s32.f32 %v1461_v40  ;;  %v1109_v4 = vunpack.c.0.s8 %v661_v13  ;;  %v2493_v36 = vcvt.s32.f32 %v1469_v63  ;;  %v1117_v59 = vunpack.c.1.s8 %v661_v13  ;;  %v741_v13 = vld [vmem:[%s12149_s4 + $0x4a8] sm:$0xff] }
 0x20b   :  { %v3101_v3 = vpack.c.bf16 %v2285_v22, %v2277_v58  ;;  %v2613_v14 = vcvt.s32.f32 %v1589_v38  ;;  %3960 = vmatpush.bf16.msra.mxu2 %v3037_v18  ;;  %3949 = vmatmul.bf16.vlgmr.msra.gmra.mxu1 %v9589_v7  ;;  %v2621_v29 = vcvt.s32.f32 %v1597_v47  ;;  %v1237_v52 = vunpack.c.0.s8 %v693_v5  ;;  %v3757_v22 = vpop.f32.mrf.mxu2  ;;  %v3770_v63 = vpop.f32.mrf.mxu3 }
 0x20c   :  { %3993 = vmatpush.bf16.msrb.mxu1 %v3277_v49  ;;  %v2133_v24 = vcvt.s32.f32 %v1109_v4  ;;  %v1245_v62 = vunpack.c.1.s8 %v693_v5  ;;  %v3205_v30 = vpack.c.bf16 %v2493_v36, %v2485_v10  ;;  %v2141_v61 = vcvt.s32.f32 %v1117_v59 }
 0x20d   :  { %3973 = vmatpush.bf16.msra.mxu3 %v3101_v3  ;;  %v1733_v34 = vunpack.c.2.s8 %v813_v60  ;;  %v1741_v21 = vunpack.c.3.s8 %v813_v60  ;;  %v3269_v23 = vpack.c.bf16 %v2621_v29, %v2613_v14  ;;  %v2261_v37 = vcvt.s32.f32 %v1237_v52 }
 0x20e   :  { %v2269_v6 = vcvt.s32.f32 %v1245_v62  ;;  %v1861_v57 = vunpack.c.2.s8 %v845_v44  ;;  %3981 = vmatpush.bf16.msrb.mxu0 %v3205_v30  ;;  %v3029_v17 = vpack.c.bf16 %v2141_v61, %v2133_v24  ;;  %v1869_v54 = vunpack.c.3.s8 %v845_v44  ;;  %v805_v62 = vld [vmem:[%s12149_s4 + $0x6a8] sm:$0xff] }
 0x20f   :  { %v2757_v5 = vcvt.s32.f32 %v1733_v34  ;;  %v2765_v33 = vcvt.s32.f32 %v1741_v21  ;;  %v1445_v53 = vunpack.c.2.s8 %v741_v13  ;;  %v1453_v42 = vunpack.c.3.s8 %v741_v13  ;;  %v837_v21 = vld [vmem:[%s12149_s4 + $0x7a8] sm:$0xff] }
 0x210   :  { %3994 = vmatpush.bf16.msrb.mxu1 %v3269_v23  ;;  %v3093_v26 = vpack.c.bf16 %v2269_v6, %v2261_v37  ;;  %v2885_v50 = vcvt.s32.f32 %v1861_v57  ;;  %3961 = vmatpush.bf16.msra.mxu2 %v3029_v17  ;;  %v2893_v20 = vcvt.s32.f32 %v1869_v54  ;;  %v1573_v40 = vunpack.c.2.s8 %v773_v43 }
 0x211   :  { %v3341_v49 = vpack.c.bf16 %v2765_v33, %v2757_v5  ;;  %v1581_v58 = vunpack.c.3.s8 %v773_v43  ;;  %v2469_v38 = vcvt.s32.f32 %v1445_v53  ;;  %v2477_v18 = vcvt.s32.f32 %v1453_v42  ;;  %v765_v53 = vld [vmem:[%s12149_s4 + $0x568] sm:$0xff] }
 0x212   :  { %3974 = vmatpush.bf16.msra.mxu3 %v3093_v26  ;;  %v1717_v10 = vunpack.c.0.s8 %v813_v60  ;;  %v1725_v47 = vunpack.c.1.s8 %v813_v60  ;;  %v3405_v4 = vpack.c.bf16 %v2893_v20, %v2885_v50  ;;  %v2597_v3 = vcvt.s32.f32 %v1573_v40 }
 0x213   :  { %v2605_v36 = vcvt.s32.f32 %v1581_v58  ;;  %v1845_v14 = vunpack.c.0.s8 %v845_v44  ;;  %3962 = vmatmul.bf16.vlgmr.msra.gmra.mxu2 %v9647_v48  ;;  %v3197_v59 = vpack.c.bf16 %v2477_v18, %v2469_v38  ;;  %v1853_v52 = vunpack.c.1.s8 %v845_v44 }
 0x214   :  { %4006 = vmatpush.bf16.msrb.mxu2 %v3341_v49  ;;  %v2741_v29 = vcvt.s32.f32 %v1717_v10  ;;  %v2749_v24 = vcvt.s32.f32 %v1725_v47  ;;  %v10528_v60 = vadd.f32 %v10477_v46, %v10475_v12  ;;  %v1429_v34 = vunpack.c.0.s8 %v741_v13  ;;  %v733_v12 = vld [vmem:[%s12149_s4 + $0x468] sm:$0xff] }
 0x215   :  { %v3261_v30 = vpack.c.bf16 %v2605_v36, %v2597_v3  ;;  %v2869_v61 = vcvt.s32.f32 %v1845_v14  ;;  %3975 = vmatmul.bf16.vlgmr.msra.gmra.mxu3 %v9649_v32  ;;  %3982 = vmatpush.bf16.msrb.mxu0 %v3197_v59  ;;  %v2877_v23 = vcvt.s32.f32 %v1853_v52  ;;  %v1437_v37 = vunpack.c.1.s8 %v741_v13 }
 0x216   :  { %4019 = vmatpush.bf16.msrb.mxu3 %v3405_v4  ;;  %v3333_v44 = vpack.c.bf16 %v2749_v24, %v2741_v29  ;;  %v1557_v6 = vunpack.c.0.s8 %v773_v43  ;;  %v2453_v57 = vcvt.s32.f32 %v1429_v34  ;;  %v1565_v17 = vunpack.c.1.s8 %v773_v43 }
 0x217   :  { %3995 = vmatpush.bf16.msrb.mxu1 %v3261_v30  ;;  %v1701_v5 = vunpack.c.2.s8 %v805_v62  ;;  %v1709_v33 = vunpack.c.3.s8 %v805_v62  ;;  %v3397_v46 = vpack.c.bf16 %v2877_v23, %v2869_v61  ;;  %v2461_v54 = vcvt.s32.f32 %v1437_v37 }
 0x218   :  { %4007 = vmatpush.bf16.msrb.mxu2 %v3333_v44  ;;  %v2581_v26 = vcvt.s32.f32 %v1557_v6  ;;  %v1829_v50 = vunpack.c.2.s8 %v837_v21  ;;  %v2589_v13 = vcvt.s32.f32 %v1565_v17  ;;  %v1837_v20 = vunpack.c.3.s8 %v837_v21  ;;  %v797_v44 = vld [vmem:[%s12149_s4 + $0x668] sm:$0xff] }
 0x219   :  { %v2725_v42 = vcvt.s32.f32 %v1701_v5  ;;  %v2733_v49 = vcvt.s32.f32 %v1709_v33  ;;  %v3189_v43 = vpack.c.bf16 %v2461_v54, %v2453_v57  ;;  %v1413_v58 = vunpack.c.2.s8 %v733_v12 }
 0x21a   :  { %4020 = vmatpush.bf16.msrb.mxu3 %v3397_v46  ;;  %v2853_v40 = vcvt.s32.f32 %v1829_v50  ;;  %v1421_v22 = vunpack.c.3.s8 %v733_v12  ;;  %v3253_v63 = vpack.c.bf16 %v2589_v13, %v2581_v26  ;;  %v2861_v18 = vcvt.s32.f32 %v1837_v20  ;;  %v725_v13 = vld [vmem:[%s12149_s4 + $0x428] sm:$0xff] }
 0x21b   :  { %v3325_v38 = vpack.c.bf16 %v2733_v49, %v2725_v42  ;;  %v1541_v10 = vunpack.c.2.s8 %v765_v53  ;;  %3983 = vmatpush.bf16.msrb.mxu0 %v3189_v43  ;;  %v2437_v47 = vcvt.s32.f32 %v1413_v58  ;;  %v1549_v3 = vunpack.c.3.s8 %v765_v53  ;;  %v10552_v43 = vpop.f32.mrf.mxu0 }
 0x21c   :  { %v2445_v4 = vcvt.s32.f32 %v1421_v22  ;;  %v1685_v36 = vunpack.c.0.s8 %v805_v62  ;;  %3996 = vmatpush.bf16.msrb.mxu1 %v3253_v63  ;;  %v3389_v14 = vpack.c.bf16 %v2861_v18, %v2853_v40  ;;  %v1693_v29 = vunpack.c.1.s8 %v805_v62  ;;  %v829_v62 = vld [vmem:[%s12149_s4 + $0x768] sm:$0xff]  ;;  %v10554_v40 = vpop.f32.mrf.mxu1 }
 0x21d   :  { %4008 = vmatpush.bf16.msrb.mxu2 %v3325_v38  ;;  %v2565_v59 = vcvt.s32.f32 %v1541_v10  ;;  %v1813_v24 = vunpack.c.0.s8 %v837_v21  ;;  %v2573_v30 = vcvt.s32.f32 %v1549_v3  ;;  %v1821_v34 = vunpack.c.1.s8 %v837_v21 }
 0x21e   :  { %v3181_v52 = vpack.c.bf16 %v2445_v4, %v2437_v47  ;;  %v2709_v61 = vcvt.s32.f32 %v1685_v36  ;;  %4021 = vmatpush.bf16.msrb.mxu3 %v3389_v14  ;;  %v2717_v23 = vcvt.s32.f32 %v1693_v29  ;;  %v1397_v6 = vunpack.c.0.s8 %v733_v12 }
 0x21f   :  { %v2837_v37 = vcvt.s32.f32 %v1813_v24  ;;  %v1405_v57 = vunpack.c.1.s8 %v733_v12  ;;  %v3245_v17 = vpack.c.bf16 %v2573_v30, %v2565_v59  ;;  %v2845_v5 = vcvt.s32.f32 %v1821_v34 }
 0x220   :  { %3984 = vmatpush.bf16.msrb.mxu0 %v3181_v52  ;;  %v1525_v33 = vunpack.c.0.s8 %v765_v53  ;;  %v1533_v46 = vunpack.c.1.s8 %v765_v53  ;;  %v3317_v54 = vpack.c.bf16 %v2717_v23, %v2709_v61  ;;  %v2421_v21 = vcvt.s32.f32 %v1397_v6  ;;  %v757_v53 = vld [vmem:[%s12149_s4 + $0x528] sm:$0xff] }
 0x221   :  { %v2429_v26 = vcvt.s32.f32 %v1405_v57  ;;  %v1669_v50 = vunpack.c.2.s8 %v797_v44  ;;  %3997 = vmatpush.bf16.msrb.mxu1 %v3245_v17  ;;  %v3381_v42 = vpack.c.bf16 %v2845_v5, %v2837_v37  ;;  %v1677_v20 = vunpack.c.3.s8 %v797_v44 }
 0x222   :  { %v2549_v12 = vcvt.s32.f32 %v1525_v33  ;;  %v2557_v49 = vcvt.s32.f32 %v1533_v46  ;;  %4009 = vmatpush.bf16.msrb.mxu2 %v3317_v54  ;;  %v1797_v63 = vunpack.c.2.s8 %v829_v62  ;;  %v1805_v38 = vunpack.c.3.s8 %v829_v62 }
 0x223   :  { %v3173_v58 = vpack.c.bf16 %v2429_v26, %v2421_v21  ;;  %v2693_v22 = vcvt.s32.f32 %v1669_v50  ;;  %4022 = vmatpush.bf16.msrb.mxu3 %v3381_v42  ;;  %v2701_v10 = vcvt.s32.f32 %v1677_v20  ;;  %v3756_v47 = vadd.f32 %v10504_v16, %v10528_v60  ;;  %v654_v42 = vld [vmem:[%s12149_s4 + $0x1f0] sm:$0xff] }
 0x224   :  { %v3237_v18 = vpack.c.bf16 %v2557_v49, %v2549_v12  ;;  %v1381_v4 = vunpack.c.2.s8 %v725_v13  ;;  %v2821_v3 = vcvt.s32.f32 %v1797_v63  ;;  %v2829_v36 = vcvt.s32.f32 %v1805_v38  ;;  %v3796_v12 = vpop.f32.mrf.mxu1 }
 0x225   :  { %3985 = vmatpush.bf16.msrb.mxu0 %v3173_v58  ;;  %v1389_v14 = vunpack.c.3.s8 %v725_v13  ;;  %v1509_v59 = vunpack.c.2.s8 %v757_v53  ;;  %v3309_v29 = vpack.c.bf16 %v2701_v10, %v2693_v22  ;;  %v10559_v24 = vadd.f32 %v10506_v45, %v3756_v47  ;;  %v622_v45 = vld [vmem:[%s12149_s4 + $0xf0] sm:$0xff]  ;;  %v821_v10 = vld [vmem:[%s12149_s4 + $0x728] sm:$0xff] }
 0x226   :  { %3998 = vmatpush.bf16.msrb.mxu1 %v3237_v18  ;;  %v2405_v52 = vcvt.s32.f32 %v1381_v4  ;;  %v1517_v30 = vunpack.c.3.s8 %v757_v53  ;;  %v3373_v61 = vpack.c.bf16 %v2829_v36, %v2821_v3  ;;  %v1653_v37 = vunpack.c.0.s8 %v797_v44 }
 0x227   :  { %v2413_v34 = vcvt.s32.f32 %v1389_v14  ;;  %v2533_v23 = vcvt.s32.f32 %v1509_v59  ;;  %4010 = vmatpush.bf16.msrb.mxu2 %v3309_v29  ;;  %v1661_v16 = vunpack.c.1.s8 %v797_v44  ;;  %v1781_v60 = vunpack.c.0.s8 %v829_v62  ;;  %v3783_v44 = vpop.f32.mrf.mxu0 }
 0x228   :  { %v2541_v6 = vcvt.s32.f32 %v1517_v30  ;;  %v1789_v57 = vunpack.c.1.s8 %v829_v62  ;;  %4023 = vmatpush.bf16.msrb.mxu3 %v3373_v61  ;;  %v2677_v5 = vcvt.s32.f32 %v1653_v37  ;;  %v1365_v33 = vunpack.c.0.s8 %v725_v13 }
 0x229   :  { %v3165_v17 = vpack.c.bf16 %v2413_v34, %v2405_v52  ;;  %v1373_v46 = vunpack.c.1.s8 %v725_v13  ;;  %v2685_v21 = vcvt.s32.f32 %v1661_v16  ;;  %v2805_v26 = vcvt.s32.f32 %v1781_v60  ;;  %v789_v13 = vld [vmem:[%s12149_s4 + $0x628] sm:$0xff] }
 0x22a   :  { %v3229_v54 = vpack.c.bf16 %v2541_v6, %v2533_v23  ;;  %v2813_v50 = vcvt.s32.f32 %v1789_v57  ;;  %v2389_v62 = vcvt.s32.f32 %v1365_v33  ;;  %v1493_v20 = vunpack.c.0.s8 %v757_v53 }
 0x22b   :  { %3986 = vmatpush.bf16.msrb.mxu0 %v3165_v17  ;;  %v2397_v49 = vcvt.s32.f32 %v1373_v46  ;;  %v1501_v58 = vunpack.c.1.s8 %v757_v53  ;;  %v3301_v22 = vpack.c.bf16 %v2685_v21, %v2677_v5  ;;  %v966_v38 = vunpack.c.2.s8 %v622_v45 }
 0x22c   :  { %3999 = vmatpush.bf16.msrb.mxu1 %v3229_v54  ;;  %v3365_v63 = vpack.c.bf16 %v2813_v50, %v2805_v26  ;;  %v974_v18 = vunpack.c.3.s8 %v622_v45  ;;  %v2517_v4 = vcvt.s32.f32 %v1493_v20  ;;  %v1094_v36 = vunpack.c.2.s8 %v654_v42  ;;  %v10573_v26 = vpop.f32.mrf.mxu2  ;;  %v10575_v50 = vpop.f32.mrf.mxu3  ;;  %v686_v20 = vld [vmem:[%s12149_s4 + $0x2f0] sm:$0xff] }
 0x22d   :  { %v3157_v47 = vpack.c.bf16 %v2397_v49, %v2389_v62  ;;  %v2525_v3 = vcvt.s32.f32 %v1501_v58  ;;  %4011 = vmatpush.bf16.msrb.mxu2 %v3301_v22  ;;  %v1990_v53 = vcvt.s32.f32 %v966_v38  ;;  %v1102_v59 = vunpack.c.3.s8 %v654_v42 }
 0x22e   :  { %4024 = vmatpush.bf16.msrb.mxu3 %v3365_v63  ;;  %v1998_v14 = vcvt.s32.f32 %v974_v18  ;;  %v1637_v29 = vunpack.c.2.s8 %v789_v13  ;;  %v2118_v30 = vcvt.s32.f32 %v1094_v36  ;;  %v1645_v61 = vunpack.c.3.s8 %v789_v13 }
 0x22f   :  { %3987 = vmatpush.bf16.msrb.mxu0 %v3157_v47  ;;  %v3221_v52 = vpack.c.bf16 %v2525_v3, %v2517_v4  ;;  %v1765_v34 = vunpack.c.2.s8 %v821_v10  ;;  %v2126_v37 = vcvt.s32.f32 %v1102_v59  ;;  %v1773_v16 = vunpack.c.3.s8 %v821_v10  ;;  %v10588_v3 = vld [vmem:[%s12149_s4 + $0xb0] sm:$0xff] }
 0x230   :  { %v2958_v23 = vpack.c.bf16 %v1998_v14, %v1990_v53  ;;  %v2661_v6 = vcvt.s32.f32 %v1637_v29  ;;  %v2669_v60 = vcvt.s32.f32 %v1645_v61  ;;  %v950_v17 = vunpack.c.0.s8 %v622_v45  ;;  %v646_v61 = vld [vmem:[%s12149_s4 + $0x1b0] sm:$0xff] }
 0x231   :  { %4000 = vmatpush.bf16.msrb.mxu1 %v3221_v52  ;;  %v2789_v57 = vcvt.s32.f32 %v1765_v34  ;;  %v958_v5 = vunpack.c.1.s8 %v622_v45  ;;  %v3022_v33 = vpack.c.bf16 %v2126_v37, %v2118_v30  ;;  %v2797_v46 = vcvt.s32.f32 %v1773_v16 }
 0x232   :  { %v1078_v54 = vunpack.c.0.s8 %v654_v42  ;;  %v1086_v21 = vunpack.c.1.s8 %v654_v42  ;;  %v3293_v44 = vpack.c.bf16 %v2669_v60, %v2661_v6  ;;  %3988 = vmatmul.bf16.vlgmr.msrb.gmra.mxu0 %v9661_v8  ;;  %v1974_v12 = vcvt.s32.f32 %v950_v17  ;;  %v718_v42 = vld [vmem:[%s12149_s4 + $0x3f0] sm:$0xff] }
 0x233   :  { %4032 = vmatpush.bf16.msra.mxu0 %v2958_v23  ;;  %v1982_v62 = vcvt.s32.f32 %v958_v5  ;;  %v1621_v49 = vunpack.c.0.s8 %v789_v13  ;;  %v3357_v45 = vpack.c.bf16 %v2797_v46, %v2789_v57  ;;  %v1629_v63 = vunpack.c.1.s8 %v789_v13 }
 0x234   :  { %v2102_v58 = vcvt.s32.f32 %v1078_v54  ;;  %v2110_v22 = vcvt.s32.f32 %v1086_v21  ;;  %4012 = vmatpush.bf16.msrb.mxu2 %v3293_v44  ;;  %4001 = vmatmul.bf16.vlgmr.msrb.gmra.mxu1 %v9663_v25  ;;  %v1749_v47 = vunpack.c.0.s8 %v821_v10  ;;  %v1757_v4 = vunpack.c.1.s8 %v821_v10  ;;  %v3809_v54 = vpop.f32.mrf.mxu2  ;;  %v3822_v21 = vpop.f32.mrf.mxu3 }
 0x235   :  { %4045 = vmatpush.bf16.msra.mxu1 %v3022_v33  ;;  %v2950_v38 = vpack.c.bf16 %v1982_v62, %v1974_v12  ;;  %v2645_v18 = vcvt.s32.f32 %v1621_v49  ;;  %4025 = vmatpush.bf16.msrb.mxu3 %v3357_v45  ;;  %v2653_v53 = vcvt.s32.f32 %v1629_v63  ;;  %v1222_v13 = vunpack.c.2.s8 %v686_v20 }
 0x236   :  { %v3014_v36 = vpack.c.bf16 %v2110_v22, %v2102_v58  ;;  %v1230_v14 = vunpack.c.3.s8 %v686_v20  ;;  %v2773_v59 = vcvt.s32.f32 %v1749_v47  ;;  %v2781_v29 = vcvt.s32.f32 %v1757_v4 }
 0x237   :  { %4033 = vmatpush.bf16.msra.mxu0 %v2950_v38  ;;  %v1350_v52 = vunpack.c.2.s8 %v718_v42  ;;  %v1358_v30 = vunpack.c.3.s8 %v718_v42  ;;  %v3285_v10 = vpack.c.bf16 %v2653_v53, %v2645_v18  ;;  %v2246_v34 = vcvt.s32.f32 %v1222_v13 }
 0x238   :  { %v2254_v23 = vcvt.s32.f32 %v1230_v14  ;;  %v934_v37 = vunpack.c.2.s8 %v10588_v3  ;;  %v3349_v6 = vpack.c.bf16 %v2781_v29, %v2773_v59  ;;  %v942_v57 = vunpack.c.3.s8 %v10588_v3  ;;  %v710_v14 = vld [vmem:[%s12149_s4 + $0x3b0] sm:$0xff] }
 0x239   :  { %4046 = vmatpush.bf16.msra.mxu1 %v3014_v36  ;;  %v2374_v16 = vcvt.s32.f32 %v1350_v52  ;;  %v2382_v60 = vcvt.s32.f32 %v1358_v30  ;;  %4013 = vmatpush.bf16.msrb.mxu2 %v3285_v10  ;;  %v1062_v33 = vunpack.c.2.s8 %v646_v61  ;;  %v1070_v46 = vunpack.c.3.s8 %v646_v61  ;;  %v678_v36 = vld [vmem:[%s12149_s4 + $0x2b0] sm:$0xff] }
 0x23a   :  { %v3086_v17 = vpack.c.bf16 %v2254_v23, %v2246_v34  ;;  %v1958_v5 = vcvt.s32.f32 %v934_v37  ;;  %4026 = vmatpush.bf16.msrb.mxu3 %v3349_v6  ;;  %v1966_v12 = vcvt.s32.f32 %v942_v57  ;;  %v1206_v62 = vunpack.c.0.s8 %v686_v20  ;;  %v606_v52 = vld [vmem:[%s12149_s4 + $0x70] sm:$0xff] }
 0x23b   :  { %v3150_v44 = vpack.c.bf16 %v2382_v60, %v2374_v16  ;;  %v1214_v49 = vunpack.c.1.s8 %v686_v20  ;;  %v2086_v45 = vcvt.s32.f32 %v1062_v33  ;;  %v2094_v58 = vcvt.s32.f32 %v1070_v46 }
 0x23c   :  { %v1334_v22 = vunpack.c.0.s8 %v718_v42  ;;  %v1342_v63 = vunpack.c.1.s8 %v718_v42  ;;  %4014 = vmatmul.bf16.vlgmr.msrb.gmra.mxu2 %v9739_v0  ;;  %v2942_v38 = vpack.c.bf16 %v1966_v12, %v1958_v5  ;;  %v2230_v18 = vcvt.s32.f32 %v1206_v62 }
 0x23d   :  { %4058 = vmatpush.bf16.msra.mxu2 %v3086_v17  ;;  %v2238_v47 = vcvt.s32.f32 %v1214_v49  ;;  %v3782_v4 = vadd.f32 %v10552_v43, %v10559_v24  ;;  %4027 = vmatmul.bf16.vlgmr.msrb.gmra.mxu3 %v9741_v31  ;;  %v3006_v20 = vpack.c.bf16 %v2094_v58, %v2086_v45  ;;  %v918_v42 = vunpack.c.0.s8 %v10588_v3 }
 0x23e   :  { %4071 = vmatpush.bf16.msra.mxu3 %v3150_v44  ;;  %v2358_v53 = vcvt.s32.f32 %v1334_v22  ;;  %v2366_v13 = vcvt.s32.f32 %v1342_v63  ;;  %4034 = vmatpush.bf16.msra.mxu0 %v2942_v38  ;;  %v926_v43 = vunpack.c.1.s8 %v10588_v3  ;;  %v1046_v24 = vunpack.c.0.s8 %v646_v61 }
 0x23f   :  { %v3078_v59 = vpack.c.bf16 %v2238_v47, %v2230_v18  ;;  %v10607_v29 = vadd.f32 %v10554_v40, %v3782_v4  ;;  %4047 = vmatpush.bf16.msra.mxu1 %v3006_v20  ;;  %v1942_v10 = vcvt.s32.f32 %v918_v42  ;;  %v1054_v34 = vunpack.c.1.s8 %v646_v61  ;;  %v638_v40 = vld [vmem:[%s12149_s4 + $0x170] sm:$0xff] }
 0x240   :  { %v3142_v30 = vpack.c.bf16 %v2366_v13, %v2358_v53  ;;  %v1190_v23 = vunpack.c.2.s8 %v678_v36  ;;  %v1950_v37 = vcvt.s32.f32 %v926_v43  ;;  %v2070_v6 = vcvt.s32.f32 %v1046_v24  ;;  %v670_v42 = vld [vmem:[%s12149_s4 + $0x270] sm:$0xff] }
 0x241   :  { %4059 = vmatpush.bf16.msra.mxu2 %v3078_v59  ;;  %v1198_v16 = vunpack.c.3.s8 %v678_v36  ;;  %v1318_v60 = vunpack.c.2.s8 %v710_v14  ;;  %v2078_v3 = vcvt.s32.f32 %v1054_v34  ;;  %v1326_v17 = vunpack.c.3.s8 %v710_v14 }
 0x242   :  { %4072 = vmatpush.bf16.msra.mxu3 %v3142_v30  ;;  %v2214_v57 = vcvt.s32.f32 %v1190_v23  ;;  %v902_v5 = vunpack.c.2.s8 %v606_v52  ;;  %v2934_v33 = vpack.c.bf16 %v1950_v37, %v1942_v10  ;;  %v910_v21 = vunpack.c.3.s8 %v606_v52  ;;  %v702_v37 = vld [vmem:[%s12149_s4 + $0x370] sm:$0xff] }
 0x243   :  { %v2222_v46 = vcvt.s32.f32 %v1198_v16  ;;  %v2342_v54 = vcvt.s32.f32 %v1318_v60  ;;  %v2998_v61 = vpack.c.bf16 %v2078_v3, %v2070_v6  ;;  %v2350_v44 = vcvt.s32.f32 %v1326_v17 }
 0x244   :  { %v1926_v12 = vcvt.s32.f32 %v902_v5  ;;  %v1030_v62 = vunpack.c.2.s8 %v638_v40  ;;  %4035 = vmatpush.bf16.msra.mxu0 %v2934_v33  ;;  %v1934_v45 = vcvt.s32.f32 %v910_v21  ;;  %v1038_v58 = vunpack.c.3.s8 %v638_v40  ;;  %v10628_v21 = vld [vmem:[%s12149_s4 + $0x130] sm:$0xff] }
 0x245   :  { %v3070_v49 = vpack.c.bf16 %v2222_v46, %v2214_v57  ;;  %v1174_v22 = vunpack.c.0.s8 %v678_v36  ;;  %4048 = vmatpush.bf16.msra.mxu1 %v2998_v61  ;;  %v3134_v63 = vpack.c.bf16 %v2350_v44, %v2342_v54  ;;  %v1182_v18 = vunpack.c.1.s8 %v678_v36 }
 0x246   :  { %v2054_v38 = vcvt.s32.f32 %v1030_v62  ;;  %v1302_v47 = vunpack.c.0.s8 %v710_v14  ;;  %v2926_v4 = vpack.c.bf16 %v1934_v45, %v1926_v12  ;;  %v2062_v20 = vcvt.s32.f32 %v1038_v58  ;;  %v10637_v45 = vpop.f32.mrf.mxu1  ;;  %v10639_v58 = vld [vmem:[#allocation2 + $0x8] sm:$0xff] }
 0x247   :  { %4060 = vmatpush.bf16.msra.mxu2 %v3070_v49  ;;  %v2198_v53 = vcvt.s32.f32 %v1174_v22  ;;  %v1310_v13 = vunpack.c.1.s8 %v710_v14  ;;  %4073 = vmatpush.bf16.msra.mxu3 %v3134_v63  ;;  %v2206_v59 = vcvt.s32.f32 %v1182_v18  ;;  %v886_v24 = vunpack.c.0.s8 %v606_v52  ;;  %v10635_v49 = vpop.f32.mrf.mxu0 }
 0x248   :  { %v2326_v43 = vcvt.s32.f32 %v1302_v47  ;;  %v894_v30 = vunpack.c.1.s8 %v606_v52  ;;  %4036 = vmatpush.bf16.msra.mxu0 %v2926_v4  ;;  %v2990_v10 = vpack.c.bf16 %v2062_v20, %v2054_v38  ;;  %v1014_v23 = vunpack.c.0.s8 %v638_v40  ;;  %v598_v52 = vld [vmem:[%s12149_s4 + $0x30] sm:$0xff] }
 0x249   :  { %v2334_v34 = vcvt.s32.f32 %v1310_v13  ;;  %v1022_v36 = vunpack.c.1.s8 %v638_v40  ;;  %v3062_v6 = vpack.c.bf16 %v2206_v59, %v2198_v53  ;;  %v1910_v14 = vcvt.s32.f32 %v886_v24 }
 0x24a   :  { %v1918_v16 = vcvt.s32.f32 %v894_v30  ;;  %v1158_v60 = vunpack.c.2.s8 %v670_v42  ;;  %4049 = vmatpush.bf16.msra.mxu1 %v2990_v10  ;;  %v2038_v57 = vcvt.s32.f32 %v1014_v23  ;;  %v1166_v5 = vunpack.c.3.s8 %v670_v42 }
 0x24b   :  { %v3126_v3 = vpack.c.bf16 %v2334_v34, %v2326_v43  ;;  %v2046_v17 = vcvt.s32.f32 %v1022_v36  ;;  %4061 = vmatpush.bf16.msra.mxu2 %v3062_v6  ;;  %v1286_v46 = vunpack.c.2.s8 %v702_v37  ;;  %v1294_v54 = vunpack.c.3.s8 %v702_v37 }
 0x24c   :  { %v2918_v33 = vpack.c.bf16 %v1918_v16, %v1910_v14  ;;  %v2182_v40 = vcvt.s32.f32 %v1158_v60  ;;  %v498_v61 = vadd.f32 %v10018_v51, %v158_v28  ;;  %v2190_v12 = vcvt.s32.f32 %v1166_v5  ;;  %v750_v14 = vld [vmem:[%s12149_s4 + $0x4f0] sm:$0xff] }
 0x24d   :  { %4074 = vmatpush.bf16.msra.mxu3 %v3126_v3  ;;  %v2982_v44 = vpack.c.bf16 %v2046_v17, %v2038_v57  ;;  %v3808_v62 = vadd.f32 %v10573_v26, %v10607_v29  ;;  %v159_v22 = vperm.slane %v10639_v58, 5  ;;  %v2310_v63 = vcvt.s32.f32 %v1286_v46 }
 0x24e   :  { %4037 = vmatpush.bf16.msra.mxu0 %v2918_v33  ;;  %v2318_v38 = vcvt.s32.f32 %v1294_v54  ;;  %v870_v19 = vunpack.c.2.s8 %v598_v52  ;;  %v3054_v51 = vpack.c.bf16 %v2190_v12, %v2182_v40  ;;  %v878_v18 = vunpack.c.3.s8 %v598_v52  ;;  %v662_v33 = vld [vmem:[%s12149_s4 + $0x230] sm:$0xff]  ;;  %v3848_v46 = vpop.f32.mrf.mxu1 }
 0x24f   :  { %4050 = vmatpush.bf16.msra.mxu1 %v2982_v44  ;;  %v10643_v28 = vadd.f32 %v10575_v50, %v3808_v62  ;;  %v998_v26 = vunpack.c.2.s8 %v10628_v21  ;;  %v1006_v4 = vunpack.c.3.s8 %v10628_v21  ;;  %v1142_v20 = vunpack.c.0.s8 %v670_v42  ;;  %v3835_v40 = vpop.f32.mrf.mxu0 }
 0x250   :  { %v3118_v29 = vpack.c.bf16 %v2318_v38, %v2310_v63  ;;  %v1894_v47 = vcvt.s32.f32 %v870_v19  ;;  %v572_v53 = vmax.f32 %v498_v61, 0.0  ;;  %4062 = vmatpush.bf16.msra.mxu2 %v3054_v51  ;;  %v1902_v13 = vcvt.s32.f32 %v878_v18  ;;  %v694_v38 = vld [vmem:[%s12149_s4 + $0x330] sm:$0xff] }
 0x251   :  { %v2022_v59 = vcvt.s32.f32 %v998_v26  ;;  %v1150_v43 = vunpack.c.1.s8 %v670_v42  ;;  %v2030_v24 = vcvt.s32.f32 %v1006_v4  ;;  %v2166_v30 = vcvt.s32.f32 %v1142_v20  ;;  %v782_v42 = vld [vmem:[%s12149_s4 + $0x5f0] sm:$0xff] }
 0x252   :  { %4075 = vmatpush.bf16.msra.mxu3 %v3118_v29  ;;  %v1270_v10 = vunpack.c.0.s8 %v702_v37  ;;  %v1278_v34 = vunpack.c.1.s8 %v702_v37  ;;  %v10648_v50 = vadd.f32 %v10020_v9, %v159_v22  ;;  %v2910_v23 = vpack.c.bf16 %v1902_v13, %v1894_v47 }
 0x253   :  { %v2174_v36 = vcvt.s32.f32 %v1150_v43  ;;  %v854_v6 = vunpack.c.0.s8 %v598_v52  ;;  %v2974_v16 = vpack.c.bf16 %v2030_v24, %v2022_v59  ;;  %v862_v57 = vunpack.c.1.s8 %v598_v52 }
 0x254   :  { %v2294_v60 = vcvt.s32.f32 %v1270_v10  ;;  %v2302_v3 = vcvt.s32.f32 %v1278_v34  ;;  %v10656_v17 = vpack.c.bf16 %v572_v53, %v572_v53  ;;  %4038 = vmatpush.bf16.msra.mxu0 %v2910_v23  ;;  %v982_v5 = vunpack.c.0.s8 %v10628_v21 }
 0x255   :  { %v3046_v9 = vpack.c.bf16 %v2174_v36, %v2166_v30  ;;  %v1878_v37 = vcvt.s32.f32 %v854_v6  ;;  %4051 = vmatpush.bf16.msra.mxu1 %v2974_v16  ;;  %v1886_v52 = vcvt.s32.f32 %v862_v57  ;;  %v990_v61 = vunpack.c.1.s8 %v10628_v21  ;;  %v10666_v16 = vpop.f32.mrf.mxu2 }
 0x256   :  { %v3110_v54 = vpack.c.bf16 %v2302_v3, %v2294_v60  ;;  %v1478_v44 = vunpack.c.2.s8 %v750_v14  ;;  %v2006_v12 = vcvt.s32.f32 %v982_v5  ;;  %v1486_v62 = vunpack.c.3.s8 %v750_v14  ;;  %v10668_v60 = vpop.f32.mrf.mxu3  ;;  %v814_v5 = vld [vmem:[%s12149_s4 + $0x6f0] sm:$0xff] }
 0x257   :  { %4063 = vmatpush.bf16.msra.mxu2 %v3046_v9  ;;  %v1606_v22 = vunpack.c.2.s8 %v782_v42  ;;  %v1614_v63 = vunpack.c.3.s8 %v782_v42  ;;  %v2902_v19 = vpack.c.bf16 %v1886_v52, %v1878_v37  ;;  %v2014_v51 = vcvt.s32.f32 %v990_v61  ;;  %v846_v52 = vld [vmem:[%s12149_s4 + $0x7f0] sm:$0xff] }
 0x258   :  { %4076 = vmatpush.bf16.msra.mxu3 %v3110_v54  ;;  %v2502_v18 = vcvt.s32.f32 %v1478_v44  ;;  %v1126_v26 = vunpack.c.2.s8 %v662_v33  ;;  %v2510_v29 = vcvt.s32.f32 %v1486_v62  ;;  %v1134_v20 = vunpack.c.3.s8 %v662_v33 }
 0x259   :  { %v2630_v47 = vcvt.s32.f32 %v1606_v22  ;;  %v2638_v4 = vcvt.s32.f32 %v1614_v63  ;;  %4039 = vmatpush.bf16.msra.mxu0 %v2902_v19  ;;  %v2966_v21 = vpack.c.bf16 %v2014_v51, %v2006_v12  ;;  %v1254_v13 = vunpack.c.2.s8 %v694_v38 }
 0x25a   :  { %v2150_v53 = vcvt.s32.f32 %v1126_v26  ;;  %v1262_v59 = vunpack.c.3.s8 %v694_v38  ;;  %v3214_v43 = vpack.c.bf16 %v2510_v29, %v2502_v18  ;;  %v2158_v30 = vcvt.s32.f32 %v1134_v20 }
 0x25b   :  { %v3278_v24 = vpack.c.bf16 %v2638_v4, %v2630_v47  ;;  %v1462_v10 = vunpack.c.0.s8 %v750_v14  ;;  %4052 = vmatpush.bf16.msra.mxu1 %v2966_v21  ;;  %v2278_v34 = vcvt.s32.f32 %v1254_v13  ;;  %v1470_v36 = vunpack.c.1.s8 %v750_v14  ;;  %v774_v47 = vld [vmem:[%s12149_s4 + $0x5b0] sm:$0xff] }
 0x25c   :  { %v2286_v23 = vcvt.s32.f32 %v1262_v59  ;;  %v1590_v6 = vunpack.c.0.s8 %v782_v42  ;;  %v3038_v3 = vpack.c.bf16 %v2158_v30, %v2150_v53  ;;  %v1598_v9 = vunpack.c.1.s8 %v782_v42  ;;  %4040 = vmatmul.bf16.vlgmr.msra.gmra.mxu0 %v9587_v35 }
 0x25d   :  { %4084 = vmatpush.bf16.msrb.mxu0 %v3214_v43  ;;  %v2486_v57 = vcvt.s32.f32 %v1462_v10  ;;  %v1110_v37 = vunpack.c.0.s8 %v662_v33  ;;  %v2494_v46 = vcvt.s32.f32 %v1470_v36  ;;  %v1118_v54 = vunpack.c.1.s8 %v662_v33  ;;  %v742_v33 = vld [vmem:[%s12149_s4 + $0x4b0] sm:$0xff] }
 0x25e   :  { %v3102_v40 = vpack.c.bf16 %v2286_v23, %v2278_v34  ;;  %v2614_v14 = vcvt.s32.f32 %v1590_v6  ;;  %4064 = vmatpush.bf16.msra.mxu2 %v3038_v3  ;;  %4053 = vmatmul.bf16.vlgmr.msra.gmra.mxu1 %v9589_v7  ;;  %v2622_v61 = vcvt.s32.f32 %v1598_v9  ;;  %v1238_v44 = vunpack.c.0.s8 %v694_v38  ;;  %v3861_v23 = vpop.f32.mrf.mxu2  ;;  %v3874_v36 = vpop.f32.mrf.mxu3 }
 0x25f   :  { %4097 = vmatpush.bf16.msrb.mxu1 %v3278_v24  ;;  %v2134_v42 = vcvt.s32.f32 %v1110_v37  ;;  %v1246_v12 = vunpack.c.1.s8 %v694_v38  ;;  %v3206_v62 = vpack.c.bf16 %v2494_v46, %v2486_v57  ;;  %v2142_v22 = vcvt.s32.f32 %v1118_v54 }
 0x260   :  { %4077 = vmatpush.bf16.msra.mxu3 %v3102_v40  ;;  %v1734_v63 = vunpack.c.2.s8 %v814_v5  ;;  %v1742_v19 = vunpack.c.3.s8 %v814_v5  ;;  %v3270_v51 = vpack.c.bf16 %v2622_v61, %v2614_v14  ;;  %v2262_v18 = vcvt.s32.f32 %v1238_v44 }
 0x261   :  { %v2270_v26 = vcvt.s32.f32 %v1246_v12  ;;  %v1862_v29 = vunpack.c.2.s8 %v846_v52  ;;  %4085 = vmatpush.bf16.msrb.mxu0 %v3206_v62  ;;  %v3030_v4 = vpack.c.bf16 %v2142_v22, %v2134_v42  ;;  %v1870_v21 = vunpack.c.3.s8 %v846_v52  ;;  %v806_v12 = vld [vmem:[%s12149_s4 + $0x6b0] sm:$0xff] }
 0x262   :  { %v2758_v38 = vcvt.s32.f32 %v1734_v63  ;;  %v2766_v20 = vcvt.s32.f32 %v1742_v19  ;;  %v1446_v59 = vunpack.c.2.s8 %v742_v33  ;;  %v1454_v43 = vunpack.c.3.s8 %v742_v33  ;;  %v838_v19 = vld [vmem:[%s12149_s4 + $0x7b0] sm:$0xff] }
 0x263   :  { %4098 = vmatpush.bf16.msrb.mxu1 %v3270_v51  ;;  %v3094_v53 = vpack.c.bf16 %v2270_v26, %v2262_v18  ;;  %v2886_v13 = vcvt.s32.f32 %v1862_v29  ;;  %4065 = vmatpush.bf16.msra.mxu2 %v3030_v4  ;;  %v2894_v30 = vcvt.s32.f32 %v1870_v21  ;;  %v1574_v10 = vunpack.c.2.s8 %v774_v47 }
 0x264   :  { %v3342_v24 = vpack.c.bf16 %v2766_v20, %v2758_v38  ;;  %v1582_v34 = vunpack.c.3.s8 %v774_v47  ;;  %v2470_v6 = vcvt.s32.f32 %v1446_v59  ;;  %v2478_v3 = vcvt.s32.f32 %v1454_v43  ;;  %v766_v59 = vld [vmem:[%s12149_s4 + $0x570] sm:$0xff] }
 0x265   :  { %4078 = vmatpush.bf16.msra.mxu3 %v3094_v53  ;;  %v1718_v57 = vunpack.c.0.s8 %v814_v5  ;;  %v1726_v9 = vunpack.c.1.s8 %v814_v5  ;;  %v3406_v37 = vpack.c.bf16 %v2894_v30, %v2886_v13  ;;  %v2598_v40 = vcvt.s32.f32 %v1574_v10 }
 0x266   :  { %v2606_v46 = vcvt.s32.f32 %v1582_v34  ;;  %v1846_v14 = vunpack.c.0.s8 %v846_v52  ;;  %4066 = vmatmul.bf16.vlgmr.msra.gmra.mxu2 %v9647_v48  ;;  %v3198_v54 = vpack.c.bf16 %v2478_v3, %v2470_v6  ;;  %v1854_v44 = vunpack.c.1.s8 %v846_v52 }
 0x267   :  { %4110 = vmatpush.bf16.msrb.mxu2 %v3342_v24  ;;  %v2742_v61 = vcvt.s32.f32 %v1718_v57  ;;  %v2750_v42 = vcvt.s32.f32 %v1726_v9  ;;  %v10690_v5 = vadd.f32 %v10637_v45, %v10635_v49  ;;  %v1430_v63 = vunpack.c.0.s8 %v742_v33  ;;  %v734_v49 = vld [vmem:[%s12149_s4 + $0x470] sm:$0xff] }
 0x268   :  { %v3262_v62 = vpack.c.bf16 %v2606_v46, %v2598_v40  ;;  %v2870_v22 = vcvt.s32.f32 %v1846_v14  ;;  %4079 = vmatmul.bf16.vlgmr.msra.gmra.mxu3 %v9649_v32  ;;  %4086 = vmatpush.bf16.msrb.mxu0 %v3198_v54  ;;  %v2878_v51 = vcvt.s32.f32 %v1854_v44  ;;  %v1438_v18 = vunpack.c.1.s8 %v742_v33 }
 0x269   :  { %4123 = vmatpush.bf16.msrb.mxu3 %v3406_v37  ;;  %v3334_v52 = vpack.c.bf16 %v2750_v42, %v2742_v61  ;;  %v1558_v26 = vunpack.c.0.s8 %v774_v47  ;;  %v2454_v29 = vcvt.s32.f32 %v1430_v63  ;;  %v1566_v4 = vunpack.c.1.s8 %v774_v47 }
 0x26a   :  { %4099 = vmatpush.bf16.msrb.mxu1 %v3262_v62  ;;  %v1702_v38 = vunpack.c.2.s8 %v806_v12  ;;  %v1710_v20 = vunpack.c.3.s8 %v806_v12  ;;  %v3398_v45 = vpack.c.bf16 %v2878_v51, %v2870_v22  ;;  %v2462_v21 = vcvt.s32.f32 %v1438_v18 }
 0x26b   :  { %4111 = vmatpush.bf16.msrb.mxu2 %v3334_v52  ;;  %v2582_v53 = vcvt.s32.f32 %v1558_v26  ;;  %v1830_v13 = vunpack.c.2.s8 %v838_v19  ;;  %v2590_v33 = vcvt.s32.f32 %v1566_v4  ;;  %v1838_v30 = vunpack.c.3.s8 %v838_v19  ;;  %v798_v52 = vld [vmem:[%s12149_s4 + $0x670] sm:$0xff] }
 0x26c   :  { %v2726_v43 = vcvt.s32.f32 %v1702_v38  ;;  %v2734_v24 = vcvt.s32.f32 %v1710_v20  ;;  %v3190_v47 = vpack.c.bf16 %v2462_v21, %v2454_v29  ;;  %v1414_v34 = vunpack.c.2.s8 %v734_v49 }
 0x26d   :  { %4124 = vmatpush.bf16.msrb.mxu3 %v3398_v45  ;;  %v2854_v10 = vcvt.s32.f32 %v1830_v13  ;;  %v1422_v23 = vunpack.c.3.s8 %v734_v49  ;;  %v3254_v36 = vpack.c.bf16 %v2590_v33, %v2582_v53  ;;  %v2862_v3 = vcvt.s32.f32 %v1838_v30  ;;  %v726_v33 = vld [vmem:[%s12149_s4 + $0x430] sm:$0xff] }
 0x26e   :  { %v3326_v6 = vpack.c.bf16 %v2734_v24, %v2726_v43  ;;  %v1542_v57 = vunpack.c.2.s8 %v766_v59  ;;  %4087 = vmatpush.bf16.msrb.mxu0 %v3190_v47  ;;  %v2438_v9 = vcvt.s32.f32 %v1414_v34  ;;  %v1550_v40 = vunpack.c.3.s8 %v766_v59  ;;  %v10714_v47 = vpop.f32.mrf.mxu0 }
 0x26f   :  { %v2446_v37 = vcvt.s32.f32 %v1422_v23  ;;  %v1686_v46 = vunpack.c.0.s8 %v806_v12  ;;  %4100 = vmatpush.bf16.msrb.mxu1 %v3254_v36  ;;  %v3390_v14 = vpack.c.bf16 %v2862_v3, %v2854_v10  ;;  %v1694_v61 = vunpack.c.1.s8 %v806_v12  ;;  %v830_v12 = vld [vmem:[%s12149_s4 + $0x770] sm:$0xff]  ;;  %v10716_v10 = vpop.f32.mrf.mxu1 }
 0x270   :  { %4112 = vmatpush.bf16.msrb.mxu2 %v3326_v6  ;;  %v2566_v54 = vcvt.s32.f32 %v1542_v57  ;;  %v1814_v42 = vunpack.c.0.s8 %v838_v19  ;;  %v2574_v62 = vcvt.s32.f32 %v1550_v40  ;;  %v1822_v63 = vunpack.c.1.s8 %v838_v19 }
 0x271   :  { %v3182_v44 = vpack.c.bf16 %v2446_v37, %v2438_v9  ;;  %v2710_v22 = vcvt.s32.f32 %v1686_v46  ;;  %4125 = vmatpush.bf16.msrb.mxu3 %v3390_v14  ;;  %v2718_v51 = vcvt.s32.f32 %v1694_v61  ;;  %v1398_v26 = vunpack.c.0.s8 %v734_v49 }
 0x272   :  { %v2838_v18 = vcvt.s32.f32 %v1814_v42  ;;  %v1406_v29 = vunpack.c.1.s8 %v734_v49  ;;  %v3246_v4 = vpack.c.bf16 %v2574_v62, %v2566_v54  ;;  %v2846_v38 = vcvt.s32.f32 %v1822_v63 }
 0x273   :  { %4088 = vmatpush.bf16.msrb.mxu0 %v3182_v44  ;;  %v1526_v20 = vunpack.c.0.s8 %v766_v59  ;;  %v1534_v45 = vunpack.c.1.s8 %v766_v59  ;;  %v3318_v21 = vpack.c.bf16 %v2718_v51, %v2710_v22  ;;  %v2422_v19 = vcvt.s32.f32 %v1398_v26  ;;  %v758_v59 = vld [vmem:[%s12149_s4 + $0x530] sm:$0xff] }
 0x274   :  { %v2430_v53 = vcvt.s32.f32 %v1406_v29  ;;  %v1670_v13 = vunpack.c.2.s8 %v798_v52  ;;  %4101 = vmatpush.bf16.msrb.mxu1 %v3246_v4  ;;  %v3382_v43 = vpack.c.bf16 %v2846_v38, %v2838_v18  ;;  %v1678_v30 = vunpack.c.3.s8 %v798_v52 }
 0x275   :  { %v2550_v49 = vcvt.s32.f32 %v1526_v20  ;;  %v2558_v24 = vcvt.s32.f32 %v1534_v45  ;;  %4113 = vmatpush.bf16.msrb.mxu2 %v3318_v21  ;;  %v1798_v36 = vunpack.c.2.s8 %v830_v12  ;;  %v1806_v6 = vunpack.c.3.s8 %v830_v12 }
 0x276   :  { %v3174_v34 = vpack.c.bf16 %v2430_v53, %v2422_v19  ;;  %v2694_v23 = vcvt.s32.f32 %v1670_v13  ;;  %4126 = vmatpush.bf16.msrb.mxu3 %v3382_v43  ;;  %v2702_v57 = vcvt.s32.f32 %v1678_v30  ;;  %v3860_v9 = vadd.f32 %v10666_v16, %v10690_v5  ;;  %v655_v43 = vld [vmem:[%s12149_s4 + $0x1f8] sm:$0xff] }
 0x277   :  { %v3238_v3 = vpack.c.bf16 %v2558_v24, %v2550_v49  ;;  %v1382_v37 = vunpack.c.2.s8 %v726_v33  ;;  %v2822_v40 = vcvt.s32.f32 %v1798_v36  ;;  %v2830_v46 = vcvt.s32.f32 %v1806_v6  ;;  %v3900_v49 = vpop.f32.mrf.mxu1 }
 0x278   :  { %4089 = vmatpush.bf16.msrb.mxu0 %v3174_v34  ;;  %v1390_v14 = vunpack.c.3.s8 %v726_v33  ;;  %v1510_v54 = vunpack.c.2.s8 %v758_v59  ;;  %v3310_v61 = vpack.c.bf16 %v2702_v57, %v2694_v23  ;;  %v10721_v42 = vadd.f32 %v10668_v60, %v3860_v9  ;;  %v623_v60 = vld [vmem:[%s12149_s4 + $0xf8] sm:$0xff]  ;;  %v822_v57 = vld [vmem:[%s12149_s4 + $0x730] sm:$0xff] }
 0x279   :  { %4102 = vmatpush.bf16.msrb.mxu1 %v3238_v3  ;;  %v2406_v44 = vcvt.s32.f32 %v1382_v37  ;;  %v1518_v62 = vunpack.c.3.s8 %v758_v59  ;;  %v3374_v22 = vpack.c.bf16 %v2830_v46, %v2822_v40  ;;  %v1654_v18 = vunpack.c.0.s8 %v798_v52 }
 0x27a   :  { %v2414_v63 = vcvt.s32.f32 %v1390_v14  ;;  %v2534_v51 = vcvt.s32.f32 %v1510_v54  ;;  %4114 = vmatpush.bf16.msrb.mxu2 %v3310_v61  ;;  %v1662_v16 = vunpack.c.1.s8 %v798_v52  ;;  %v1782_v5 = vunpack.c.0.s8 %v830_v12  ;;  %v3887_v52 = vpop.f32.mrf.mxu0 }
 0x27b   :  { %v2542_v26 = vcvt.s32.f32 %v1518_v62  ;;  %v1790_v29 = vunpack.c.1.s8 %v830_v12  ;;  %4127 = vmatpush.bf16.msrb.mxu3 %v3374_v22  ;;  %v2678_v38 = vcvt.s32.f32 %v1654_v18  ;;  %v1366_v20 = vunpack.c.0.s8 %v726_v33 }
 0x27c   :  { %v3166_v4 = vpack.c.bf16 %v2414_v63, %v2406_v44  ;;  %v1374_v45 = vunpack.c.1.s8 %v726_v33  ;;  %v2686_v19 = vcvt.s32.f32 %v1662_v16  ;;  %v2806_v53 = vcvt.s32.f32 %v1782_v5  ;;  %v790_v33 = vld [vmem:[%s12149_s4 + $0x630] sm:$0xff] }
 0x27d   :  { %v3230_v21 = vpack.c.bf16 %v2542_v26, %v2534_v51  ;;  %v2814_v13 = vcvt.s32.f32 %v1790_v29  ;;  %v2390_v12 = vcvt.s32.f32 %v1366_v20  ;;  %v1494_v30 = vunpack.c.0.s8 %v758_v59 }
 0x27e   :  { %4090 = vmatpush.bf16.msrb.mxu0 %v3166_v4  ;;  %v2398_v24 = vcvt.s32.f32 %v1374_v45  ;;  %v1502_v34 = vunpack.c.1.s8 %v758_v59  ;;  %v3302_v23 = vpack.c.bf16 %v2686_v19, %v2678_v38  ;;  %v967_v6 = vunpack.c.2.s8 %v623_v60 }
 0x27f   :  { %4103 = vmatpush.bf16.msrb.mxu1 %v3230_v21  ;;  %v3366_v36 = vpack.c.bf16 %v2814_v13, %v2806_v53  ;;  %v975_v3 = vunpack.c.3.s8 %v623_v60  ;;  %v2518_v37 = vcvt.s32.f32 %v1494_v30  ;;  %v1095_v46 = vunpack.c.2.s8 %v655_v43  ;;  %v10735_v53 = vpop.f32.mrf.mxu2  ;;  %v10737_v13 = vpop.f32.mrf.mxu3  ;;  %v687_v30 = vld [vmem:[%s12149_s4 + $0x2f8] sm:$0xff] }
 0x280   :  { %v3158_v9 = vpack.c.bf16 %v2398_v24, %v2390_v12  ;;  %v2526_v40 = vcvt.s32.f32 %v1502_v34  ;;  %4115 = vmatpush.bf16.msrb.mxu2 %v3302_v23  ;;  %v1991_v59 = vcvt.s32.f32 %v967_v6  ;;  %v1103_v54 = vunpack.c.3.s8 %v655_v43 }
 0x281   :  { %4128 = vmatpush.bf16.msrb.mxu3 %v3366_v36  ;;  %v1999_v14 = vcvt.s32.f32 %v975_v3  ;;  %v1638_v61 = vunpack.c.2.s8 %v790_v33  ;;  %v2119_v62 = vcvt.s32.f32 %v1095_v46  ;;  %v1646_v22 = vunpack.c.3.s8 %v790_v33 }
 0x282   :  { %4091 = vmatpush.bf16.msrb.mxu0 %v3158_v9  ;;  %v3222_v44 = vpack.c.bf16 %v2526_v40, %v2518_v37  ;;  %v1766_v63 = vunpack.c.2.s8 %v822_v57  ;;  %v2127_v18 = vcvt.s32.f32 %v1103_v54  ;;  %v1774_v16 = vunpack.c.3.s8 %v822_v57  ;;  %v10750_v40 = vld [vmem:[%s12149_s4 + $0xb8] sm:$0xff] }
 0x283   :  { %v2959_v51 = vpack.c.bf16 %v1999_v14, %v1991_v59  ;;  %v2662_v26 = vcvt.s32.f32 %v1638_v61  ;;  %v2670_v5 = vcvt.s32.f32 %v1646_v22  ;;  %v951_v4 = vunpack.c.0.s8 %v623_v60  ;;  %v647_v22 = vld [vmem:[%s12149_s4 + $0x1b8] sm:$0xff] }
 0x284   :  { %4104 = vmatpush.bf16.msrb.mxu1 %v3222_v44  ;;  %v2790_v29 = vcvt.s32.f32 %v1766_v63  ;;  %v959_v38 = vunpack.c.1.s8 %v623_v60  ;;  %v3023_v20 = vpack.c.bf16 %v2127_v18, %v2119_v62  ;;  %v2798_v45 = vcvt.s32.f32 %v1774_v16 }
 0x285   :  { %v1079_v21 = vunpack.c.0.s8 %v655_v43  ;;  %v1087_v19 = vunpack.c.1.s8 %v655_v43  ;;  %v3294_v52 = vpack.c.bf16 %v2670_v5, %v2662_v26  ;;  %4092 = vmatmul.bf16.vlgmr.msrb.gmra.mxu0 %v9661_v8  ;;  %v1975_v49 = vcvt.s32.f32 %v951_v4  ;;  %v719_v43 = vld [vmem:[%s12149_s4 + $0x3f8] sm:$0xff] }
 0x286   :  { %4136 = vmatpush.bf16.msra.mxu0 %v2959_v51  ;;  %v1983_v12 = vcvt.s32.f32 %v959_v38  ;;  %v1622_v24 = vunpack.c.0.s8 %v790_v33  ;;  %v3358_v60 = vpack.c.bf16 %v2798_v45, %v2790_v29  ;;  %v1630_v36 = vunpack.c.1.s8 %v790_v33 }
 0x287   :  { %v2103_v34 = vcvt.s32.f32 %v1079_v21  ;;  %v2111_v23 = vcvt.s32.f32 %v1087_v19  ;;  %4116 = vmatpush.bf16.msrb.mxu2 %v3294_v52  ;;  %4105 = vmatmul.bf16.vlgmr.msrb.gmra.mxu1 %v9663_v25  ;;  %v1750_v9 = vunpack.c.0.s8 %v822_v57  ;;  %v1758_v37 = vunpack.c.1.s8 %v822_v57  ;;  %v3913_v21 = vpop.f32.mrf.mxu2  ;;  %v3926_v19 = vpop.f32.mrf.mxu3 }
 0x288   :  { %4149 = vmatpush.bf16.msra.mxu1 %v3023_v20  ;;  %v2951_v6 = vpack.c.bf16 %v1983_v12, %v1975_v49  ;;  %v2646_v3 = vcvt.s32.f32 %v1622_v24  ;;  %4129 = vmatpush.bf16.msrb.mxu3 %v3358_v60  ;;  %v2654_v59 = vcvt.s32.f32 %v1630_v36  ;;  %v1223_v33 = vunpack.c.2.s8 %v687_v30 }
 0x289   :  { %v3015_v46 = vpack.c.bf16 %v2111_v23, %v2103_v34  ;;  %v1231_v14 = vunpack.c.3.s8 %v687_v30  ;;  %v2774_v54 = vcvt.s32.f32 %v1750_v9  ;;  %v2782_v61 = vcvt.s32.f32 %v1758_v37 }
 0x28a   :  { %4137 = vmatpush.bf16.msra.mxu0 %v2951_v6  ;;  %v1351_v44 = vunpack.c.2.s8 %v719_v43  ;;  %v1359_v62 = vunpack.c.3.s8 %v719_v43  ;;  %v3286_v57 = vpack.c.bf16 %v2654_v59, %v2646_v3  ;;  %v2247_v63 = vcvt.s32.f32 %v1223_v33 }
 0x28b   :  { %v2255_v51 = vcvt.s32.f32 %v1231_v14  ;;  %v935_v18 = vunpack.c.2.s8 %v10750_v40  ;;  %v3350_v26 = vpack.c.bf16 %v2782_v61, %v2774_v54  ;;  %v943_v29 = vunpack.c.3.s8 %v10750_v40  ;;  %v711_v14 = vld [vmem:[%s12149_s4 + $0x3b8] sm:$0xff] }
 0x28c   :  { %4150 = vmatpush.bf16.msra.mxu1 %v3015_v46  ;;  %v2375_v16 = vcvt.s32.f32 %v1351_v44  ;;  %v2383_v5 = vcvt.s32.f32 %v1359_v62  ;;  %4117 = vmatpush.bf16.msrb.mxu2 %v3286_v57  ;;  %v1063_v20 = vunpack.c.2.s8 %v647_v22  ;;  %v1071_v45 = vunpack.c.3.s8 %v647_v22  ;;  %v679_v46 = vld [vmem:[%s12149_s4 + $0x2b8] sm:$0xff] }
 0x28d   :  { %v3087_v4 = vpack.c.bf16 %v2255_v51, %v2247_v63  ;;  %v1959_v38 = vcvt.s32.f32 %v935_v18  ;;  %4130 = vmatpush.bf16.msrb.mxu3 %v3350_v26  ;;  %v1967_v49 = vcvt.s32.f32 %v943_v29  ;;  %v1207_v12 = vunpack.c.0.s8 %v687_v30  ;;  %v607_v44 = vld [vmem:[%s12149_s4 + $0x78] sm:$0xff] }
 0x28e   :  { %v3151_v52 = vpack.c.bf16 %v2383_v5, %v2375_v16  ;;  %v1215_v24 = vunpack.c.1.s8 %v687_v30  ;;  %v2087_v60 = vcvt.s32.f32 %v1063_v20  ;;  %v2095_v34 = vcvt.s32.f32 %v1071_v45 }
 0x28f   :  { %v1335_v23 = vunpack.c.0.s8 %v719_v43  ;;  %v1343_v36 = vunpack.c.1.s8 %v719_v43  ;;  %4118 = vmatmul.bf16.vlgmr.msrb.gmra.mxu2 %v9739_v0  ;;  %v2943_v6 = vpack.c.bf16 %v1967_v49, %v1959_v38  ;;  %v2231_v3 = vcvt.s32.f32 %v1207_v12 }
 0x290   :  { %4162 = vmatpush.bf16.msra.mxu2 %v3087_v4  ;;  %v2239_v9 = vcvt.s32.f32 %v1215_v24  ;;  %v3886_v37 = vadd.f32 %v10714_v47, %v10721_v42  ;;  %4131 = vmatmul.bf16.vlgmr.msrb.gmra.mxu3 %v9741_v31  ;;  %v3007_v30 = vpack.c.bf16 %v2095_v34, %v2087_v60  ;;  %v919_v43 = vunpack.c.0.s8 %v10750_v40 }
 0x291   :  { %4175 = vmatpush.bf16.msra.mxu3 %v3151_v52  ;;  %v2359_v59 = vcvt.s32.f32 %v1335_v23  ;;  %v2367_v33 = vcvt.s32.f32 %v1343_v36  ;;  %4138 = vmatpush.bf16.msra.mxu0 %v2943_v6  ;;  %v927_v47 = vunpack.c.1.s8 %v10750_v40  ;;  %v1047_v42 = vunpack.c.0.s8 %v647_v22 }
 0x292   :  { %v3079_v54 = vpack.c.bf16 %v2239_v9, %v2231_v3  ;;  %v10769_v61 = vadd.f32 %v10716_v10, %v3886_v37  ;;  %4151 = vmatpush.bf16.msra.mxu1 %v3007_v30  ;;  %v1943_v57 = vcvt.s32.f32 %v919_v43  ;;  %v1055_v63 = vunpack.c.1.s8 %v647_v22  ;;  %v639_v10 = vld [vmem:[%s12149_s4 + $0x178] sm:$0xff] }
 0x293   :  { %v3143_v62 = vpack.c.bf16 %v2367_v33, %v2359_v59  ;;  %v1191_v51 = vunpack.c.2.s8 %v679_v46  ;;  %v1951_v18 = vcvt.s32.f32 %v927_v47  ;;  %v2071_v26 = vcvt.s32.f32 %v1047_v42  ;;  %v671_v43 = vld [vmem:[%s12149_s4 + $0x278] sm:$0xff] }
 0x294   :  { %4163 = vmatpush.bf16.msra.mxu2 %v3079_v54  ;;  %v1199_v16 = vunpack.c.3.s8 %v679_v46  ;;  %v1319_v5 = vunpack.c.2.s8 %v711_v14  ;;  %v2079_v40 = vcvt.s32.f32 %v1055_v63  ;;  %v1327_v4 = vunpack.c.3.s8 %v711_v14 }
 0x295   :  { %4176 = vmatpush.bf16.msra.mxu3 %v3143_v62  ;;  %v2215_v29 = vcvt.s32.f32 %v1191_v51  ;;  %v903_v38 = vunpack.c.2.s8 %v607_v44  ;;  %v2935_v20 = vpack.c.bf16 %v1951_v18, %v1943_v57  ;;  %v911_v19 = vunpack.c.3.s8 %v607_v44  ;;  %v703_v18 = vld [vmem:[%s12149_s4 + $0x378] sm:$0xff] }
 0x296   :  { %v2223_v45 = vcvt.s32.f32 %v1199_v16  ;;  %v2343_v21 = vcvt.s32.f32 %v1319_v5  ;;  %v2999_v22 = vpack.c.bf16 %v2079_v40, %v2071_v26  ;;  %v2351_v52 = vcvt.s32.f32 %v1327_v4 }
 0x297   :  { %v1927_v49 = vcvt.s32.f32 %v903_v38  ;;  %v1031_v12 = vunpack.c.2.s8 %v639_v10  ;;  %4139 = vmatpush.bf16.msra.mxu0 %v2935_v20  ;;  %v1935_v60 = vcvt.s32.f32 %v911_v19  ;;  %v1039_v34 = vunpack.c.3.s8 %v639_v10  ;;  %v10790_v19 = vld [vmem:[%s12149_s4 + $0x138] sm:$0xff] }
 0x298   :  { %v3071_v24 = vpack.c.bf16 %v2223_v45, %v2215_v29  ;;  %v1175_v23 = vunpack.c.0.s8 %v679_v46  ;;  %4152 = vmatpush.bf16.msra.mxu1 %v2999_v22  ;;  %v3135_v36 = vpack.c.bf16 %v2351_v52, %v2343_v21  ;;  %v1183_v3 = vunpack.c.1.s8 %v679_v46 }
 0x299   :  { %v2055_v6 = vcvt.s32.f32 %v1031_v12  ;;  %v1303_v9 = vunpack.c.0.s8 %v711_v14  ;;  %v2927_v37 = vpack.c.bf16 %v1935_v60, %v1927_v49  ;;  %v2063_v30 = vcvt.s32.f32 %v1039_v34  ;;  %v10797_v60 = vpop.f32.mrf.mxu1 }
 0x29a   :  { %4164 = vmatpush.bf16.msra.mxu2 %v3071_v24  ;;  %v2199_v59 = vcvt.s32.f32 %v1175_v23  ;;  %v1311_v33 = vunpack.c.1.s8 %v711_v14  ;;  %4177 = vmatpush.bf16.msra.mxu3 %v3135_v36  ;;  %v2207_v54 = vcvt.s32.f32 %v1183_v3  ;;  %v887_v42 = vunpack.c.0.s8 %v607_v44  ;;  %v10795_v24 = vpop.f32.mrf.mxu0 }
 0x29b   :  { %v2327_v47 = vcvt.s32.f32 %v1303_v9  ;;  %v895_v62 = vunpack.c.1.s8 %v607_v44  ;;  %4140 = vmatpush.bf16.msra.mxu0 %v2927_v37  ;;  %v2991_v57 = vpack.c.bf16 %v2063_v30, %v2055_v6  ;;  %v1015_v51 = vunpack.c.0.s8 %v639_v10  ;;  %v599_v44 = vld [vmem:[%s12149_s4 + $0x38] sm:$0xff] }
 0x29c   :  { %v2335_v63 = vcvt.s32.f32 %v1311_v33  ;;  %v1023_v46 = vunpack.c.1.s8 %v639_v10  ;;  %v3063_v26 = vpack.c.bf16 %v2207_v54, %v2199_v59  ;;  %v1911_v14 = vcvt.s32.f32 %v887_v42 }
 0x29d   :  { %v1919_v16 = vcvt.s32.f32 %v895_v62  ;;  %v1159_v5 = vunpack.c.2.s8 %v671_v43  ;;  %4153 = vmatpush.bf16.msra.mxu1 %v2991_v57  ;;  %v2039_v29 = vcvt.s32.f32 %v1015_v51  ;;  %v1167_v38 = vunpack.c.3.s8 %v671_v43 }
 0x29e   :  { %v3127_v40 = vpack.c.bf16 %v2335_v63, %v2327_v47  ;;  %v2047_v4 = vcvt.s32.f32 %v1023_v46  ;;  %4165 = vmatpush.bf16.msra.mxu2 %v3063_v26  ;;  %v1287_v45 = vunpack.c.2.s8 %v703_v18  ;;  %v1295_v21 = vunpack.c.3.s8 %v703_v18 }
 0x29f   :  { %v2919_v20 = vpack.c.bf16 %v1919_v16, %v1911_v14  ;;  %v2183_v10 = vcvt.s32.f32 %v1159_v5  ;;  %v573_v22 = vmax.f32 %v10648_v50, 0.0  ;;  %v2191_v49 = vcvt.s32.f32 %v1167_v38  ;;  %v751_v16 = vld [vmem:[%s12149_s4 + $0x4f8] sm:$0xff] }
 0x2a0   :  { %4178 = vmatpush.bf16.msra.mxu3 %v3127_v40  ;;  %v2983_v52 = vpack.c.bf16 %v2047_v4, %v2039_v29  ;;  %v3912_v12 = vadd.f32 %v10735_v53, %v10769_v61  ;;  %v160_v34 = vperm.slane %v10639_v58, 6  ;;  %v2311_v23 = vcvt.s32.f32 %v1287_v45 }
 0x2a1   :  { %4141 = vmatpush.bf16.msra.mxu0 %v2919_v20  ;;  %v2319_v36 = vcvt.s32.f32 %v1295_v21  ;;  %v871_v6 = vunpack.c.2.s8 %v599_v44  ;;  %v3055_v3 = vpack.c.bf16 %v2191_v49, %v2183_v10  ;;  %v879_v9 = vunpack.c.3.s8 %v599_v44  ;;  %v663_v10 = vld [vmem:[%s12149_s4 + $0x238] sm:$0xff]  ;;  %v3952_v21 = vpop.f32.mrf.mxu1 }
 0x2a2   :  { %4154 = vmatpush.bf16.msra.mxu1 %v2983_v52  ;;  %v10801_v50 = vadd.f32 %v10737_v13, %v3912_v12  ;;  %v999_v37 = vunpack.c.2.s8 %v10790_v19  ;;  %v1007_v61 = vunpack.c.3.s8 %v10790_v19  ;;  %v1143_v59 = vunpack.c.0.s8 %v671_v43  ;;  %v3939_v45 = vpop.f32.mrf.mxu0  ;;  %v815_v21 = vld [vmem:[%s12149_s4 + $0x6f8] sm:$0xff] }
 0x2a3   :  { %v3119_v30 = vpack.c.bf16 %v2319_v36, %v2311_v23  ;;  %v1895_v53 = vcvt.s32.f32 %v871_v6  ;;  %v10805_v33 = vpack.c.bf16 %v573_v22, %v573_v22  ;;  %4166 = vmatpush.bf16.msra.mxu2 %v3055_v3  ;;  %v1903_v54 = vcvt.s32.f32 %v879_v9  ;;  %v695_v6 = vld [vmem:[%s12149_s4 + $0x338] sm:$0xff] }
 0x2a4   :  { %v2023_v47 = vcvt.s32.f32 %v999_v37  ;;  %v1151_v42 = vunpack.c.1.s8 %v671_v43  ;;  %v2031_v62 = vcvt.s32.f32 %v1007_v61  ;;  %v2167_v57 = vcvt.s32.f32 %v1143_v59  ;;  %v783_v43 = vld [vmem:[%s12149_s4 + $0x5f8] sm:$0xff] }
 0x2a5   :  { %4179 = vmatpush.bf16.msra.mxu3 %v3119_v30  ;;  %v1271_v63 = vunpack.c.0.s8 %v703_v18  ;;  %v1279_v13 = vunpack.c.1.s8 %v703_v18  ;;  %v10808_v51 = vadd.f32 %v10045_v56, %v160_v34  ;;  %v2911_v46 = vpack.c.bf16 %v1903_v54, %v1895_v53 }
 0x2a6   :  { %v2175_v26 = vcvt.s32.f32 %v1151_v42  ;;  %v855_v14 = vunpack.c.0.s8 %v599_v44  ;;  %v2975_v5 = vpack.c.bf16 %v2031_v62, %v2023_v47  ;;  %v863_v4 = vunpack.c.1.s8 %v599_v44 }
 0x2a7   :  { %v2295_v40 = vcvt.s32.f32 %v1271_v63  ;;  %v2303_v29 = vcvt.s32.f32 %v1279_v13  ;;  %v161_v18 = vperm.slane %v10639_v58, 7  ;;  %4142 = vmatpush.bf16.msra.mxu0 %v2911_v46  ;;  %v983_v20 = vunpack.c.0.s8 %v10790_v19 }
 0x2a8   :  { %v3047_v56 = vpack.c.bf16 %v2175_v26, %v2167_v57  ;;  %v1879_v38 = vcvt.s32.f32 %v855_v14  ;;  %4155 = vmatpush.bf16.msra.mxu1 %v2975_v5  ;;  %v1887_v44 = vcvt.s32.f32 %v863_v4  ;;  %v991_v52 = vunpack.c.1.s8 %v10790_v19  ;;  %v10827_v4 = vpop.f32.mrf.mxu3 }
 0x2a9   :  { %v3111_v22 = vpack.c.bf16 %v2303_v29, %v2295_v40  ;;  %v1479_v49 = vunpack.c.2.s8 %v751_v16  ;;  %v2007_v12 = vcvt.s32.f32 %v983_v20  ;;  %v1487_v34 = vunpack.c.3.s8 %v751_v16  ;;  %v10825_v29 = vpop.f32.mrf.mxu2 }
 0x2aa   :  { %4167 = vmatpush.bf16.msra.mxu2 %v3047_v56  ;;  %v1607_v23 = vunpack.c.2.s8 %v783_v43  ;;  %v1615_v36 = vunpack.c.3.s8 %v783_v43  ;;  %v2903_v3 = vpack.c.bf16 %v1887_v44, %v1879_v38  ;;  %v2015_v9 = vcvt.s32.f32 %v991_v52 }
 0x2ab   :  { %4180 = vmatpush.bf16.msra.mxu3 %v3111_v22  ;;  %v2503_v37 = vcvt.s32.f32 %v1479_v49  ;;  %v1127_v30 = vunpack.c.2.s8 %v663_v10  ;;  %v2511_v53 = vcvt.s32.f32 %v1487_v34  ;;  %v1135_v54 = vunpack.c.3.s8 %v663_v10  ;;  %v847_v49 = vld [vmem:[%s12149_s4 + $0x7f8] sm:$0xff] }
 0x2ac   :  { %v2631_v61 = vcvt.s32.f32 %v1607_v23  ;;  %v2639_v59 = vcvt.s32.f32 %v1615_v36  ;;  %4143 = vmatpush.bf16.msra.mxu0 %v2903_v3  ;;  %v2967_v19 = vpack.c.bf16 %v2015_v9, %v2007_v12  ;;  %v1255_v42 = vunpack.c.2.s8 %v695_v6 }
 0x2ad   :  { %v2151_v47 = vcvt.s32.f32 %v1127_v30  ;;  %v1263_v62 = vunpack.c.3.s8 %v695_v6  ;;  %v3215_v57 = vpack.c.bf16 %v2511_v53, %v2503_v37  ;;  %v2159_v13 = vcvt.s32.f32 %v1135_v54 }
 0x2ae   :  { %v3279_v63 = vpack.c.bf16 %v2639_v59, %v2631_v61  ;;  %v1463_v46 = vunpack.c.0.s8 %v751_v16  ;;  %4156 = vmatpush.bf16.msra.mxu1 %v2967_v19  ;;  %v2279_v26 = vcvt.s32.f32 %v1255_v42  ;;  %v1471_v5 = vunpack.c.1.s8 %v751_v16 }
 0x2af   :  { %v2287_v14 = vcvt.s32.f32 %v1263_v62  ;;  %v1591_v40 = vunpack.c.0.s8 %v783_v43  ;;  %v3039_v56 = vpack.c.bf16 %v2159_v13, %v2151_v47  ;;  %v1599_v20 = vunpack.c.1.s8 %v783_v43  ;;  %4144 = vmatmul.bf16.vlgmr.msra.gmra.mxu0 %v9587_v35  ;;  %v743_v35 = vld [vmem:[%s12149_s4 + $0x4b8] sm:$0xff] }
 0x2b0   :  { %4188 = vmatpush.bf16.msrb.mxu0 %v3215_v57  ;;  %v2487_v38 = vcvt.s32.f32 %v1463_v46  ;;  %v1111_v45 = vunpack.c.0.s8 %v663_v10  ;;  %v2495_v44 = vcvt.s32.f32 %v1471_v5  ;;  %v1119_v52 = vunpack.c.1.s8 %v663_v10  ;;  %v3978_v5 = vpop.f32.mrf.mxu3 }
 0x2b1   :  { %v3103_v22 = vpack.c.bf16 %v2287_v14, %v2279_v26  ;;  %v2615_v16 = vcvt.s32.f32 %v1591_v40  ;;  %4168 = vmatpush.bf16.msra.mxu2 %v3039_v56  ;;  %4157 = vmatmul.bf16.vlgmr.msra.gmra.mxu1 %v9589_v7  ;;  %v2623_v12 = vcvt.s32.f32 %v1599_v20  ;;  %v1239_v34 = vunpack.c.0.s8 %v695_v6  ;;  %v775_v7 = vld [vmem:[%s12149_s4 + $0x5b8] sm:$0xff]  ;;  %v3965_v14 = vpop.f32.mrf.mxu2 }
 0x2b2   :  { %4201 = vmatpush.bf16.msrb.mxu1 %v3279_v63  ;;  %v2135_v43 = vcvt.s32.f32 %v1111_v45  ;;  %v1247_v23 = vunpack.c.1.s8 %v695_v6  ;;  %v3207_v36 = vpack.c.bf16 %v2495_v44, %v2487_v38  ;;  %v2143_v3 = vcvt.s32.f32 %v1119_v52 }
 0x2b3   :  { %4181 = vmatpush.bf16.msra.mxu3 %v3103_v22  ;;  %v1735_v9 = vunpack.c.2.s8 %v815_v21  ;;  %v1743_v37 = vunpack.c.3.s8 %v815_v21  ;;  %v3271_v10 = vpack.c.bf16 %v2623_v12, %v2615_v16  ;;  %v2263_v30 = vcvt.s32.f32 %v1239_v34 }
 0x2b4   :  { %v2271_v53 = vcvt.s32.f32 %v1247_v23  ;;  %v1863_v61 = vunpack.c.2.s8 %v847_v49  ;;  %4189 = vmatpush.bf16.msrb.mxu0 %v3207_v36  ;;  %v3031_v59 = vpack.c.bf16 %v2143_v3, %v2135_v43  ;;  %v1871_v19 = vunpack.c.3.s8 %v847_v49  ;;  %v807_v23 = vld [vmem:[%s12149_s4 + $0x6b8] sm:$0xff] }
 0x2b5   :  { %v2759_v6 = vcvt.s32.f32 %v1735_v9  ;;  %v2767_v54 = vcvt.s32.f32 %v1743_v37  ;;  %v1447_v62 = vunpack.c.2.s8 %v743_v35  ;;  %v1455_v57 = vunpack.c.3.s8 %v743_v35 }
 0x2b6   :  { %4202 = vmatpush.bf16.msrb.mxu1 %v3271_v10  ;;  %v3095_v47 = vpack.c.bf16 %v2271_v53, %v2263_v30  ;;  %v2887_v42 = vcvt.s32.f32 %v1863_v61  ;;  %4169 = vmatpush.bf16.msra.mxu2 %v3031_v59  ;;  %v2895_v13 = vcvt.s32.f32 %v1871_v19  ;;  %v1575_v46 = vunpack.c.2.s8 %v775_v7 }
 0x2b7   :  { %v3343_v63 = vpack.c.bf16 %v2767_v54, %v2759_v6  ;;  %v1583_v26 = vunpack.c.3.s8 %v775_v7  ;;  %v2471_v40 = vcvt.s32.f32 %v1447_v62  ;;  %v2479_v56 = vcvt.s32.f32 %v1455_v57 }
 0x2b8   :  { %4182 = vmatpush.bf16.msra.mxu3 %v3095_v47  ;;  %v1719_v38 = vunpack.c.0.s8 %v815_v21  ;;  %v1727_v20 = vunpack.c.1.s8 %v815_v21  ;;  %v3407_v45 = vpack.c.bf16 %v2895_v13, %v2887_v42  ;;  %v2599_v22 = vcvt.s32.f32 %v1575_v46 }
 0x2b9   :  { %v2607_v44 = vcvt.s32.f32 %v1583_v26  ;;  %v1847_v16 = vunpack.c.0.s8 %v847_v49  ;;  %4170 = vmatmul.bf16.vlgmr.msra.gmra.mxu2 %v9647_v48  ;;  %v3199_v52 = vpack.c.bf16 %v2479_v56, %v2471_v40  ;;  %v1855_v34 = vunpack.c.1.s8 %v847_v49  ;;  %v839_v48 = vld [vmem:[%s12149_s4 + $0x7b8] sm:$0xff] }
 0x2ba   :  { %4214 = vmatpush.bf16.msrb.mxu2 %v3343_v63  ;;  %v2743_v12 = vcvt.s32.f32 %v1719_v38  ;;  %v2751_v43 = vcvt.s32.f32 %v1727_v20  ;;  %v10849_v21 = vadd.f32 %v10797_v60, %v10795_v24  ;;  %v1431_v9 = vunpack.c.0.s8 %v743_v35  ;;  %v735_v24 = vld [vmem:[%s12149_s4 + $0x478] sm:$0xff] }
 0x2bb   :  { %v3263_v36 = vpack.c.bf16 %v2607_v44, %v2599_v22  ;;  %v2871_v3 = vcvt.s32.f32 %v1847_v16  ;;  %4183 = vmatmul.bf16.vlgmr.msra.gmra.mxu3 %v9649_v32  ;;  %4190 = vmatpush.bf16.msrb.mxu0 %v3199_v52  ;;  %v2879_v37 = vcvt.s32.f32 %v1855_v34  ;;  %v1439_v10 = vunpack.c.1.s8 %v743_v35  ;;  %v767_v32 = vld [vmem:[%s12149_s4 + $0x578] sm:$0xff] }
 0x2bc   :  { %4227 = vmatpush.bf16.msrb.mxu3 %v3407_v45  ;;  %v3335_v49 = vpack.c.bf16 %v2751_v43, %v2743_v12  ;;  %v1559_v30 = vunpack.c.0.s8 %v775_v7  ;;  %v2455_v53 = vcvt.s32.f32 %v1431_v9  ;;  %v1567_v61 = vunpack.c.1.s8 %v775_v7 }
 0x2bd   :  { %4203 = vmatpush.bf16.msrb.mxu1 %v3263_v36  ;;  %v1703_v59 = vunpack.c.2.s8 %v807_v23  ;;  %v1711_v6 = vunpack.c.3.s8 %v807_v23  ;;  %v3399_v60 = vpack.c.bf16 %v2879_v37, %v2871_v3  ;;  %v2463_v54 = vcvt.s32.f32 %v1439_v10  ;;  %v799_v3 = vld [vmem:[%s12149_s4 + $0x678] sm:$0xff] }
 0x2be   :  { %4215 = vmatpush.bf16.msrb.mxu2 %v3335_v49  ;;  %v2583_v19 = vcvt.s32.f32 %v1559_v30  ;;  %v1831_v47 = vunpack.c.2.s8 %v839_v48  ;;  %v2591_v35 = vcvt.s32.f32 %v1567_v61  ;;  %v1839_v57 = vunpack.c.3.s8 %v839_v48 }
 0x2bf   :  { %v2727_v42 = vcvt.s32.f32 %v1703_v59  ;;  %v2735_v62 = vcvt.s32.f32 %v1711_v6  ;;  %v3191_v7 = vpack.c.bf16 %v2463_v54, %v2455_v53  ;;  %v1415_v13 = vunpack.c.2.s8 %v735_v24 }
 0x2c0   :  { %4228 = vmatpush.bf16.msrb.mxu3 %v3399_v60  ;;  %v2855_v63 = vcvt.s32.f32 %v1831_v47  ;;  %v1423_v46 = vunpack.c.3.s8 %v735_v24  ;;  %v3255_v26 = vpack.c.bf16 %v2591_v35, %v2583_v19  ;;  %v2863_v5 = vcvt.s32.f32 %v1839_v57  ;;  %v727_v19 = vld [vmem:[%s12149_s4 + $0x438] sm:$0xff]  ;;  %v10875_v57 = vpop.f32.mrf.mxu1 }
 0x2c1   :  { %v3327_v14 = vpack.c.bf16 %v2735_v62, %v2727_v42  ;;  %v1543_v40 = vunpack.c.2.s8 %v767_v32  ;;  %4191 = vmatpush.bf16.msrb.mxu0 %v3191_v7  ;;  %v2439_v56 = vcvt.s32.f32 %v1415_v13  ;;  %v1551_v20 = vunpack.c.3.s8 %v767_v32  ;;  %v10873_v62 = vpop.f32.mrf.mxu0 }
 0x2c2   :  { %v2447_v38 = vcvt.s32.f32 %v1423_v46  ;;  %v1687_v45 = vunpack.c.0.s8 %v807_v23  ;;  %4204 = vmatpush.bf16.msrb.mxu1 %v3255_v26  ;;  %v3391_v22 = vpack.c.bf16 %v2863_v5, %v2855_v63  ;;  %v1695_v16 = vunpack.c.1.s8 %v807_v23  ;;  %v831_v23 = vld [vmem:[%s12149_s4 + $0x778] sm:$0xff] }
 0x2c3   :  { %4216 = vmatpush.bf16.msrb.mxu2 %v3327_v14  ;;  %v2567_v44 = vcvt.s32.f32 %v1543_v40  ;;  %v1815_v52 = vunpack.c.0.s8 %v839_v48  ;;  %v2575_v43 = vcvt.s32.f32 %v1551_v20  ;;  %v1823_v36 = vunpack.c.1.s8 %v839_v48 }
 0x2c4   :  { %v3183_v12 = vpack.c.bf16 %v2447_v38, %v2439_v56  ;;  %v2711_v34 = vcvt.s32.f32 %v1687_v45  ;;  %4229 = vmatpush.bf16.msrb.mxu3 %v3391_v22  ;;  %v2719_v9 = vcvt.s32.f32 %v1695_v16  ;;  %v1399_v37 = vunpack.c.0.s8 %v735_v24 }
 0x2c5   :  { %v2839_v49 = vcvt.s32.f32 %v1815_v52  ;;  %v1407_v10 = vunpack.c.1.s8 %v735_v24  ;;  %v3247_v30 = vpack.c.bf16 %v2575_v43, %v2567_v44  ;;  %v2847_v53 = vcvt.s32.f32 %v1823_v36 }
 0x2c6   :  { %4192 = vmatpush.bf16.msrb.mxu0 %v3183_v12  ;;  %v1527_v61 = vunpack.c.0.s8 %v767_v32  ;;  %v1535_v59 = vunpack.c.1.s8 %v767_v32  ;;  %v3319_v6 = vpack.c.bf16 %v2719_v9, %v2711_v34  ;;  %v2423_v48 = vcvt.s32.f32 %v1399_v37  ;;  %v759_v32 = vld [vmem:[%s12149_s4 + $0x538] sm:$0xff] }
 0x2c7   :  { %v2431_v60 = vcvt.s32.f32 %v1407_v10  ;;  %v1671_v54 = vunpack.c.2.s8 %v799_v3  ;;  %4205 = vmatpush.bf16.msrb.mxu1 %v3247_v30  ;;  %v3383_v47 = vpack.c.bf16 %v2847_v53, %v2839_v49  ;;  %v1679_v42 = vunpack.c.3.s8 %v799_v3 }
 0x2c8   :  { %v2551_v24 = vcvt.s32.f32 %v1527_v61  ;;  %v2559_v35 = vcvt.s32.f32 %v1535_v59  ;;  %4217 = vmatpush.bf16.msrb.mxu2 %v3319_v6  ;;  %v1799_v13 = vunpack.c.2.s8 %v831_v23  ;;  %v1807_v46 = vunpack.c.3.s8 %v831_v23  ;;  %v4324_v61 = vld [vmem:[#allocation7 + $0xc0] sm:$0xff] }
 0x2c9   :  { %v3175_v7 = vpack.c.bf16 %v2431_v60, %v2423_v48  ;;  %v2695_v63 = vcvt.s32.f32 %v1671_v54  ;;  %4230 = vmatpush.bf16.msrb.mxu3 %v3383_v47  ;;  %v2703_v14 = vcvt.s32.f32 %v1679_v42  ;;  %v3964_v5 = vadd.f32 %v10825_v29, %v10849_v21  ;;  %v4356_v60 = vld [vmem:[#allocation7 + $0x1c0] sm:$0xff]  ;;  %v3991_v54 = vpop.f32.mrf.mxu0  ;;  %v4004_v47 = vpop.f32.mrf.mxu1 }
 0x2ca   :  { %v3239_v26 = vpack.c.bf16 %v2559_v35, %v2551_v24  ;;  %v1383_v40 = vunpack.c.2.s8 %v727_v19  ;;  %v2823_v56 = vcvt.s32.f32 %v1799_v13  ;;  %v2831_v38 = vcvt.s32.f32 %v1807_v46  ;;  %v823_v46 = vld [vmem:[%s12149_s4 + $0x738] sm:$0xff] }
 0x2cb   :  { %4193 = vmatpush.bf16.msrb.mxu0 %v3175_v7  ;;  %v1391_v20 = vunpack.c.3.s8 %v727_v19  ;;  %v1511_v45 = vunpack.c.2.s8 %v759_v32  ;;  %v3311_v22 = vpack.c.bf16 %v2703_v14, %v2695_v63  ;;  %v10880_v44 = vadd.f32 %v10827_v4, %v3964_v5 }
 0x2cc   :  { %4206 = vmatpush.bf16.msrb.mxu1 %v3239_v26  ;;  %v2407_v16 = vcvt.s32.f32 %v1383_v40  ;;  %v1519_v52 = vunpack.c.3.s8 %v759_v32  ;;  %v3375_v12 = vpack.c.bf16 %v2831_v38, %v2823_v56  ;;  %v1655_v36 = vunpack.c.0.s8 %v799_v3 }
 0x2cd   :  { %v2415_v43 = vcvt.s32.f32 %v1391_v20  ;;  %v2535_v34 = vcvt.s32.f32 %v1511_v45  ;;  %4218 = vmatpush.bf16.msrb.mxu2 %v3311_v22  ;;  %v1663_v29 = vunpack.c.1.s8 %v799_v3  ;;  %v1783_v21 = vunpack.c.0.s8 %v831_v23 }
 0x2ce   :  { %v2543_v9 = vcvt.s32.f32 %v1519_v52  ;;  %v1791_v49 = vunpack.c.1.s8 %v831_v23  ;;  %4231 = vmatpush.bf16.msrb.mxu3 %v3375_v12  ;;  %v2679_v10 = vcvt.s32.f32 %v1655_v36  ;;  %v1367_v30 = vunpack.c.0.s8 %v727_v19  ;;  %v791_v23 = vld [vmem:[%s12149_s4 + $0x638] sm:$0xff] }
 0x2cf   :  { %v3167_v37 = vpack.c.bf16 %v2415_v43, %v2407_v16  ;;  %v1375_v53 = vunpack.c.1.s8 %v727_v19  ;;  %v2687_v4 = vcvt.s32.f32 %v1663_v29  ;;  %v2807_v6 = vcvt.s32.f32 %v1783_v21 }
 0x2d0   :  { %v3231_v59 = vpack.c.bf16 %v2543_v9, %v2535_v34  ;;  %v2815_v48 = vcvt.s32.f32 %v1791_v49  ;;  %v2391_v24 = vcvt.s32.f32 %v1367_v30  ;;  %v1495_v42 = vunpack.c.0.s8 %v759_v32 }
 0x2d1   :  { %4194 = vmatpush.bf16.msrb.mxu0 %v3167_v37  ;;  %v2399_v35 = vcvt.s32.f32 %v1375_v53  ;;  %v1503_v3 = vunpack.c.1.s8 %v759_v32  ;;  %v3303_v7 = vpack.c.bf16 %v2687_v4, %v2679_v10  ;;  %v4668_v63 = vunpack.c.2.s8 %v4324_v61  ;;  %v10890_v4 = vpop.f32.mrf.mxu3 }
 0x2d2   :  { %4207 = vmatpush.bf16.msrb.mxu1 %v3231_v59  ;;  %v3367_v19 = vpack.c.bf16 %v2815_v48, %v2807_v6  ;;  %v4676_v13 = vunpack.c.3.s8 %v4324_v61  ;;  %v2519_v14 = vcvt.s32.f32 %v1495_v42  ;;  %v4796_v40 = vunpack.c.2.s8 %v4356_v60  ;;  %v10888_v59 = vpop.f32.mrf.mxu2 }
 0x2d3   :  { %v3159_v26 = vpack.c.bf16 %v2399_v35, %v2391_v24  ;;  %v2527_v5 = vcvt.s32.f32 %v1503_v3  ;;  %4219 = vmatpush.bf16.msrb.mxu2 %v3303_v7  ;;  %v5692_v32 = vcvt.s32.f32 %v4668_v63  ;;  %v4804_v38 = vunpack.c.3.s8 %v4356_v60  ;;  %v4388_v24 = vld [vmem:[#allocation7 + $0x2c0] sm:$0xff] }
 0x2d4   :  { %4232 = vmatpush.bf16.msrb.mxu3 %v3367_v19  ;;  %v5700_v56 = vcvt.s32.f32 %v4676_v13  ;;  %v1639_v20 = vunpack.c.2.s8 %v791_v23  ;;  %v5820_v22 = vcvt.s32.f32 %v4796_v40  ;;  %v1647_v16 = vunpack.c.3.s8 %v791_v23  ;;  %v4420_v7 = vld [vmem:[#allocation7 + $0x3c0] sm:$0xff] }
 0x2d5   :  { %4195 = vmatpush.bf16.msrb.mxu0 %v3159_v26  ;;  %v3223_v45 = vpack.c.bf16 %v2527_v5, %v2519_v14  ;;  %v1767_v52 = vunpack.c.2.s8 %v823_v46  ;;  %v5828_v43 = vcvt.s32.f32 %v4804_v38  ;;  %v1775_v36 = vunpack.c.3.s8 %v823_v46  ;;  %v10894_v26 = vld [vmem:[#allocation7 + $0x80] sm:$0xff] }
 0x2d6   :  { %v6660_v12 = vpack.c.bf16 %v5700_v56, %v5692_v32  ;;  %v2663_v34 = vcvt.s32.f32 %v1639_v20  ;;  %v2671_v9 = vcvt.s32.f32 %v1647_v16  ;;  %v4652_v21 = vunpack.c.0.s8 %v4324_v61  ;;  %v4348_v20 = vld [vmem:[#allocation7 + $0x180] sm:$0xff] }
 0x2d7   :  { %4208 = vmatpush.bf16.msrb.mxu1 %v3223_v45  ;;  %v2791_v29 = vcvt.s32.f32 %v1767_v52  ;;  %v4660_v49 = vunpack.c.1.s8 %v4324_v61  ;;  %v6724_v37 = vpack.c.bf16 %v5828_v43, %v5820_v22  ;;  %v2799_v10 = vcvt.s32.f32 %v1775_v36 }
 0x2d8   :  { %v4780_v30 = vunpack.c.0.s8 %v4356_v60  ;;  %v4788_v53 = vunpack.c.1.s8 %v4356_v60  ;;  %v3295_v6 = vpack.c.bf16 %v2671_v9, %v2663_v34  ;;  %4196 = vmatmul.bf16.vlgmr.msrb.gmra.mxu0 %v9661_v8  ;;  %v5676_v48 = vcvt.s32.f32 %v4652_v21 }
 0x2d9   :  { %7116 = vmatpush.bf16.msra.mxu0 %v6660_v12  ;;  %v5684_v54 = vcvt.s32.f32 %v4660_v49  ;;  %v1623_v47 = vunpack.c.0.s8 %v791_v23  ;;  %v3359_v35 = vpack.c.bf16 %v2799_v10, %v2791_v29  ;;  %v1631_v3 = vunpack.c.1.s8 %v791_v23  ;;  %v4030_v49 = vpop.f32.mrf.mxu3 }
 0x2da   :  { %v5804_v42 = vcvt.s32.f32 %v4780_v30  ;;  %v5812_v61 = vcvt.s32.f32 %v4788_v53  ;;  %4220 = vmatpush.bf16.msrb.mxu2 %v3295_v6  ;;  %4209 = vmatmul.bf16.vlgmr.msrb.gmra.mxu1 %v9663_v25  ;;  %v1751_v63 = vunpack.c.0.s8 %v823_v46  ;;  %v1759_v13 = vunpack.c.1.s8 %v823_v46  ;;  %v4017_v21 = vpop.f32.mrf.mxu2 }
 0x2db   :  { %7129 = vmatpush.bf16.msra.mxu1 %v6724_v37  ;;  %v6652_v60 = vpack.c.bf16 %v5684_v54, %v5676_v48  ;;  %v2647_v19 = vcvt.s32.f32 %v1623_v47  ;;  %4233 = vmatpush.bf16.msrb.mxu3 %v3359_v35  ;;  %v2655_v14 = vcvt.s32.f32 %v1631_v3  ;;  %v4924_v5 = vunpack.c.2.s8 %v4388_v24 }
 0x2dc   :  { %v6716_v8 = vpack.c.bf16 %v5812_v61, %v5804_v42  ;;  %v4932_v40 = vunpack.c.3.s8 %v4388_v24  ;;  %v2775_v32 = vcvt.s32.f32 %v1751_v63  ;;  %v2783_v56 = vcvt.s32.f32 %v1759_v13 }
 0x2dd   :  { %7117 = vmatpush.bf16.msra.mxu0 %v6652_v60  ;;  %v5052_v38 = vunpack.c.2.s8 %v4420_v7  ;;  %v5060_v23 = vunpack.c.3.s8 %v4420_v7  ;;  %v3287_v45 = vpack.c.bf16 %v2655_v14, %v2647_v19  ;;  %v5948_v25 = vcvt.s32.f32 %v4924_v5  ;;  %v4380_v60 = vld [vmem:[#allocation7 + $0x280] sm:$0xff] }
 0x2de   :  { %v5956_v22 = vcvt.s32.f32 %v4932_v40  ;;  %v4636_v16 = vunpack.c.2.s8 %v10894_v26  ;;  %v3351_v46 = vpack.c.bf16 %v2783_v56, %v2775_v32  ;;  %v4644_v43 = vunpack.c.3.s8 %v10894_v26  ;;  %v4308_v40 = vld [vmem:[#allocation7 + $0x40] sm:$0xff] }
 0x2df   :  { %7130 = vmatpush.bf16.msra.mxu1 %v6716_v8  ;;  %v6076_v52 = vcvt.s32.f32 %v5052_v38  ;;  %v6084_v12 = vcvt.s32.f32 %v5060_v23  ;;  %4221 = vmatpush.bf16.msrb.mxu2 %v3287_v45  ;;  %v4764_v9 = vunpack.c.2.s8 %v4348_v20  ;;  %v4772_v29 = vunpack.c.3.s8 %v4348_v20  ;;  %v4412_v8 = vld [vmem:[#allocation7 + $0x380] sm:$0xff] }
 0x2e0   :  { %v6788_v34 = vpack.c.bf16 %v5956_v22, %v5948_v25  ;;  %v5660_v36 = vcvt.s32.f32 %v4636_v16  ;;  %4234 = vmatpush.bf16.msrb.mxu3 %v3351_v46  ;;  %v5668_v10 = vcvt.s32.f32 %v4644_v43  ;;  %v4908_v30 = vunpack.c.0.s8 %v4388_v24  ;;  %v4340_v25 = vld [vmem:[#allocation7 + $0x140] sm:$0xff] }
 0x2e1   :  { %v6852_v37 = vpack.c.bf16 %v6084_v12, %v6076_v52  ;;  %v4916_v53 = vunpack.c.1.s8 %v4388_v24  ;;  %v5788_v6 = vcvt.s32.f32 %v4764_v9  ;;  %v5796_v48 = vcvt.s32.f32 %v4772_v29 }
 0x2e2   :  { %v5036_v54 = vunpack.c.0.s8 %v4420_v7  ;;  %v5044_v47 = vunpack.c.1.s8 %v4420_v7  ;;  %4222 = vmatmul.bf16.vlgmr.msrb.gmra.mxu2 %v9739_v0  ;;  %v6644_v35 = vpack.c.bf16 %v5668_v10, %v5660_v36  ;;  %v5932_v42 = vcvt.s32.f32 %v4908_v30 }
 0x2e3   :  { %7142 = vmatpush.bf16.msra.mxu2 %v6788_v34  ;;  %v5940_v61 = vcvt.s32.f32 %v4916_v53  ;;  %v3990_v3 = vadd.f32 %v10873_v62, %v10880_v44  ;;  %4235 = vmatmul.bf16.vlgmr.msrb.gmra.mxu3 %v9741_v31  ;;  %v6708_v19 = vpack.c.bf16 %v5796_v48, %v5788_v6  ;;  %v4620_v13 = vunpack.c.0.s8 %v10894_v26 }
 0x2e4   :  { %7155 = vmatpush.bf16.msra.mxu3 %v6852_v37  ;;  %v6060_v63 = vcvt.s32.f32 %v5036_v54  ;;  %v6068_v24 = vcvt.s32.f32 %v5044_v47  ;;  %7118 = vmatpush.bf16.msra.mxu0 %v6644_v35  ;;  %v4628_v0 = vunpack.c.1.s8 %v10894_v26  ;;  %v4748_v5 = vunpack.c.0.s8 %v4348_v20 }
 0x2e5   :  { %v6780_v7 = vpack.c.bf16 %v5940_v61, %v5932_v42  ;;  %v10904_v14 = vadd.f32 %v10875_v57, %v3990_v3  ;;  %7131 = vmatpush.bf16.msra.mxu1 %v6708_v19  ;;  %v5644_v44 = vcvt.s32.f32 %v4620_v13  ;;  %v4756_v32 = vunpack.c.1.s8 %v4348_v20  ;;  %v4372_v42 = vld [vmem:[#allocation7 + $0x240] sm:$0xff] }
 0x2e6   :  { %v6844_v62 = vpack.c.bf16 %v6068_v24, %v6060_v63  ;;  %v4892_v31 = vunpack.c.2.s8 %v4380_v60  ;;  %v5652_v56 = vcvt.s32.f32 %v4628_v0  ;;  %v5772_v38 = vcvt.s32.f32 %v4748_v5  ;;  %v4404_v5 = vld [vmem:[#allocation7 + $0x340] sm:$0xff] }
 0x2e7   :  { %7143 = vmatpush.bf16.msra.mxu2 %v6780_v7  ;;  %v4900_v23 = vunpack.c.3.s8 %v4380_v60  ;;  %v5020_v45 = vunpack.c.2.s8 %v4412_v8  ;;  %v5780_v22 = vcvt.s32.f32 %v4756_v32  ;;  %v5028_v57 = vunpack.c.3.s8 %v4412_v8 }
 0x2e8   :  { %7156 = vmatpush.bf16.msra.mxu3 %v6844_v62  ;;  %v5916_v16 = vcvt.s32.f32 %v4892_v31  ;;  %v4604_v46 = vunpack.c.2.s8 %v4308_v40  ;;  %v6636_v52 = vpack.c.bf16 %v5652_v56, %v5644_v44  ;;  %v4612_v43 = vunpack.c.3.s8 %v4308_v40 }
 0x2e9   :  { %v5924_v26 = vcvt.s32.f32 %v4900_v23  ;;  %v6044_v12 = vcvt.s32.f32 %v5020_v45  ;;  %v6700_v34 = vpack.c.bf16 %v5780_v22, %v5772_v38  ;;  %v6052_v36 = vcvt.s32.f32 %v5028_v57  ;;  %v4300_v23 = vld [vmem:[#allocation7] sm:$0xff] }
 0x2ea   :  { %v5628_v9 = vcvt.s32.f32 %v4604_v46  ;;  %v4732_v20 = vunpack.c.2.s8 %v4340_v25  ;;  %7119 = vmatpush.bf16.msra.mxu0 %v6636_v52  ;;  %v5636_v21 = vcvt.s32.f32 %v4612_v43  ;;  %v4740_v49 = vunpack.c.3.s8 %v4340_v25  ;;  %v10907_v57 = vld [vmem:[#allocation7 + $0x100] sm:$0xff]  ;;  %v10916_v43 = vpop.f32.mrf.mxu1 }
 0x2eb   :  { %v6772_v29 = vpack.c.bf16 %v5924_v26, %v5916_v16  ;;  %v4876_v37 = vunpack.c.0.s8 %v4380_v60  ;;  %7132 = vmatpush.bf16.msra.mxu1 %v6700_v34  ;;  %v6836_v10 = vpack.c.bf16 %v6052_v36, %v6044_v12  ;;  %v4884_v53 = vunpack.c.1.s8 %v4380_v60  ;;  %v10914_v12 = vpop.f32.mrf.mxu0 }
 0x2ec   :  { %v5756_v30 = vcvt.s32.f32 %v4732_v20  ;;  %v5004_v6 = vunpack.c.0.s8 %v4412_v8  ;;  %v6628_v48 = vpack.c.bf16 %v5636_v21, %v5628_v9  ;;  %v5764_v54 = vcvt.s32.f32 %v4740_v49 }
 0x2ed   :  { %7144 = vmatpush.bf16.msra.mxu2 %v6772_v29  ;;  %v5900_v47 = vcvt.s32.f32 %v4876_v37  ;;  %v5012_v35 = vunpack.c.1.s8 %v4412_v8  ;;  %7157 = vmatpush.bf16.msra.mxu3 %v6836_v10  ;;  %v5908_v61 = vcvt.s32.f32 %v4884_v53  ;;  %v4588_v19 = vunpack.c.0.s8 %v4308_v40 }
 0x2ee   :  { %v6028_v3 = vcvt.s32.f32 %v5004_v6  ;;  %v4596_v63 = vunpack.c.1.s8 %v4308_v40  ;;  %7120 = vmatpush.bf16.msra.mxu0 %v6628_v48  ;;  %v6692_v24 = vpack.c.bf16 %v5764_v54, %v5756_v30  ;;  %v4716_v7 = vunpack.c.0.s8 %v4340_v25 }
 0x2ef   :  { %v6036_v13 = vcvt.s32.f32 %v5012_v35  ;;  %v4724_v0 = vunpack.c.1.s8 %v4340_v25  ;;  %v6764_v62 = vpack.c.bf16 %v5908_v61, %v5900_v47  ;;  %v5612_v60 = vcvt.s32.f32 %v4588_v19 }
 0x2f0   :  { %v5620_v44 = vcvt.s32.f32 %v4596_v63  ;;  %v4860_v32 = vunpack.c.2.s8 %v4372_v42  ;;  %7133 = vmatpush.bf16.msra.mxu1 %v6692_v24  ;;  %v5740_v56 = vcvt.s32.f32 %v4716_v7  ;;  %v4868_v38 = vunpack.c.3.s8 %v4372_v42  ;;  %v4484_v7 = vld [vmem:[#allocation7 + $0x5c0] sm:$0xff] }
 0x2f1   :  { %v6828_v31 = vpack.c.bf16 %v6036_v13, %v6028_v3  ;;  %v5748_v8 = vcvt.s32.f32 %v4724_v0  ;;  %7145 = vmatpush.bf16.msra.mxu2 %v6764_v62  ;;  %v4988_v40 = vunpack.c.2.s8 %v4404_v5  ;;  %v4996_v16 = vunpack.c.3.s8 %v4404_v5  ;;  %v4452_v3 = vld [vmem:[#allocation7 + $0x4c0] sm:$0xff] }
 0x2f2   :  { %v6620_v45 = vpack.c.bf16 %v5620_v44, %v5612_v60  ;;  %v5884_v22 = vcvt.s32.f32 %v4860_v32  ;;  %v558_v25 = vadd.f32 %v10047_v2, %v161_v18  ;;  %v5892_v52 = vcvt.s32.f32 %v4868_v38  ;;  %v4364_v44 = vld [vmem:[#allocation7 + $0x200] sm:$0xff]  ;;  %v4056_v32 = vpop.f32.mrf.mxu1 }
 0x2f3   :  { %7158 = vmatpush.bf16.msra.mxu3 %v6828_v31  ;;  %v6684_v46 = vpack.c.bf16 %v5748_v8, %v5740_v56  ;;  %v4016_v26 = vadd.f32 %v10888_v59, %v10904_v14  ;;  %v574_v34 = vmax.f32 %v10808_v51, 0.0  ;;  %v6012_v36 = vcvt.s32.f32 %v4988_v40 }
 0x2f4   :  { %7121 = vmatpush.bf16.msra.mxu0 %v6620_v45  ;;  %v6020_v9 = vcvt.s32.f32 %v4996_v16  ;;  %v4572_v20 = vunpack.c.2.s8 %v4300_v23  ;;  %v6756_v58 = vpack.c.bf16 %v5892_v52, %v5884_v22  ;;  %v4580_v18 = vunpack.c.3.s8 %v4300_v23  ;;  %v4396_v16 = vld [vmem:[#allocation7 + $0x300] sm:$0xff] }
 0x2f5   :  { %7134 = vmatpush.bf16.msra.mxu1 %v6684_v46  ;;  %v10920_v2 = vadd.f32 %v10890_v4, %v4016_v26  ;;  %v4700_v29 = vunpack.c.2.s8 %v10907_v57  ;;  %v4708_v14 = vunpack.c.3.s8 %v10907_v57  ;;  %v4844_v49 = vunpack.c.0.s8 %v4372_v42 }
 0x2f6   :  { %v6820_v21 = vpack.c.bf16 %v6020_v9, %v6012_v36  ;;  %v5596_v59 = vcvt.s32.f32 %v4572_v20  ;;  %v575_v37 = vmax.f32 %v558_v25, 0.0  ;;  %7146 = vmatpush.bf16.msra.mxu2 %v6756_v58  ;;  %v5604_v51 = vcvt.s32.f32 %v4580_v18 }
 0x2f7   :  { %v5724_v10 = vcvt.s32.f32 %v4700_v29  ;;  %v4852_v30 = vunpack.c.1.s8 %v4372_v42  ;;  %v5732_v53 = vcvt.s32.f32 %v4708_v14  ;;  %v5868_v6 = vcvt.s32.f32 %v4844_v49 }
 0x2f8   :  { %7159 = vmatpush.bf16.msra.mxu3 %v6820_v21  ;;  %v4972_v48 = vunpack.c.0.s8 %v4404_v5  ;;  %v4980_v54 = vunpack.c.1.s8 %v4404_v5  ;;  %v10924_v4 = vpack.c.bf16 %v574_v34, %v574_v34  ;;  %v6612_v47 = vpack.c.bf16 %v5604_v51, %v5596_v59  ;;  %v4043_v5 = vpop.f32.mrf.mxu0 }
 0x2f9   :  { %v5876_v35 = vcvt.s32.f32 %v4852_v30  ;;  %v4556_v61 = vunpack.c.0.s8 %v4300_v23  ;;  %v6676_v19 = vpack.c.bf16 %v5732_v53, %v5724_v10  ;;  %v4564_v13 = vunpack.c.1.s8 %v4300_v23  ;;  %v10930_v53 = vpop.f32.mrf.mxu2 }
 0x2fa   :  { %v5996_v63 = vcvt.s32.f32 %v4972_v48  ;;  %v6004_v24 = vcvt.s32.f32 %v4980_v54  ;;  %v10926_v0 = vpack.c.bf16 %v575_v37, %v575_v37  ;;  %7122 = vmatpush.bf16.msra.mxu0 %v6612_v47  ;;  %v4684_v60 = vunpack.c.0.s8 %v10907_v57 }
 0x2fb   :  { %v6748_v42 = vpack.c.bf16 %v5876_v35, %v5868_v6  ;;  %v5580_v62 = vcvt.s32.f32 %v4556_v61  ;;  %7135 = vmatpush.bf16.msra.mxu1 %v6676_v19  ;;  %v5588_v56 = vcvt.s32.f32 %v4564_v13  ;;  %v4692_v8 = vunpack.c.1.s8 %v10907_v57  ;;  %v10932_v6 = vpop.f32.mrf.mxu3  ;;  %v4516_v61 = vld [vmem:[#allocation7 + $0x6c0] sm:$0xff] }
 0x2fc   :  { %v6812_v31 = vpack.c.bf16 %v6004_v24, %v5996_v63  ;;  %v5180_v38 = vunpack.c.2.s8 %v4452_v3  ;;  %v5708_v45 = vcvt.s32.f32 %v4684_v60  ;;  %v5188_v23 = vunpack.c.3.s8 %v4452_v3 }
 0x2fd   :  { %7147 = vmatpush.bf16.msra.mxu2 %v6748_v42  ;;  %v5308_v22 = vunpack.c.2.s8 %v4484_v7  ;;  %v5316_v40 = vunpack.c.3.s8 %v4484_v7  ;;  %v6604_v25 = vpack.c.bf16 %v5588_v56, %v5580_v62  ;;  %v5716_v46 = vcvt.s32.f32 %v4692_v8  ;;  %v4548_v42 = vld [vmem:[#allocation7 + $0x7c0] sm:$0xff] }
 0x2fe   :  { %7160 = vmatpush.bf16.msra.mxu3 %v6812_v31  ;;  %v6204_v52 = vcvt.s32.f32 %v5180_v38  ;;  %v4828_v26 = vunpack.c.2.s8 %v4364_v44  ;;  %v6212_v34 = vcvt.s32.f32 %v5188_v23  ;;  %v4836_v20 = vunpack.c.3.s8 %v4364_v44  ;;  %v4444_v8 = vld [vmem:[#allocation7 + $0x480] sm:$0xff] }
 0x2ff   :  { %v6332_v36 = vcvt.s32.f32 %v5308_v22  ;;  %v6340_v9 = vcvt.s32.f32 %v5316_v40  ;;  %7123 = vmatpush.bf16.msra.mxu0 %v6604_v25  ;;  %v6668_v58 = vpack.c.bf16 %v5716_v46, %v5708_v45  ;;  %v4956_v57 = vunpack.c.2.s8 %v4396_v16  ;;  %v4476_v40 = vld [vmem:[#allocation7 + $0x580] sm:$0xff] }
 0x300   :  { %v5852_v18 = vcvt.s32.f32 %v4828_v26  ;;  %v4964_v29 = vunpack.c.3.s8 %v4396_v16  ;;  %v6916_v21 = vpack.c.bf16 %v6212_v34, %v6204_v52  ;;  %v5860_v14 = vcvt.s32.f32 %v4836_v20 }
 0x301   :  { %v6980_v59 = vpack.c.bf16 %v6340_v9, %v6332_v36  ;;  %v5164_v49 = vunpack.c.0.s8 %v4452_v3  ;;  %7136 = vmatpush.bf16.msra.mxu1 %v6668_v58  ;;  %v5980_v37 = vcvt.s32.f32 %v4956_v57  ;;  %v5172_v10 = vunpack.c.1.s8 %v4452_v3  ;;  %v4069_v57 = vpop.f32.mrf.mxu2 }
 0x302   :  { %v5988_v51 = vcvt.s32.f32 %v4964_v29  ;;  %v5292_v30 = vunpack.c.0.s8 %v4484_v7  ;;  %v6740_v48 = vpack.c.bf16 %v5860_v14, %v5852_v18  ;;  %v5300_v47 = vunpack.c.1.s8 %v4484_v7  ;;  %7124 = vmatmul.bf16.vlgmr.msra.gmra.mxu0 %v10196_v27 }
 0x303   :  { %7168 = vmatpush.bf16.msrb.mxu0 %v6916_v21  ;;  %v6188_v54 = vcvt.s32.f32 %v5164_v49  ;;  %v4812_v35 = vunpack.c.0.s8 %v4364_v44  ;;  %v6196_v63 = vcvt.s32.f32 %v5172_v10  ;;  %v4820_v13 = vunpack.c.1.s8 %v4364_v44  ;;  %v4082_v29 = vpop.f32.mrf.mxu3 }
 0x304   :  { %v6804_v19 = vpack.c.bf16 %v5988_v51, %v5980_v37  ;;  %v6316_v24 = vcvt.s32.f32 %v5292_v30  ;;  %7148 = vmatpush.bf16.msra.mxu2 %v6740_v48  ;;  %7137 = vmatmul.bf16.vlgmr.msra.gmra.mxu1 %v10318_v1  ;;  %v6324_v3 = vcvt.s32.f32 %v5300_v47  ;;  %v4940_v60 = vunpack.c.0.s8 %v4396_v16 }
 0x305   :  { %7181 = vmatpush.bf16.msrb.mxu1 %v6980_v59  ;;  %v5836_v62 = vcvt.s32.f32 %v4812_v35  ;;  %v4948_v5 = vunpack.c.1.s8 %v4396_v16  ;;  %v6908_v32 = vpack.c.bf16 %v6196_v63, %v6188_v54  ;;  %v5844_v31 = vcvt.s32.f32 %v4820_v13 }
 0x306   :  { %7161 = vmatpush.bf16.msra.mxu3 %v6804_v19  ;;  %v5436_v7 = vunpack.c.2.s8 %v4516_v61  ;;  %v5444_v56 = vunpack.c.3.s8 %v4516_v61  ;;  %v6972_v38 = vpack.c.bf16 %v6324_v3, %v6316_v24  ;;  %v5964_v45 = vcvt.s32.f32 %v4940_v60  ;;  %v4508_v19 = vld [vmem:[#allocation7 + $0x680] sm:$0xff] }
 0x307   :  { %v5972_v23 = vcvt.s32.f32 %v4948_v5  ;;  %v5564_v22 = vunpack.c.2.s8 %v4548_v42  ;;  %7169 = vmatpush.bf16.msrb.mxu0 %v6908_v32  ;;  %v6732_v44 = vpack.c.bf16 %v5844_v31, %v5836_v62  ;;  %v5572_v52 = vunpack.c.3.s8 %v4548_v42  ;;  %v4540_v3 = vld [vmem:[#allocation7 + $0x780] sm:$0xff] }
 0x308   :  { %v6460_v25 = vcvt.s32.f32 %v5436_v7  ;;  %v6468_v46 = vcvt.s32.f32 %v5444_v56  ;;  %v5148_v16 = vunpack.c.2.s8 %v4444_v8  ;;  %v5156_v36 = vunpack.c.3.s8 %v4444_v8 }
 0x309   :  { %7182 = vmatpush.bf16.msrb.mxu1 %v6972_v38  ;;  %v6796_v26 = vpack.c.bf16 %v5972_v23, %v5964_v45  ;;  %v6588_v34 = vcvt.s32.f32 %v5564_v22  ;;  %7149 = vmatpush.bf16.msra.mxu2 %v6732_v44  ;;  %v6596_v20 = vcvt.s32.f32 %v5572_v52  ;;  %v5276_v58 = vunpack.c.2.s8 %v4476_v40  ;;  %v4436_v38 = vld [vmem:[#allocation7 + $0x440] sm:$0xff] }
 0x30a   :  { %v7044_v9 = vpack.c.bf16 %v6468_v46, %v6460_v25  ;;  %v5284_v18 = vunpack.c.3.s8 %v4476_v40  ;;  %v6172_v21 = vcvt.s32.f32 %v5148_v16  ;;  %v6180_v59 = vcvt.s32.f32 %v5156_v36  ;;  %v4468_v22 = vld [vmem:[#allocation7 + $0x540] sm:$0xff] }
 0x30b   :  { %7162 = vmatpush.bf16.msra.mxu3 %v6796_v26  ;;  %v5420_v14 = vunpack.c.0.s8 %v4516_v61  ;;  %v5428_v49 = vunpack.c.1.s8 %v4516_v61  ;;  %v7108_v37 = vpack.c.bf16 %v6596_v20, %v6588_v34  ;;  %v6300_v51 = vcvt.s32.f32 %v5276_v58 }
 0x30c   :  { %v6308_v10 = vcvt.s32.f32 %v5284_v18  ;;  %v5548_v30 = vunpack.c.0.s8 %v4548_v42  ;;  %7150 = vmatmul.bf16.vlgmr.msra.gmra.mxu2 %v10485_v41  ;;  %v6900_v48 = vpack.c.bf16 %v6180_v59, %v6172_v21  ;;  %v5556_v35 = vunpack.c.1.s8 %v4548_v42 }
 0x30d   :  { %7194 = vmatpush.bf16.msrb.mxu2 %v7044_v9  ;;  %v6444_v54 = vcvt.s32.f32 %v5420_v14  ;;  %v6452_v47 = vcvt.s32.f32 %v5428_v49  ;;  %v10939_v13 = vadd.f32 %v10916_v43, %v10914_v12  ;;  %v5132_v61 = vunpack.c.0.s8 %v4444_v8 }
 0x30e   :  { %v6964_v63 = vpack.c.bf16 %v6308_v10, %v6300_v51  ;;  %v6572_v24 = vcvt.s32.f32 %v5548_v30  ;;  %7163 = vmatmul.bf16.vlgmr.msra.gmra.mxu3 %v10487_v39  ;;  %7170 = vmatpush.bf16.msrb.mxu0 %v6900_v48  ;;  %v6580_v60 = vcvt.s32.f32 %v5556_v35  ;;  %v5140_v5 = vunpack.c.1.s8 %v4444_v8  ;;  %v4500_v48 = vld [vmem:[#allocation7 + $0x640] sm:$0xff] }
 0x30f   :  { %7207 = vmatpush.bf16.msrb.mxu3 %v7108_v37  ;;  %v7036_v62 = vpack.c.bf16 %v6452_v47, %v6444_v54  ;;  %v5260_v32 = vunpack.c.0.s8 %v4476_v40  ;;  %v6156_v31 = vcvt.s32.f32 %v5132_v61  ;;  %v5268_v42 = vunpack.c.1.s8 %v4476_v40 }
 0x310   :  { %7183 = vmatpush.bf16.msrb.mxu1 %v6964_v63  ;;  %v5404_v7 = vunpack.c.2.s8 %v4508_v19  ;;  %v5412_v56 = vunpack.c.3.s8 %v4508_v19  ;;  %v7100_v45 = vpack.c.bf16 %v6580_v60, %v6572_v24  ;;  %v6164_v23 = vcvt.s32.f32 %v5140_v5  ;;  %v4532_v5 = vld [vmem:[#allocation7 + $0x740] sm:$0xff] }
 0x311   :  { %7195 = vmatpush.bf16.msrb.mxu2 %v7036_v62  ;;  %v6284_v12 = vcvt.s32.f32 %v5260_v32  ;;  %v5532_v43 = vunpack.c.2.s8 %v4540_v3  ;;  %v6292_v44 = vcvt.s32.f32 %v5268_v42  ;;  %v5540_v52 = vunpack.c.3.s8 %v4540_v3 }
 0x312   :  { %v6428_v25 = vcvt.s32.f32 %v5404_v7  ;;  %v6436_v46 = vcvt.s32.f32 %v5412_v56  ;;  %v6892_v26 = vpack.c.bf16 %v6164_v23, %v6156_v31  ;;  %v5116_v34 = vunpack.c.2.s8 %v4436_v38  ;;  %v4428_v7 = vld [vmem:[#allocation7 + $0x400] sm:$0xff] }
 0x313   :  { %7208 = vmatpush.bf16.msrb.mxu3 %v7100_v45  ;;  %v6556_v8 = vcvt.s32.f32 %v5532_v43  ;;  %v5124_v16 = vunpack.c.3.s8 %v4436_v38  ;;  %v6956_v36 = vpack.c.bf16 %v6292_v44, %v6284_v12  ;;  %v6564_v9 = vcvt.s32.f32 %v5540_v52  ;;  %v4460_v12 = vld [vmem:[#allocation7 + $0x500] sm:$0xff]  ;;  %v10942_v43 = vpop.f32.mrf.mxu0 }
 0x314   :  { %v7028_v40 = vpack.c.bf16 %v6436_v46, %v6428_v25  ;;  %v5244_v20 = vunpack.c.2.s8 %v4468_v22  ;;  %7171 = vmatpush.bf16.msrb.mxu0 %v6892_v26  ;;  %v6140_v58 = vcvt.s32.f32 %v5116_v34  ;;  %v5252_v57 = vunpack.c.3.s8 %v4468_v22 }
 0x315   :  { %v6148_v18 = vcvt.s32.f32 %v5124_v16  ;;  %v5388_v29 = vunpack.c.0.s8 %v4508_v19  ;;  %7184 = vmatpush.bf16.msrb.mxu1 %v6956_v36  ;;  %v7092_v21 = vpack.c.bf16 %v6564_v9, %v6556_v8  ;;  %v5396_v14 = vunpack.c.1.s8 %v4508_v19 }
 0x316   :  { %7196 = vmatpush.bf16.msrb.mxu2 %v7028_v40  ;;  %v6268_v59 = vcvt.s32.f32 %v5244_v20  ;;  %v5516_v49 = vunpack.c.0.s8 %v4540_v3  ;;  %v6276_v51 = vcvt.s32.f32 %v5252_v57  ;;  %v5524_v30 = vunpack.c.1.s8 %v4540_v3 }
 0x317   :  { %v6884_v37 = vpack.c.bf16 %v6148_v18, %v6140_v58  ;;  %v6412_v10 = vcvt.s32.f32 %v5388_v29  ;;  %7209 = vmatpush.bf16.msrb.mxu3 %v7092_v21  ;;  %v6420_v54 = vcvt.s32.f32 %v5396_v14  ;;  %v5100_v35 = vunpack.c.0.s8 %v4436_v38 }
 0x318   :  { %v6540_v47 = vcvt.s32.f32 %v5516_v49  ;;  %v5108_v63 = vunpack.c.1.s8 %v4436_v38  ;;  %v6948_v24 = vpack.c.bf16 %v6276_v51, %v6268_v59  ;;  %v6548_v61 = vcvt.s32.f32 %v5524_v30  ;;  %v10944_v38 = vpop.f32.mrf.mxu1 }
 0x319   :  { %7172 = vmatpush.bf16.msrb.mxu0 %v6884_v37  ;;  %v5228_v62 = vunpack.c.0.s8 %v4468_v22  ;;  %v5236_v60 = vunpack.c.1.s8 %v4468_v22  ;;  %v7020_v32 = vpack.c.bf16 %v6420_v54, %v6412_v10  ;;  %v6124_v31 = vcvt.s32.f32 %v5100_v35 }
 0x31a   :  { %v6132_v19 = vcvt.s32.f32 %v5108_v63  ;;  %v5372_v42 = vunpack.c.2.s8 %v4500_v48  ;;  %7185 = vmatpush.bf16.msrb.mxu1 %v6948_v24  ;;  %v7084_v56 = vpack.c.bf16 %v6548_v61, %v6540_v47  ;;  %v5380_v23 = vunpack.c.3.s8 %v4500_v48  ;;  %v4325_v47 = vld [vmem:[#allocation7 + $0xc8] sm:$0xff] }
 0x31b   :  { %v6252_v3 = vcvt.s32.f32 %v5228_v62  ;;  %v6260_v45 = vcvt.s32.f32 %v5236_v60  ;;  %7197 = vmatpush.bf16.msrb.mxu2 %v7020_v32  ;;  %v5500_v22 = vunpack.c.2.s8 %v4532_v5  ;;  %v5508_v46 = vunpack.c.3.s8 %v4532_v5  ;;  %v4357_v61 = vld [vmem:[#allocation7 + $0x1c8] sm:$0xff]  ;;  %v4095_v62 = vpop.f32.mrf.mxu0 }
 0x31c   :  { %v6876_v44 = vpack.c.bf16 %v6132_v19, %v6124_v31  ;;  %v6396_v25 = vcvt.s32.f32 %v5372_v42  ;;  %7210 = vmatpush.bf16.msrb.mxu3 %v7084_v56  ;;  %v6404_v26 = vcvt.s32.f32 %v5380_v23  ;;  %v4068_v8 = vadd.f32 %v10930_v53, %v10939_v13  ;;  %v4492_v42 = vld [vmem:[#allocation7 + $0x600] sm:$0xff] }
 0x31d   :  { %v6940_v52 = vpack.c.bf16 %v6260_v45, %v6252_v3  ;;  %v5084_v34 = vunpack.c.2.s8 %v4428_v7  ;;  %v6524_v16 = vcvt.s32.f32 %v5500_v22  ;;  %v6532_v36 = vcvt.s32.f32 %v5508_v46 }
 0x31e   :  { %7173 = vmatpush.bf16.msrb.mxu0 %v6876_v44  ;;  %v5092_v40 = vunpack.c.3.s8 %v4428_v7  ;;  %v5212_v9 = vunpack.c.2.s8 %v4460_v12  ;;  %v7012_v20 = vpack.c.bf16 %v6404_v26, %v6396_v25  ;;  %v10949_v58 = vadd.f32 %v10932_v6, %v4068_v8 }
 0x31f   :  { %7186 = vmatpush.bf16.msrb.mxu1 %v6940_v52  ;;  %v6108_v18 = vcvt.s32.f32 %v5084_v34  ;;  %v5220_v57 = vunpack.c.3.s8 %v4460_v12  ;;  %v7076_v29 = vpack.c.bf16 %v6532_v36, %v6524_v16  ;;  %v5356_v14 = vunpack.c.0.s8 %v4500_v48 }
 0x320   :  { %v6116_v21 = vcvt.s32.f32 %v5092_v40  ;;  %v6236_v59 = vcvt.s32.f32 %v5212_v9  ;;  %7198 = vmatpush.bf16.msrb.mxu2 %v7012_v20  ;;  %v5364_v53 = vunpack.c.1.s8 %v4500_v48  ;;  %v5484_v13 = vunpack.c.0.s8 %v4532_v5  ;;  %v4108_v60 = vpop.f32.mrf.mxu1 }
 0x321   :  { %v6244_v49 = vcvt.s32.f32 %v5220_v57  ;;  %v5492_v37 = vunpack.c.1.s8 %v4532_v5  ;;  %7211 = vmatpush.bf16.msrb.mxu3 %v7076_v29  ;;  %v6380_v10 = vcvt.s32.f32 %v5356_v14  ;;  %v5068_v30 = vunpack.c.0.s8 %v4428_v7  ;;  %v4421_v60 = vld [vmem:[#allocation7 + $0x3c8] sm:$0xff] }
 0x322   :  { %v6868_v51 = vpack.c.bf16 %v6116_v21, %v6108_v18  ;;  %v5076_v54 = vunpack.c.1.s8 %v4428_v7  ;;  %v6388_v6 = vcvt.s32.f32 %v5364_v53  ;;  %v6508_v63 = vcvt.s32.f32 %v5484_v13  ;;  %v4524_v7 = vld [vmem:[#allocation7 + $0x700] sm:$0xff] }
 0x323   :  { %v6932_v35 = vpack.c.bf16 %v6244_v49, %v6236_v59  ;;  %v6516_v24 = vcvt.s32.f32 %v5492_v37  ;;  %v6092_v32 = vcvt.s32.f32 %v5068_v30  ;;  %v5196_v19 = vunpack.c.0.s8 %v4460_v12  ;;  %v10951_v37 = vpop.f32.mrf.mxu2 }
 0x324   :  { %7174 = vmatpush.bf16.msrb.mxu0 %v6868_v51  ;;  %v6100_v31 = vcvt.s32.f32 %v5076_v54  ;;  %v5204_v48 = vunpack.c.1.s8 %v4460_v12  ;;  %v7004_v5 = vpack.c.bf16 %v6388_v6, %v6380_v10  ;;  %v4669_v3 = vunpack.c.2.s8 %v4325_v47  ;;  %v10953_v51 = vpop.f32.mrf.mxu3  ;;  %v4389_v6 = vld [vmem:[#allocation7 + $0x2c8] sm:$0xff] }
 0x325   :  { %7187 = vmatpush.bf16.msrb.mxu1 %v6932_v35  ;;  %v7068_v56 = vpack.c.bf16 %v6516_v24, %v6508_v63  ;;  %v4677_v45 = vunpack.c.3.s8 %v4325_v47  ;;  %v6220_v44 = vcvt.s32.f32 %v5196_v19  ;;  %v4797_v22 = vunpack.c.2.s8 %v4357_v61 }
 0x326   :  { %v6860_v23 = vpack.c.bf16 %v6100_v31, %v6092_v32  ;;  %v6228_v25 = vcvt.s32.f32 %v5204_v48  ;;  %7199 = vmatpush.bf16.msrb.mxu2 %v7004_v5  ;;  %v5693_v46 = vcvt.s32.f32 %v4669_v3  ;;  %v4805_v26 = vunpack.c.3.s8 %v4357_v61  ;;  %v10957_v48 = vld [vmem:[#allocation7 + $0x88] sm:$0xff] }
 0x327   :  { %7212 = vmatpush.bf16.msrb.mxu3 %v7068_v56  ;;  %v5701_v52 = vcvt.s32.f32 %v4677_v45  ;;  %v5340_v8 = vunpack.c.2.s8 %v4492_v42  ;;  %v5821_v12 = vcvt.s32.f32 %v4797_v22  ;;  %v5348_v16 = vunpack.c.3.s8 %v4492_v42  ;;  %v4349_v22 = vld [vmem:[#allocation7 + $0x188] sm:$0xff] }
 0x328   :  { %7175 = vmatpush.bf16.msrb.mxu0 %v6860_v23  ;;  %v6924_v34 = vpack.c.bf16 %v6228_v25, %v6220_v44  ;;  %v5468_v36 = vunpack.c.2.s8 %v4524_v7  ;;  %v5829_v9 = vcvt.s32.f32 %v4805_v26  ;;  %v5476_v18 = vunpack.c.3.s8 %v4524_v7 }
 0x329   :  { %v6661_v40 = vpack.c.bf16 %v5701_v52, %v5693_v46  ;;  %v6364_v20 = vcvt.s32.f32 %v5340_v8  ;;  %v6372_v57 = vcvt.s32.f32 %v5348_v16  ;;  %v4653_v21 = vunpack.c.0.s8 %v4325_v47 }
 0x32a   :  { %7188 = vmatpush.bf16.msrb.mxu1 %v6924_v34  ;;  %v6492_v29 = vcvt.s32.f32 %v5468_v36  ;;  %v4661_v59 = vunpack.c.1.s8 %v4325_v47  ;;  %v6725_v14 = vpack.c.bf16 %v5829_v9, %v5821_v12  ;;  %v6500_v49 = vcvt.s32.f32 %v5476_v18 }
 0x32b   :  { %v4781_v53 = vunpack.c.0.s8 %v4357_v61  ;;  %v4789_v13 = vunpack.c.1.s8 %v4357_v61  ;;  %v6996_v10 = vpack.c.bf16 %v6372_v57, %v6364_v20  ;;  %7176 = vmatmul.bf16.vlgmr.msrb.gmra.mxu0 %v10656_v17  ;;  %v5677_v30 = vcvt.s32.f32 %v4653_v21  ;;  %v4121_v18 = vpop.f32.mrf.mxu2 }
 0x32c   :  { %7220 = vmatpush.bf16.msra.mxu0 %v6661_v40  ;;  %v5685_v54 = vcvt.s32.f32 %v4661_v59  ;;  %v5324_v35 = vunpack.c.0.s8 %v4492_v42  ;;  %v7060_v63 = vpack.c.bf16 %v6500_v49, %v6492_v29  ;;  %v5332_v62 = vunpack.c.1.s8 %v4492_v42  ;;  %v4134_v57 = vpop.f32.mrf.mxu3 }
 0x32d   :  { %v5805_v24 = vcvt.s32.f32 %v4781_v53  ;;  %v5813_v47 = vcvt.s32.f32 %v4789_v13  ;;  %7200 = vmatpush.bf16.msrb.mxu2 %v6996_v10  ;;  %7189 = vmatmul.bf16.vlgmr.msrb.gmra.mxu1 %v10805_v33  ;;  %v5452_v31 = vunpack.c.0.s8 %v4524_v7  ;;  %v5460_v19 = vunpack.c.1.s8 %v4524_v7 }
 0x32e   :  { %7233 = vmatpush.bf16.msra.mxu1 %v6725_v14  ;;  %v6653_v61 = vpack.c.bf16 %v5685_v54, %v5677_v30  ;;  %v6348_v32 = vcvt.s32.f32 %v5324_v35  ;;  %7213 = vmatpush.bf16.msrb.mxu3 %v7060_v63  ;;  %v6356_v56 = vcvt.s32.f32 %v5332_v62  ;;  %v4925_v3 = vunpack.c.2.s8 %v4389_v6 }
 0x32f   :  { %v6717_v5 = vpack.c.bf16 %v5813_v47, %v5805_v24  ;;  %v4933_v45 = vunpack.c.3.s8 %v4389_v6  ;;  %v6476_v23 = vcvt.s32.f32 %v5452_v31  ;;  %v6484_v44 = vcvt.s32.f32 %v5460_v19  ;;  %v4381_v24 = vld [vmem:[#allocation7 + $0x288] sm:$0xff] }
 0x330   :  { %7221 = vmatpush.bf16.msra.mxu0 %v6653_v61  ;;  %v5053_v25 = vunpack.c.2.s8 %v4421_v60  ;;  %v5061_v42 = vunpack.c.3.s8 %v4421_v60  ;;  %v6988_v46 = vpack.c.bf16 %v6356_v56, %v6348_v32  ;;  %v5949_v52 = vcvt.s32.f32 %v4925_v3  ;;  %v4413_v32 = vld [vmem:[#allocation7 + $0x388] sm:$0xff] }
 0x331   :  { %v5957_v26 = vcvt.s32.f32 %v4933_v45  ;;  %v4637_v8 = vunpack.c.2.s8 %v10957_v48  ;;  %v7052_v7 = vpack.c.bf16 %v6484_v44, %v6476_v23  ;;  %v4645_v16 = vunpack.c.3.s8 %v10957_v48  ;;  %v4309_v56 = vld [vmem:[#allocation7 + $0x48] sm:$0xff] }
 0x332   :  { %7234 = vmatpush.bf16.msra.mxu1 %v6717_v5  ;;  %v6077_v34 = vcvt.s32.f32 %v5053_v25  ;;  %v6085_v12 = vcvt.s32.f32 %v5061_v42  ;;  %7201 = vmatpush.bf16.msrb.mxu2 %v6988_v46  ;;  %v4765_v9 = vunpack.c.2.s8 %v4349_v22  ;;  %v4773_v20 = vunpack.c.3.s8 %v4349_v22  ;;  %v4341_v46 = vld [vmem:[#allocation7 + $0x148] sm:$0xff] }
 0x333   :  { %v6789_v36 = vpack.c.bf16 %v5957_v26, %v5949_v52  ;;  %v5661_v40 = vcvt.s32.f32 %v4637_v8  ;;  %7214 = vmatpush.bf16.msrb.mxu3 %v7052_v7  ;;  %v5669_v21 = vcvt.s32.f32 %v4645_v16  ;;  %v4909_v59 = vunpack.c.0.s8 %v4389_v6 }
 0x334   :  { %v6853_v29 = vpack.c.bf16 %v6085_v12, %v6077_v34  ;;  %v4917_v14 = vunpack.c.1.s8 %v4389_v6  ;;  %v5789_v49 = vcvt.s32.f32 %v4765_v9  ;;  %v5797_v53 = vcvt.s32.f32 %v4773_v20 }
 0x335   :  { %v5037_v13 = vunpack.c.0.s8 %v4421_v60  ;;  %v5045_v10 = vunpack.c.1.s8 %v4421_v60  ;;  %7202 = vmatmul.bf16.vlgmr.msrb.gmra.mxu2 %v10924_v4  ;;  %v6645_v30 = vpack.c.bf16 %v5669_v21, %v5661_v40  ;;  %v5933_v54 = vcvt.s32.f32 %v4909_v59 }
 0x336   :  { %7246 = vmatpush.bf16.msra.mxu2 %v6789_v36  ;;  %v5941_v35 = vcvt.s32.f32 %v4917_v14  ;;  %v4094_v63 = vadd.f32 %v10942_v43, %v10949_v58  ;;  %7215 = vmatmul.bf16.vlgmr.msrb.gmra.mxu3 %v10926_v0  ;;  %v6709_v47 = vpack.c.bf16 %v5797_v53, %v5789_v49  ;;  %v4621_v61 = vunpack.c.0.s8 %v10957_v48 }
 0x337   :  { %7259 = vmatpush.bf16.msra.mxu3 %v6853_v29  ;;  %v6061_v62 = vcvt.s32.f32 %v5037_v13  ;;  %v6069_v6 = vcvt.s32.f32 %v5045_v10  ;;  %7222 = vmatpush.bf16.msra.mxu0 %v6645_v30  ;;  %v4629_v19 = vunpack.c.1.s8 %v10957_v48  ;;  %v4749_v5 = vunpack.c.0.s8 %v4349_v22  ;;  %v4373_v30 = vld [vmem:[#allocation7 + $0x248] sm:$0xff] }
 0x338   :  { %v6781_v60 = vpack.c.bf16 %v5941_v35, %v5933_v54  ;;  %v10967_v31 = vadd.f32 %v10944_v38, %v4094_v63  ;;  %7235 = vmatpush.bf16.msra.mxu1 %v6709_v47  ;;  %v5645_v58 = vcvt.s32.f32 %v4621_v61  ;;  %v4757_v3 = vunpack.c.1.s8 %v4349_v22 }
 0x339   :  { %v6845_v43 = vpack.c.bf16 %v6069_v6, %v6061_v62  ;;  %v4893_v45 = vunpack.c.2.s8 %v4381_v24  ;;  %v5653_v23 = vcvt.s32.f32 %v4629_v19  ;;  %v5773_v44 = vcvt.s32.f32 %v4749_v5  ;;  %v4405_v19 = vld [vmem:[#allocation7 + $0x348] sm:$0xff] }
 0x33a   :  { %7247 = vmatpush.bf16.msra.mxu2 %v6781_v60  ;;  %v4901_v25 = vunpack.c.3.s8 %v4381_v24  ;;  %v5021_v42 = vunpack.c.2.s8 %v4413_v32  ;;  %v5781_v52 = vcvt.s32.f32 %v4757_v3  ;;  %v5029_v38 = vunpack.c.3.s8 %v4413_v32 }
 0x33b   :  { %7260 = vmatpush.bf16.msra.mxu3 %v6845_v43  ;;  %v5917_v26 = vcvt.s32.f32 %v4893_v45  ;;  %v4605_v8 = vunpack.c.2.s8 %v4309_v56  ;;  %v6637_v7 = vpack.c.bf16 %v5653_v23, %v5645_v58  ;;  %v4613_v12 = vunpack.c.3.s8 %v4309_v56 }
 0x33c   :  { %v5925_v48 = vcvt.s32.f32 %v4901_v25  ;;  %v6045_v34 = vcvt.s32.f32 %v5021_v42  ;;  %v6701_v16 = vpack.c.bf16 %v5781_v52, %v5773_v44  ;;  %v6053_v36 = vcvt.s32.f32 %v5029_v38  ;;  %v4301_v44 = vld [vmem:[#allocation7 + $0x8] sm:$0xff] }
 0x33d   :  { %v5629_v40 = vcvt.s32.f32 %v4605_v8  ;;  %v4733_v22 = vunpack.c.2.s8 %v4341_v46  ;;  %7223 = vmatpush.bf16.msra.mxu0 %v6637_v7  ;;  %v5637_v20 = vcvt.s32.f32 %v4613_v12  ;;  %v4741_v18 = vunpack.c.3.s8 %v4341_v46  ;;  %v10972_v7 = vpop.f32.mrf.mxu0 }
 0x33e   :  { %v6773_v9 = vpack.c.bf16 %v5925_v48, %v5917_v26  ;;  %v4877_v57 = vunpack.c.0.s8 %v4381_v24  ;;  %7236 = vmatpush.bf16.msra.mxu1 %v6701_v16  ;;  %v6837_v29 = vpack.c.bf16 %v6053_v36, %v6045_v34  ;;  %v4885_v59 = vunpack.c.1.s8 %v4381_v24  ;;  %v4333_v26 = vld [vmem:[#allocation7 + $0x108] sm:$0xff]  ;;  %v10974_v48 = vpop.f32.mrf.mxu1 }
 0x33f   :  { %v5757_v21 = vcvt.s32.f32 %v4733_v22  ;;  %v5005_v14 = vunpack.c.0.s8 %v4413_v32  ;;  %v6629_v49 = vpack.c.bf16 %v5637_v20, %v5629_v40  ;;  %v5765_v53 = vcvt.s32.f32 %v4741_v18 }
 0x340   :  { %7248 = vmatpush.bf16.msra.mxu2 %v6773_v9  ;;  %v5901_v13 = vcvt.s32.f32 %v4877_v57  ;;  %v5013_v10 = vunpack.c.1.s8 %v4413_v32  ;;  %7261 = vmatpush.bf16.msra.mxu3 %v6837_v29  ;;  %v5909_v54 = vcvt.s32.f32 %v4885_v59  ;;  %v4589_v63 = vunpack.c.0.s8 %v4309_v56 }
 0x341   :  { %v6029_v35 = vcvt.s32.f32 %v5005_v14  ;;  %v4597_v47 = vunpack.c.1.s8 %v4309_v56  ;;  %7224 = vmatpush.bf16.msra.mxu0 %v6629_v49  ;;  %v6693_v62 = vpack.c.bf16 %v5765_v53, %v5757_v21  ;;  %v4717_v61 = vunpack.c.0.s8 %v4341_v46 }
 0x342   :  { %v6037_v6 = vcvt.s32.f32 %v5013_v10  ;;  %v4725_v60 = vunpack.c.1.s8 %v4341_v46  ;;  %v6765_v5 = vpack.c.bf16 %v5909_v54, %v5901_v13  ;;  %v5613_v24 = vcvt.s32.f32 %v4589_v63 }
 0x343   :  { %v5621_v43 = vcvt.s32.f32 %v4597_v47  ;;  %v4861_v58 = vunpack.c.2.s8 %v4373_v30  ;;  %7237 = vmatpush.bf16.msra.mxu1 %v6693_v62  ;;  %v5741_v45 = vcvt.s32.f32 %v4717_v61  ;;  %v4869_v23 = vunpack.c.3.s8 %v4373_v30 }
 0x344   :  { %v6829_v3 = vpack.c.bf16 %v6037_v6, %v6029_v35  ;;  %v5749_v32 = vcvt.s32.f32 %v4725_v60  ;;  %7249 = vmatpush.bf16.msra.mxu2 %v6765_v5  ;;  %v4989_v56 = vunpack.c.2.s8 %v4405_v19  ;;  %v4997_v52 = vunpack.c.3.s8 %v4405_v19  ;;  %v4485_v6 = vld [vmem:[#allocation7 + $0x5c8] sm:$0xff] }
 0x345   :  { %v6621_v25 = vpack.c.bf16 %v5621_v43, %v5613_v24  ;;  %v5885_v42 = vcvt.s32.f32 %v4861_v58  ;;  %v5893_v46 = vcvt.s32.f32 %v4869_v23  ;;  %v4120_v8 = vadd.f32 %v10951_v37, %v10967_v31  ;;  %v4365_v24 = vld [vmem:[#allocation7 + $0x208] sm:$0xff] }
 0x346   :  { %7262 = vmatpush.bf16.msra.mxu3 %v6829_v3  ;;  %v6685_v38 = vpack.c.bf16 %v5749_v32, %v5741_v45  ;;  %v6013_v34 = vcvt.s32.f32 %v4989_v56  ;;  %v6021_v12 = vcvt.s32.f32 %v4997_v52  ;;  %v4573_v16 = vunpack.c.2.s8 %v4301_v44  ;;  %v4160_v43 = vpop.f32.mrf.mxu1  ;;  %v4397_v56 = vld [vmem:[#allocation7 + $0x308] sm:$0xff] }
 0x347   :  { %7225 = vmatpush.bf16.msra.mxu0 %v6621_v25  ;;  %v6757_v36 = vpack.c.bf16 %v5893_v46, %v5885_v42  ;;  %v10977_v40 = vadd.f32 %v10953_v51, %v4120_v8  ;;  %v4581_v22 = vunpack.c.3.s8 %v4301_v44  ;;  %v4701_v9 = vunpack.c.2.s8 %v4333_v26  ;;  %v4453_v51 = vld [vmem:[#allocation7 + $0x4c8] sm:$0xff] }
 0x348   :  { %7238 = vmatpush.bf16.msra.mxu1 %v6685_v38  ;;  %v6821_v20 = vpack.c.bf16 %v6021_v12, %v6013_v34  ;;  %v5597_v18 = vcvt.s32.f32 %v4573_v16  ;;  %v4709_v57 = vunpack.c.3.s8 %v4333_v26  ;;  %v4845_v29 = vunpack.c.0.s8 %v4373_v30 }
 0x349   :  { %7250 = vmatpush.bf16.msra.mxu2 %v6757_v36  ;;  %v5605_v37 = vcvt.s32.f32 %v4581_v22  ;;  %v5725_v31 = vcvt.s32.f32 %v4701_v9  ;;  %v4853_v21 = vunpack.c.1.s8 %v4373_v30  ;;  %v4973_v49 = vunpack.c.0.s8 %v4405_v19  ;;  %v4147_v30 = vpop.f32.mrf.mxu0 }
 0x34a   :  { %7263 = vmatpush.bf16.msra.mxu3 %v6821_v20  ;;  %v5733_v59 = vcvt.s32.f32 %v4709_v57  ;;  %v5869_v14 = vcvt.s32.f32 %v4845_v29  ;;  %v4981_v53 = vunpack.c.1.s8 %v4405_v19  ;;  %v4557_v54 = vunpack.c.0.s8 %v4301_v44 }
 0x34b   :  { %v6613_v13 = vpack.c.bf16 %v5605_v37, %v5597_v18  ;;  %v5877_v10 = vcvt.s32.f32 %v4853_v21  ;;  %v5997_v63 = vcvt.s32.f32 %v4973_v49  ;;  %v4565_v62 = vunpack.c.1.s8 %v4301_v44  ;;  %v10981_v49 = vpop.f32.mrf.mxu3 }
 0x34c   :  { %v6677_v35 = vpack.c.bf16 %v5733_v59, %v5725_v31  ;;  %v6005_v47 = vcvt.s32.f32 %v4981_v53  ;;  %v5581_v60 = vcvt.s32.f32 %v4557_v54  ;;  %v4685_v5 = vunpack.c.0.s8 %v4333_v26 }
 0x34d   :  { %7226 = vmatpush.bf16.msra.mxu0 %v6613_v13  ;;  %v6749_v61 = vpack.c.bf16 %v5877_v10, %v5869_v14  ;;  %v5589_v3 = vcvt.s32.f32 %v4565_v62  ;;  %v4693_v19 = vunpack.c.1.s8 %v4333_v26  ;;  %v5181_v45 = vunpack.c.2.s8 %v4453_v51  ;;  %v10979_v14 = vpop.f32.mrf.mxu2 }
 0x34e   :  { %7239 = vmatpush.bf16.msra.mxu1 %v6677_v35  ;;  %v6813_v58 = vpack.c.bf16 %v6005_v47, %v5997_v63  ;;  %v5709_v32 = vcvt.s32.f32 %v4685_v5  ;;  %v5189_v23 = vunpack.c.3.s8 %v4453_v51  ;;  %v5309_v25 = vunpack.c.2.s8 %v4485_v6  ;;  %v4517_v35 = vld [vmem:[#allocation7 + $0x6c8] sm:$0xff] }
 0x34f   :  { %7251 = vmatpush.bf16.msra.mxu2 %v6749_v61  ;;  %v5317_v42 = vunpack.c.3.s8 %v4485_v6  ;;  %v6605_v44 = vpack.c.bf16 %v5589_v3, %v5581_v60  ;;  %v5717_v52 = vcvt.s32.f32 %v4693_v19  ;;  %v6205_v38 = vcvt.s32.f32 %v5181_v45  ;;  %v4549_v60 = vld [vmem:[#allocation7 + $0x7c8] sm:$0xff] }
 0x350   :  { %7264 = vmatpush.bf16.msra.mxu3 %v6813_v58  ;;  %v4829_v46 = vunpack.c.2.s8 %v4365_v24  ;;  %v6213_v8 = vcvt.s32.f32 %v5189_v23  ;;  %v6333_v34 = vcvt.s32.f32 %v5309_v25  ;;  %v4837_v16 = vunpack.c.3.s8 %v4365_v24  ;;  %v4445_v45 = vld [vmem:[#allocation7 + $0x488] sm:$0xff] }
 0x351   :  { %v6341_v12 = vcvt.s32.f32 %v5317_v42  ;;  %7227 = vmatpush.bf16.msra.mxu0 %v6605_v44  ;;  %v6669_v36 = vpack.c.bf16 %v5717_v52, %v5709_v32  ;;  %v4957_v26 = vunpack.c.2.s8 %v4397_v56  ;;  %v4965_v9 = vunpack.c.3.s8 %v4397_v56  ;;  %v4477_v44 = vld [vmem:[#allocation7 + $0x588] sm:$0xff] }
 0x352   :  { %v5853_v22 = vcvt.s32.f32 %v4829_v46  ;;  %v6917_v20 = vpack.c.bf16 %v6213_v8, %v6205_v38  ;;  %v5861_v57 = vcvt.s32.f32 %v4837_v16  ;;  %v5165_v29 = vunpack.c.0.s8 %v4453_v51 }
 0x353   :  { %v6981_v18 = vpack.c.bf16 %v6341_v12, %v6333_v34  ;;  %7240 = vmatpush.bf16.msra.mxu1 %v6669_v36  ;;  %v5981_v37 = vcvt.s32.f32 %v4957_v26  ;;  %v5989_v31 = vcvt.s32.f32 %v4965_v9  ;;  %v5173_v21 = vunpack.c.1.s8 %v4453_v51 }
 0x354   :  { %v5293_v59 = vunpack.c.0.s8 %v4485_v6  ;;  %v6741_v53 = vpack.c.bf16 %v5861_v57, %v5853_v22  ;;  %v6189_v13 = vcvt.s32.f32 %v5165_v29  ;;  %v5301_v10 = vunpack.c.1.s8 %v4485_v6  ;;  %7228 = vmatmul.bf16.vlgmr.msra.gmra.mxu0 %v10196_v27 }
 0x355   :  { %7272 = vmatpush.bf16.msrb.mxu0 %v6917_v20  ;;  %v4813_v54 = vunpack.c.0.s8 %v4365_v24  ;;  %v6805_v63 = vpack.c.bf16 %v5989_v31, %v5981_v37  ;;  %v6197_v47 = vcvt.s32.f32 %v5173_v21  ;;  %v4821_v61 = vunpack.c.1.s8 %v4365_v24  ;;  %v4173_v9 = vpop.f32.mrf.mxu2  ;;  %v4186_v20 = vpop.f32.mrf.mxu3 }
 0x356   :  { %v6317_v62 = vcvt.s32.f32 %v5293_v59  ;;  %7252 = vmatpush.bf16.msra.mxu2 %v6741_v53  ;;  %7241 = vmatmul.bf16.vlgmr.msra.gmra.mxu1 %v10318_v1  ;;  %v6325_v51 = vcvt.s32.f32 %v5301_v10  ;;  %v4941_v30 = vunpack.c.0.s8 %v4397_v56  ;;  %v4949_v43 = vunpack.c.1.s8 %v4397_v56 }
 0x357   :  { %7285 = vmatpush.bf16.msrb.mxu1 %v6981_v18  ;;  %v5837_v5 = vcvt.s32.f32 %v4813_v54  ;;  %7265 = vmatpush.bf16.msra.mxu3 %v6805_v63  ;;  %v6909_v58 = vpack.c.bf16 %v6197_v47, %v6189_v13  ;;  %v5845_v3 = vcvt.s32.f32 %v4821_v61  ;;  %v5437_v6 = vunpack.c.2.s8 %v4517_v35  ;;  %v4509_v47 = vld [vmem:[#allocation7 + $0x688] sm:$0xff] }
 0x358   :  { %v5445_v19 = vunpack.c.3.s8 %v4517_v35  ;;  %v6973_v32 = vpack.c.bf16 %v6325_v51, %v6317_v62  ;;  %v5965_v23 = vcvt.s32.f32 %v4941_v30  ;;  %v5973_v25 = vcvt.s32.f32 %v4949_v43 }
 0x359   :  { %v5565_v42 = vunpack.c.2.s8 %v4549_v60  ;;  %7273 = vmatpush.bf16.msrb.mxu0 %v6909_v58  ;;  %v6733_v24 = vpack.c.bf16 %v5845_v3, %v5837_v5  ;;  %v6461_v52 = vcvt.s32.f32 %v5437_v6  ;;  %v5573_v46 = vunpack.c.3.s8 %v4549_v60  ;;  %v4541_v5 = vld [vmem:[#allocation7 + $0x788] sm:$0xff] }
 0x35a   :  { %v6469_v38 = vcvt.s32.f32 %v5445_v19  ;;  %v6797_v8 = vpack.c.bf16 %v5973_v25, %v5965_v23  ;;  %v5149_v56 = vunpack.c.2.s8 %v4445_v45  ;;  %v5157_v12 = vunpack.c.3.s8 %v4445_v45  ;;  %v4437_v23 = vld [vmem:[#allocation7 + $0x448] sm:$0xff] }
 0x35b   :  { %7286 = vmatpush.bf16.msrb.mxu1 %v6973_v32  ;;  %v6589_v34 = vcvt.s32.f32 %v5565_v42  ;;  %7253 = vmatpush.bf16.msra.mxu2 %v6733_v24  ;;  %v6597_v36 = vcvt.s32.f32 %v5573_v46  ;;  %v5277_v22 = vunpack.c.2.s8 %v4477_v44  ;;  %v5285_v26 = vunpack.c.3.s8 %v4477_v44  ;;  %v4469_v24 = vld [vmem:[#allocation7 + $0x548] sm:$0xff] }
 0x35c   :  { %v7045_v16 = vpack.c.bf16 %v6469_v38, %v6461_v52  ;;  %7266 = vmatpush.bf16.msra.mxu3 %v6797_v8  ;;  %v6173_v18 = vcvt.s32.f32 %v5149_v56  ;;  %v6181_v57 = vcvt.s32.f32 %v5157_v12  ;;  %v5421_v29 = vunpack.c.0.s8 %v4517_v35 }
 0x35d   :  { %v5429_v37 = vunpack.c.1.s8 %v4517_v35  ;;  %v7109_v31 = vpack.c.bf16 %v6597_v36, %v6589_v34  ;;  %v6301_v21 = vcvt.s32.f32 %v5277_v22  ;;  %v6309_v59 = vcvt.s32.f32 %v5285_v26 }
 0x35e   :  { %v5549_v53 = vunpack.c.0.s8 %v4549_v60  ;;  %7254 = vmatmul.bf16.vlgmr.msra.gmra.mxu2 %v10485_v41  ;;  %v6901_v13 = vpack.c.bf16 %v6181_v57, %v6173_v18  ;;  %v6445_v10 = vcvt.s32.f32 %v5421_v29  ;;  %v5557_v63 = vunpack.c.1.s8 %v4549_v60 }
 0x35f   :  { %7298 = vmatpush.bf16.msrb.mxu2 %v7045_v16  ;;  %v6453_v54 = vcvt.s32.f32 %v5429_v37  ;;  %v6965_v62 = vpack.c.bf16 %v6309_v59, %v6301_v21  ;;  %v10988_v51 = vadd.f32 %v10974_v48, %v10972_v7  ;;  %v5133_v35 = vunpack.c.0.s8 %v4445_v45  ;;  %7267 = vmatmul.bf16.vlgmr.msra.gmra.mxu3 %v10487_v39 }
 0x360   :  { %7311 = vmatpush.bf16.msrb.mxu3 %v7109_v31  ;;  %v6573_v61 = vcvt.s32.f32 %v5549_v53  ;;  %7274 = vmatpush.bf16.msrb.mxu0 %v6901_v13  ;;  %v6581_v43 = vcvt.s32.f32 %v5557_v63  ;;  %v5141_v58 = vunpack.c.1.s8 %v4445_v45  ;;  %v5261_v3 = vunpack.c.0.s8 %v4477_v44 }
 0x361   :  { %v7037_v30 = vpack.c.bf16 %v6453_v54, %v6445_v10  ;;  %7287 = vmatpush.bf16.msrb.mxu1 %v6965_v62  ;;  %v6157_v6 = vcvt.s32.f32 %v5133_v35  ;;  %v5269_v60 = vunpack.c.1.s8 %v4477_v44  ;;  %v5405_v19 = vunpack.c.2.s8 %v4509_v47  ;;  %v4501_v10 = vld [vmem:[#allocation7 + $0x648] sm:$0xff] }
 0x362   :  { %v5413_v32 = vunpack.c.3.s8 %v4509_v47  ;;  %v7101_v25 = vpack.c.bf16 %v6581_v43, %v6573_v61  ;;  %v6165_v42 = vcvt.s32.f32 %v5141_v58  ;;  %v6285_v7 = vcvt.s32.f32 %v5261_v3  ;;  %v4533_v3 = vld [vmem:[#allocation7 + $0x748] sm:$0xff] }
 0x363   :  { %7299 = vmatpush.bf16.msrb.mxu2 %v7037_v30  ;;  %v5533_v48 = vunpack.c.2.s8 %v4541_v5  ;;  %v6293_v52 = vcvt.s32.f32 %v5269_v60  ;;  %v6429_v38 = vcvt.s32.f32 %v5405_v19  ;;  %v5541_v8 = vunpack.c.3.s8 %v4541_v5 }
 0x364   :  { %v6437_v46 = vcvt.s32.f32 %v5413_v32  ;;  %7312 = vmatpush.bf16.msrb.mxu3 %v7101_v25  ;;  %v6893_v34 = vpack.c.bf16 %v6165_v42, %v6157_v6  ;;  %v5117_v56 = vunpack.c.2.s8 %v4437_v23  ;;  %v5125_v12 = vunpack.c.3.s8 %v4437_v23  ;;  %v4429_v32 = vld [vmem:[#allocation7 + $0x408] sm:$0xff] }
 0x365   :  { %v6557_v45 = vcvt.s32.f32 %v5533_v48  ;;  %v6957_v16 = vpack.c.bf16 %v6293_v52, %v6285_v7  ;;  %v6565_v36 = vcvt.s32.f32 %v5541_v8  ;;  %v5245_v22 = vunpack.c.2.s8 %v4469_v24  ;;  %v4461_v48 = vld [vmem:[#allocation7 + $0x508] sm:$0xff]  ;;  %v10991_v52 = vpop.f32.mrf.mxu0 }
 0x366   :  { %v7029_v44 = vpack.c.bf16 %v6437_v46, %v6429_v38  ;;  %7275 = vmatpush.bf16.msrb.mxu0 %v6893_v34  ;;  %v6141_v26 = vcvt.s32.f32 %v5117_v56  ;;  %v6149_v9 = vcvt.s32.f32 %v5125_v12  ;;  %v5253_v20 = vunpack.c.3.s8 %v4469_v24 }
 0x367   :  { %v5389_v18 = vunpack.c.0.s8 %v4509_v47  ;;  %7288 = vmatpush.bf16.msrb.mxu1 %v6957_v16  ;;  %v7093_v57 = vpack.c.bf16 %v6565_v36, %v6557_v45  ;;  %v6269_v29 = vcvt.s32.f32 %v5245_v22  ;;  %v5397_v37 = vunpack.c.1.s8 %v4509_v47 }
 0x368   :  { %7300 = vmatpush.bf16.msrb.mxu2 %v7029_v44  ;;  %v5517_v31 = vunpack.c.0.s8 %v4541_v5  ;;  %v6885_v21 = vpack.c.bf16 %v6149_v9, %v6141_v26  ;;  %v6277_v59 = vcvt.s32.f32 %v5253_v20  ;;  %v5525_v13 = vunpack.c.1.s8 %v4541_v5 }
 0x369   :  { %v6413_v53 = vcvt.s32.f32 %v5389_v18  ;;  %7313 = vmatpush.bf16.msrb.mxu3 %v7093_v57  ;;  %v6421_v54 = vcvt.s32.f32 %v5397_v37  ;;  %v5101_v62 = vunpack.c.0.s8 %v4437_v23  ;;  %v5109_v61 = vunpack.c.1.s8 %v4437_v23  ;;  %v10993_v23 = vpop.f32.mrf.mxu1 }
 0x36a   :  { %v6541_v63 = vcvt.s32.f32 %v5517_v31  ;;  %7276 = vmatpush.bf16.msrb.mxu0 %v6885_v21  ;;  %v6949_v35 = vpack.c.bf16 %v6277_v59, %v6269_v29  ;;  %v6549_v30 = vcvt.s32.f32 %v5525_v13  ;;  %v5229_v43 = vunpack.c.0.s8 %v4469_v24 }
 0x36b   :  { %v5237_v58 = vunpack.c.1.s8 %v4469_v24  ;;  %v7021_v6 = vpack.c.bf16 %v6421_v54, %v6413_v53  ;;  %v6125_v60 = vcvt.s32.f32 %v5101_v62  ;;  %v6133_v47 = vcvt.s32.f32 %v5109_v61  ;;  %v4326_v62 = vld [vmem:[#allocation7 + $0xd0] sm:$0xff] }
 0x36c   :  { %v5373_v19 = vunpack.c.2.s8 %v4501_v10  ;;  %7289 = vmatpush.bf16.msrb.mxu1 %v6949_v35  ;;  %v7085_v25 = vpack.c.bf16 %v6549_v30, %v6541_v63  ;;  %v6253_v5 = vcvt.s32.f32 %v5229_v43  ;;  %v5381_v7 = vunpack.c.3.s8 %v4501_v10  ;;  %v4358_v43 = vld [vmem:[#allocation7 + $0x1d0] sm:$0xff] }
 0x36d   :  { %v6261_v42 = vcvt.s32.f32 %v5237_v58  ;;  %7301 = vmatpush.bf16.msrb.mxu2 %v7021_v6  ;;  %v6877_v38 = vpack.c.bf16 %v6133_v47, %v6125_v60  ;;  %v5501_v24 = vunpack.c.2.s8 %v4533_v3  ;;  %v5509_v8 = vunpack.c.3.s8 %v4533_v3  ;;  %v4199_v58 = vpop.f32.mrf.mxu0 }
 0x36e   :  { %v6397_v46 = vcvt.s32.f32 %v5373_v19  ;;  %7314 = vmatpush.bf16.msrb.mxu3 %v7085_v25  ;;  %v6405_v45 = vcvt.s32.f32 %v5381_v7  ;;  %v4172_v56 = vadd.f32 %v10979_v14, %v10988_v51  ;;  %v5085_v12 = vunpack.c.2.s8 %v4429_v32  ;;  %v4493_v25 = vld [vmem:[#allocation7 + $0x608] sm:$0xff] }
 0x36f   :  { %v6941_v34 = vpack.c.bf16 %v6261_v42, %v6253_v5  ;;  %7277 = vmatpush.bf16.msrb.mxu0 %v6877_v38  ;;  %v6525_v16 = vcvt.s32.f32 %v5501_v24  ;;  %v6533_v44 = vcvt.s32.f32 %v5509_v8  ;;  %v5093_v36 = vunpack.c.3.s8 %v4429_v32 }
 0x370   :  { %v5213_v22 = vunpack.c.2.s8 %v4461_v48  ;;  %v7013_v26 = vpack.c.bf16 %v6405_v45, %v6397_v46  ;;  %v10998_v9 = vadd.f32 %v10981_v49, %v4172_v56  ;;  %v6109_v20 = vcvt.s32.f32 %v5085_v12 }
 0x371   :  { %7290 = vmatpush.bf16.msrb.mxu1 %v6941_v34  ;;  %v5221_v18 = vunpack.c.3.s8 %v4461_v48  ;;  %v7077_v57 = vpack.c.bf16 %v6533_v44, %v6525_v16  ;;  %v6117_v29 = vcvt.s32.f32 %v5093_v36  ;;  %v5357_v31 = vunpack.c.0.s8 %v4501_v10  ;;  %v4212_v6 = vpop.f32.mrf.mxu1 }
 0x372   :  { %v6237_v37 = vcvt.s32.f32 %v5213_v22  ;;  %7302 = vmatpush.bf16.msrb.mxu2 %v7013_v26  ;;  %v5365_v14 = vunpack.c.1.s8 %v4501_v10  ;;  %v5485_v51 = vunpack.c.0.s8 %v4533_v3  ;;  %v5493_v59 = vunpack.c.1.s8 %v4533_v3 }
 0x373   :  { %v6245_v21 = vcvt.s32.f32 %v5221_v18  ;;  %7315 = vmatpush.bf16.msrb.mxu3 %v7077_v57  ;;  %v6869_v53 = vpack.c.bf16 %v6117_v29, %v6109_v20  ;;  %v6381_v13 = vcvt.s32.f32 %v5357_v31  ;;  %v5069_v54 = vunpack.c.0.s8 %v4429_v32 }
 0x374   :  { %v5077_v63 = vunpack.c.1.s8 %v4429_v32  ;;  %v6389_v49 = vcvt.s32.f32 %v5365_v14  ;;  %v6509_v35 = vcvt.s32.f32 %v5485_v51  ;;  %v6517_v30 = vcvt.s32.f32 %v5493_v59  ;;  %v4525_v32 = vld [vmem:[#allocation7 + $0x708] sm:$0xff] }
 0x375   :  { %v6933_v61 = vpack.c.bf16 %v6245_v21, %v6237_v37  ;;  %7278 = vmatpush.bf16.msrb.mxu0 %v6869_v53  ;;  %v6093_v60 = vcvt.s32.f32 %v5069_v54  ;;  %v5197_v19 = vunpack.c.0.s8 %v4461_v48  ;;  %v5205_v10 = vunpack.c.1.s8 %v4461_v48  ;;  %v11000_v53 = vpop.f32.mrf.mxu2 }
 0x376   :  { %v6101_v47 = vcvt.s32.f32 %v5077_v63  ;;  %v7005_v3 = vpack.c.bf16 %v6389_v49, %v6381_v13  ;;  %v7069_v5 = vpack.c.bf16 %v6517_v30, %v6509_v35  ;;  %v4670_v42 = vunpack.c.2.s8 %v4326_v62  ;;  %v11002_v13 = vpop.f32.mrf.mxu3  ;;  %v4390_v35 = vld [vmem:[#allocation7 + $0x2d0] sm:$0xff] }
 0x377   :  { %7291 = vmatpush.bf16.msrb.mxu1 %v6933_v61  ;;  %v4678_v7 = vunpack.c.3.s8 %v4326_v62  ;;  %v6221_v46 = vcvt.s32.f32 %v5197_v19  ;;  %v6229_v24 = vcvt.s32.f32 %v5205_v10  ;;  %v4798_v8 = vunpack.c.2.s8 %v4358_v43 }
 0x378   :  { %v6861_v38 = vpack.c.bf16 %v6101_v47, %v6093_v60  ;;  %7303 = vmatpush.bf16.msrb.mxu2 %v7005_v3  ;;  %7316 = vmatpush.bf16.msrb.mxu3 %v7069_v5  ;;  %v5694_v34 = vcvt.s32.f32 %v4670_v42  ;;  %v4806_v56 = vunpack.c.3.s8 %v4358_v43  ;;  %v5341_v12 = vunpack.c.2.s8 %v4493_v25  ;;  %v4422_v60 = vld [vmem:[#allocation7 + $0x3d0] sm:$0xff] }
 0x379   :  { %v5702_v45 = vcvt.s32.f32 %v4678_v7  ;;  %v6925_v16 = vpack.c.bf16 %v6229_v24, %v6221_v46  ;;  %v5822_v48 = vcvt.s32.f32 %v4798_v8  ;;  %v5349_v44 = vunpack.c.3.s8 %v4493_v25  ;;  %v11006_v3 = vld [vmem:[#allocation7 + $0x90] sm:$0xff] }
 0x37a   :  { %7279 = vmatpush.bf16.msrb.mxu0 %v6861_v38  ;;  %v5469_v36 = vunpack.c.2.s8 %v4525_v32  ;;  %v5830_v26 = vcvt.s32.f32 %v4806_v56  ;;  %v6365_v20 = vcvt.s32.f32 %v5341_v12  ;;  %v5477_v18 = vunpack.c.3.s8 %v4525_v32 }
 0x37b   :  { %v6662_v22 = vpack.c.bf16 %v5702_v45, %v5694_v34  ;;  %7292 = vmatpush.bf16.msrb.mxu1 %v6925_v16  ;;  %v6373_v57 = vcvt.s32.f32 %v5349_v44  ;;  %v4654_v37 = vunpack.c.0.s8 %v4326_v62  ;;  %v4662_v31 = vunpack.c.1.s8 %v4326_v62  ;;  %v4350_v34 = vld [vmem:[#allocation7 + $0x190] sm:$0xff] }
 0x37c   :  { %v6493_v29 = vcvt.s32.f32 %v5469_v36  ;;  %v6726_v21 = vpack.c.bf16 %v5830_v26, %v5822_v48  ;;  %v6501_v14 = vcvt.s32.f32 %v5477_v18  ;;  %v4782_v51 = vunpack.c.0.s8 %v4358_v43 }
 0x37d   :  { %v4790_v59 = vunpack.c.1.s8 %v4358_v43  ;;  %v6997_v54 = vpack.c.bf16 %v6373_v57, %v6365_v20  ;;  %7280 = vmatmul.bf16.vlgmr.msrb.gmra.mxu0 %v10656_v17  ;;  %v5678_v63 = vcvt.s32.f32 %v4654_v37  ;;  %v5686_v61 = vcvt.s32.f32 %v4662_v31  ;;  %v4225_v57 = vpop.f32.mrf.mxu2 }
 0x37e   :  { %7324 = vmatpush.bf16.msra.mxu0 %v6662_v22  ;;  %v5325_v49 = vunpack.c.0.s8 %v4493_v25  ;;  %v7061_v30 = vpack.c.bf16 %v6501_v14, %v6493_v29  ;;  %v5806_v58 = vcvt.s32.f32 %v4782_v51  ;;  %v5333_v6 = vunpack.c.1.s8 %v4493_v25  ;;  %7293 = vmatmul.bf16.vlgmr.msrb.gmra.mxu1 %v10805_v33  ;;  %v4238_v29 = vpop.f32.mrf.mxu3 }
 0x37f   :  { %7337 = vmatpush.bf16.msra.mxu1 %v6726_v21  ;;  %v5814_v62 = vcvt.s32.f32 %v4790_v59  ;;  %7304 = vmatpush.bf16.msrb.mxu2 %v6997_v54  ;;  %v6654_v43 = vpack.c.bf16 %v5686_v61, %v5678_v63  ;;  %v5453_v19 = vunpack.c.0.s8 %v4525_v32  ;;  %v5461_v10 = vunpack.c.1.s8 %v4525_v32 }
 0x380   :  { %v6349_v47 = vcvt.s32.f32 %v5325_v49  ;;  %7317 = vmatpush.bf16.msrb.mxu3 %v7061_v30  ;;  %v6357_v42 = vcvt.s32.f32 %v5333_v6  ;;  %v4926_v7 = vunpack.c.2.s8 %v4390_v35  ;;  %v4934_v38 = vunpack.c.3.s8 %v4390_v35 }
 0x381   :  { %v6718_v5 = vpack.c.bf16 %v5814_v62, %v5806_v58  ;;  %v6477_v46 = vcvt.s32.f32 %v5453_v19  ;;  %v6485_v24 = vcvt.s32.f32 %v5461_v10  ;;  %v5054_v8 = vunpack.c.2.s8 %v4422_v60  ;;  %v4382_v62 = vld [vmem:[#allocation7 + $0x290] sm:$0xff] }
 0x382   :  { %7325 = vmatpush.bf16.msra.mxu0 %v6654_v43  ;;  %v5062_v25 = vunpack.c.3.s8 %v4422_v60  ;;  %v6989_v45 = vpack.c.bf16 %v6357_v42, %v6349_v47  ;;  %v5950_v56 = vcvt.s32.f32 %v4926_v7  ;;  %v5958_v12 = vcvt.s32.f32 %v4934_v38  ;;  %v4414_v19 = vld [vmem:[#allocation7 + $0x390] sm:$0xff] }
 0x383   :  { %7338 = vmatpush.bf16.msra.mxu1 %v6718_v5  ;;  %v4638_v16 = vunpack.c.2.s8 %v11006_v3  ;;  %v7053_v32 = vpack.c.bf16 %v6485_v24, %v6477_v46  ;;  %v6078_v48 = vcvt.s32.f32 %v5054_v8  ;;  %v4646_v36 = vunpack.c.3.s8 %v11006_v3  ;;  %v4310_v7 = vld [vmem:[#allocation7 + $0x50] sm:$0xff] }
 0x384   :  { %v6086_v44 = vcvt.s32.f32 %v5062_v25  ;;  %7305 = vmatpush.bf16.msrb.mxu2 %v6989_v45  ;;  %v6790_v22 = vpack.c.bf16 %v5958_v12, %v5950_v56  ;;  %v4766_v20 = vunpack.c.2.s8 %v4350_v34  ;;  %v4774_v18 = vunpack.c.3.s8 %v4350_v34  ;;  %v4342_v56 = vld [vmem:[#allocation7 + $0x150] sm:$0xff] }
 0x385   :  { %v5662_v26 = vcvt.s32.f32 %v4638_v16  ;;  %7318 = vmatpush.bf16.msrb.mxu3 %v7053_v32  ;;  %v5670_v31 = vcvt.s32.f32 %v4646_v36  ;;  %v4910_v21 = vunpack.c.0.s8 %v4390_v35  ;;  %v4918_v14 = vunpack.c.1.s8 %v4390_v35 }
 0x386   :  { %v6854_v37 = vpack.c.bf16 %v6086_v44, %v6078_v48  ;;  %v5790_v51 = vcvt.s32.f32 %v4766_v20  ;;  %v5798_v59 = vcvt.s32.f32 %v4774_v18  ;;  %v5038_v54 = vunpack.c.0.s8 %v4422_v60 }
 0x387   :  { %v5046_v63 = vunpack.c.1.s8 %v4422_v60  ;;  %7306 = vmatmul.bf16.vlgmr.msrb.gmra.mxu2 %v10924_v4  ;;  %v6646_v61 = vpack.c.bf16 %v5670_v31, %v5662_v26  ;;  %v5934_v49 = vcvt.s32.f32 %v4910_v21  ;;  %v5942_v30 = vcvt.s32.f32 %v4918_v14 }
 0x388   :  { %7350 = vmatpush.bf16.msra.mxu2 %v6790_v22  ;;  %v4198_v58 = vadd.f32 %v10991_v52, %v10998_v9  ;;  %7319 = vmatmul.bf16.vlgmr.msrb.gmra.mxu3 %v10926_v0  ;;  %v6710_v6 = vpack.c.bf16 %v5798_v59, %v5790_v51  ;;  %v6062_v43 = vcvt.s32.f32 %v5038_v54  ;;  %v4622_v47 = vunpack.c.0.s8 %v11006_v3 }
 0x389   :  { %7363 = vmatpush.bf16.msra.mxu3 %v6854_v37  ;;  %v6070_v35 = vcvt.s32.f32 %v5046_v63  ;;  %7326 = vmatpush.bf16.msra.mxu0 %v6646_v61  ;;  %v6782_v60 = vpack.c.bf16 %v5942_v30, %v5934_v49  ;;  %v4630_v5 = vunpack.c.1.s8 %v11006_v3  ;;  %v4750_v42 = vunpack.c.0.s8 %v4350_v34  ;;  %v4374_v49 = vld [vmem:[#allocation7 + $0x250] sm:$0xff] }
 0x38a   :  { %v11016_v10 = vadd.f32 %v10993_v23, %v4198_v58  ;;  %7339 = vmatpush.bf16.msra.mxu1 %v6710_v6  ;;  %v5646_v9 = vcvt.s32.f32 %v4622_v47  ;;  %v4758_v38 = vunpack.c.1.s8 %v4350_v34  ;;  %v4894_v46 = vunpack.c.2.s8 %v4382_v62 }
 0x38b   :  { %v6846_v52 = vpack.c.bf16 %v6070_v35, %v6062_v43  ;;  %v5654_v24 = vcvt.s32.f32 %v4630_v5  ;;  %v5774_v8 = vcvt.s32.f32 %v4750_v42  ;;  %v4902_v25 = vunpack.c.3.s8 %v4382_v62  ;;  %v4406_v42 = vld [vmem:[#allocation7 + $0x350] sm:$0xff] }
 0x38c   :  { %7351 = vmatpush.bf16.msra.mxu2 %v6782_v60  ;;  %v5022_v45 = vunpack.c.2.s8 %v4414_v19  ;;  %v5782_v12 = vcvt.s32.f32 %v4758_v38  ;;  %v5918_v16 = vcvt.s32.f32 %v4894_v46  ;;  %v5030_v23 = vunpack.c.3.s8 %v4414_v19 }
 0x38d   :  { %7364 = vmatpush.bf16.msra.mxu3 %v6846_v52  ;;  %v4606_v32 = vunpack.c.2.s8 %v4310_v7  ;;  %v6638_v48 = vpack.c.bf16 %v5654_v24, %v5646_v9  ;;  %v5926_v3 = vcvt.s32.f32 %v4902_v25  ;;  %v4614_v36 = vunpack.c.3.s8 %v4310_v7  ;;  %v4302_v25 = vld [vmem:[#allocation7 + $0x10] sm:$0xff] }
 0x38e   :  { %v6046_v44 = vcvt.s32.f32 %v5022_v45  ;;  %v6702_v22 = vpack.c.bf16 %v5782_v12, %v5774_v8  ;;  %v6054_v26 = vcvt.s32.f32 %v5030_v23  ;;  %v4734_v34 = vunpack.c.2.s8 %v4342_v56  ;;  %v4334_v23 = vld [vmem:[#allocation7 + $0x110] sm:$0xff] }
 0x38f   :  { %v5630_v20 = vcvt.s32.f32 %v4606_v32  ;;  %7327 = vmatpush.bf16.msra.mxu0 %v6638_v48  ;;  %v6774_v18 = vpack.c.bf16 %v5926_v3, %v5918_v16  ;;  %v5638_v57 = vcvt.s32.f32 %v4614_v36  ;;  %v4742_v29 = vunpack.c.3.s8 %v4342_v56  ;;  %v11021_v3 = vpop.f32.mrf.mxu0 }
 0x390   :  { %v4878_v37 = vunpack.c.0.s8 %v4382_v62  ;;  %7340 = vmatpush.bf16.msra.mxu1 %v6702_v22  ;;  %v6838_v31 = vpack.c.bf16 %v6054_v26, %v6046_v44  ;;  %v5758_v21 = vcvt.s32.f32 %v4734_v34  ;;  %v4886_v14 = vunpack.c.1.s8 %v4382_v62  ;;  %v11023_v44 = vpop.f32.mrf.mxu1 }
 0x391   :  { %v5006_v51 = vunpack.c.0.s8 %v4414_v19  ;;  %7352 = vmatpush.bf16.msra.mxu2 %v6774_v18  ;;  %v6630_v59 = vpack.c.bf16 %v5638_v57, %v5630_v20  ;;  %v5766_v54 = vcvt.s32.f32 %v4742_v29  ;;  %v5014_v61 = vunpack.c.1.s8 %v4414_v19 }
 0x392   :  { %v5902_v63 = vcvt.s32.f32 %v4878_v37  ;;  %7365 = vmatpush.bf16.msra.mxu3 %v6838_v31  ;;  %v5910_v30 = vcvt.s32.f32 %v4886_v14  ;;  %v4590_v6 = vunpack.c.0.s8 %v4310_v7  ;;  %v4598_v43 = vunpack.c.1.s8 %v4310_v7 }
 0x393   :  { %v6030_v58 = vcvt.s32.f32 %v5006_v51  ;;  %7328 = vmatpush.bf16.msra.mxu0 %v6630_v59  ;;  %v6694_v35 = vpack.c.bf16 %v5766_v54, %v5758_v21  ;;  %v6038_v47 = vcvt.s32.f32 %v5014_v61  ;;  %v4718_v60 = vunpack.c.0.s8 %v4342_v56 }
 0x394   :  { %v4726_v5 = vunpack.c.1.s8 %v4342_v56  ;;  %v6766_v52 = vpack.c.bf16 %v5910_v30, %v5902_v63  ;;  %v5614_v62 = vcvt.s32.f32 %v4590_v6  ;;  %v5622_v9 = vcvt.s32.f32 %v4598_v43 }
 0x395   :  { %v4862_v38 = vunpack.c.2.s8 %v4374_v49  ;;  %7341 = vmatpush.bf16.msra.mxu1 %v6694_v35  ;;  %v6830_v46 = vpack.c.bf16 %v6038_v47, %v6030_v58  ;;  %v5742_v24 = vcvt.s32.f32 %v4718_v60  ;;  %v4870_v8 = vunpack.c.3.s8 %v4374_v49  ;;  %v4486_v60 = vld [vmem:[#allocation7 + $0x5d0] sm:$0xff] }
 0x396   :  { %v5750_v19 = vcvt.s32.f32 %v4726_v5  ;;  %7353 = vmatpush.bf16.msra.mxu2 %v6766_v52  ;;  %v6622_v45 = vpack.c.bf16 %v5622_v9, %v5614_v62  ;;  %v4990_v7 = vunpack.c.2.s8 %v4406_v42  ;;  %v4998_v16 = vunpack.c.3.s8 %v4406_v42  ;;  %v4366_v9 = vld [vmem:[#allocation7 + $0x210] sm:$0xff] }
 0x397   :  { %v5886_v12 = vcvt.s32.f32 %v4862_v38  ;;  %7366 = vmatpush.bf16.msra.mxu3 %v6830_v46  ;;  %v5894_v56 = vcvt.s32.f32 %v4870_v8  ;;  %v4224_v48 = vadd.f32 %v11000_v53, %v11016_v10  ;;  %v4574_v26 = vunpack.c.2.s8 %v4302_v25 }
 0x398   :  { %v6686_v32 = vpack.c.bf16 %v5750_v19, %v5742_v24  ;;  %7329 = vmatpush.bf16.msra.mxu0 %v6622_v45  ;;  %v6014_v36 = vcvt.s32.f32 %v4990_v7  ;;  %v6022_v22 = vcvt.s32.f32 %v4998_v16  ;;  %v4582_v18 = vunpack.c.3.s8 %v4302_v25  ;;  %v7140_v38 = vpop.f32.mrf.mxu1  ;;  %v4398_v16 = vld [vmem:[#allocation7 + $0x310] sm:$0xff] }
 0x399   :  { %v6758_v20 = vpack.c.bf16 %v5894_v56, %v5886_v12  ;;  %v11026_v34 = vadd.f32 %v11002_v13, %v4224_v48  ;;  %v4702_v57 = vunpack.c.2.s8 %v4334_v23  ;;  %v5598_v37 = vcvt.s32.f32 %v4574_v26  ;;  %v4454_v13 = vld [vmem:[#allocation7 + $0x4d0] sm:$0xff] }
 0x39a   :  { %7342 = vmatpush.bf16.msra.mxu1 %v6686_v32  ;;  %v6822_v29 = vpack.c.bf16 %v6022_v22, %v6014_v36  ;;  %v4710_v31 = vunpack.c.3.s8 %v4334_v23  ;;  %v4846_v21 = vunpack.c.0.s8 %v4374_v49  ;;  %v5606_v53 = vcvt.s32.f32 %v4582_v18 }
 0x39b   :  { %7354 = vmatpush.bf16.msra.mxu2 %v6758_v20  ;;  %v5726_v10 = vcvt.s32.f32 %v4702_v57  ;;  %v4854_v14 = vunpack.c.1.s8 %v4374_v49  ;;  %v4974_v54 = vunpack.c.0.s8 %v4406_v42  ;;  %v4982_v63 = vunpack.c.1.s8 %v4406_v42  ;;  %v7127_v49 = vpop.f32.mrf.mxu0 }
 0x39c   :  { %7367 = vmatpush.bf16.msra.mxu3 %v6822_v29  ;;  %v5734_v51 = vcvt.s32.f32 %v4710_v31  ;;  %v5870_v59 = vcvt.s32.f32 %v4846_v21  ;;  %v6614_v61 = vpack.c.bf16 %v5606_v53, %v5598_v37  ;;  %v4558_v58 = vunpack.c.0.s8 %v4302_v25 }
 0x39d   :  { %v5878_v30 = vcvt.s32.f32 %v4854_v14  ;;  %v5998_v43 = vcvt.s32.f32 %v4974_v54  ;;  %v6006_v35 = vcvt.s32.f32 %v4982_v63  ;;  %v4566_v47 = vunpack.c.1.s8 %v4302_v25  ;;  %v11028_v54 = vpop.f32.mrf.mxu2  ;;  %v11030_v63 = vpop.f32.mrf.mxu3 }
 0x39e   :  { %v6678_v6 = vpack.c.bf16 %v5734_v51, %v5726_v10  ;;  %7330 = vmatpush.bf16.msra.mxu0 %v6614_v61  ;;  %v5582_v52 = vcvt.s32.f32 %v4558_v58  ;;  %v4686_v62 = vunpack.c.0.s8 %v4334_v23  ;;  %v4694_v42 = vunpack.c.1.s8 %v4334_v23 }
 0x39f   :  { %v6750_v5 = vpack.c.bf16 %v5878_v30, %v5870_v59  ;;  %v6814_v46 = vpack.c.bf16 %v6006_v35, %v5998_v43  ;;  %v5590_v24 = vcvt.s32.f32 %v4566_v47  ;;  %v5182_v19 = vunpack.c.2.s8 %v4454_v13  ;;  %v4518_v43 = vld [vmem:[#allocation7 + $0x6d0] sm:$0xff] }
 0x3a0   :  { %7343 = vmatpush.bf16.msra.mxu1 %v6678_v6  ;;  %v5710_v8 = vcvt.s32.f32 %v4686_v62  ;;  %v5190_v45 = vunpack.c.3.s8 %v4454_v13  ;;  %v5310_v12 = vunpack.c.2.s8 %v4486_v60  ;;  %v5318_v7 = vunpack.c.3.s8 %v4486_v60  ;;  %v4550_v62 = vld [vmem:[#allocation7 + $0x7d0] sm:$0xff] }
 0x3a1   :  { %7355 = vmatpush.bf16.msra.mxu2 %v6750_v5  ;;  %7368 = vmatpush.bf16.msra.mxu3 %v6814_v46  ;;  %v6606_v25 = vpack.c.bf16 %v5590_v24, %v5582_v52  ;;  %v5718_v32 = vcvt.s32.f32 %v4694_v42  ;;  %v6206_v56 = vcvt.s32.f32 %v5182_v19  ;;  %v4830_v48 = vunpack.c.2.s8 %v4366_v9 }
 0x3a2   :  { %v6214_v36 = vcvt.s32.f32 %v5190_v45  ;;  %v6334_v22 = vcvt.s32.f32 %v5310_v12  ;;  %v6342_v26 = vcvt.s32.f32 %v5318_v7  ;;  %v4838_v20 = vunpack.c.3.s8 %v4366_v9 }
 0x3a3   :  { %7331 = vmatpush.bf16.msra.mxu0 %v6606_v25  ;;  %v6670_v18 = vpack.c.bf16 %v5718_v32, %v5710_v8  ;;  %v5854_v57 = vcvt.s32.f32 %v4830_v48  ;;  %v4958_v23 = vunpack.c.2.s8 %v4398_v16  ;;  %v4966_v29 = vunpack.c.3.s8 %v4398_v16  ;;  %v4446_v8 = vld [vmem:[#allocation7 + $0x490] sm:$0xff] }
 0x3a4   :  { %v6918_v37 = vpack.c.bf16 %v6214_v36, %v6206_v56  ;;  %v6982_v31 = vpack.c.bf16 %v6342_v26, %v6334_v22  ;;  %v5862_v21 = vcvt.s32.f32 %v4838_v20  ;;  %v5166_v53 = vunpack.c.0.s8 %v4454_v13  ;;  %v4478_v32 = vld [vmem:[#allocation7 + $0x590] sm:$0xff] }
 0x3a5   :  { %7344 = vmatpush.bf16.msra.mxu1 %v6670_v18  ;;  %v5982_v10 = vcvt.s32.f32 %v4958_v23  ;;  %v5990_v14 = vcvt.s32.f32 %v4966_v29  ;;  %v5174_v51 = vunpack.c.1.s8 %v4454_v13  ;;  %v5294_v59 = vunpack.c.0.s8 %v4486_v60 }
 0x3a6   :  { %v6742_v61 = vpack.c.bf16 %v5862_v21, %v5854_v57  ;;  %v6190_v30 = vcvt.s32.f32 %v5166_v53  ;;  %v5302_v58 = vunpack.c.1.s8 %v4486_v60  ;;  %v4814_v6 = vunpack.c.0.s8 %v4366_v9  ;;  %7332 = vmatmul.bf16.vlgmr.msra.gmra.mxu0 %v10196_v27 }
 0x3a7   :  { %7376 = vmatpush.bf16.msrb.mxu0 %v6918_v37  ;;  %v6806_v35 = vpack.c.bf16 %v5990_v14, %v5982_v10  ;;  %v6198_v47 = vcvt.s32.f32 %v5174_v51  ;;  %v6318_v5 = vcvt.s32.f32 %v5294_v59  ;;  %v4822_v52 = vunpack.c.1.s8 %v4366_v9  ;;  %v7153_v37 = vpop.f32.mrf.mxu2 }
 0x3a8   :  { %7356 = vmatpush.bf16.msra.mxu2 %v6742_v61  ;;  %7345 = vmatmul.bf16.vlgmr.msra.gmra.mxu1 %v10318_v1  ;;  %v6326_v13 = vcvt.s32.f32 %v5302_v58  ;;  %v5838_v49 = vcvt.s32.f32 %v4814_v6  ;;  %v4942_v38 = vunpack.c.0.s8 %v4398_v16  ;;  %v4950_v46 = vunpack.c.1.s8 %v4398_v16 }
 0x3a9   :  { %7389 = vmatpush.bf16.msrb.mxu1 %v6982_v31  ;;  %7369 = vmatpush.bf16.msra.mxu3 %v6806_v35  ;;  %v6910_v24 = vpack.c.bf16 %v6198_v47, %v6190_v30  ;;  %v5846_v42 = vcvt.s32.f32 %v4822_v52  ;;  %v5438_v60 = vunpack.c.2.s8 %v4518_v43  ;;  %v5446_v19 = vunpack.c.3.s8 %v4518_v43  ;;  %v7166_v31 = vpop.f32.mrf.mxu3 }
 0x3aa   :  { %v6974_v45 = vpack.c.bf16 %v6326_v13, %v6318_v5  ;;  %v5966_v12 = vcvt.s32.f32 %v4942_v38  ;;  %v5974_v7 = vcvt.s32.f32 %v4950_v46  ;;  %v5566_v25 = vunpack.c.2.s8 %v4550_v62  ;;  %v4510_v5 = vld [vmem:[#allocation7 + $0x690] sm:$0xff] }
 0x3ab   :  { %7377 = vmatpush.bf16.msrb.mxu0 %v6910_v24  ;;  %v6734_v9 = vpack.c.bf16 %v5846_v42, %v5838_v49  ;;  %v6462_v56 = vcvt.s32.f32 %v5438_v60  ;;  %v6470_v48 = vcvt.s32.f32 %v5446_v19  ;;  %v5574_v36 = vunpack.c.3.s8 %v4550_v62  ;;  %v4542_v38 = vld [vmem:[#allocation7 + $0x790] sm:$0xff] }
 0x3ac   :  { %v6798_v22 = vpack.c.bf16 %v5974_v7, %v5966_v12  ;;  %v6590_v26 = vcvt.s32.f32 %v5566_v25  ;;  %v5150_v16 = vunpack.c.2.s8 %v4446_v8  ;;  %v5158_v20 = vunpack.c.3.s8 %v4446_v8  ;;  %v4438_v7 = vld [vmem:[#allocation7 + $0x450] sm:$0xff] }
 0x3ad   :  { %7390 = vmatpush.bf16.msrb.mxu1 %v6974_v45  ;;  %7357 = vmatpush.bf16.msra.mxu2 %v6734_v9  ;;  %v7046_v18 = vpack.c.bf16 %v6470_v48, %v6462_v56  ;;  %v6598_v57 = vcvt.s32.f32 %v5574_v36  ;;  %v5278_v23 = vunpack.c.2.s8 %v4478_v32  ;;  %v5286_v29 = vunpack.c.3.s8 %v4478_v32  ;;  %v4470_v56 = vld [vmem:[#allocation7 + $0x550] sm:$0xff] }
 0x3ae   :  { %7370 = vmatpush.bf16.msra.mxu3 %v6798_v22  ;;  %v6174_v21 = vcvt.s32.f32 %v5150_v16  ;;  %v6182_v53 = vcvt.s32.f32 %v5158_v20  ;;  %v5422_v10 = vunpack.c.0.s8 %v4518_v43  ;;  %v5430_v14 = vunpack.c.1.s8 %v4518_v43 }
 0x3af   :  { %v7110_v51 = vpack.c.bf16 %v6598_v57, %v6590_v26  ;;  %v6302_v59 = vcvt.s32.f32 %v5278_v23  ;;  %v6310_v61 = vcvt.s32.f32 %v5286_v29  ;;  %v5550_v30 = vunpack.c.0.s8 %v4550_v62 }
 0x3b0   :  { %7358 = vmatmul.bf16.vlgmr.msra.gmra.mxu2 %v10485_v41  ;;  %v6902_v58 = vpack.c.bf16 %v6182_v53, %v6174_v21  ;;  %v6446_v6 = vcvt.s32.f32 %v5422_v10  ;;  %v6454_v35 = vcvt.s32.f32 %v5430_v14  ;;  %v5558_v47 = vunpack.c.1.s8 %v4550_v62 }
 0x3b1   :  { %7402 = vmatpush.bf16.msrb.mxu2 %v7046_v18  ;;  %v6966_v52 = vpack.c.bf16 %v6310_v61, %v6302_v59  ;;  %v6574_v13 = vcvt.s32.f32 %v5550_v30  ;;  %v11037_v49 = vadd.f32 %v11023_v44, %v11021_v3  ;;  %v5134_v43 = vunpack.c.0.s8 %v4446_v8  ;;  %7371 = vmatmul.bf16.vlgmr.msra.gmra.mxu3 %v10487_v39 }
 0x3b2   :  { %7415 = vmatpush.bf16.msrb.mxu3 %v7110_v51  ;;  %7378 = vmatpush.bf16.msrb.mxu0 %v6902_v58  ;;  %v7038_v46 = vpack.c.bf16 %v6454_v35, %v6446_v6  ;;  %v6582_v24 = vcvt.s32.f32 %v5558_v47  ;;  %v5142_v42 = vunpack.c.1.s8 %v4446_v8  ;;  %v5262_v60 = vunpack.c.0.s8 %v4478_v32  ;;  %v4502_v35 = vld [vmem:[#allocation7 + $0x650] sm:$0xff] }
 0x3b3   :  { %7391 = vmatpush.bf16.msrb.mxu1 %v6966_v52  ;;  %v6158_v19 = vcvt.s32.f32 %v5134_v43  ;;  %v5270_v62 = vunpack.c.1.s8 %v4478_v32  ;;  %v5406_v45 = vunpack.c.2.s8 %v4510_v5  ;;  %v5414_v12 = vunpack.c.3.s8 %v4510_v5 }
 0x3b4   :  { %v7102_v25 = vpack.c.bf16 %v6582_v24, %v6574_v13  ;;  %v6166_v9 = vcvt.s32.f32 %v5142_v42  ;;  %v6286_v3 = vcvt.s32.f32 %v5262_v60  ;;  %v5534_v44 = vunpack.c.2.s8 %v4542_v38 }
 0x3b5   :  { %7403 = vmatpush.bf16.msrb.mxu2 %v7038_v46  ;;  %v6294_v48 = vcvt.s32.f32 %v5270_v62  ;;  %v6430_v36 = vcvt.s32.f32 %v5406_v45  ;;  %v6438_v22 = vcvt.s32.f32 %v5414_v12  ;;  %v5542_v26 = vunpack.c.3.s8 %v4542_v38 }
 0x3b6   :  { %7416 = vmatpush.bf16.msrb.mxu3 %v7102_v25  ;;  %v6894_v16 = vpack.c.bf16 %v6166_v9, %v6158_v19  ;;  %v6558_v8 = vcvt.s32.f32 %v5534_v44  ;;  %v5118_v20 = vunpack.c.2.s8 %v4438_v7  ;;  %v5126_v18 = vunpack.c.3.s8 %v4438_v7  ;;  %v4534_v19 = vld [vmem:[#allocation7 + $0x750] sm:$0xff] }
 0x3b7   :  { %v6958_v57 = vpack.c.bf16 %v6294_v48, %v6286_v3  ;;  %v7030_v32 = vpack.c.bf16 %v6438_v22, %v6430_v36  ;;  %v6566_v23 = vcvt.s32.f32 %v5542_v26  ;;  %v5246_v29 = vunpack.c.2.s8 %v4470_v56  ;;  %v4430_v25 = vld [vmem:[#allocation7 + $0x410] sm:$0xff]  ;;  %v11040_v36 = vpop.f32.mrf.mxu0 }
 0x3b8   :  { %7379 = vmatpush.bf16.msrb.mxu0 %v6894_v16  ;;  %v6142_v37 = vcvt.s32.f32 %v5118_v20  ;;  %v6150_v31 = vcvt.s32.f32 %v5126_v18  ;;  %v5254_v21 = vunpack.c.3.s8 %v4470_v56  ;;  %v5390_v53 = vunpack.c.0.s8 %v4510_v5  ;;  %v4462_v48 = vld [vmem:[#allocation7 + $0x510] sm:$0xff] }
 0x3b9   :  { %7392 = vmatpush.bf16.msrb.mxu1 %v6958_v57  ;;  %7404 = vmatpush.bf16.msrb.mxu2 %v7030_v32  ;;  %v7094_v10 = vpack.c.bf16 %v6566_v23, %v6558_v8  ;;  %v6270_v14 = vcvt.s32.f32 %v5246_v29  ;;  %v5398_v51 = vunpack.c.1.s8 %v4510_v5  ;;  %v5518_v59 = vunpack.c.0.s8 %v4542_v38 }
 0x3ba   :  { %v6886_v61 = vpack.c.bf16 %v6150_v31, %v6142_v37  ;;  %v6278_v30 = vcvt.s32.f32 %v5254_v21  ;;  %v6414_v58 = vcvt.s32.f32 %v5390_v53  ;;  %v5526_v6 = vunpack.c.1.s8 %v4542_v38 }
 0x3bb   :  { %7417 = vmatpush.bf16.msrb.mxu3 %v7094_v10  ;;  %v6422_v47 = vcvt.s32.f32 %v5398_v51  ;;  %v6542_v52 = vcvt.s32.f32 %v5518_v59  ;;  %v5102_v13 = vunpack.c.0.s8 %v4438_v7  ;;  %v5110_v43 = vunpack.c.1.s8 %v4438_v7  ;;  %v11042_v7 = vpop.f32.mrf.mxu1 }
 0x3bc   :  { %7380 = vmatpush.bf16.msrb.mxu0 %v6886_v61  ;;  %v6950_v46 = vpack.c.bf16 %v6278_v30, %v6270_v14  ;;  %v6550_v24 = vcvt.s32.f32 %v5526_v6  ;;  %v5230_v42 = vunpack.c.0.s8 %v4470_v56  ;;  %v5238_v60 = vunpack.c.1.s8 %v4470_v56 }
 0x3bd   :  { %v7022_v62 = vpack.c.bf16 %v6422_v47, %v6414_v58  ;;  %v6126_v45 = vcvt.s32.f32 %v5102_v13  ;;  %v6134_v5 = vcvt.s32.f32 %v5110_v43  ;;  %v5374_v12 = vunpack.c.2.s8 %v4502_v35  ;;  %v4327_v43 = vld [vmem:[#allocation7 + $0xd8] sm:$0xff] }
 0x3be   :  { %7393 = vmatpush.bf16.msrb.mxu1 %v6950_v46  ;;  %v7086_v9 = vpack.c.bf16 %v6550_v24, %v6542_v52  ;;  %v6254_v38 = vcvt.s32.f32 %v5230_v42  ;;  %v6262_v3 = vcvt.s32.f32 %v5238_v60  ;;  %v5382_v44 = vunpack.c.3.s8 %v4502_v35  ;;  %v4359_v60 = vld [vmem:[#allocation7 + $0x1d8] sm:$0xff] }
 0x3bf   :  { %7405 = vmatpush.bf16.msrb.mxu2 %v7022_v62  ;;  %v6878_v22 = vpack.c.bf16 %v6134_v5, %v6126_v45  ;;  %v6398_v26 = vcvt.s32.f32 %v5374_v12  ;;  %v5502_v56 = vunpack.c.2.s8 %v4534_v19  ;;  %v5510_v16 = vunpack.c.3.s8 %v4534_v19  ;;  %v7179_v62 = vpop.f32.mrf.mxu0 }
 0x3c0   :  { %7418 = vmatpush.bf16.msrb.mxu3 %v7086_v9  ;;  %v6942_v8 = vpack.c.bf16 %v6262_v3, %v6254_v38  ;;  %v6406_v20 = vcvt.s32.f32 %v5382_v44  ;;  %v7152_v18 = vadd.f32 %v11028_v54, %v11037_v49  ;;  %v5086_v57 = vunpack.c.2.s8 %v4430_v25  ;;  %v4494_v38 = vld [vmem:[#allocation7 + $0x610] sm:$0xff] }
 0x3c1   :  { %7381 = vmatpush.bf16.msrb.mxu0 %v6878_v22  ;;  %v6526_v32 = vcvt.s32.f32 %v5502_v56  ;;  %v6534_v23 = vcvt.s32.f32 %v5510_v16  ;;  %v5094_v29 = vunpack.c.3.s8 %v4430_v25  ;;  %v5214_v37 = vunpack.c.2.s8 %v4462_v48 }
 0x3c2   :  { %7394 = vmatpush.bf16.msrb.mxu1 %v6942_v8  ;;  %v7014_v31 = vpack.c.bf16 %v6406_v20, %v6398_v26  ;;  %v11047_v21 = vadd.f32 %v11030_v63, %v7152_v18  ;;  %v6110_v53 = vcvt.s32.f32 %v5086_v57  ;;  %v5222_v10 = vunpack.c.3.s8 %v4462_v48 }
 0x3c3   :  { %v7078_v14 = vpack.c.bf16 %v6534_v23, %v6526_v32  ;;  %v6118_v51 = vcvt.s32.f32 %v5094_v29  ;;  %v6238_v59 = vcvt.s32.f32 %v5214_v37  ;;  %v5358_v61 = vunpack.c.0.s8 %v4502_v35  ;;  %v7192_v45 = vpop.f32.mrf.mxu1 }
 0x3c4   :  { %7406 = vmatpush.bf16.msrb.mxu2 %v7014_v31  ;;  %v6246_v30 = vcvt.s32.f32 %v5222_v10  ;;  %v5366_v54 = vunpack.c.1.s8 %v4502_v35  ;;  %v5486_v49 = vunpack.c.0.s8 %v4534_v19  ;;  %v5494_v58 = vunpack.c.1.s8 %v4534_v19 }
 0x3c5   :  { %7419 = vmatpush.bf16.msrb.mxu3 %v7078_v14  ;;  %v6870_v6 = vpack.c.bf16 %v6118_v51, %v6110_v53  ;;  %v6382_v47 = vcvt.s32.f32 %v5358_v61  ;;  %v5070_v52 = vunpack.c.0.s8 %v4430_v25  ;;  %v5078_v13 = vunpack.c.1.s8 %v4430_v25  ;;  %v4526_v25 = vld [vmem:[#allocation7 + $0x710] sm:$0xff] }
 0x3c6   :  { %v6934_v46 = vpack.c.bf16 %v6246_v30, %v6238_v59  ;;  %v6390_v63 = vcvt.s32.f32 %v5366_v54  ;;  %v6510_v24 = vcvt.s32.f32 %v5486_v49  ;;  %v6518_v42 = vcvt.s32.f32 %v5494_v58 }
 0x3c7   :  { %7382 = vmatpush.bf16.msrb.mxu0 %v6870_v6  ;;  %v6094_v5 = vcvt.s32.f32 %v5070_v52  ;;  %v6102_v12 = vcvt.s32.f32 %v5078_v13  ;;  %v5198_v9 = vunpack.c.0.s8 %v4462_v48  ;;  %v5206_v35 = vunpack.c.1.s8 %v4462_v48  ;;  %v11051_v52 = vpop.f32.mrf.mxu3 }
 0x3c8   :  { %7395 = vmatpush.bf16.msrb.mxu1 %v6934_v46  ;;  %v7006_v19 = vpack.c.bf16 %v6390_v63, %v6382_v47  ;;  %v7070_v3 = vpack.c.bf16 %v6518_v42, %v6510_v24  ;;  %v4671_v44 = vunpack.c.2.s8 %v4327_v43  ;;  %v4679_v22 = vunpack.c.3.s8 %v4327_v43  ;;  %v11049_v47 = vpop.f32.mrf.mxu2  ;;  %v4391_v42 = vld [vmem:[#allocation7 + $0x2d8] sm:$0xff] }
 0x3c9   :  { %v6862_v26 = vpack.c.bf16 %v6102_v12, %v6094_v5  ;;  %v6222_v56 = vcvt.s32.f32 %v5198_v9  ;;  %v6230_v16 = vcvt.s32.f32 %v5206_v35  ;;  %v4799_v8 = vunpack.c.2.s8 %v4359_v60  ;;  %v4423_v12 = vld [vmem:[#allocation7 + $0x3d8] sm:$0xff] }
 0x3ca   :  { %7407 = vmatpush.bf16.msrb.mxu2 %v7006_v19  ;;  %7420 = vmatpush.bf16.msrb.mxu3 %v7070_v3  ;;  %v5695_v20 = vcvt.s32.f32 %v4671_v44  ;;  %v5703_v18 = vcvt.s32.f32 %v4679_v22  ;;  %v4807_v57 = vunpack.c.3.s8 %v4359_v60  ;;  %v5342_v32 = vunpack.c.2.s8 %v4494_v38  ;;  %v11055_v3 = vld [vmem:[#allocation7 + $0x98] sm:$0xff] }
 0x3cb   :  { %7383 = vmatpush.bf16.msrb.mxu0 %v6862_v26  ;;  %v6926_v23 = vpack.c.bf16 %v6230_v16, %v6222_v56  ;;  %v5823_v48 = vcvt.s32.f32 %v4799_v8  ;;  %v5350_v29 = vunpack.c.3.s8 %v4494_v38  ;;  %v5470_v37 = vunpack.c.2.s8 %v4526_v25 }
 0x3cc   :  { %v6663_v31 = vpack.c.bf16 %v5703_v18, %v5695_v20  ;;  %v5831_v53 = vcvt.s32.f32 %v4807_v57  ;;  %v6366_v10 = vcvt.s32.f32 %v5342_v32  ;;  %v5478_v14 = vunpack.c.3.s8 %v4526_v25  ;;  %v4351_v18 = vld [vmem:[#allocation7 + $0x198] sm:$0xff] }
 0x3cd   :  { %7396 = vmatpush.bf16.msrb.mxu1 %v6926_v23  ;;  %v6374_v51 = vcvt.s32.f32 %v5350_v29  ;;  %v6494_v59 = vcvt.s32.f32 %v5470_v37  ;;  %v4655_v61 = vunpack.c.0.s8 %v4327_v43  ;;  %v4663_v30 = vunpack.c.1.s8 %v4327_v43 }
 0x3ce   :  { %v6727_v54 = vpack.c.bf16 %v5831_v53, %v5823_v48  ;;  %v6502_v49 = vcvt.s32.f32 %v5478_v14  ;;  %v4783_v58 = vunpack.c.0.s8 %v4359_v60  ;;  %v4791_v6 = vunpack.c.1.s8 %v4359_v60  ;;  %7384 = vmatmul.bf16.vlgmr.msrb.gmra.mxu0 %v10656_v17 }
 0x3cf   :  { %7428 = vmatpush.bf16.msra.mxu0 %v6663_v31  ;;  %v6998_v13 = vpack.c.bf16 %v6374_v51, %v6366_v10  ;;  %v5679_v46 = vcvt.s32.f32 %v4655_v61  ;;  %v5687_v63 = vcvt.s32.f32 %v4663_v30  ;;  %v5326_v24 = vunpack.c.0.s8 %v4494_v38  ;;  %v7218_v61 = vpop.f32.mrf.mxu3 }
 0x3d0   :  { %v7062_v62 = vpack.c.bf16 %v6502_v49, %v6494_v59  ;;  %v5807_v45 = vcvt.s32.f32 %v4783_v58  ;;  %v5815_v43 = vcvt.s32.f32 %v4791_v6  ;;  %v5334_v5 = vunpack.c.1.s8 %v4494_v38  ;;  %7397 = vmatmul.bf16.vlgmr.msrb.gmra.mxu1 %v10805_v33  ;;  %v7205_v59 = vpop.f32.mrf.mxu2 }
 0x3d1   :  { %7441 = vmatpush.bf16.msra.mxu1 %v6727_v54  ;;  %7408 = vmatpush.bf16.msrb.mxu2 %v6998_v13  ;;  %v6655_v60 = vpack.c.bf16 %v5687_v63, %v5679_v46  ;;  %v6350_v9 = vcvt.s32.f32 %v5326_v24  ;;  %v5454_v35 = vunpack.c.0.s8 %v4526_v25  ;;  %v5462_v19 = vunpack.c.1.s8 %v4526_v25 }
 0x3d2   :  { %7421 = vmatpush.bf16.msrb.mxu3 %v7062_v62  ;;  %v6719_v44 = vpack.c.bf16 %v5815_v43, %v5807_v45  ;;  %v6358_v22 = vcvt.s32.f32 %v5334_v5  ;;  %v4927_v26 = vunpack.c.2.s8 %v4391_v42  ;;  %v4935_v56 = vunpack.c.3.s8 %v4391_v42  ;;  %v4383_v5 = vld [vmem:[#allocation7 + $0x298] sm:$0xff] }
 0x3d3   :  { %7429 = vmatpush.bf16.msra.mxu0 %v6655_v60  ;;  %v6478_v16 = vcvt.s32.f32 %v5454_v35  ;;  %v6486_v8 = vcvt.s32.f32 %v5462_v19  ;;  %v5055_v20 = vunpack.c.2.s8 %v4423_v12  ;;  %v5063_v38 = vunpack.c.3.s8 %v4423_v12  ;;  %v4415_v19 = vld [vmem:[#allocation7 + $0x398] sm:$0xff] }
 0x3d4   :  { %v6990_v57 = vpack.c.bf16 %v6358_v22, %v6350_v9  ;;  %v5951_v32 = vcvt.s32.f32 %v4927_v26  ;;  %v5959_v23 = vcvt.s32.f32 %v4935_v56  ;;  %v4639_v48 = vunpack.c.2.s8 %v11055_v3  ;;  %v4311_v56 = vld [vmem:[#allocation7 + $0x58] sm:$0xff] }
 0x3d5   :  { %7442 = vmatpush.bf16.msra.mxu1 %v6719_v44  ;;  %v7054_v25 = vpack.c.bf16 %v6486_v8, %v6478_v16  ;;  %v6079_v29 = vcvt.s32.f32 %v5055_v20  ;;  %v6087_v37 = vcvt.s32.f32 %v5063_v38  ;;  %v4647_v31 = vunpack.c.3.s8 %v11055_v3 }
 0x3d6   :  { %7409 = vmatpush.bf16.msrb.mxu2 %v6990_v57  ;;  %v6791_v53 = vpack.c.bf16 %v5959_v23, %v5951_v32  ;;  %v5663_v10 = vcvt.s32.f32 %v4639_v48  ;;  %v4767_v14 = vunpack.c.2.s8 %v4351_v18  ;;  %v4775_v51 = vunpack.c.3.s8 %v4351_v18  ;;  %v4343_v23 = vld [vmem:[#allocation7 + $0x158] sm:$0xff] }
 0x3d7   :  { %7422 = vmatpush.bf16.msrb.mxu3 %v7054_v25  ;;  %v6855_v30 = vpack.c.bf16 %v6087_v37, %v6079_v29  ;;  %v5671_v54 = vcvt.s32.f32 %v4647_v31  ;;  %v4911_v49 = vunpack.c.0.s8 %v4391_v42  ;;  %v4919_v58 = vunpack.c.1.s8 %v4391_v42 }
 0x3d8   :  { %v5791_v6 = vcvt.s32.f32 %v4767_v14  ;;  %v5799_v13 = vcvt.s32.f32 %v4775_v51  ;;  %v5039_v46 = vunpack.c.0.s8 %v4423_v12  ;;  %v5047_v63 = vunpack.c.1.s8 %v4423_v12 }
 0x3d9   :  { %7410 = vmatmul.bf16.vlgmr.msrb.gmra.mxu2 %v10924_v4  ;;  %v6647_v24 = vpack.c.bf16 %v5671_v54, %v5663_v10  ;;  %v5935_v62 = vcvt.s32.f32 %v4911_v49  ;;  %v5943_v45 = vcvt.s32.f32 %v4919_v58  ;;  %v7178_v43 = vadd.f32 %v11040_v36, %v11047_v21 }
 0x3da   :  { %7454 = vmatpush.bf16.msra.mxu2 %v6791_v53  ;;  %7423 = vmatmul.bf16.vlgmr.msrb.gmra.mxu3 %v10926_v0  ;;  %v6711_v60 = vpack.c.bf16 %v5799_v13, %v5791_v6  ;;  %v6063_v9 = vcvt.s32.f32 %v5039_v46  ;;  %v6071_v42 = vcvt.s32.f32 %v5047_v63  ;;  %v4623_v35 = vunpack.c.0.s8 %v11055_v3 }
 0x3db   :  { %7467 = vmatpush.bf16.msra.mxu3 %v6855_v30  ;;  %7430 = vmatpush.bf16.msra.mxu0 %v6647_v24  ;;  %v6783_v12 = vpack.c.bf16 %v5943_v45, %v5935_v62  ;;  %v11065_v44 = vadd.f32 %v11042_v7, %v7178_v43  ;;  %v4631_v22 = vunpack.c.1.s8 %v11055_v3  ;;  %v4751_v26 = vunpack.c.0.s8 %v4351_v18  ;;  %v4375_v45 = vld [vmem:[#allocation7 + $0x258] sm:$0xff] }
 0x3dc   :  { %7443 = vmatpush.bf16.msra.mxu1 %v6711_v60  ;;  %v6847_v36 = vpack.c.bf16 %v6071_v42, %v6063_v9  ;;  %v5647_v21 = vcvt.s32.f32 %v4623_v35  ;;  %v4759_v16 = vunpack.c.1.s8 %v4351_v18  ;;  %v4895_v8 = vunpack.c.2.s8 %v4383_v5 }
 0x3dd   :  { %v5655_v20 = vcvt.s32.f32 %v4631_v22  ;;  %v5775_v38 = vcvt.s32.f32 %v4751_v26  ;;  %v4903_v57 = vunpack.c.3.s8 %v4383_v5  ;;  %v5023_v32 = vunpack.c.2.s8 %v4415_v19 }
 0x3de   :  { %7455 = vmatpush.bf16.msra.mxu2 %v6783_v12  ;;  %v5783_v48 = vcvt.s32.f32 %v4759_v16  ;;  %v5919_v25 = vcvt.s32.f32 %v4895_v8  ;;  %v5031_v7 = vunpack.c.3.s8 %v4415_v19  ;;  %v4607_v29 = vunpack.c.2.s8 %v4311_v56 }
 0x3df   :  { %7468 = vmatpush.bf16.msra.mxu3 %v6847_v36  ;;  %v6639_v37 = vpack.c.bf16 %v5655_v20, %v5647_v21  ;;  %v5927_v3 = vcvt.s32.f32 %v4903_v57  ;;  %v6047_v31 = vcvt.s32.f32 %v5023_v32  ;;  %v4615_v53 = vunpack.c.3.s8 %v4311_v56  ;;  %v4407_v36 = vld [vmem:[#allocation7 + $0x358] sm:$0xff] }
 0x3e0   :  { %v6703_v10 = vpack.c.bf16 %v5783_v48, %v5775_v38  ;;  %v6055_v14 = vcvt.s32.f32 %v5031_v7  ;;  %v5631_v51 = vcvt.s32.f32 %v4607_v29  ;;  %v4735_v18 = vunpack.c.2.s8 %v4343_v23  ;;  %v4303_v32 = vld [vmem:[#allocation7 + $0x18] sm:$0xff] }
 0x3e1   :  { %7431 = vmatpush.bf16.msra.mxu0 %v6639_v37  ;;  %v6775_v59 = vpack.c.bf16 %v5927_v3, %v5919_v25  ;;  %v5639_v61 = vcvt.s32.f32 %v4615_v53  ;;  %v4743_v30 = vunpack.c.3.s8 %v4343_v23  ;;  %v4879_v54 = vunpack.c.0.s8 %v4383_v5  ;;  %v4335_v29 = vld [vmem:[#allocation7 + $0x118] sm:$0xff]  ;;  %v11072_v53 = vpop.f32.mrf.mxu1 }
 0x3e2   :  { %7444 = vmatpush.bf16.msra.mxu1 %v6703_v10  ;;  %v6839_v49 = vpack.c.bf16 %v6055_v14, %v6047_v31  ;;  %v5759_v58 = vcvt.s32.f32 %v4735_v18  ;;  %v4887_v6 = vunpack.c.1.s8 %v4383_v5  ;;  %v5007_v13 = vunpack.c.0.s8 %v4415_v19  ;;  %v11070_v31 = vpop.f32.mrf.mxu0 }
 0x3e3   :  { %7456 = vmatpush.bf16.msra.mxu2 %v6775_v59  ;;  %v6631_v46 = vpack.c.bf16 %v5639_v61, %v5631_v51  ;;  %v5767_v63 = vcvt.s32.f32 %v4743_v30  ;;  %v5903_v24 = vcvt.s32.f32 %v4879_v54  ;;  %v5015_v62 = vunpack.c.1.s8 %v4415_v19 }
 0x3e4   :  { %7469 = vmatpush.bf16.msra.mxu3 %v6839_v49  ;;  %v5911_v43 = vcvt.s32.f32 %v4887_v6  ;;  %v6031_v60 = vcvt.s32.f32 %v5007_v13  ;;  %v4591_v9 = vunpack.c.0.s8 %v4311_v56  ;;  %v4599_v42 = vunpack.c.1.s8 %v4311_v56 }
 0x3e5   :  { %7432 = vmatpush.bf16.msra.mxu0 %v6631_v46  ;;  %v6695_v35 = vpack.c.bf16 %v5767_v63, %v5759_v58  ;;  %v6039_v12 = vcvt.s32.f32 %v5015_v62  ;;  %v4719_v22 = vunpack.c.0.s8 %v4343_v23  ;;  %v4727_v26 = vunpack.c.1.s8 %v4343_v23 }
 0x3e6   :  { %v6767_v21 = vpack.c.bf16 %v5911_v43, %v5903_v24  ;;  %v5615_v5 = vcvt.s32.f32 %v4591_v9  ;;  %v5623_v16 = vcvt.s32.f32 %v4599_v42  ;;  %v4863_v8 = vunpack.c.2.s8 %v4375_v45 }
 0x3e7   :  { %7445 = vmatpush.bf16.msra.mxu1 %v6695_v35  ;;  %v6831_v20 = vpack.c.bf16 %v6039_v12, %v6031_v60  ;;  %v5743_v38 = vcvt.s32.f32 %v4719_v22  ;;  %v5751_v19 = vcvt.s32.f32 %v4727_v26  ;;  %v4871_v57 = vunpack.c.3.s8 %v4375_v45  ;;  %v4487_v26 = vld [vmem:[#allocation7 + $0x5d8] sm:$0xff] }
 0x3e8   :  { %7457 = vmatpush.bf16.msra.mxu2 %v6767_v21  ;;  %v6623_v48 = vpack.c.bf16 %v5623_v16, %v5615_v5  ;;  %v5887_v25 = vcvt.s32.f32 %v4863_v8  ;;  %v4991_v56 = vunpack.c.2.s8 %v4407_v36  ;;  %v4999_v7 = vunpack.c.3.s8 %v4407_v36  ;;  %v4367_v8 = vld [vmem:[#allocation7 + $0x218] sm:$0xff] }
 0x3e9   :  { %7470 = vmatpush.bf16.msra.mxu3 %v6831_v20  ;;  %v6687_v37 = vpack.c.bf16 %v5751_v19, %v5743_v38  ;;  %v5895_v23 = vcvt.s32.f32 %v4871_v57  ;;  %v7204_v3 = vadd.f32 %v11049_v47, %v11065_v44  ;;  %v4575_v51 = vunpack.c.2.s8 %v4303_v32  ;;  %v7244_v20 = vpop.f32.mrf.mxu1 }
 0x3ea   :  { %7433 = vmatpush.bf16.msra.mxu0 %v6623_v48  ;;  %v6015_v10 = vcvt.s32.f32 %v4991_v56  ;;  %v6023_v14 = vcvt.s32.f32 %v4999_v7  ;;  %v4583_v61 = vunpack.c.3.s8 %v4303_v32  ;;  %v4703_v30 = vunpack.c.2.s8 %v4335_v29 }
 0x3eb   :  { %7446 = vmatpush.bf16.msra.mxu1 %v6687_v37  ;;  %v6759_v18 = vpack.c.bf16 %v5895_v23, %v5887_v25  ;;  %v11075_v59 = vadd.f32 %v11051_v52, %v7204_v3  ;;  %v5599_v49 = vcvt.s32.f32 %v4575_v51  ;;  %v4711_v58 = vunpack.c.3.s8 %v4335_v29  ;;  %v4455_v52 = vld [vmem:[#allocation7 + $0x4d8] sm:$0xff] }
 0x3ec   :  { %v6823_v54 = vpack.c.bf16 %v6023_v14, %v6015_v10  ;;  %v4847_v6 = vunpack.c.0.s8 %v4375_v45  ;;  %v5607_v47 = vcvt.s32.f32 %v4583_v61  ;;  %v5727_v44 = vcvt.s32.f32 %v4703_v30  ;;  %v4399_v37 = vld [vmem:[#allocation7 + $0x318] sm:$0xff] }
 0x3ed   :  { %7458 = vmatpush.bf16.msra.mxu2 %v6759_v18  ;;  %v4855_v13 = vunpack.c.1.s8 %v4375_v45  ;;  %v5735_v46 = vcvt.s32.f32 %v4711_v58  ;;  %v4975_v24 = vunpack.c.0.s8 %v4407_v36  ;;  %v4983_v62 = vunpack.c.1.s8 %v4407_v36  ;;  %v7231_v45 = vpop.f32.mrf.mxu0 }
 0x3ee   :  { %7471 = vmatpush.bf16.msra.mxu3 %v6823_v54  ;;  %v5871_v63 = vcvt.s32.f32 %v4847_v6  ;;  %v6615_v43 = vpack.c.bf16 %v5607_v47, %v5599_v49  ;;  %v4559_v9 = vunpack.c.0.s8 %v4303_v32  ;;  %v4567_v22 = vunpack.c.1.s8 %v4303_v32  ;;  %v4551_v45 = vld [vmem:[#allocation7 + $0x7d8] sm:$0xff] }
 0x3ef   :  { %v5879_v60 = vcvt.s32.f32 %v4855_v13  ;;  %v6679_v42 = vpack.c.bf16 %v5735_v46, %v5727_v44  ;;  %v5999_v35 = vcvt.s32.f32 %v4975_v24  ;;  %v6007_v12 = vcvt.s32.f32 %v4983_v62  ;;  %v11077_v62 = vpop.f32.mrf.mxu2 }
 0x3f0   :  { %7434 = vmatpush.bf16.msra.mxu0 %v6615_v43  ;;  %v5583_v5 = vcvt.s32.f32 %v4559_v9  ;;  %v4687_v16 = vunpack.c.0.s8 %v4335_v29  ;;  %v5591_v19 = vcvt.s32.f32 %v4567_v22  ;;  %v4695_v36 = vunpack.c.1.s8 %v4335_v29  ;;  %v11079_v43 = vpop.f32.mrf.mxu3 }
 0x3f1   :  { %v6751_v21 = vpack.c.bf16 %v5879_v60, %v5871_v63  ;;  %7447 = vmatpush.bf16.msra.mxu1 %v6679_v42  ;;  %v6815_v38 = vpack.c.bf16 %v6007_v12, %v5999_v35  ;;  %v5183_v57 = vunpack.c.2.s8 %v4455_v52  ;;  %v5191_v25 = vunpack.c.3.s8 %v4455_v52  ;;  %v4519_v12 = vld [vmem:[#allocation7 + $0x6d8] sm:$0xff] }
 0x3f2   :  { %v5711_v48 = vcvt.s32.f32 %v4687_v16  ;;  %v5311_v56 = vunpack.c.2.s8 %v4487_v26  ;;  %v5319_v7 = vunpack.c.3.s8 %v4487_v26  ;;  %v6607_v32 = vpack.c.bf16 %v5591_v19, %v5583_v5 }
 0x3f3   :  { %7459 = vmatpush.bf16.msra.mxu2 %v6751_v21  ;;  %7472 = vmatpush.bf16.msra.mxu3 %v6815_v38  ;;  %v5719_v23 = vcvt.s32.f32 %v4695_v36  ;;  %v6207_v3 = vcvt.s32.f32 %v5183_v57  ;;  %v4831_v10 = vunpack.c.2.s8 %v4367_v8  ;;  %v6215_v14 = vcvt.s32.f32 %v5191_v25  ;;  %v4447_v25 = vld [vmem:[#allocation7 + $0x498] sm:$0xff] }
 0x3f4   :  { %v6335_v51 = vcvt.s32.f32 %v5311_v56  ;;  %v6343_v18 = vcvt.s32.f32 %v5319_v7  ;;  %v4839_v61 = vunpack.c.3.s8 %v4367_v8  ;;  %7435 = vmatpush.bf16.msra.mxu0 %v6607_v32  ;;  %v4959_v29 = vunpack.c.2.s8 %v4399_v37 }
 0x3f5   :  { %v6671_v30 = vpack.c.bf16 %v5719_v23, %v5711_v48  ;;  %v5855_v54 = vcvt.s32.f32 %v4831_v10  ;;  %v4967_v49 = vunpack.c.3.s8 %v4399_v37  ;;  %v6919_v58 = vpack.c.bf16 %v6215_v14, %v6207_v3  ;;  %v4479_v3 = vld [vmem:[#allocation7 + $0x598] sm:$0xff] }
 0x3f6   :  { %v6983_v6 = vpack.c.bf16 %v6343_v18, %v6335_v51  ;;  %v5863_v47 = vcvt.s32.f32 %v4839_v61  ;;  %v5167_v44 = vunpack.c.0.s8 %v4455_v52  ;;  %v5983_v13 = vcvt.s32.f32 %v4959_v29 }
 0x3f7   :  { %7448 = vmatpush.bf16.msra.mxu1 %v6671_v30  ;;  %v5991_v46 = vcvt.s32.f32 %v4967_v49  ;;  %v5175_v63 = vunpack.c.1.s8 %v4455_v52  ;;  %v5295_v24 = vunpack.c.0.s8 %v4487_v26  ;;  %v5303_v42 = vunpack.c.1.s8 %v4487_v26  ;;  %7436 = vmatmul.bf16.vlgmr.msra.gmra.mxu0 %v10196_v27 }
 0x3f8   :  { %7480 = vmatpush.bf16.msrb.mxu0 %v6919_v58  ;;  %v6743_v60 = vpack.c.bf16 %v5863_v47, %v5855_v54  ;;  %v6191_v9 = vcvt.s32.f32 %v5167_v44  ;;  %v4815_v35 = vunpack.c.0.s8 %v4367_v8  ;;  %v4823_v16 = vunpack.c.1.s8 %v4367_v8  ;;  %v7270_v47 = vpop.f32.mrf.mxu3 }
 0x3f9   :  { %v6807_v22 = vpack.c.bf16 %v5991_v46, %v5983_v13  ;;  %v6199_v21 = vcvt.s32.f32 %v5175_v63  ;;  %v6319_v5 = vcvt.s32.f32 %v5295_v24  ;;  %v6327_v52 = vcvt.s32.f32 %v5303_v42 }
 0x3fa   :  { %7460 = vmatpush.bf16.msra.mxu2 %v6743_v60  ;;  %7449 = vmatmul.bf16.vlgmr.msra.gmra.mxu1 %v10318_v1  ;;  %v5839_v20 = vcvt.s32.f32 %v4815_v35  ;;  %v4943_v38 = vunpack.c.0.s8 %v4399_v37  ;;  %v4951_v19 = vunpack.c.1.s8 %v4399_v37  ;;  %v5847_v57 = vcvt.s32.f32 %v4823_v16  ;;  %v4511_v16 = vld [vmem:[#allocation7 + $0x698] sm:$0xff] }
 0x3fb   :  { %7493 = vmatpush.bf16.msrb.mxu1 %v6983_v6  ;;  %7473 = vmatpush.bf16.msra.mxu3 %v6807_v22  ;;  %v6911_v36 = vpack.c.bf16 %v6199_v21, %v6191_v9  ;;  %v5439_v26 = vunpack.c.2.s8 %v4519_v12  ;;  %v5447_v48 = vunpack.c.3.s8 %v4519_v12  ;;  %v6975_v56 = vpack.c.bf16 %v6327_v52, %v6319_v5  ;;  %v7257_v6 = vpop.f32.mrf.mxu2 }
 0x3fc   :  { %v5967_v7 = vcvt.s32.f32 %v4943_v38  ;;  %v5975_v32 = vcvt.s32.f32 %v4951_v19  ;;  %v5567_v23 = vunpack.c.2.s8 %v4551_v45  ;;  %v6735_v8 = vpack.c.bf16 %v5847_v57, %v5839_v20  ;;  %v4543_v19 = vld [vmem:[#allocation7 + $0x798] sm:$0xff] }
 0x3fd   :  { %7481 = vmatpush.bf16.msrb.mxu0 %v6911_v36  ;;  %v6463_v10 = vcvt.s32.f32 %v5439_v26  ;;  %v6471_v14 = vcvt.s32.f32 %v5447_v48  ;;  %v5575_v51 = vunpack.c.3.s8 %v4551_v45  ;;  %v5151_v37 = vunpack.c.2.s8 %v4447_v25 }
 0x3fe   :  { %v6799_v18 = vpack.c.bf16 %v5975_v32, %v5967_v7  ;;  %v6591_v61 = vcvt.s32.f32 %v5567_v23  ;;  %v5159_v30 = vunpack.c.3.s8 %v4447_v25  ;;  %7461 = vmatpush.bf16.msra.mxu2 %v6735_v8  ;;  %v5279_v49 = vunpack.c.2.s8 %v4479_v3  ;;  %v4439_v23 = vld [vmem:[#allocation7 + $0x458] sm:$0xff] }
 0x3ff   :  { %7494 = vmatpush.bf16.msrb.mxu1 %v6975_v56  ;;  %v7047_v54 = vpack.c.bf16 %v6471_v14, %v6463_v10  ;;  %v6599_v29 = vcvt.s32.f32 %v5575_v51  ;;  %v5287_v58 = vunpack.c.3.s8 %v4479_v3  ;;  %v6175_v44 = vcvt.s32.f32 %v5151_v37  ;;  %v4471_v14 = vld [vmem:[#allocation7 + $0x558] sm:$0xff] }
 0x400   :  { %7474 = vmatpush.bf16.msra.mxu3 %v6799_v18  ;;  %v6183_v13 = vcvt.s32.f32 %v5159_v30  ;;  %v5423_v46 = vunpack.c.0.s8 %v4519_v12  ;;  %v5431_v63 = vunpack.c.1.s8 %v4519_v12  ;;  %v6303_v60 = vcvt.s32.f32 %v5279_v49 }
 0x401   :  { %v7111_v24 = vpack.c.bf16 %v6599_v29, %v6591_v61  ;;  %v6311_v9 = vcvt.s32.f32 %v5287_v58  ;;  %v5551_v42 = vunpack.c.0.s8 %v4551_v45  ;;  %7462 = vmatmul.bf16.vlgmr.msra.gmra.mxu2 %v10485_v41  ;;  %v5559_v5 = vunpack.c.1.s8 %v4551_v45 }
 0x402   :  { %7506 = vmatpush.bf16.msrb.mxu2 %v7047_v54  ;;  %v6903_v35 = vpack.c.bf16 %v6183_v13, %v6175_v44  ;;  %v6447_v22 = vcvt.s32.f32 %v5423_v46  ;;  %v6455_v21 = vcvt.s32.f32 %v5431_v63  ;;  %v11086_v38 = vadd.f32 %v11072_v53, %v11070_v31 }
 0x403   :  { %v6967_v52 = vpack.c.bf16 %v6311_v9, %v6303_v60  ;;  %v6575_v20 = vcvt.s32.f32 %v5551_v42  ;;  %v5135_v12 = vunpack.c.0.s8 %v4447_v25  ;;  %7475 = vmatmul.bf16.vlgmr.msra.gmra.mxu3 %v10487_v39  ;;  %v6583_v57 = vcvt.s32.f32 %v5559_v5  ;;  %v4503_v5 = vld [vmem:[#allocation7 + $0x658] sm:$0xff] }
 0x404   :  { %7519 = vmatpush.bf16.msrb.mxu3 %v7111_v24  ;;  %7482 = vmatpush.bf16.msrb.mxu0 %v6903_v35  ;;  %v7039_v36 = vpack.c.bf16 %v6455_v21, %v6447_v22  ;;  %v5143_v26 = vunpack.c.1.s8 %v4447_v25  ;;  %v5263_v48 = vunpack.c.0.s8 %v4479_v3  ;;  %v5271_v45 = vunpack.c.1.s8 %v4479_v3 }
 0x405   :  { %7495 = vmatpush.bf16.msrb.mxu1 %v6967_v52  ;;  %v6159_v56 = vcvt.s32.f32 %v5135_v12  ;;  %v5407_v7 = vunpack.c.2.s8 %v4511_v16  ;;  %v5415_v32 = vunpack.c.3.s8 %v4511_v16  ;;  %v7103_v8 = vpack.c.bf16 %v6583_v57, %v6575_v20 }
 0x406   :  { %7507 = vmatpush.bf16.msrb.mxu2 %v7039_v36  ;;  %v6167_v10 = vcvt.s32.f32 %v5143_v26  ;;  %v6287_v31 = vcvt.s32.f32 %v5263_v48  ;;  %v5535_v53 = vunpack.c.2.s8 %v4543_v19  ;;  %v6295_v51 = vcvt.s32.f32 %v5271_v45  ;;  %v4535_v45 = vld [vmem:[#allocation7 + $0x758] sm:$0xff] }
 0x407   :  { %v6431_v18 = vcvt.s32.f32 %v5407_v7  ;;  %v6439_v61 = vcvt.s32.f32 %v5415_v32  ;;  %v5543_v37 = vunpack.c.3.s8 %v4543_v19  ;;  %v5119_v54 = vunpack.c.2.s8 %v4439_v23 }
 0x408   :  { %7520 = vmatpush.bf16.msrb.mxu3 %v7103_v8  ;;  %v6895_v30 = vpack.c.bf16 %v6167_v10, %v6159_v56  ;;  %v6559_v25 = vcvt.s32.f32 %v5535_v53  ;;  %v5127_v29 = vunpack.c.3.s8 %v4439_v23  ;;  %v6959_v49 = vpack.c.bf16 %v6295_v51, %v6287_v31  ;;  %v4431_v10 = vld [vmem:[#allocation7 + $0x418] sm:$0xff] }
 0x409   :  { %v7031_v3 = vpack.c.bf16 %v6439_v61, %v6431_v18  ;;  %v6567_v58 = vcvt.s32.f32 %v5543_v37  ;;  %v5247_v6 = vunpack.c.2.s8 %v4471_v14  ;;  %v6143_v47 = vcvt.s32.f32 %v5119_v54  ;;  %v4463_v18 = vld [vmem:[#allocation7 + $0x518] sm:$0xff]  ;;  %v11089_v61 = vpop.f32.mrf.mxu0 }
 0x40a   :  { %7483 = vmatpush.bf16.msrb.mxu0 %v6895_v30  ;;  %v6151_v44 = vcvt.s32.f32 %v5127_v29  ;;  %v5255_v13 = vunpack.c.3.s8 %v4471_v14  ;;  %v5391_v46 = vunpack.c.0.s8 %v4511_v16  ;;  %7496 = vmatpush.bf16.msrb.mxu1 %v6959_v49  ;;  %v5399_v60 = vunpack.c.1.s8 %v4511_v16 }
 0x40b   :  { %7508 = vmatpush.bf16.msrb.mxu2 %v7031_v3  ;;  %v7095_v63 = vpack.c.bf16 %v6567_v58, %v6559_v25  ;;  %v6271_v24 = vcvt.s32.f32 %v5247_v6  ;;  %v5519_v9 = vunpack.c.0.s8 %v4543_v19  ;;  %v5527_v21 = vunpack.c.1.s8 %v4543_v19 }
 0x40c   :  { %v6887_v42 = vpack.c.bf16 %v6151_v44, %v6143_v47  ;;  %v6279_v35 = vcvt.s32.f32 %v5255_v13  ;;  %v6415_v22 = vcvt.s32.f32 %v5391_v46  ;;  %v6423_v52 = vcvt.s32.f32 %v5399_v60 }
 0x40d   :  { %7521 = vmatpush.bf16.msrb.mxu3 %v7095_v63  ;;  %v6543_v20 = vcvt.s32.f32 %v5519_v9  ;;  %v5103_v12 = vunpack.c.0.s8 %v4439_v23  ;;  %v5111_v36 = vunpack.c.1.s8 %v4439_v23  ;;  %v6551_v26 = vcvt.s32.f32 %v5527_v21  ;;  %v11091_v23 = vpop.f32.mrf.mxu1 }
 0x40e   :  { %7484 = vmatpush.bf16.msrb.mxu0 %v6887_v42  ;;  %v6951_v57 = vpack.c.bf16 %v6279_v35, %v6271_v24  ;;  %v5231_v48 = vunpack.c.0.s8 %v4471_v14  ;;  %v5239_v56 = vunpack.c.1.s8 %v4471_v14  ;;  %v7023_v7 = vpack.c.bf16 %v6423_v52, %v6415_v22 }
 0x40f   :  { %v6127_v32 = vcvt.s32.f32 %v5103_v12  ;;  %v6135_v16 = vcvt.s32.f32 %v5111_v36  ;;  %v5375_v8 = vunpack.c.2.s8 %v4503_v5  ;;  %v7087_v31 = vpack.c.bf16 %v6551_v26, %v6543_v20 }
 0x410   :  { %7497 = vmatpush.bf16.msrb.mxu1 %v6951_v57  ;;  %v6255_v19 = vcvt.s32.f32 %v5231_v48  ;;  %v6263_v53 = vcvt.s32.f32 %v5239_v56  ;;  %v5383_v51 = vunpack.c.3.s8 %v4503_v5  ;;  %7509 = vmatpush.bf16.msrb.mxu2 %v7023_v7  ;;  %v5503_v14 = vunpack.c.2.s8 %v4535_v45  ;;  %v4328_v57 = vld [vmem:[#allocation7 + $0xe0] sm:$0xff] }
 0x411   :  { %v6879_v37 = vpack.c.bf16 %v6135_v16, %v6127_v32  ;;  %v6399_v30 = vcvt.s32.f32 %v5375_v8  ;;  %v5511_v25 = vunpack.c.3.s8 %v4535_v45  ;;  %7522 = vmatpush.bf16.msrb.mxu3 %v7087_v31  ;;  %v7256_v49 = vadd.f32 %v11077_v62, %v11086_v38  ;;  %v4360_v7 = vld [vmem:[#allocation7 + $0x1e0] sm:$0xff]  ;;  %v7283_v32 = vpop.f32.mrf.mxu0 }
 0x412   :  { %v6943_v54 = vpack.c.bf16 %v6263_v53, %v6255_v19  ;;  %v6407_v29 = vcvt.s32.f32 %v5383_v51  ;;  %v5087_v3 = vunpack.c.2.s8 %v4431_v10  ;;  %v6527_v58 = vcvt.s32.f32 %v5503_v14  ;;  %v4495_v53 = vld [vmem:[#allocation7 + $0x618] sm:$0xff]  ;;  %v4392_v32 = vld [vmem:[#allocation7 + $0x2e0] sm:$0xff] }
 0x413   :  { %7485 = vmatpush.bf16.msrb.mxu0 %v6879_v37  ;;  %v6535_v6 = vcvt.s32.f32 %v5511_v25  ;;  %v5095_v47 = vunpack.c.3.s8 %v4431_v10  ;;  %v5215_v44 = vunpack.c.2.s8 %v4463_v18  ;;  %v11096_v46 = vadd.f32 %v11079_v43, %v7256_v49 }
 0x414   :  { %7498 = vmatpush.bf16.msrb.mxu1 %v6943_v54  ;;  %v7015_v13 = vpack.c.bf16 %v6407_v29, %v6399_v30  ;;  %v6111_v63 = vcvt.s32.f32 %v5087_v3  ;;  %v5223_v24 = vunpack.c.3.s8 %v4463_v18  ;;  %v5359_v35 = vunpack.c.0.s8 %v4503_v5 }
 0x415   :  { %v7079_v60 = vpack.c.bf16 %v6535_v6, %v6527_v58  ;;  %v6119_v9 = vcvt.s32.f32 %v5095_v47  ;;  %v6239_v42 = vcvt.s32.f32 %v5215_v44  ;;  %v5367_v62 = vunpack.c.1.s8 %v4503_v5  ;;  %v7296_v16 = vpop.f32.mrf.mxu1 }
 0x416   :  { %7510 = vmatpush.bf16.msrb.mxu2 %v7015_v13  ;;  %v6247_v22 = vcvt.s32.f32 %v5223_v24  ;;  %v5487_v38 = vunpack.c.0.s8 %v4535_v45  ;;  %v5495_v21 = vunpack.c.1.s8 %v4535_v45  ;;  %v6383_v20 = vcvt.s32.f32 %v5359_v35 }
 0x417   :  { %7523 = vmatpush.bf16.msrb.mxu3 %v7079_v60  ;;  %v6871_v52 = vpack.c.bf16 %v6119_v9, %v6111_v63  ;;  %v5071_v12 = vunpack.c.0.s8 %v4431_v10  ;;  %v5079_v36 = vunpack.c.1.s8 %v4431_v10  ;;  %v6391_v43 = vcvt.s32.f32 %v5367_v62  ;;  %v4527_v10 = vld [vmem:[#allocation7 + $0x718] sm:$0xff] }
 0x418   :  { %v6935_v26 = vpack.c.bf16 %v6247_v22, %v6239_v42  ;;  %v6511_v48 = vcvt.s32.f32 %v5487_v38  ;;  %v6519_v56 = vcvt.s32.f32 %v5495_v21  ;;  %v5199_v19 = vunpack.c.0.s8 %v4463_v18 }
 0x419   :  { %7486 = vmatpush.bf16.msrb.mxu0 %v6871_v52  ;;  %v6095_v8 = vcvt.s32.f32 %v5071_v12  ;;  %v6103_v31 = vcvt.s32.f32 %v5079_v36  ;;  %v5207_v5 = vunpack.c.1.s8 %v4463_v18  ;;  %v7007_v45 = vpack.c.bf16 %v6391_v43, %v6383_v20  ;;  %v11098_v12 = vpop.f32.mrf.mxu2  ;;  %v11100_v36 = vpop.f32.mrf.mxu3 }
 0x41a   :  { %7499 = vmatpush.bf16.msrb.mxu1 %v6935_v26  ;;  %v7071_v51 = vpack.c.bf16 %v6519_v56, %v6511_v48  ;;  %v4672_v37 = vunpack.c.2.s8 %v4328_v57  ;;  %v4680_v30 = vunpack.c.3.s8 %v4328_v57  ;;  %v6223_v25 = vcvt.s32.f32 %v5199_v19  ;;  %v4424_v19 = vld [vmem:[#allocation7 + $0x3e0] sm:$0xff] }
 0x41b   :  { %v6863_v14 = vpack.c.bf16 %v6103_v31, %v6095_v8  ;;  %v6231_v54 = vcvt.s32.f32 %v5207_v5  ;;  %v4800_v29 = vunpack.c.2.s8 %v4360_v7  ;;  %7511 = vmatpush.bf16.msrb.mxu2 %v7007_v45  ;;  %v4808_v58 = vunpack.c.3.s8 %v4360_v7 }
 0x41c   :  { %7524 = vmatpush.bf16.msrb.mxu3 %v7071_v51  ;;  %v5696_v49 = vcvt.s32.f32 %v4672_v37  ;;  %v5704_v3 = vcvt.s32.f32 %v4680_v30  ;;  %v5343_v6 = vunpack.c.2.s8 %v4495_v53  ;;  %v5351_v44 = vunpack.c.3.s8 %v4495_v53  ;;  %v11104_v37 = vld [vmem:[#allocation7 + $0xa0] sm:$0xff] }
 0x41d   :  { %7487 = vmatpush.bf16.msrb.mxu0 %v6863_v14  ;;  %v6927_v47 = vpack.c.bf16 %v6231_v54, %v6223_v25  ;;  %v5824_v18 = vcvt.s32.f32 %v4800_v29  ;;  %v5471_v13 = vunpack.c.2.s8 %v4527_v10  ;;  %v5832_v24 = vcvt.s32.f32 %v4808_v58  ;;  %v4352_v58 = vld [vmem:[#allocation7 + $0x1a0] sm:$0xff] }
 0x41e   :  { %v6664_v63 = vpack.c.bf16 %v5704_v3, %v5696_v49  ;;  %v6367_v60 = vcvt.s32.f32 %v5343_v6  ;;  %v5479_v9 = vunpack.c.3.s8 %v4527_v10  ;;  %v6375_v42 = vcvt.s32.f32 %v5351_v44 }
 0x41f   :  { %7500 = vmatpush.bf16.msrb.mxu1 %v6927_v47  ;;  %v6495_v35 = vcvt.s32.f32 %v5471_v13  ;;  %v4656_v22 = vunpack.c.0.s8 %v4328_v57  ;;  %v4664_v62 = vunpack.c.1.s8 %v4328_v57  ;;  %v6728_v38 = vpack.c.bf16 %v5832_v24, %v5824_v18 }
 0x420   :  { %v6503_v21 = vcvt.s32.f32 %v5479_v9  ;;  %v4784_v52 = vunpack.c.0.s8 %v4360_v7  ;;  %v4792_v20 = vunpack.c.1.s8 %v4360_v7  ;;  %v6999_v26 = vpack.c.bf16 %v6375_v42, %v6367_v60  ;;  %7488 = vmatmul.bf16.vlgmr.msrb.gmra.mxu0 %v10656_v17 }
 0x421   :  { %7532 = vmatpush.bf16.msra.mxu0 %v6664_v63  ;;  %v5680_v43 = vcvt.s32.f32 %v4656_v22  ;;  %v5688_v48 = vcvt.s32.f32 %v4664_v62  ;;  %v5327_v56 = vunpack.c.0.s8 %v4495_v53  ;;  %v5335_v31 = vunpack.c.1.s8 %v4495_v53  ;;  %v7309_v22 = vpop.f32.mrf.mxu2  ;;  %v7322_v62 = vpop.f32.mrf.mxu3 }
 0x422   :  { %v7063_v16 = vpack.c.bf16 %v6503_v21, %v6495_v35  ;;  %v5808_v8 = vcvt.s32.f32 %v4784_v52  ;;  %v5816_v57 = vcvt.s32.f32 %v4792_v20  ;;  %7512 = vmatpush.bf16.msrb.mxu2 %v6999_v26  ;;  %7501 = vmatmul.bf16.vlgmr.msrb.gmra.mxu1 %v10805_v33  ;;  %v5455_v45 = vunpack.c.0.s8 %v4527_v10 }
 0x423   :  { %7545 = vmatpush.bf16.msra.mxu1 %v6728_v38  ;;  %v6656_v7 = vpack.c.bf16 %v5688_v48, %v5680_v43  ;;  %v6351_v5 = vcvt.s32.f32 %v5327_v56  ;;  %v5463_v51 = vunpack.c.1.s8 %v4527_v10  ;;  %v6359_v14 = vcvt.s32.f32 %v5335_v31 }
 0x424   :  { %7525 = vmatpush.bf16.msrb.mxu3 %v7063_v16  ;;  %v6720_v30 = vpack.c.bf16 %v5816_v57, %v5808_v8  ;;  %v4928_v25 = vunpack.c.2.s8 %v4392_v32  ;;  %v4936_v54 = vunpack.c.3.s8 %v4392_v32  ;;  %v6479_v29 = vcvt.s32.f32 %v5455_v45 }
 0x425   :  { %7533 = vmatpush.bf16.msra.mxu0 %v6656_v7  ;;  %v6487_v49 = vcvt.s32.f32 %v5463_v51  ;;  %v5056_v3 = vunpack.c.2.s8 %v4424_v19  ;;  %v5064_v53 = vunpack.c.3.s8 %v4424_v19  ;;  %v6991_v6 = vpack.c.bf16 %v6359_v14, %v6351_v5  ;;  %v4384_v7 = vld [vmem:[#allocation7 + $0x2a0] sm:$0xff] }
 0x426   :  { %v5952_v47 = vcvt.s32.f32 %v4928_v25  ;;  %v5960_v18 = vcvt.s32.f32 %v4936_v54  ;;  %v4640_v44 = vunpack.c.2.s8 %v11104_v37  ;;  %v4648_v24 = vunpack.c.3.s8 %v11104_v37 }
 0x427   :  { %7546 = vmatpush.bf16.msra.mxu1 %v6720_v30  ;;  %v7055_v10 = vpack.c.bf16 %v6487_v49, %v6479_v29  ;;  %v6080_v13 = vcvt.s32.f32 %v5056_v3  ;;  %v6088_v63 = vcvt.s32.f32 %v5064_v53  ;;  %7513 = vmatpush.bf16.msrb.mxu2 %v6991_v6  ;;  %v4768_v42 = vunpack.c.2.s8 %v4352_v58  ;;  %v4416_v30 = vld [vmem:[#allocation7 + $0x3a0] sm:$0xff] }
 0x428   :  { %v6792_v60 = vpack.c.bf16 %v5960_v18, %v5952_v47  ;;  %v5664_v9 = vcvt.s32.f32 %v4640_v44  ;;  %v4776_v35 = vunpack.c.3.s8 %v4352_v58  ;;  %v5672_v21 = vcvt.s32.f32 %v4648_v24  ;;  %v4312_v29 = vld [vmem:[#allocation7 + $0x60] sm:$0xff] }
 0x429   :  { %7526 = vmatpush.bf16.msrb.mxu3 %v7055_v10  ;;  %v6856_v38 = vpack.c.bf16 %v6088_v63, %v6080_v13  ;;  %v4912_v52 = vunpack.c.0.s8 %v4392_v32  ;;  %v4920_v20 = vunpack.c.1.s8 %v4392_v32  ;;  %v5792_v26 = vcvt.s32.f32 %v4768_v42  ;;  %v4344_v44 = vld [vmem:[#allocation7 + $0x160] sm:$0xff] }
 0x42a   :  { %v5800_v43 = vcvt.s32.f32 %v4776_v35  ;;  %v5040_v48 = vunpack.c.0.s8 %v4424_v19  ;;  %v5048_v56 = vunpack.c.1.s8 %v4424_v19  ;;  %7514 = vmatmul.bf16.vlgmr.msrb.gmra.mxu2 %v10924_v4  ;;  %v6648_v16 = vpack.c.bf16 %v5672_v21, %v5664_v9 }
 0x42b   :  { %7558 = vmatpush.bf16.msra.mxu2 %v6792_v60  ;;  %v5936_v8 = vcvt.s32.f32 %v4912_v52  ;;  %v5944_v57 = vcvt.s32.f32 %v4920_v20  ;;  %v7282_v31 = vadd.f32 %v11089_v61, %v11096_v46  ;;  %v4624_v51 = vunpack.c.0.s8 %v11104_v37 }
 0x42c   :  { %7527 = vmatmul.bf16.vlgmr.msrb.gmra.mxu3 %v10926_v0  ;;  %v6712_v5 = vpack.c.bf16 %v5800_v43, %v5792_v26  ;;  %v6064_v45 = vcvt.s32.f32 %v5040_v48  ;;  %v6072_v32 = vcvt.s32.f32 %v5048_v56  ;;  %7534 = vmatpush.bf16.msra.mxu0 %v6648_v16  ;;  %v4632_v25 = vunpack.c.1.s8 %v11104_v37 }
 0x42d   :  { %7571 = vmatpush.bf16.msra.mxu3 %v6856_v38  ;;  %v6784_v19 = vpack.c.bf16 %v5944_v57, %v5936_v8  ;;  %v11114_v14 = vadd.f32 %v11091_v23, %v7282_v31  ;;  %v4752_v54 = vunpack.c.0.s8 %v4352_v58  ;;  %v5648_v46 = vcvt.s32.f32 %v4624_v51  ;;  %v4376_v31 = vld [vmem:[#allocation7 + $0x260] sm:$0xff] }
 0x42e   :  { %7547 = vmatpush.bf16.msra.mxu1 %v6712_v5  ;;  %v6848_v61 = vpack.c.bf16 %v6072_v32, %v6064_v45  ;;  %v4760_v49 = vunpack.c.1.s8 %v4352_v58  ;;  %v4896_v3 = vunpack.c.2.s8 %v4384_v7  ;;  %v5656_v53 = vcvt.s32.f32 %v4632_v25 }
 0x42f   :  { %7559 = vmatpush.bf16.msra.mxu2 %v6784_v19  ;;  %v5776_v6 = vcvt.s32.f32 %v4752_v54  ;;  %v4904_v47 = vunpack.c.3.s8 %v4384_v7  ;;  %v5024_v18 = vunpack.c.2.s8 %v4416_v30  ;;  %v5032_v23 = vunpack.c.3.s8 %v4416_v30 }
 0x430   :  { %v5784_v10 = vcvt.s32.f32 %v4760_v49  ;;  %v5920_v13 = vcvt.s32.f32 %v4896_v3  ;;  %v4608_v63 = vunpack.c.2.s8 %v4312_v29  ;;  %v6640_v24 = vpack.c.bf16 %v5656_v53, %v5648_v46  ;;  %v4408_v46 = vld [vmem:[#allocation7 + $0x360] sm:$0xff] }
 0x431   :  { %7572 = vmatpush.bf16.msra.mxu3 %v6848_v61  ;;  %v5928_v37 = vcvt.s32.f32 %v4904_v47  ;;  %v6048_v60 = vcvt.s32.f32 %v5024_v18  ;;  %v4616_v9 = vunpack.c.3.s8 %v4312_v29  ;;  %v6056_v35 = vcvt.s32.f32 %v5032_v23 }
 0x432   :  { %v6704_v42 = vpack.c.bf16 %v5784_v10, %v5776_v6  ;;  %v5632_v22 = vcvt.s32.f32 %v4608_v63  ;;  %v4736_v58 = vunpack.c.2.s8 %v4344_v44  ;;  %7535 = vmatpush.bf16.msra.mxu0 %v6640_v24  ;;  %v4744_v21 = vunpack.c.3.s8 %v4344_v44  ;;  %v4304_v10 = vld [vmem:[#allocation7 + $0x20] sm:$0xff] }
 0x433   :  { %v6776_v62 = vpack.c.bf16 %v5928_v37, %v5920_v13  ;;  %v5640_v38 = vcvt.s32.f32 %v4616_v9  ;;  %v4880_v52 = vunpack.c.0.s8 %v4384_v7  ;;  %v6840_v20 = vpack.c.bf16 %v6056_v35, %v6048_v60  ;;  %v4336_v24 = vld [vmem:[#allocation7 + $0x120] sm:$0xff]  ;;  %v11119_v9 = vpop.f32.mrf.mxu0 }
 0x434   :  { %7548 = vmatpush.bf16.msra.mxu1 %v6704_v42  ;;  %v5760_v26 = vcvt.s32.f32 %v4736_v58  ;;  %v4888_v43 = vunpack.c.1.s8 %v4384_v7  ;;  %v5008_v48 = vunpack.c.0.s8 %v4416_v30  ;;  %v5768_v16 = vcvt.s32.f32 %v4744_v21  ;;  %v11121_v42 = vpop.f32.mrf.mxu1 }
 0x435   :  { %7560 = vmatpush.bf16.msra.mxu2 %v6776_v62  ;;  %v6632_v56 = vpack.c.bf16 %v5640_v38, %v5632_v22  ;;  %v5904_v8 = vcvt.s32.f32 %v4880_v52  ;;  %v5016_v57 = vunpack.c.1.s8 %v4416_v30  ;;  %7573 = vmatpush.bf16.msra.mxu3 %v6840_v20  ;;  %v4592_v32 = vunpack.c.0.s8 %v4312_v29 }
 0x436   :  { %v5912_v5 = vcvt.s32.f32 %v4888_v43  ;;  %v6032_v45 = vcvt.s32.f32 %v5008_v48  ;;  %v4600_v51 = vunpack.c.1.s8 %v4312_v29  ;;  %v6696_v19 = vpack.c.bf16 %v5768_v16, %v5760_v26 }
 0x437   :  { %7536 = vmatpush.bf16.msra.mxu0 %v6632_v56  ;;  %v6040_v25 = vcvt.s32.f32 %v5016_v57  ;;  %v4720_v54 = vunpack.c.0.s8 %v4344_v44  ;;  %v4728_v61 = vunpack.c.1.s8 %v4344_v44  ;;  %v5616_v7 = vcvt.s32.f32 %v4592_v32 }
 0x438   :  { %v6768_v49 = vpack.c.bf16 %v5912_v5, %v5904_v8  ;;  %v5624_v3 = vcvt.s32.f32 %v4600_v51  ;;  %v4864_v53 = vunpack.c.2.s8 %v4376_v31  ;;  %7549 = vmatpush.bf16.msra.mxu1 %v6696_v19  ;;  %v4872_v18 = vunpack.c.3.s8 %v4376_v31 }
 0x439   :  { %v6832_v6 = vpack.c.bf16 %v6040_v25, %v6032_v45  ;;  %v5744_v47 = vcvt.s32.f32 %v4720_v54  ;;  %v5752_v30 = vcvt.s32.f32 %v4728_v61  ;;  %v4992_v29 = vunpack.c.2.s8 %v4408_v46 }
 0x43a   :  { %7561 = vmatpush.bf16.msra.mxu2 %v6768_v49  ;;  %v6624_v13 = vpack.c.bf16 %v5624_v3, %v5616_v7  ;;  %v5888_v23 = vcvt.s32.f32 %v4864_v53  ;;  %v5000_v63 = vunpack.c.3.s8 %v4408_v46  ;;  %v5896_v44 = vcvt.s32.f32 %v4872_v18  ;;  %v4488_v49 = vld [vmem:[#allocation7 + $0x5e0] sm:$0xff] }
 0x43b   :  { %7574 = vmatpush.bf16.msra.mxu3 %v6832_v6  ;;  %v6688_v37 = vpack.c.bf16 %v5752_v30, %v5744_v47  ;;  %v7308_v60 = vadd.f32 %v11098_v12, %v11114_v14  ;;  %v6016_v35 = vcvt.s32.f32 %v4992_v29  ;;  %v4576_v58 = vunpack.c.2.s8 %v4304_v10  ;;  %v4368_v6 = vld [vmem:[#allocation7 + $0x220] sm:$0xff] }
 0x43c   :  { %7537 = vmatpush.bf16.msra.mxu0 %v6624_v13  ;;  %v6024_v22 = vcvt.s32.f32 %v5000_v63  ;;  %v6760_v62 = vpack.c.bf16 %v5896_v44, %v5888_v23  ;;  %v4584_v21 = vunpack.c.3.s8 %v4304_v10  ;;  %v4704_v52 = vunpack.c.2.s8 %v4336_v24  ;;  %v7348_v47 = vpop.f32.mrf.mxu1  ;;  %v4400_v44 = vld [vmem:[#allocation7 + $0x320] sm:$0xff] }
 0x43d   :  { %7550 = vmatpush.bf16.msra.mxu1 %v6688_v37  ;;  %v11124_v38 = vadd.f32 %v11100_v36, %v7308_v60  ;;  %v5600_v26 = vcvt.s32.f32 %v4576_v58  ;;  %v4712_v43 = vunpack.c.3.s8 %v4336_v24  ;;  %v4848_v48 = vunpack.c.0.s8 %v4376_v31  ;;  %v4456_v36 = vld [vmem:[#allocation7 + $0x4e0] sm:$0xff] }
 0x43e   :  { %v6824_v20 = vpack.c.bf16 %v6024_v22, %v6016_v35  ;;  %7562 = vmatpush.bf16.msra.mxu2 %v6760_v62  ;;  %v5608_v12 = vcvt.s32.f32 %v4584_v21  ;;  %v5728_v14 = vcvt.s32.f32 %v4704_v52  ;;  %v4856_v56 = vunpack.c.1.s8 %v4376_v31  ;;  %v7335_v31 = vpop.f32.mrf.mxu0  ;;  %v4552_v47 = vld [vmem:[#allocation7 + $0x7e0] sm:$0xff] }
 0x43f   :  { %v5736_v16 = vcvt.s32.f32 %v4712_v43  ;;  %v5872_v8 = vcvt.s32.f32 %v4848_v48  ;;  %v4976_v57 = vunpack.c.0.s8 %v4408_v46  ;;  %v4984_v5 = vunpack.c.1.s8 %v4408_v46 }
 0x440   :  { %7575 = vmatpush.bf16.msra.mxu3 %v6824_v20  ;;  %v6616_v45 = vpack.c.bf16 %v5608_v12, %v5600_v26  ;;  %v5880_v32 = vcvt.s32.f32 %v4856_v56  ;;  %v4560_v51 = vunpack.c.0.s8 %v4304_v10  ;;  %v4568_v61 = vunpack.c.1.s8 %v4304_v10 }
 0x441   :  { %v6680_v19 = vpack.c.bf16 %v5736_v16, %v5728_v14  ;;  %v6000_v25 = vcvt.s32.f32 %v4976_v57  ;;  %v6008_v54 = vcvt.s32.f32 %v4984_v5  ;;  %v4688_v53 = vunpack.c.0.s8 %v4336_v24 }
 0x442   :  { %7538 = vmatpush.bf16.msra.mxu0 %v6616_v45  ;;  %v6752_v7 = vpack.c.bf16 %v5880_v32, %v5872_v8  ;;  %v5584_v3 = vcvt.s32.f32 %v4560_v51  ;;  %v5592_v18 = vcvt.s32.f32 %v4568_v61  ;;  %v4696_v46 = vunpack.c.1.s8 %v4336_v24  ;;  %v11126_v45 = vpop.f32.mrf.mxu2  ;;  %v11128_v32 = vpop.f32.mrf.mxu3  ;;  %v4520_v61 = vld [vmem:[#allocation7 + $0x6e0] sm:$0xff] }
 0x443   :  { %7551 = vmatpush.bf16.msra.mxu1 %v6680_v19  ;;  %v6816_v30 = vpack.c.bf16 %v6008_v54, %v6000_v25  ;;  %v5184_v13 = vunpack.c.2.s8 %v4456_v36  ;;  %v5712_v23 = vcvt.s32.f32 %v4688_v53  ;;  %v5192_v29 = vunpack.c.3.s8 %v4456_v36 }
 0x444   :  { %7563 = vmatpush.bf16.msra.mxu2 %v6752_v7  ;;  %v5312_v63 = vunpack.c.2.s8 %v4488_v49  ;;  %v5320_v37 = vunpack.c.3.s8 %v4488_v49  ;;  %v6608_v10 = vpack.c.bf16 %v5592_v18, %v5584_v3  ;;  %v5720_v60 = vcvt.s32.f32 %v4696_v46 }
 0x445   :  { %7576 = vmatpush.bf16.msra.mxu3 %v6816_v30  ;;  %v6208_v35 = vcvt.s32.f32 %v5184_v13  ;;  %v4832_v22 = vunpack.c.2.s8 %v4368_v6  ;;  %v6216_v58 = vcvt.s32.f32 %v5192_v29  ;;  %v4840_v52 = vunpack.c.3.s8 %v4368_v6 }
 0x446   :  { %v6336_v62 = vcvt.s32.f32 %v5312_v63  ;;  %v6344_v21 = vcvt.s32.f32 %v5320_v37  ;;  %7539 = vmatpush.bf16.msra.mxu0 %v6608_v10  ;;  %v6672_v20 = vpack.c.bf16 %v5720_v60, %v5712_v23  ;;  %v4960_v24 = vunpack.c.2.s8 %v4400_v44  ;;  %v4448_v63 = vld [vmem:[#allocation7 + $0x4a0] sm:$0xff] }
 0x447   :  { %v5856_v26 = vcvt.s32.f32 %v4832_v22  ;;  %v4968_v43 = vunpack.c.3.s8 %v4400_v44  ;;  %v6920_v48 = vpack.c.bf16 %v6216_v58, %v6208_v35  ;;  %v5864_v14 = vcvt.s32.f32 %v4840_v52  ;;  %v4480_v22 = vld [vmem:[#allocation7 + $0x5a0] sm:$0xff] }
 0x448   :  { %v6984_v12 = vpack.c.bf16 %v6344_v21, %v6336_v62  ;;  %v5168_v56 = vunpack.c.0.s8 %v4456_v36  ;;  %7552 = vmatpush.bf16.msra.mxu1 %v6672_v20  ;;  %v5984_v16 = vcvt.s32.f32 %v4960_v24  ;;  %v5176_v57 = vunpack.c.1.s8 %v4456_v36 }
 0x449   :  { %v5992_v8 = vcvt.s32.f32 %v4968_v43  ;;  %v5296_v5 = vunpack.c.0.s8 %v4488_v49  ;;  %v6744_v51 = vpack.c.bf16 %v5864_v14, %v5856_v26  ;;  %v5304_v25 = vunpack.c.1.s8 %v4488_v49  ;;  %7540 = vmatmul.bf16.vlgmr.msra.gmra.mxu0 %v10196_v27 }
 0x44a   :  { %7584 = vmatpush.bf16.msrb.mxu0 %v6920_v48  ;;  %v6192_v19 = vcvt.s32.f32 %v5168_v56  ;;  %v4816_v54 = vunpack.c.0.s8 %v4368_v6  ;;  %v6200_v3 = vcvt.s32.f32 %v5176_v57  ;;  %v4824_v31 = vunpack.c.1.s8 %v4368_v6  ;;  %v7361_v14 = vpop.f32.mrf.mxu2  ;;  %v7374_v56 = vpop.f32.mrf.mxu3 }
 0x44b   :  { %v6808_v7 = vpack.c.bf16 %v5992_v8, %v5984_v16  ;;  %v6320_v53 = vcvt.s32.f32 %v5296_v5  ;;  %7564 = vmatpush.bf16.msra.mxu2 %v6744_v51  ;;  %7553 = vmatmul.bf16.vlgmr.msra.gmra.mxu1 %v10318_v1  ;;  %v6328_v36 = vcvt.s32.f32 %v5304_v25  ;;  %v4944_v18 = vunpack.c.0.s8 %v4400_v44 }
 0x44c   :  { %7597 = vmatpush.bf16.msrb.mxu1 %v6984_v12  ;;  %v5840_v30 = vcvt.s32.f32 %v4816_v54  ;;  %v4952_v46 = vunpack.c.1.s8 %v4400_v44  ;;  %v6912_v13 = vpack.c.bf16 %v6200_v3, %v6192_v19  ;;  %v5848_v23 = vcvt.s32.f32 %v4824_v31 }
 0x44d   :  { %7577 = vmatpush.bf16.msra.mxu3 %v6808_v7  ;;  %v5440_v49 = vunpack.c.2.s8 %v4520_v61  ;;  %v5448_v29 = vunpack.c.3.s8 %v4520_v61  ;;  %v6976_v37 = vpack.c.bf16 %v6328_v36, %v6320_v53  ;;  %v5968_v10 = vcvt.s32.f32 %v4944_v18  ;;  %v4512_v36 = vld [vmem:[#allocation7 + $0x6a0] sm:$0xff] }
 0x44e   :  { %v5976_v60 = vcvt.s32.f32 %v4952_v46  ;;  %v5568_v35 = vunpack.c.2.s8 %v4552_v47  ;;  %7585 = vmatpush.bf16.msrb.mxu0 %v6912_v13  ;;  %v6736_v6 = vpack.c.bf16 %v5848_v23, %v5840_v30  ;;  %v5576_v21 = vunpack.c.3.s8 %v4552_v47  ;;  %v4544_v13 = vld [vmem:[#allocation7 + $0x7a0] sm:$0xff] }
 0x44f   :  { %v6464_v58 = vcvt.s32.f32 %v5440_v49  ;;  %v6472_v62 = vcvt.s32.f32 %v5448_v29  ;;  %v5152_v44 = vunpack.c.2.s8 %v4448_v63  ;;  %v5160_v26 = vunpack.c.3.s8 %v4448_v63 }
 0x450   :  { %7598 = vmatpush.bf16.msrb.mxu1 %v6976_v37  ;;  %v6800_v52 = vpack.c.bf16 %v5976_v60, %v5968_v10  ;;  %v6592_v20 = vcvt.s32.f32 %v5568_v35  ;;  %7565 = vmatpush.bf16.msra.mxu2 %v6736_v6  ;;  %v6600_v43 = vcvt.s32.f32 %v5576_v21  ;;  %v5280_v48 = vunpack.c.2.s8 %v4480_v22  ;;  %v4440_v6 = vld [vmem:[#allocation7 + $0x460] sm:$0xff] }
 0x451   :  { %v7048_v24 = vpack.c.bf16 %v6472_v62, %v6464_v58  ;;  %v5288_v12 = vunpack.c.3.s8 %v4480_v22  ;;  %v6176_v16 = vcvt.s32.f32 %v5152_v44  ;;  %v6184_v8 = vcvt.s32.f32 %v5160_v26 }
 0x452   :  { %7578 = vmatpush.bf16.msra.mxu3 %v6800_v52  ;;  %v5424_v57 = vunpack.c.0.s8 %v4520_v61  ;;  %v5432_v5 = vunpack.c.1.s8 %v4520_v61  ;;  %v7112_v51 = vpack.c.bf16 %v6600_v43, %v6592_v20  ;;  %v6304_v19 = vcvt.s32.f32 %v5280_v48  ;;  %v4472_v52 = vld [vmem:[#allocation7 + $0x560] sm:$0xff] }
 0x453   :  { %v6312_v25 = vcvt.s32.f32 %v5288_v12  ;;  %v5552_v54 = vunpack.c.0.s8 %v4552_v47  ;;  %7566 = vmatmul.bf16.vlgmr.msra.gmra.mxu2 %v10485_v41  ;;  %v6904_v7 = vpack.c.bf16 %v6184_v8, %v6176_v16  ;;  %v5560_v31 = vunpack.c.1.s8 %v4552_v47 }
 0x454   :  { %7610 = vmatpush.bf16.msrb.mxu2 %v7048_v24  ;;  %v6448_v3 = vcvt.s32.f32 %v5424_v57  ;;  %v6456_v53 = vcvt.s32.f32 %v5432_v5  ;;  %v5136_v46 = vunpack.c.0.s8 %v4448_v63  ;;  %v5144_v49 = vunpack.c.1.s8 %v4448_v63 }
 0x455   :  { %v6968_v30 = vpack.c.bf16 %v6312_v25, %v6304_v19  ;;  %v6576_v18 = vcvt.s32.f32 %v5552_v54  ;;  %7579 = vmatmul.bf16.vlgmr.msra.gmra.mxu3 %v10487_v39  ;;  %7586 = vmatpush.bf16.msrb.mxu0 %v6904_v7  ;;  %v6584_v23 = vcvt.s32.f32 %v5560_v31  ;;  %v5264_v29 = vunpack.c.0.s8 %v4480_v22 }
 0x456   :  { %7623 = vmatpush.bf16.msrb.mxu3 %v7112_v51  ;;  %v7040_v61 = vpack.c.bf16 %v6456_v53, %v6448_v3  ;;  %v6160_v37 = vcvt.s32.f32 %v5136_v46  ;;  %v5272_v10 = vunpack.c.1.s8 %v4480_v22  ;;  %v5408_v60 = vunpack.c.2.s8 %v4512_v36 }
 0x457   :  { %7599 = vmatpush.bf16.msrb.mxu1 %v6968_v30  ;;  %v5416_v35 = vunpack.c.3.s8 %v4512_v36  ;;  %v7104_v47 = vpack.c.bf16 %v6584_v23, %v6576_v18  ;;  %v6168_v58 = vcvt.s32.f32 %v5144_v49  ;;  %v6288_v62 = vcvt.s32.f32 %v5264_v29  ;;  %v4504_v18 = vld [vmem:[#allocation7 + $0x660] sm:$0xff] }
 0x458   :  { %7611 = vmatpush.bf16.msrb.mxu2 %v7040_v61  ;;  %v5536_v21 = vunpack.c.2.s8 %v4544_v13  ;;  %v6296_v20 = vcvt.s32.f32 %v5272_v10  ;;  %v6432_v44 = vcvt.s32.f32 %v5408_v60  ;;  %v5544_v24 = vunpack.c.3.s8 %v4544_v13 }
 0x459   :  { %v6440_v26 = vcvt.s32.f32 %v5416_v35  ;;  %v6896_v43 = vpack.c.bf16 %v6168_v58, %v6160_v37  ;;  %v5120_v48 = vunpack.c.2.s8 %v4440_v6  ;;  %v5128_v12 = vunpack.c.3.s8 %v4440_v6  ;;  %v4536_v35 = vld [vmem:[#allocation7 + $0x760] sm:$0xff] }
 0x45a   :  { %7624 = vmatpush.bf16.msrb.mxu3 %v7104_v47  ;;  %v6560_v63 = vcvt.s32.f32 %v5536_v21  ;;  %v6960_v14 = vpack.c.bf16 %v6296_v20, %v6288_v62  ;;  %v6568_v56 = vcvt.s32.f32 %v5544_v24  ;;  %v5248_v16 = vunpack.c.2.s8 %v4472_v52  ;;  %v4432_v21 = vld [vmem:[#allocation7 + $0x420] sm:$0xff] }
 0x45b   :  { %v7032_v22 = vpack.c.bf16 %v6440_v26, %v6432_v44  ;;  %7587 = vmatpush.bf16.msrb.mxu0 %v6896_v43  ;;  %v6144_v8 = vcvt.s32.f32 %v5120_v48  ;;  %v6152_v57 = vcvt.s32.f32 %v5128_v12  ;;  %v5256_v5 = vunpack.c.3.s8 %v4472_v52  ;;  %v4464_v24 = vld [vmem:[#allocation7 + $0x520] sm:$0xff]  ;;  %v11134_v43 = vpop.f32.mrf.mxu0 }
 0x45c   :  { %v5392_v51 = vunpack.c.0.s8 %v4512_v36  ;;  %7600 = vmatpush.bf16.msrb.mxu1 %v6960_v14  ;;  %v7096_v19 = vpack.c.bf16 %v6568_v56, %v6560_v63  ;;  %v6272_v25 = vcvt.s32.f32 %v5248_v16  ;;  %v5400_v54 = vunpack.c.1.s8 %v4512_v36 }
 0x45d   :  { %7612 = vmatpush.bf16.msrb.mxu2 %v7032_v22  ;;  %v5520_v7 = vunpack.c.0.s8 %v4544_v13  ;;  %v6888_v3 = vpack.c.bf16 %v6152_v57, %v6144_v8  ;;  %v6280_v53 = vcvt.s32.f32 %v5256_v5  ;;  %v5528_v30 = vunpack.c.1.s8 %v4544_v13 }
 0x45e   :  { %v6416_v31 = vcvt.s32.f32 %v5392_v51  ;;  %7625 = vmatpush.bf16.msrb.mxu3 %v7096_v19  ;;  %v6424_v46 = vcvt.s32.f32 %v5400_v54  ;;  %v5104_v23 = vunpack.c.0.s8 %v4440_v6  ;;  %v5112_v49 = vunpack.c.1.s8 %v4440_v6  ;;  %v11136_v6 = vpop.f32.mrf.mxu1 }
 0x45f   :  { %v6544_v61 = vcvt.s32.f32 %v5520_v7  ;;  %7588 = vmatpush.bf16.msrb.mxu0 %v6888_v3  ;;  %v6952_v29 = vpack.c.bf16 %v6280_v53, %v6272_v25  ;;  %v6552_v37 = vcvt.s32.f32 %v5528_v30  ;;  %v5232_v10 = vunpack.c.0.s8 %v4472_v52 }
 0x460   :  { %v5240_v60 = vunpack.c.1.s8 %v4472_v52  ;;  %v7024_v47 = vpack.c.bf16 %v6424_v46, %v6416_v31  ;;  %v6128_v58 = vcvt.s32.f32 %v5104_v23  ;;  %v6136_v36 = vcvt.s32.f32 %v5112_v49 }
 0x461   :  { %v5376_v62 = vunpack.c.2.s8 %v4504_v18  ;;  %7601 = vmatpush.bf16.msrb.mxu1 %v6952_v29  ;;  %v7088_v20 = vpack.c.bf16 %v6552_v37, %v6544_v61  ;;  %v6256_v13 = vcvt.s32.f32 %v5232_v10  ;;  %v5384_v26 = vunpack.c.3.s8 %v4504_v18  ;;  %v4329_v10 = vld [vmem:[#allocation7 + $0xe8] sm:$0xff] }
 0x462   :  { %v6264_v44 = vcvt.s32.f32 %v5240_v60  ;;  %7613 = vmatpush.bf16.msrb.mxu2 %v7024_v47  ;;  %v6880_v63 = vpack.c.bf16 %v6136_v36, %v6128_v58  ;;  %v5504_v52 = vunpack.c.2.s8 %v4536_v35  ;;  %v5512_v12 = vunpack.c.3.s8 %v4536_v35 }
 0x463   :  { %v6400_v48 = vcvt.s32.f32 %v5376_v62  ;;  %7626 = vmatpush.bf16.msrb.mxu3 %v7088_v20  ;;  %v6408_v22 = vcvt.s32.f32 %v5384_v26  ;;  %v5088_v56 = vunpack.c.2.s8 %v4432_v21  ;;  %v5096_v57 = vunpack.c.3.s8 %v4432_v21  ;;  %v4361_v62 = vld [vmem:[#allocation7 + $0x1e8] sm:$0xff]  ;;  %v7387_v20 = vpop.f32.mrf.mxu0 }
 0x464   :  { %v6944_v14 = vpack.c.bf16 %v6264_v44, %v6256_v13  ;;  %7589 = vmatpush.bf16.msrb.mxu0 %v6880_v63  ;;  %v6528_v16 = vcvt.s32.f32 %v5504_v52  ;;  %v6536_v8 = vcvt.s32.f32 %v5512_v12  ;;  %v5216_v5 = vunpack.c.2.s8 %v4464_v24 }
 0x465   :  { %v7016_v51 = vpack.c.bf16 %v6408_v22, %v6400_v48  ;;  %v6112_v19 = vcvt.s32.f32 %v5088_v56  ;;  %v5224_v25 = vunpack.c.3.s8 %v4464_v24  ;;  %v6120_v7 = vcvt.s32.f32 %v5096_v57  ;;  %v4496_v48 = vld [vmem:[#allocation7 + $0x620] sm:$0xff] }
 0x466   :  { %7602 = vmatpush.bf16.msrb.mxu1 %v6944_v14  ;;  %v7080_v54 = vpack.c.bf16 %v6536_v8, %v6528_v16  ;;  %v6240_v3 = vcvt.s32.f32 %v5216_v5  ;;  %v5360_v53 = vunpack.c.0.s8 %v4504_v18  ;;  %v5368_v30 = vunpack.c.1.s8 %v4504_v18  ;;  %v7400_v13 = vpop.f32.mrf.mxu1 }
 0x467   :  { %7614 = vmatpush.bf16.msrb.mxu2 %v7016_v51  ;;  %v6248_v31 = vcvt.s32.f32 %v5224_v25  ;;  %v5488_v46 = vunpack.c.0.s8 %v4536_v35  ;;  %v5496_v61 = vunpack.c.1.s8 %v4536_v35  ;;  %v6872_v23 = vpack.c.bf16 %v6120_v7, %v6112_v19 }
 0x468   :  { %7627 = vmatpush.bf16.msrb.mxu3 %v7080_v54  ;;  %v6384_v49 = vcvt.s32.f32 %v5360_v53  ;;  %v5072_v29 = vunpack.c.0.s8 %v4432_v21  ;;  %v5080_v37 = vunpack.c.1.s8 %v4432_v21  ;;  %v6392_v47 = vcvt.s32.f32 %v5368_v30  ;;  %v4528_v21 = vld [vmem:[#allocation7 + $0x720] sm:$0xff] }
 0x469   :  { %v6936_v60 = vpack.c.bf16 %v6248_v31, %v6240_v3  ;;  %v6512_v58 = vcvt.s32.f32 %v5488_v46  ;;  %v6520_v36 = vcvt.s32.f32 %v5496_v61  ;;  %7590 = vmatpush.bf16.msrb.mxu0 %v6872_v23  ;;  %v5200_v63 = vunpack.c.0.s8 %v4464_v24 }
 0x46a   :  { %v6096_v44 = vcvt.s32.f32 %v5072_v29  ;;  %v6104_v26 = vcvt.s32.f32 %v5080_v37  ;;  %v5208_v18 = vunpack.c.1.s8 %v4464_v24  ;;  %v7008_v35 = vpack.c.bf16 %v6392_v47, %v6384_v49 }
 0x46b   :  { %7603 = vmatpush.bf16.msrb.mxu1 %v6936_v60  ;;  %v7072_v52 = vpack.c.bf16 %v6520_v36, %v6512_v58  ;;  %v4673_v12 = vunpack.c.2.s8 %v4329_v10  ;;  %v4681_v14 = vunpack.c.3.s8 %v4329_v10  ;;  %v6224_v56 = vcvt.s32.f32 %v5200_v63  ;;  %v11138_v58 = vpop.f32.mrf.mxu2  ;;  %v11140_v36 = vpop.f32.mrf.mxu3  ;;  %v4393_v63 = vld [vmem:[#allocation7 + $0x2e8] sm:$0xff] }
 0x46c   :  { %v6864_v22 = vpack.c.bf16 %v6104_v26, %v6096_v44  ;;  %v6232_v16 = vcvt.s32.f32 %v5208_v18  ;;  %v4801_v8 = vunpack.c.2.s8 %v4361_v62  ;;  %7615 = vmatpush.bf16.msrb.mxu2 %v7008_v35  ;;  %v4809_v51 = vunpack.c.3.s8 %v4361_v62 }
 0x46d   :  { %7628 = vmatpush.bf16.msrb.mxu3 %v7072_v52  ;;  %v5697_v57 = vcvt.s32.f32 %v4673_v12  ;;  %v5705_v5 = vcvt.s32.f32 %v4681_v14  ;;  %v5344_v19 = vunpack.c.2.s8 %v4496_v48  ;;  %v5352_v54 = vunpack.c.3.s8 %v4496_v48  ;;  %v4425_v12 = vld [vmem:[#allocation7 + $0x3e8] sm:$0xff] }
 0x46e   :  { %7591 = vmatpush.bf16.msrb.mxu0 %v6864_v22  ;;  %v6928_v25 = vpack.c.bf16 %v6232_v16, %v6224_v56  ;;  %v5825_v24 = vcvt.s32.f32 %v4801_v8  ;;  %v5472_v7 = vunpack.c.2.s8 %v4528_v21  ;;  %v5833_v53 = vcvt.s32.f32 %v4809_v51  ;;  %v4321_v16 = vld [vmem:[#allocation7 + $0xa8] sm:$0xff] }
 0x46f   :  { %v6665_v3 = vpack.c.bf16 %v5705_v5, %v5697_v57  ;;  %v6368_v31 = vcvt.s32.f32 %v5344_v19  ;;  %v5480_v30 = vunpack.c.3.s8 %v4528_v21  ;;  %v6376_v46 = vcvt.s32.f32 %v5352_v54 }
 0x470   :  { %7604 = vmatpush.bf16.msrb.mxu1 %v6928_v25  ;;  %v6496_v61 = vcvt.s32.f32 %v5472_v7  ;;  %v4657_v23 = vunpack.c.0.s8 %v4329_v10  ;;  %v4665_v49 = vunpack.c.1.s8 %v4329_v10  ;;  %v6729_v29 = vpack.c.bf16 %v5833_v53, %v5825_v24 }
 0x471   :  { %v6504_v37 = vcvt.s32.f32 %v5480_v30  ;;  %v4785_v60 = vunpack.c.0.s8 %v4361_v62  ;;  %v4793_v47 = vunpack.c.1.s8 %v4361_v62  ;;  %v7000_v20 = vpack.c.bf16 %v6376_v46, %v6368_v31  ;;  %7592 = vmatmul.bf16.vlgmr.msrb.gmra.mxu0 %v10656_v17 }
 0x472   :  { %7636 = vmatpush.bf16.msra.mxu0 %v6665_v3  ;;  %v5681_v13 = vcvt.s32.f32 %v4657_v23  ;;  %v5689_v44 = vcvt.s32.f32 %v4665_v49  ;;  %v5328_v26 = vunpack.c.0.s8 %v4496_v48  ;;  %v5336_v52 = vunpack.c.1.s8 %v4496_v48  ;;  %v4353_v48 = vld [vmem:[#allocation7 + $0x1a8] sm:$0xff] }
 0x473   :  { %v7064_v18 = vpack.c.bf16 %v6504_v37, %v6496_v61  ;;  %v5809_v35 = vcvt.s32.f32 %v4785_v60  ;;  %v5817_v10 = vcvt.s32.f32 %v4793_v47  ;;  %7616 = vmatpush.bf16.msrb.mxu2 %v7000_v20  ;;  %7605 = vmatmul.bf16.vlgmr.msrb.gmra.mxu1 %v10805_v33  ;;  %v5456_v22 = vunpack.c.0.s8 %v4528_v21  ;;  %v7413_v60 = vpop.f32.mrf.mxu2  ;;  %v7426_v47 = vpop.f32.mrf.mxu3 }
 0x474   :  { %7649 = vmatpush.bf16.msra.mxu1 %v6729_v29  ;;  %v6657_v62 = vpack.c.bf16 %v5689_v44, %v5681_v13  ;;  %v6352_v14 = vcvt.s32.f32 %v5328_v26  ;;  %v5464_v56 = vunpack.c.1.s8 %v4528_v21  ;;  %v6360_v57 = vcvt.s32.f32 %v5336_v52 }
 0x475   :  { %7629 = vmatpush.bf16.msrb.mxu3 %v7064_v18  ;;  %v6721_v8 = vpack.c.bf16 %v5817_v10, %v5809_v35  ;;  %v4929_v5 = vunpack.c.2.s8 %v4393_v63  ;;  %v4937_v51 = vunpack.c.3.s8 %v4393_v63  ;;  %v6480_v19 = vcvt.s32.f32 %v5456_v22 }
 0x476   :  { %7637 = vmatpush.bf16.msra.mxu0 %v6657_v62  ;;  %v6488_v25 = vcvt.s32.f32 %v5464_v56  ;;  %v5057_v24 = vunpack.c.2.s8 %v4425_v12  ;;  %v5065_v54 = vunpack.c.3.s8 %v4425_v12  ;;  %v6992_v7 = vpack.c.bf16 %v6360_v57, %v6352_v14  ;;  %v4385_v56 = vld [vmem:[#allocation7 + $0x2a8] sm:$0xff] }
 0x477   :  { %v5953_v3 = vcvt.s32.f32 %v4929_v5  ;;  %v5961_v53 = vcvt.s32.f32 %v4937_v51  ;;  %v4641_v31 = vunpack.c.2.s8 %v4321_v16  ;;  %v4649_v61 = vunpack.c.3.s8 %v4321_v16 }
 0x478   :  { %7650 = vmatpush.bf16.msra.mxu1 %v6721_v8  ;;  %v7056_v30 = vpack.c.bf16 %v6488_v25, %v6480_v19  ;;  %v6081_v46 = vcvt.s32.f32 %v5057_v24  ;;  %v6089_v21 = vcvt.s32.f32 %v5065_v54  ;;  %7617 = vmatpush.bf16.msrb.mxu2 %v6992_v7  ;;  %v4769_v29 = vunpack.c.2.s8 %v4353_v48  ;;  %v4417_v19 = vld [vmem:[#allocation7 + $0x3a8] sm:$0xff] }
 0x479   :  { %v6793_v23 = vpack.c.bf16 %v5961_v53, %v5953_v3  ;;  %v5665_v49 = vcvt.s32.f32 %v4641_v31  ;;  %v4777_v37 = vunpack.c.3.s8 %v4353_v48  ;;  %v5673_v13 = vcvt.s32.f32 %v4649_v61  ;;  %v4313_v54 = vld [vmem:[#allocation7 + $0x68] sm:$0xff] }
 0x47a   :  { %7630 = vmatpush.bf16.msrb.mxu3 %v7056_v30  ;;  %v6857_v20 = vpack.c.bf16 %v6089_v21, %v6081_v46  ;;  %v4913_v44 = vunpack.c.0.s8 %v4393_v63  ;;  %v4921_v26 = vunpack.c.1.s8 %v4393_v63  ;;  %v5793_v18 = vcvt.s32.f32 %v4769_v29  ;;  %v4345_v61 = vld [vmem:[#allocation7 + $0x168] sm:$0xff] }
 0x47b   :  { %v5801_v35 = vcvt.s32.f32 %v4777_v37  ;;  %v5041_v10 = vunpack.c.0.s8 %v4425_v12  ;;  %v5049_v52 = vunpack.c.1.s8 %v4425_v12  ;;  %7618 = vmatmul.bf16.vlgmr.msrb.gmra.mxu2 %v10924_v4  ;;  %v6649_v62 = vpack.c.bf16 %v5673_v13, %v5665_v49 }
 0x47c   :  { %7662 = vmatpush.bf16.msra.mxu2 %v6793_v23  ;;  %v5937_v14 = vcvt.s32.f32 %v4913_v44  ;;  %v5945_v22 = vcvt.s32.f32 %v4921_v26  ;;  %v4625_v51 = vunpack.c.0.s8 %v4321_v16  ;;  %v4633_v25 = vunpack.c.1.s8 %v4321_v16 }
 0x47d   :  { %7631 = vmatmul.bf16.vlgmr.msrb.gmra.mxu3 %v10926_v0  ;;  %v6713_v8 = vpack.c.bf16 %v5801_v35, %v5793_v18  ;;  %v6065_v57 = vcvt.s32.f32 %v5041_v10  ;;  %v6073_v5 = vcvt.s32.f32 %v5049_v52  ;;  %7638 = vmatpush.bf16.msra.mxu0 %v6649_v62  ;;  %v4753_v24 = vunpack.c.0.s8 %v4353_v48 }
 0x47e   :  { %7675 = vmatpush.bf16.msra.mxu3 %v6857_v20  ;;  %v6785_v63 = vpack.c.bf16 %v5945_v22, %v5937_v14  ;;  %v5649_v7 = vcvt.s32.f32 %v4625_v51  ;;  %v4761_v3 = vunpack.c.1.s8 %v4353_v48  ;;  %v4897_v53 = vunpack.c.2.s8 %v4385_v56 }
 0x47f   :  { %7651 = vmatpush.bf16.msra.mxu1 %v6713_v8  ;;  %v6849_v12 = vpack.c.bf16 %v6073_v5, %v6065_v57  ;;  %v5657_v31 = vcvt.s32.f32 %v4633_v25  ;;  %v5777_v30 = vcvt.s32.f32 %v4753_v24  ;;  %v4905_v46 = vunpack.c.3.s8 %v4385_v56  ;;  %v4377_v25 = vld [vmem:[#allocation7 + $0x268] sm:$0xff] }
 0x480   :  { %7663 = vmatpush.bf16.msra.mxu2 %v6785_v63  ;;  %v5025_v21 = vunpack.c.2.s8 %v4417_v19  ;;  %v5785_v23 = vcvt.s32.f32 %v4761_v3  ;;  %v5921_v49 = vcvt.s32.f32 %v4897_v53  ;;  %v5033_v29 = vunpack.c.3.s8 %v4417_v19 }
 0x481   :  { %v4609_v37 = vunpack.c.2.s8 %v4313_v54  ;;  %v6641_v60 = vpack.c.bf16 %v5657_v31, %v5649_v7  ;;  %v5929_v16 = vcvt.s32.f32 %v4905_v46  ;;  %v4617_v20 = vunpack.c.3.s8 %v4313_v54 }
 0x482   :  { %7676 = vmatpush.bf16.msra.mxu3 %v6849_v12  ;;  %v6049_v47 = vcvt.s32.f32 %v5025_v21  ;;  %v6705_v13 = vpack.c.bf16 %v5785_v23, %v5777_v30  ;;  %v6057_v44 = vcvt.s32.f32 %v5033_v29  ;;  %v4737_v48 = vunpack.c.2.s8 %v4345_v61  ;;  %v4409_v21 = vld [vmem:[#allocation7 + $0x368] sm:$0xff] }
 0x483   :  { %v5633_v26 = vcvt.s32.f32 %v4609_v37  ;;  %7639 = vmatpush.bf16.msra.mxu0 %v6641_v60  ;;  %v6777_v18 = vpack.c.bf16 %v5929_v16, %v5921_v49  ;;  %v5641_v35 = vcvt.s32.f32 %v4617_v20  ;;  %v4745_v10 = vunpack.c.3.s8 %v4345_v61 }
 0x484   :  { %v4881_v52 = vunpack.c.0.s8 %v4385_v56  ;;  %7652 = vmatpush.bf16.msra.mxu1 %v6705_v13  ;;  %v6841_v62 = vpack.c.bf16 %v6057_v44, %v6049_v47  ;;  %v5761_v14 = vcvt.s32.f32 %v4737_v48  ;;  %v4889_v22 = vunpack.c.1.s8 %v4385_v56  ;;  %v4305_v47 = vld [vmem:[#allocation7 + $0x28] sm:$0xff] }
 0x485   :  { %v5009_v8 = vunpack.c.0.s8 %v4417_v19  ;;  %7664 = vmatpush.bf16.msra.mxu2 %v6777_v18  ;;  %v6633_v57 = vpack.c.bf16 %v5641_v35, %v5633_v26  ;;  %v5769_v5 = vcvt.s32.f32 %v4745_v10  ;;  %v5017_v63 = vunpack.c.1.s8 %v4417_v19  ;;  %v4337_v26 = vld [vmem:[#allocation7 + $0x128] sm:$0xff]  ;;  %v11146_v18 = vpop.f32.mrf.mxu0  ;;  %v11148_v35 = vpop.f32.mrf.mxu1 }
 0x486   :  { %v5905_v51 = vcvt.s32.f32 %v4881_v52  ;;  %7677 = vmatpush.bf16.msra.mxu3 %v6841_v62  ;;  %v5913_v24 = vcvt.s32.f32 %v4889_v22  ;;  %v4593_v7 = vunpack.c.0.s8 %v4313_v54  ;;  %v4601_v3 = vunpack.c.1.s8 %v4313_v54 }
 0x487   :  { %v6033_v12 = vcvt.s32.f32 %v5009_v8  ;;  %7640 = vmatpush.bf16.msra.mxu0 %v6633_v57  ;;  %v6697_v53 = vpack.c.bf16 %v5769_v5, %v5761_v14  ;;  %v6041_v31 = vcvt.s32.f32 %v5017_v63  ;;  %v4721_v30 = vunpack.c.0.s8 %v4345_v61 }
 0x488   :  { %v4729_v46 = vunpack.c.1.s8 %v4345_v61  ;;  %v6769_v23 = vpack.c.bf16 %v5913_v24, %v5905_v51  ;;  %v5617_v56 = vcvt.s32.f32 %v4593_v7  ;;  %v5625_v49 = vcvt.s32.f32 %v4601_v3 }
 0x489   :  { %v4865_v29 = vunpack.c.2.s8 %v4377_v25  ;;  %7653 = vmatpush.bf16.msra.mxu1 %v6697_v53  ;;  %v6833_v37 = vpack.c.bf16 %v6041_v31, %v6033_v12  ;;  %v5745_v60 = vcvt.s32.f32 %v4721_v30  ;;  %v4873_v16 = vunpack.c.3.s8 %v4377_v25 }
 0x48a   :  { %v5753_v19 = vcvt.s32.f32 %v4729_v46  ;;  %7665 = vmatpush.bf16.msra.mxu2 %v6769_v23  ;;  %v6625_v20 = vpack.c.bf16 %v5625_v49, %v5617_v56  ;;  %v4993_v54 = vunpack.c.2.s8 %v4409_v21  ;;  %v5001_v44 = vunpack.c.3.s8 %v4409_v21  ;;  %v4457_v49 = vld [vmem:[#allocation7 + $0x4e8] sm:$0xff] }
 0x48b   :  { %v5889_v13 = vcvt.s32.f32 %v4865_v29  ;;  %7678 = vmatpush.bf16.msra.mxu3 %v6833_v37  ;;  %v5897_v61 = vcvt.s32.f32 %v4873_v16  ;;  %v4577_v62 = vunpack.c.2.s8 %v4305_v47  ;;  %v4585_v22 = vunpack.c.3.s8 %v4305_v47  ;;  %v4489_v16 = vld [vmem:[#allocation7 + $0x5e8] sm:$0xff] }
 0x48c   :  { %v6689_v48 = vpack.c.bf16 %v5753_v19, %v5745_v60  ;;  %7641 = vmatpush.bf16.msra.mxu0 %v6625_v20  ;;  %v6017_v10 = vcvt.s32.f32 %v4993_v54  ;;  %v6025_v52 = vcvt.s32.f32 %v5001_v44  ;;  %v4705_v8 = vunpack.c.2.s8 %v4337_v26  ;;  %v4369_v44 = vld [vmem:[#allocation7 + $0x228] sm:$0xff] }
 0x48d   :  { %v6761_v14 = vpack.c.bf16 %v5897_v61, %v5889_v13  ;;  %v5601_v5 = vcvt.s32.f32 %v4577_v62  ;;  %v4713_v51 = vunpack.c.3.s8 %v4337_v26  ;;  %v4849_v63 = vunpack.c.0.s8 %v4377_v25 }
 0x48e   :  { %7654 = vmatpush.bf16.msra.mxu1 %v6689_v48  ;;  %v6825_v57 = vpack.c.bf16 %v6025_v52, %v6017_v10  ;;  %v5609_v24 = vcvt.s32.f32 %v4585_v22  ;;  %v5729_v12 = vcvt.s32.f32 %v4705_v8  ;;  %v4857_v7 = vunpack.c.1.s8 %v4377_v25  ;;  %v7439_v25 = vpop.f32.mrf.mxu0  ;;  %v7452_v48 = vpop.f32.mrf.mxu1 }
 0x48f   :  { %7666 = vmatpush.bf16.msra.mxu2 %v6761_v14  ;;  %v5737_v3 = vcvt.s32.f32 %v4713_v51  ;;  %v5873_v53 = vcvt.s32.f32 %v4849_v63  ;;  %v4977_v31 = vunpack.c.0.s8 %v4409_v21  ;;  %v4985_v30 = vunpack.c.1.s8 %v4409_v21 }
 0x490   :  { %7679 = vmatpush.bf16.msra.mxu3 %v6825_v57  ;;  %v6617_v46 = vpack.c.bf16 %v5609_v24, %v5601_v5  ;;  %v5881_v23 = vcvt.s32.f32 %v4857_v7  ;;  %v4561_v56 = vunpack.c.0.s8 %v4305_v47  ;;  %v4569_v19 = vunpack.c.1.s8 %v4305_v47  ;;  %v4401_v57 = vld [vmem:[#allocation7 + $0x328] sm:$0xff] }
 0x491   :  { %v6681_v29 = vpack.c.bf16 %v5737_v3, %v5729_v12  ;;  %v6001_v37 = vcvt.s32.f32 %v4977_v31  ;;  %v6009_v60 = vcvt.s32.f32 %v4985_v30  ;;  %v4689_v54 = vunpack.c.0.s8 %v4337_v26 }
 0x492   :  { %7642 = vmatpush.bf16.msra.mxu0 %v6617_v46  ;;  %v6753_v20 = vpack.c.bf16 %v5881_v23, %v5873_v53  ;;  %v5585_v13 = vcvt.s32.f32 %v4561_v56  ;;  %v5593_v10 = vcvt.s32.f32 %v4569_v19  ;;  %v4697_v21 = vunpack.c.1.s8 %v4337_v26 }
 0x493   :  { %7655 = vmatpush.bf16.msra.mxu1 %v6681_v29  ;;  %v6817_v61 = vpack.c.bf16 %v6009_v60, %v6001_v37  ;;  %v5185_v52 = vunpack.c.2.s8 %v4457_v49  ;;  %v5713_v62 = vcvt.s32.f32 %v4689_v54  ;;  %v5193_v14 = vunpack.c.3.s8 %v4457_v49  ;;  %v11152_v54 = vpop.f32.mrf.mxu3 }
 0x494   :  { %7667 = vmatpush.bf16.msra.mxu2 %v6753_v20  ;;  %v5313_v22 = vunpack.c.2.s8 %v4489_v16  ;;  %v5321_v8 = vunpack.c.3.s8 %v4489_v16  ;;  %v6609_v47 = vpack.c.bf16 %v5593_v10, %v5585_v13  ;;  %v5721_v5 = vcvt.s32.f32 %v4697_v21  ;;  %v11150_v13 = vpop.f32.mrf.mxu2  ;;  %v4521_v21 = vld [vmem:[#allocation7 + $0x6e8] sm:$0xff] }
 0x495   :  { %7680 = vmatpush.bf16.msra.mxu3 %v6817_v61  ;;  %v6209_v51 = vcvt.s32.f32 %v5185_v52  ;;  %v4833_v63 = vunpack.c.2.s8 %v4369_v44  ;;  %v6217_v24 = vcvt.s32.f32 %v5193_v14  ;;  %v4841_v3 = vunpack.c.3.s8 %v4369_v44 }
 0x496   :  { %v6337_v12 = vcvt.s32.f32 %v5313_v22  ;;  %v6345_v7 = vcvt.s32.f32 %v5321_v8  ;;  %7643 = vmatpush.bf16.msra.mxu0 %v6609_v47  ;;  %v6673_v53 = vpack.c.bf16 %v5721_v5, %v5713_v62  ;;  %v4961_v26 = vunpack.c.2.s8 %v4401_v57  ;;  %v4553_v8 = vld [vmem:[#allocation7 + $0x7e8] sm:$0xff] }
 0x497   :  { %v5857_v31 = vcvt.s32.f32 %v4833_v63  ;;  %v4969_v30 = vunpack.c.3.s8 %v4401_v57  ;;  %v6921_v46 = vpack.c.bf16 %v6217_v24, %v6209_v51  ;;  %v5865_v56 = vcvt.s32.f32 %v4841_v3 }
 0x498   :  { %v6985_v23 = vpack.c.bf16 %v6345_v7, %v6337_v12  ;;  %v5169_v29 = vunpack.c.0.s8 %v4457_v49  ;;  %7656 = vmatpush.bf16.msra.mxu1 %v6673_v53  ;;  %v5985_v37 = vcvt.s32.f32 %v4961_v26  ;;  %v5177_v19 = vunpack.c.1.s8 %v4457_v49  ;;  %v4449_v7 = vld [vmem:[#allocation7 + $0x4a8] sm:$0xff] }
 0x499   :  { %v5993_v60 = vcvt.s32.f32 %v4969_v30  ;;  %v5297_v20 = vunpack.c.0.s8 %v4489_v16  ;;  %v6745_v25 = vpack.c.bf16 %v5865_v56, %v5857_v31  ;;  %v5305_v61 = vunpack.c.1.s8 %v4489_v16  ;;  %7644 = vmatmul.bf16.vlgmr.msra.gmra.mxu0 %v10196_v27  ;;  %v4481_v30 = vld [vmem:[#allocation7 + $0x5a8] sm:$0xff] }
 0x49a   :  { %7688 = vmatpush.bf16.msrb.mxu0 %v6921_v46  ;;  %v6193_v48 = vcvt.s32.f32 %v5169_v29  ;;  %v4817_v10 = vunpack.c.0.s8 %v4369_v44  ;;  %v6201_v62 = vcvt.s32.f32 %v5177_v19  ;;  %v4825_v22 = vunpack.c.1.s8 %v4369_v44 }
 0x49b   :  { %v6809_v52 = vpack.c.bf16 %v5993_v60, %v5985_v37  ;;  %v6321_v14 = vcvt.s32.f32 %v5297_v20  ;;  %7668 = vmatpush.bf16.msra.mxu2 %v6745_v25  ;;  %7657 = vmatmul.bf16.vlgmr.msra.gmra.mxu1 %v10318_v1  ;;  %v6329_v49 = vcvt.s32.f32 %v5305_v61  ;;  %v4945_v5 = vunpack.c.0.s8 %v4401_v57 }
 0x49c   :  { %7701 = vmatpush.bf16.msrb.mxu1 %v6985_v23  ;;  %v5841_v47 = vcvt.s32.f32 %v4817_v10  ;;  %v4953_v51 = vunpack.c.1.s8 %v4401_v57  ;;  %v6913_v63 = vpack.c.bf16 %v6201_v62, %v6193_v48  ;;  %v5849_v24 = vcvt.s32.f32 %v4825_v22  ;;  %v7465_v61 = vpop.f32.mrf.mxu2  ;;  %v7478_v10 = vpop.f32.mrf.mxu3 }
 0x49d   :  { %7681 = vmatpush.bf16.msra.mxu3 %v6809_v52  ;;  %v5441_v16 = vunpack.c.2.s8 %v4521_v21  ;;  %v5449_v12 = vunpack.c.3.s8 %v4521_v21  ;;  %v6977_v3 = vpack.c.bf16 %v6329_v49, %v6321_v14  ;;  %v5969_v53 = vcvt.s32.f32 %v4945_v5 }
 0x49e   :  { %v5977_v31 = vcvt.s32.f32 %v4953_v51  ;;  %v5569_v26 = vunpack.c.2.s8 %v4553_v8  ;;  %7689 = vmatpush.bf16.msrb.mxu0 %v6913_v63  ;;  %v6737_v44 = vpack.c.bf16 %v5849_v24, %v5841_v47  ;;  %v5577_v56 = vunpack.c.3.s8 %v4553_v8 }
 0x49f   :  { %v6465_v46 = vcvt.s32.f32 %v5441_v16  ;;  %v6473_v23 = vcvt.s32.f32 %v5449_v12  ;;  %v5153_v57 = vunpack.c.2.s8 %v4449_v7  ;;  %v5161_v60 = vunpack.c.3.s8 %v4449_v7 }
 0x4a0   :  { %7702 = vmatpush.bf16.msrb.mxu1 %v6977_v3  ;;  %v6801_v29 = vpack.c.bf16 %v5977_v31, %v5969_v53  ;;  %v6593_v37 = vcvt.s32.f32 %v5569_v26  ;;  %7669 = vmatpush.bf16.msra.mxu2 %v6737_v44  ;;  %v6601_v20 = vcvt.s32.f32 %v5577_v56  ;;  %v5281_v25 = vunpack.c.2.s8 %v4481_v30  ;;  %v4513_v3 = vld [vmem:[#allocation7 + $0x6a8] sm:$0xff] }
 0x4a1   :  { %v7049_v19 = vpack.c.bf16 %v6473_v23, %v6465_v46  ;;  %v5289_v48 = vunpack.c.3.s8 %v4481_v30  ;;  %v6177_v52 = vcvt.s32.f32 %v5153_v57  ;;  %v6185_v62 = vcvt.s32.f32 %v5161_v60  ;;  %v4545_v44 = vld [vmem:[#allocation7 + $0x7a8] sm:$0xff] }
 0x4a2   :  { %7682 = vmatpush.bf16.msra.mxu3 %v6801_v29  ;;  %v5425_v14 = vunpack.c.0.s8 %v4521_v21  ;;  %v5433_v22 = vunpack.c.1.s8 %v4521_v21  ;;  %v7113_v49 = vpack.c.bf16 %v6601_v20, %v6593_v37  ;;  %v6305_v47 = vcvt.s32.f32 %v5281_v25 }
 0x4a3   :  { %v6313_v5 = vcvt.s32.f32 %v5289_v48  ;;  %v5553_v51 = vunpack.c.0.s8 %v4553_v8  ;;  %7670 = vmatmul.bf16.vlgmr.msra.gmra.mxu2 %v10485_v41  ;;  %v6905_v63 = vpack.c.bf16 %v6185_v62, %v6177_v52  ;;  %v5561_v12 = vunpack.c.1.s8 %v4553_v8  ;;  %v4473_v48 = vld [vmem:[#allocation7 + $0x568] sm:$0xff] }
 0x4a4   :  { %7714 = vmatpush.bf16.msrb.mxu2 %v7049_v19  ;;  %v6449_v24 = vcvt.s32.f32 %v5425_v14  ;;  %v6457_v16 = vcvt.s32.f32 %v5433_v22  ;;  %v11159_v26 = vadd.f32 %v11148_v35, %v11146_v18  ;;  %v5137_v21 = vunpack.c.0.s8 %v4449_v7  ;;  %v4441_v19 = vld [vmem:[#allocation7 + $0x468] sm:$0xff] }
 0x4a5   :  { %v6969_v53 = vpack.c.bf16 %v6313_v5, %v6305_v47  ;;  %v6577_v31 = vcvt.s32.f32 %v5553_v51  ;;  %7683 = vmatmul.bf16.vlgmr.msra.gmra.mxu3 %v10487_v39  ;;  %7690 = vmatpush.bf16.msrb.mxu0 %v6905_v63  ;;  %v6585_v23 = vcvt.s32.f32 %v5561_v12  ;;  %v5145_v56 = vunpack.c.1.s8 %v4449_v7 }
 0x4a6   :  { %7727 = vmatpush.bf16.msrb.mxu3 %v7113_v49  ;;  %v7041_v46 = vpack.c.bf16 %v6457_v16, %v6449_v24  ;;  %v5265_v29 = vunpack.c.0.s8 %v4481_v30  ;;  %v6161_v37 = vcvt.s32.f32 %v5137_v21  ;;  %v5273_v8 = vunpack.c.1.s8 %v4481_v30 }
 0x4a7   :  { %7703 = vmatpush.bf16.msrb.mxu1 %v6969_v53  ;;  %v5409_v57 = vunpack.c.2.s8 %v4513_v3  ;;  %v5417_v60 = vunpack.c.3.s8 %v4513_v3  ;;  %v7105_v20 = vpack.c.bf16 %v6585_v23, %v6577_v31  ;;  %v6169_v25 = vcvt.s32.f32 %v5145_v56 }
 0x4a8   :  { %7715 = vmatpush.bf16.msrb.mxu2 %v7041_v46  ;;  %v6289_v18 = vcvt.s32.f32 %v5265_v29  ;;  %v5537_v35 = vunpack.c.2.s8 %v4545_v44  ;;  %v6297_v61 = vcvt.s32.f32 %v5273_v8  ;;  %v5545_v62 = vunpack.c.3.s8 %v4545_v44  ;;  %v4505_v8 = vld [vmem:[#allocation7 + $0x668] sm:$0xff] }
 0x4a9   :  { %v6433_v10 = vcvt.s32.f32 %v5409_v57  ;;  %v6441_v52 = vcvt.s32.f32 %v5417_v60  ;;  %v6897_v14 = vpack.c.bf16 %v6169_v25, %v6161_v37  ;;  %v5121_v22 = vunpack.c.2.s8 %v4441_v19 }
 0x4aa   :  { %7728 = vmatpush.bf16.msrb.mxu3 %v7105_v20  ;;  %v6561_v7 = vcvt.s32.f32 %v5537_v35  ;;  %v5129_v49 = vunpack.c.3.s8 %v4441_v19  ;;  %v6961_v47 = vpack.c.bf16 %v6297_v61, %v6289_v18  ;;  %v6569_v5 = vcvt.s32.f32 %v5545_v62 }
 0x4ab   :  { %v7033_v30 = vpack.c.bf16 %v6441_v52, %v6433_v10  ;;  %v5249_v51 = vunpack.c.2.s8 %v4473_v48  ;;  %7691 = vmatpush.bf16.msrb.mxu0 %v6897_v14  ;;  %v6145_v63 = vcvt.s32.f32 %v5121_v22  ;;  %v5257_v16 = vunpack.c.3.s8 %v4473_v48  ;;  %v4537_v52 = vld [vmem:[#allocation7 + $0x768] sm:$0xff] }
 0x4ac   :  { %v6153_v24 = vcvt.s32.f32 %v5129_v49  ;;  %v5393_v12 = vunpack.c.0.s8 %v4513_v3  ;;  %7704 = vmatpush.bf16.msrb.mxu1 %v6961_v47  ;;  %v7097_v53 = vpack.c.bf16 %v6569_v5, %v6561_v7  ;;  %v5401_v21 = vunpack.c.1.s8 %v4513_v3  ;;  %v4433_v22 = vld [vmem:[#allocation7 + $0x428] sm:$0xff] }
 0x4ad   :  { %7716 = vmatpush.bf16.msrb.mxu2 %v7033_v30  ;;  %v6273_v31 = vcvt.s32.f32 %v5249_v51  ;;  %v5521_v46 = vunpack.c.0.s8 %v4545_v44  ;;  %v6281_v56 = vcvt.s32.f32 %v5257_v16  ;;  %v5529_v37 = vunpack.c.1.s8 %v4545_v44  ;;  %v4465_v5 = vld [vmem:[#allocation7 + $0x528] sm:$0xff]  ;;  %v11162_v51 = vpop.f32.mrf.mxu0 }
 0x4ae   :  { %v6889_v23 = vpack.c.bf16 %v6153_v24, %v6145_v63  ;;  %v6417_v29 = vcvt.s32.f32 %v5393_v12  ;;  %7729 = vmatpush.bf16.msrb.mxu3 %v7097_v53  ;;  %v6425_v57 = vcvt.s32.f32 %v5401_v21  ;;  %v5105_v20 = vunpack.c.0.s8 %v4441_v19 }
 0x4af   :  { %v6545_v60 = vcvt.s32.f32 %v5521_v46  ;;  %v5113_v25 = vunpack.c.1.s8 %v4441_v19  ;;  %v6953_v18 = vpack.c.bf16 %v6281_v56, %v6273_v31  ;;  %v6553_v35 = vcvt.s32.f32 %v5529_v37  ;;  %v11164_v19 = vpop.f32.mrf.mxu1 }
 0x4b0   :  { %7692 = vmatpush.bf16.msrb.mxu0 %v6889_v23  ;;  %v5233_v61 = vunpack.c.0.s8 %v4473_v48  ;;  %v5241_v10 = vunpack.c.1.s8 %v4473_v48  ;;  %v7025_v62 = vpack.c.bf16 %v6425_v57, %v6417_v29  ;;  %v6129_v14 = vcvt.s32.f32 %v5105_v20 }
 0x4b1   :  { %v6137_v3 = vcvt.s32.f32 %v5113_v25  ;;  %v5377_v7 = vunpack.c.2.s8 %v4505_v8  ;;  %7705 = vmatpush.bf16.msrb.mxu1 %v6953_v18  ;;  %v7089_v49 = vpack.c.bf16 %v6553_v35, %v6545_v60  ;;  %v5385_v30 = vunpack.c.3.s8 %v4505_v8 }
 0x4b2   :  { %v6257_v44 = vcvt.s32.f32 %v5233_v61  ;;  %v6265_v47 = vcvt.s32.f32 %v5241_v10  ;;  %7717 = vmatpush.bf16.msrb.mxu2 %v7025_v62  ;;  %v5505_v48 = vunpack.c.2.s8 %v4537_v52  ;;  %v5513_v16 = vunpack.c.3.s8 %v4537_v52 }
 0x4b3   :  { %v6881_v63 = vpack.c.bf16 %v6137_v3, %v6129_v14  ;;  %v6401_v24 = vcvt.s32.f32 %v5377_v7  ;;  %7730 = vmatpush.bf16.msrb.mxu3 %v7089_v49  ;;  %v6409_v53 = vcvt.s32.f32 %v5385_v30  ;;  %v7464_v31 = vadd.f32 %v11150_v13, %v11159_v26 }
 0x4b4   :  { %v6945_v12 = vpack.c.bf16 %v6265_v47, %v6257_v44  ;;  %v5089_v21 = vunpack.c.2.s8 %v4433_v22  ;;  %v6529_v46 = vcvt.s32.f32 %v5505_v48  ;;  %v6537_v23 = vcvt.s32.f32 %v5513_v16  ;;  %v4330_v44 = vld [vmem:[#allocation7 + $0xf0] sm:$0xff] }
 0x4b5   :  { %7693 = vmatpush.bf16.msrb.mxu0 %v6881_v63  ;;  %v5097_v56 = vunpack.c.3.s8 %v4433_v22  ;;  %v5217_v29 = vunpack.c.2.s8 %v4465_v5  ;;  %v7017_v37 = vpack.c.bf16 %v6409_v53, %v6401_v24  ;;  %v11169_v57 = vadd.f32 %v11152_v54, %v7464_v31  ;;  %v4362_v24 = vld [vmem:[#allocation7 + $0x1f0] sm:$0xff]  ;;  %v7491_v48 = vpop.f32.mrf.mxu0 }
 0x4b6   :  { %7706 = vmatpush.bf16.msrb.mxu1 %v6945_v12  ;;  %v6113_v60 = vcvt.s32.f32 %v5089_v21  ;;  %v5225_v20 = vunpack.c.3.s8 %v4465_v5  ;;  %v7081_v25 = vpack.c.bf16 %v6537_v23, %v6529_v46  ;;  %v5361_v61 = vunpack.c.0.s8 %v4505_v8  ;;  %v4497_v21 = vld [vmem:[#allocation7 + $0x628] sm:$0xff] }
 0x4b7   :  { %v6121_v18 = vcvt.s32.f32 %v5097_v56  ;;  %v6241_v35 = vcvt.s32.f32 %v5217_v29  ;;  %7718 = vmatpush.bf16.msrb.mxu2 %v7017_v37  ;;  %v5369_v13 = vunpack.c.1.s8 %v4505_v8  ;;  %v5489_v26 = vunpack.c.0.s8 %v4537_v52  ;;  %v7504_v16 = vpop.f32.mrf.mxu1 }
 0x4b8   :  { %v6249_v10 = vcvt.s32.f32 %v5225_v20  ;;  %v5497_v62 = vunpack.c.1.s8 %v4537_v52  ;;  %7731 = vmatpush.bf16.msrb.mxu3 %v7081_v25  ;;  %v6385_v3 = vcvt.s32.f32 %v5361_v61  ;;  %v5073_v7 = vunpack.c.0.s8 %v4433_v22 }
 0x4b9   :  { %v6873_v14 = vpack.c.bf16 %v6121_v18, %v6113_v60  ;;  %v5081_v49 = vunpack.c.1.s8 %v4433_v22  ;;  %v6393_v54 = vcvt.s32.f32 %v5369_v13  ;;  %v6513_v30 = vcvt.s32.f32 %v5489_v26  ;;  %v4529_v22 = vld [vmem:[#allocation7 + $0x728] sm:$0xff] }
 0x4ba   :  { %v6937_v47 = vpack.c.bf16 %v6249_v10, %v6241_v35  ;;  %v6521_v63 = vcvt.s32.f32 %v5497_v62  ;;  %v6097_v12 = vcvt.s32.f32 %v5073_v7  ;;  %v5201_v31 = vunpack.c.0.s8 %v4465_v5 }
 0x4bb   :  { %7694 = vmatpush.bf16.msrb.mxu0 %v6873_v14  ;;  %v6105_v53 = vcvt.s32.f32 %v5081_v49  ;;  %v5209_v8 = vunpack.c.1.s8 %v4465_v5  ;;  %v7009_v52 = vpack.c.bf16 %v6393_v54, %v6385_v3  ;;  %v4674_v23 = vunpack.c.2.s8 %v4330_v44 }
 0x4bc   :  { %7707 = vmatpush.bf16.msrb.mxu1 %v6937_v47  ;;  %v7073_v46 = vpack.c.bf16 %v6521_v63, %v6513_v30  ;;  %v4682_v56 = vunpack.c.3.s8 %v4330_v44  ;;  %v6225_v37 = vcvt.s32.f32 %v5201_v31  ;;  %v4802_v20 = vunpack.c.2.s8 %v4362_v24  ;;  %v11173_v31 = vpop.f32.mrf.mxu3 }
 0x4bd   :  { %v6865_v29 = vpack.c.bf16 %v6105_v53, %v6097_v12  ;;  %v6233_v60 = vcvt.s32.f32 %v5209_v8  ;;  %7719 = vmatpush.bf16.msrb.mxu2 %v7009_v52  ;;  %v5698_v25 = vcvt.s32.f32 %v4674_v23  ;;  %v4810_v35 = vunpack.c.3.s8 %v4362_v24  ;;  %v11171_v53 = vpop.f32.mrf.mxu2 }
 0x4be   :  { %7732 = vmatpush.bf16.msrb.mxu3 %v7073_v46  ;;  %v5706_v18 = vcvt.s32.f32 %v4682_v56  ;;  %v5345_v61 = vunpack.c.2.s8 %v4497_v21  ;;  %v5826_v5 = vcvt.s32.f32 %v4802_v20  ;;  %v5353_v13 = vunpack.c.3.s8 %v4497_v21  ;;  %v4394_v56 = vld [vmem:[#allocation7 + $0x2f0] sm:$0xff] }
 0x4bf   :  { %7695 = vmatpush.bf16.msrb.mxu0 %v6865_v29  ;;  %v6929_v10 = vpack.c.bf16 %v6233_v60, %v6225_v37  ;;  %v5473_v26 = vunpack.c.2.s8 %v4529_v22  ;;  %v5834_v14 = vcvt.s32.f32 %v4810_v35  ;;  %v5481_v7 = vunpack.c.3.s8 %v4529_v22  ;;  %v4426_v20 = vld [vmem:[#allocation7 + $0x3f0] sm:$0xff] }
 0x4c0   :  { %v6666_v62 = vpack.c.bf16 %v5706_v18, %v5698_v25  ;;  %v6369_v3 = vcvt.s32.f32 %v5345_v61  ;;  %v6377_v49 = vcvt.s32.f32 %v5353_v13  ;;  %v4658_v54 = vunpack.c.0.s8 %v4330_v44  ;;  %v11177_v61 = vld [vmem:[#allocation7 + $0xb0] sm:$0xff] }
 0x4c1   :  { %7708 = vmatpush.bf16.msrb.mxu1 %v6929_v10  ;;  %v6497_v47 = vcvt.s32.f32 %v5473_v26  ;;  %v4666_v30 = vunpack.c.1.s8 %v4330_v44  ;;  %v6730_v63 = vpack.c.bf16 %v5834_v14, %v5826_v5  ;;  %v6505_v48 = vcvt.s32.f32 %v5481_v7  ;;  %v4354_v7 = vld [vmem:[#allocation7 + $0x1b0] sm:$0xff] }
 0x4c2   :  { %v4786_v16 = vunpack.c.0.s8 %v4362_v24  ;;  %v4794_v12 = vunpack.c.1.s8 %v4362_v24  ;;  %v7001_v8 = vpack.c.bf16 %v6377_v49, %v6369_v3  ;;  %7696 = vmatmul.bf16.vlgmr.msrb.gmra.mxu0 %v10656_v17  ;;  %v5682_v52 = vcvt.s32.f32 %v4658_v54 }
 0x4c3   :  { %7740 = vmatpush.bf16.msra.mxu0 %v6666_v62  ;;  %v5690_v46 = vcvt.s32.f32 %v4666_v30  ;;  %v5329_v23 = vunpack.c.0.s8 %v4497_v21  ;;  %v7065_v29 = vpack.c.bf16 %v6505_v48, %v6497_v47  ;;  %v5337_v60 = vunpack.c.1.s8 %v4497_v21 }
 0x4c4   :  { %v5810_v37 = vcvt.s32.f32 %v4786_v16  ;;  %v5818_v44 = vcvt.s32.f32 %v4794_v12  ;;  %7720 = vmatpush.bf16.msrb.mxu2 %v7001_v8  ;;  %7709 = vmatmul.bf16.vlgmr.msrb.gmra.mxu1 %v10805_v33  ;;  %v5457_v18 = vunpack.c.0.s8 %v4529_v22  ;;  %v5465_v35 = vunpack.c.1.s8 %v4529_v22 }
 0x4c5   :  { %7753 = vmatpush.bf16.msra.mxu1 %v6730_v63  ;;  %v6658_v24 = vpack.c.bf16 %v5690_v46, %v5682_v52  ;;  %v6353_v25 = vcvt.s32.f32 %v5329_v23  ;;  %7733 = vmatpush.bf16.msrb.mxu3 %v7065_v29  ;;  %v6361_v5 = vcvt.s32.f32 %v5337_v60  ;;  %v4930_v13 = vunpack.c.2.s8 %v4394_v56  ;;  %v7517_v23 = vpop.f32.mrf.mxu2  ;;  %v7530_v29 = vpop.f32.mrf.mxu3 }
 0x4c6   :  { %v6722_v10 = vpack.c.bf16 %v5818_v44, %v5810_v37  ;;  %v4938_v26 = vunpack.c.3.s8 %v4394_v56  ;;  %v6481_v62 = vcvt.s32.f32 %v5457_v18  ;;  %v6489_v14 = vcvt.s32.f32 %v5465_v35  ;;  %v4346_v23 = vld [vmem:[#allocation7 + $0x170] sm:$0xff] }
 0x4c7   :  { %7741 = vmatpush.bf16.msra.mxu0 %v6658_v24  ;;  %v5058_v3 = vunpack.c.2.s8 %v4426_v20  ;;  %v5066_v21 = vunpack.c.3.s8 %v4426_v20  ;;  %v6993_v49 = vpack.c.bf16 %v6361_v5, %v6353_v25  ;;  %v5954_v47 = vcvt.s32.f32 %v4930_v13 }
 0x4c8   :  { %v5962_v54 = vcvt.s32.f32 %v4938_v26  ;;  %v4642_v30 = vunpack.c.2.s8 %v11177_v61  ;;  %v7057_v22 = vpack.c.bf16 %v6489_v14, %v6481_v62  ;;  %v4650_v16 = vunpack.c.3.s8 %v11177_v61  ;;  %v4386_v14 = vld [vmem:[#allocation7 + $0x2b0] sm:$0xff] }
 0x4c9   :  { %7754 = vmatpush.bf16.msra.mxu1 %v6722_v10  ;;  %v6082_v63 = vcvt.s32.f32 %v5058_v3  ;;  %v6090_v48 = vcvt.s32.f32 %v5066_v21  ;;  %7721 = vmatpush.bf16.msrb.mxu2 %v6993_v49  ;;  %v4770_v52 = vunpack.c.2.s8 %v4354_v7  ;;  %v4778_v46 = vunpack.c.3.s8 %v4354_v7 }
 0x4ca   :  { %v6794_v12 = vpack.c.bf16 %v5962_v54, %v5954_v47  ;;  %v5666_v8 = vcvt.s32.f32 %v4642_v30  ;;  %7734 = vmatpush.bf16.msrb.mxu3 %v7057_v22  ;;  %v5674_v44 = vcvt.s32.f32 %v4650_v16  ;;  %v4914_v60 = vunpack.c.0.s8 %v4394_v56  ;;  %v4418_v47 = vld [vmem:[#allocation7 + $0x3b0] sm:$0xff] }
 0x4cb   :  { %v6858_v37 = vpack.c.bf16 %v6090_v48, %v6082_v63  ;;  %v4922_v24 = vunpack.c.1.s8 %v4394_v56  ;;  %v5794_v25 = vcvt.s32.f32 %v4770_v52  ;;  %v5802_v18 = vcvt.s32.f32 %v4778_v46  ;;  %v4314_v63 = vld [vmem:[#allocation7 + $0x70] sm:$0xff] }
 0x4cc   :  { %v5042_v35 = vunpack.c.0.s8 %v4426_v20  ;;  %v5050_v10 = vunpack.c.1.s8 %v4426_v20  ;;  %7722 = vmatmul.bf16.vlgmr.msrb.gmra.mxu2 %v10924_v4  ;;  %v6650_v5 = vpack.c.bf16 %v5674_v44, %v5666_v8  ;;  %v5938_v13 = vcvt.s32.f32 %v4914_v60 }
 0x4cd   :  { %7766 = vmatpush.bf16.msra.mxu2 %v6794_v12  ;;  %v5946_v26 = vcvt.s32.f32 %v4922_v24  ;;  %v7490_v62 = vadd.f32 %v11162_v51, %v11169_v57  ;;  %7735 = vmatmul.bf16.vlgmr.msrb.gmra.mxu3 %v10926_v0  ;;  %v6714_v3 = vpack.c.bf16 %v5802_v18, %v5794_v25  ;;  %v4626_v49 = vunpack.c.0.s8 %v11177_v61 }
 0x4ce   :  { %7779 = vmatpush.bf16.msra.mxu3 %v6858_v37  ;;  %v6066_v21 = vcvt.s32.f32 %v5042_v35  ;;  %v6074_v56 = vcvt.s32.f32 %v5050_v10  ;;  %7742 = vmatpush.bf16.msra.mxu0 %v6650_v5  ;;  %v4634_v30 = vunpack.c.1.s8 %v11177_v61  ;;  %v4754_v22 = vunpack.c.0.s8 %v4354_v7 }
 0x4cf   :  { %v6786_v20 = vpack.c.bf16 %v5946_v26, %v5938_v13  ;;  %v11187_v54 = vadd.f32 %v11164_v19, %v7490_v62  ;;  %7755 = vmatpush.bf16.msra.mxu1 %v6714_v3  ;;  %v5650_v57 = vcvt.s32.f32 %v4626_v49  ;;  %v4762_v48 = vunpack.c.1.s8 %v4354_v7 }
 0x4d0   :  { %v6850_v51 = vpack.c.bf16 %v6074_v56, %v6066_v21  ;;  %v4898_v16 = vunpack.c.2.s8 %v4386_v14  ;;  %v5658_v12 = vcvt.s32.f32 %v4634_v30  ;;  %v5778_v8 = vcvt.s32.f32 %v4754_v22 }
 0x4d1   :  { %7767 = vmatpush.bf16.msra.mxu2 %v6786_v20  ;;  %v4906_v52 = vunpack.c.3.s8 %v4386_v14  ;;  %v5026_v46 = vunpack.c.2.s8 %v4418_v47  ;;  %v5786_v29 = vcvt.s32.f32 %v4762_v48  ;;  %v5034_v19 = vunpack.c.3.s8 %v4418_v47 }
 0x4d2   :  { %7780 = vmatpush.bf16.msra.mxu3 %v6850_v51  ;;  %v5922_v37 = vcvt.s32.f32 %v4898_v16  ;;  %v4610_v44 = vunpack.c.2.s8 %v4314_v63  ;;  %v6642_v60 = vpack.c.bf16 %v5658_v12, %v5650_v57  ;;  %v4618_v25 = vunpack.c.3.s8 %v4314_v63  ;;  %v4378_v57 = vld [vmem:[#allocation7 + $0x270] sm:$0xff] }
 0x4d3   :  { %v5930_v61 = vcvt.s32.f32 %v4906_v52  ;;  %v6050_v24 = vcvt.s32.f32 %v5026_v46  ;;  %v6706_v18 = vpack.c.bf16 %v5786_v29, %v5778_v8  ;;  %v6058_v35 = vcvt.s32.f32 %v5034_v19  ;;  %v4410_v19 = vld [vmem:[#allocation7 + $0x370] sm:$0xff] }
 0x4d4   :  { %v5634_v10 = vcvt.s32.f32 %v4610_v44  ;;  %v4738_v7 = vunpack.c.2.s8 %v4346_v23  ;;  %7743 = vmatpush.bf16.msra.mxu0 %v6642_v60  ;;  %v5642_v13 = vcvt.s32.f32 %v4618_v25  ;;  %v4746_v26 = vunpack.c.3.s8 %v4346_v23 }
 0x4d5   :  { %v6778_v5 = vpack.c.bf16 %v5930_v61, %v5922_v37  ;;  %v4882_v62 = vunpack.c.0.s8 %v4386_v14  ;;  %7756 = vmatpush.bf16.msra.mxu1 %v6706_v18  ;;  %v6842_v3 = vpack.c.bf16 %v6058_v35, %v6050_v24  ;;  %v4890_v56 = vunpack.c.1.s8 %v4386_v14  ;;  %v4306_v35 = vld [vmem:[#allocation7 + $0x30] sm:$0xff] }
 0x4d6   :  { %v5762_v21 = vcvt.s32.f32 %v4738_v7  ;;  %v5010_v49 = vunpack.c.0.s8 %v4418_v47  ;;  %v6634_v20 = vpack.c.bf16 %v5642_v13, %v5634_v10  ;;  %v5770_v30 = vcvt.s32.f32 %v4746_v26  ;;  %v4338_v13 = vld [vmem:[#allocation7 + $0x130] sm:$0xff] }
 0x4d7   :  { %7768 = vmatpush.bf16.msra.mxu2 %v6778_v5  ;;  %v5906_v22 = vcvt.s32.f32 %v4882_v62  ;;  %v5018_v51 = vunpack.c.1.s8 %v4418_v47  ;;  %7781 = vmatpush.bf16.msra.mxu3 %v6842_v3  ;;  %v5914_v48 = vcvt.s32.f32 %v4890_v56  ;;  %v4594_v12 = vunpack.c.0.s8 %v4314_v63  ;;  %v11192_v3 = vpop.f32.mrf.mxu0 }
 0x4d8   :  { %v6034_v16 = vcvt.s32.f32 %v5010_v49  ;;  %v4602_v8 = vunpack.c.1.s8 %v4314_v63  ;;  %7744 = vmatpush.bf16.msra.mxu0 %v6634_v20  ;;  %v6698_v52 = vpack.c.bf16 %v5770_v30, %v5762_v21  ;;  %v4722_v29 = vunpack.c.0.s8 %v4346_v23  ;;  %v11194_v21 = vpop.f32.mrf.mxu1 }
 0x4d9   :  { %v6042_v46 = vcvt.s32.f32 %v5018_v51  ;;  %v4730_v37 = vunpack.c.1.s8 %v4346_v23  ;;  %v6770_v44 = vpack.c.bf16 %v5914_v48, %v5906_v22  ;;  %v5618_v14 = vcvt.s32.f32 %v4594_v12 }
 0x4da   :  { %v5626_v60 = vcvt.s32.f32 %v4602_v8  ;;  %v4866_v61 = vunpack.c.2.s8 %v4378_v57  ;;  %7757 = vmatpush.bf16.msra.mxu1 %v6698_v52  ;;  %v5746_v25 = vcvt.s32.f32 %v4722_v29  ;;  %v4874_v18 = vunpack.c.3.s8 %v4378_v57 }
 0x4db   :  { %v6834_v24 = vpack.c.bf16 %v6042_v46, %v6034_v16  ;;  %v5754_v47 = vcvt.s32.f32 %v4730_v37  ;;  %7769 = vmatpush.bf16.msra.mxu2 %v6770_v44  ;;  %v4994_v63 = vunpack.c.2.s8 %v4410_v19  ;;  %v5002_v5 = vunpack.c.3.s8 %v4410_v19 }
 0x4dc   :  { %v6626_v10 = vpack.c.bf16 %v5626_v60, %v5618_v14  ;;  %v5890_v7 = vcvt.s32.f32 %v4866_v61  ;;  %v5898_v23 = vcvt.s32.f32 %v4874_v18  ;;  %v7516_v62 = vadd.f32 %v11171_v53, %v11187_v54 }
 0x4dd   :  { %7782 = vmatpush.bf16.msra.mxu3 %v6834_v24  ;;  %v6690_v26 = vpack.c.bf16 %v5754_v47, %v5746_v25  ;;  %v6018_v56 = vcvt.s32.f32 %v4994_v63  ;;  %v6026_v49 = vcvt.s32.f32 %v5002_v5  ;;  %v4578_v20 = vunpack.c.2.s8 %v4306_v35 }
 0x4de   :  { %7745 = vmatpush.bf16.msra.mxu0 %v6626_v10  ;;  %v6762_v30 = vpack.c.bf16 %v5898_v23, %v5890_v7  ;;  %v11197_v22 = vadd.f32 %v11173_v31, %v7516_v62  ;;  %v4586_v51 = vunpack.c.3.s8 %v4306_v35  ;;  %v4706_v48 = vunpack.c.2.s8 %v4338_v13  ;;  %v4458_v31 = vld [vmem:[#allocation7 + $0x4f0] sm:$0xff] }
 0x4df   :  { %7758 = vmatpush.bf16.msra.mxu1 %v6690_v26  ;;  %v6826_v16 = vpack.c.bf16 %v6026_v49, %v6018_v56  ;;  %v5602_v12 = vcvt.s32.f32 %v4578_v20  ;;  %v4714_v8 = vunpack.c.3.s8 %v4338_v13  ;;  %v4850_v52 = vunpack.c.0.s8 %v4378_v57  ;;  %v4490_v7 = vld [vmem:[#allocation7 + $0x5f0] sm:$0xff] }
 0x4e0   :  { %7770 = vmatpush.bf16.msra.mxu2 %v6762_v30  ;;  %v5610_v53 = vcvt.s32.f32 %v4586_v51  ;;  %v5730_v54 = vcvt.s32.f32 %v4706_v48  ;;  %v4858_v46 = vunpack.c.1.s8 %v4378_v57  ;;  %v4978_v44 = vunpack.c.0.s8 %v4410_v19  ;;  %v4370_v23 = vld [vmem:[#allocation7 + $0x230] sm:$0xff]  ;;  %v7543_v57 = vpop.f32.mrf.mxu0  ;;  %v7556_v62 = vpop.f32.mrf.mxu1 }
 0x4e1   :  { %7783 = vmatpush.bf16.msra.mxu3 %v6826_v16  ;;  %v5738_v29 = vcvt.s32.f32 %v4714_v8  ;;  %v5874_v37 = vcvt.s32.f32 %v4850_v52  ;;  %v4986_v14 = vunpack.c.1.s8 %v4410_v19  ;;  %v4562_v24 = vunpack.c.0.s8 %v4306_v35  ;;  %v11201_v57 = vpop.f32.mrf.mxu3 }
 0x4e2   :  { %v6618_v60 = vpack.c.bf16 %v5610_v53, %v5602_v12  ;;  %v5882_v61 = vcvt.s32.f32 %v4858_v46  ;;  %v6002_v47 = vcvt.s32.f32 %v4978_v44  ;;  %v4570_v10 = vunpack.c.1.s8 %v4306_v35  ;;  %v4402_v12 = vld [vmem:[#allocation7 + $0x330] sm:$0xff] }
 0x4e3   :  { %v6682_v25 = vpack.c.bf16 %v5738_v29, %v5730_v54  ;;  %v6010_v18 = vcvt.s32.f32 %v4986_v14  ;;  %v5586_v5 = vcvt.s32.f32 %v4562_v24  ;;  %v4690_v26 = vunpack.c.0.s8 %v4338_v13 }
 0x4e4   :  { %7746 = vmatpush.bf16.msra.mxu0 %v6618_v60  ;;  %v6754_v63 = vpack.c.bf16 %v5882_v61, %v5874_v37  ;;  %v5594_v49 = vcvt.s32.f32 %v4570_v10  ;;  %v4698_v19 = vunpack.c.1.s8 %v4338_v13  ;;  %v5186_v20 = vunpack.c.2.s8 %v4458_v31 }
 0x4e5   :  { %7759 = vmatpush.bf16.msra.mxu1 %v6682_v25  ;;  %v6818_v56 = vpack.c.bf16 %v6010_v18, %v6002_v47  ;;  %v5714_v30 = vcvt.s32.f32 %v4690_v26  ;;  %v5194_v51 = vunpack.c.3.s8 %v4458_v31  ;;  %v5314_v48 = vunpack.c.2.s8 %v4490_v7  ;;  %v11199_v26 = vpop.f32.mrf.mxu2 }
 0x4e6   :  { %7771 = vmatpush.bf16.msra.mxu2 %v6754_v63  ;;  %v5322_v16 = vunpack.c.3.s8 %v4490_v7  ;;  %v6610_v35 = vpack.c.bf16 %v5594_v49, %v5586_v5  ;;  %v5722_v8 = vcvt.s32.f32 %v4698_v19  ;;  %v6210_v52 = vcvt.s32.f32 %v5186_v20  ;;  %v4522_v20 = vld [vmem:[#allocation7 + $0x6f0] sm:$0xff] }
 0x4e7   :  { %7784 = vmatpush.bf16.msra.mxu3 %v6818_v56  ;;  %v4834_v53 = vunpack.c.2.s8 %v4370_v23  ;;  %v6218_v54 = vcvt.s32.f32 %v5194_v51  ;;  %v6338_v46 = vcvt.s32.f32 %v5314_v48  ;;  %v4842_v37 = vunpack.c.3.s8 %v4370_v23 }
 0x4e8   :  { %v6346_v29 = vcvt.s32.f32 %v5322_v16  ;;  %7747 = vmatpush.bf16.msra.mxu0 %v6610_v35  ;;  %v6674_v44 = vpack.c.bf16 %v5722_v8, %v5714_v30  ;;  %v4962_v13 = vunpack.c.2.s8 %v4402_v12  ;;  %v4970_v60 = vunpack.c.3.s8 %v4402_v12  ;;  %v4554_v35 = vld [vmem:[#allocation7 + $0x7f0] sm:$0xff] }
 0x4e9   :  { %v5858_v14 = vcvt.s32.f32 %v4834_v53  ;;  %v6922_v61 = vpack.c.bf16 %v6218_v54, %v6210_v52  ;;  %v5866_v25 = vcvt.s32.f32 %v4842_v37  ;;  %v5170_v47 = vunpack.c.0.s8 %v4458_v31  ;;  %v4450_v37 = vld [vmem:[#allocation7 + $0x4b0] sm:$0xff] }
 0x4ea   :  { %v6986_v24 = vpack.c.bf16 %v6346_v29, %v6338_v46  ;;  %7760 = vmatpush.bf16.msra.mxu1 %v6674_v44  ;;  %v5986_v18 = vcvt.s32.f32 %v4962_v13  ;;  %v5994_v10 = vcvt.s32.f32 %v4970_v60  ;;  %v5178_v63 = vunpack.c.1.s8 %v4458_v31 }
 0x4eb   :  { %v5298_v5 = vunpack.c.0.s8 %v4490_v7  ;;  %v6746_v62 = vpack.c.bf16 %v5866_v25, %v5858_v14  ;;  %v6194_v56 = vcvt.s32.f32 %v5170_v47  ;;  %v5306_v49 = vunpack.c.1.s8 %v4490_v7  ;;  %7748 = vmatmul.bf16.vlgmr.msra.gmra.mxu0 %v10196_v27 }
 0x4ec   :  { %7792 = vmatpush.bf16.msrb.mxu0 %v6922_v61  ;;  %v4818_v19 = vunpack.c.0.s8 %v4370_v23  ;;  %v6810_v30 = vpack.c.bf16 %v5994_v10, %v5986_v18  ;;  %v6202_v51 = vcvt.s32.f32 %v5178_v63  ;;  %v4826_v16 = vunpack.c.1.s8 %v4370_v23  ;;  %v4482_v61 = vld [vmem:[#allocation7 + $0x5b0] sm:$0xff] }
 0x4ed   :  { %v6322_v48 = vcvt.s32.f32 %v5298_v5  ;;  %7772 = vmatpush.bf16.msra.mxu2 %v6746_v62  ;;  %7761 = vmatmul.bf16.vlgmr.msra.gmra.mxu1 %v10318_v1  ;;  %v6330_v31 = vcvt.s32.f32 %v5306_v49  ;;  %v4946_v52 = vunpack.c.0.s8 %v4402_v12  ;;  %v4954_v53 = vunpack.c.1.s8 %v4402_v12 }
 0x4ee   :  { %7805 = vmatpush.bf16.msrb.mxu1 %v6986_v24  ;;  %v5842_v8 = vcvt.s32.f32 %v4818_v19  ;;  %7785 = vmatpush.bf16.msra.mxu3 %v6810_v30  ;;  %v6914_v54 = vpack.c.bf16 %v6202_v51, %v6194_v56  ;;  %v5850_v46 = vcvt.s32.f32 %v4826_v16  ;;  %v5442_v7 = vunpack.c.2.s8 %v4522_v20  ;;  %v7569_v19 = vpop.f32.mrf.mxu2  ;;  %v7582_v30 = vpop.f32.mrf.mxu3 }
 0x4ef   :  { %v5450_v29 = vunpack.c.3.s8 %v4522_v20  ;;  %v6978_v44 = vpack.c.bf16 %v6330_v31, %v6322_v48  ;;  %v5970_v14 = vcvt.s32.f32 %v4946_v52  ;;  %v5978_v13 = vcvt.s32.f32 %v4954_v53  ;;  %v4474_v19 = vld [vmem:[#allocation7 + $0x570] sm:$0xff] }
 0x4f0   :  { %v5570_v60 = vunpack.c.2.s8 %v4554_v35  ;;  %7793 = vmatpush.bf16.msrb.mxu0 %v6914_v54  ;;  %v6738_v23 = vpack.c.bf16 %v5850_v46, %v5842_v8  ;;  %v6466_v24 = vcvt.s32.f32 %v5442_v7  ;;  %v5578_v47 = vunpack.c.3.s8 %v4554_v35 }
 0x4f1   :  { %v6474_v25 = vcvt.s32.f32 %v5450_v29  ;;  %v6802_v18 = vpack.c.bf16 %v5978_v13, %v5970_v14  ;;  %v5154_v12 = vunpack.c.2.s8 %v4450_v37  ;;  %v5162_v63 = vunpack.c.3.s8 %v4450_v37  ;;  %v4514_v14 = vld [vmem:[#allocation7 + $0x6b0] sm:$0xff] }
 0x4f2   :  { %7806 = vmatpush.bf16.msrb.mxu1 %v6978_v44  ;;  %v6594_v10 = vcvt.s32.f32 %v5570_v60  ;;  %7773 = vmatpush.bf16.msra.mxu2 %v6738_v23  ;;  %v6602_v62 = vcvt.s32.f32 %v5578_v47  ;;  %v5282_v56 = vunpack.c.2.s8 %v4482_v61  ;;  %v5290_v49 = vunpack.c.3.s8 %v4482_v61 }
 0x4f3   :  { %v7050_v5 = vpack.c.bf16 %v6474_v25, %v6466_v24  ;;  %7786 = vmatpush.bf16.msra.mxu3 %v6802_v18  ;;  %v6178_v51 = vcvt.s32.f32 %v5154_v12  ;;  %v6186_v48 = vcvt.s32.f32 %v5162_v63  ;;  %v5426_v16 = vunpack.c.0.s8 %v4522_v20  ;;  %v4546_v24 = vld [vmem:[#allocation7 + $0x7b0] sm:$0xff] }
 0x4f4   :  { %v5434_v31 = vunpack.c.1.s8 %v4522_v20  ;;  %v7114_v8 = vpack.c.bf16 %v6602_v62, %v6594_v10  ;;  %v6306_v52 = vcvt.s32.f32 %v5282_v56  ;;  %v6314_v53 = vcvt.s32.f32 %v5290_v49  ;;  %v4442_v62 = vld [vmem:[#allocation7 + $0x470] sm:$0xff] }
 0x4f5   :  { %v5554_v54 = vunpack.c.0.s8 %v4554_v35  ;;  %7774 = vmatmul.bf16.vlgmr.msra.gmra.mxu2 %v10485_v41  ;;  %v6906_v46 = vpack.c.bf16 %v6186_v48, %v6178_v51  ;;  %v6450_v7 = vcvt.s32.f32 %v5426_v16  ;;  %v5562_v44 = vunpack.c.1.s8 %v4554_v35 }
 0x4f6   :  { %7818 = vmatpush.bf16.msrb.mxu2 %v7050_v5  ;;  %v6458_v29 = vcvt.s32.f32 %v5434_v31  ;;  %v6970_v13 = vpack.c.bf16 %v6314_v53, %v6306_v52  ;;  %v11208_v23 = vadd.f32 %v11194_v21, %v11192_v3  ;;  %v5138_v20 = vunpack.c.0.s8 %v4450_v37  ;;  %7787 = vmatmul.bf16.vlgmr.msra.gmra.mxu3 %v10487_v39 }
 0x4f7   :  { %7831 = vmatpush.bf16.msrb.mxu3 %v7114_v8  ;;  %v6578_v60 = vcvt.s32.f32 %v5554_v54  ;;  %7794 = vmatpush.bf16.msrb.mxu0 %v6906_v46  ;;  %v6586_v47 = vcvt.s32.f32 %v5562_v44  ;;  %v5146_v18 = vunpack.c.1.s8 %v4450_v37  ;;  %v5266_v10 = vunpack.c.0.s8 %v4482_v61 }
 0x4f8   :  { %v7042_v25 = vpack.c.bf16 %v6458_v29, %v6450_v7  ;;  %7807 = vmatpush.bf16.msrb.mxu1 %v6970_v13  ;;  %v6162_v12 = vcvt.s32.f32 %v5138_v20  ;;  %v5274_v35 = vunpack.c.1.s8 %v4482_v61  ;;  %v5410_v63 = vunpack.c.2.s8 %v4514_v14 }
 0x4f9   :  { %v5418_v5 = vunpack.c.3.s8 %v4514_v14  ;;  %v7106_v56 = vpack.c.bf16 %v6586_v47, %v6578_v60  ;;  %v6170_v49 = vcvt.s32.f32 %v5146_v18  ;;  %v6290_v3 = vcvt.s32.f32 %v5266_v10 }
 0x4fa   :  { %7819 = vmatpush.bf16.msrb.mxu2 %v7042_v25  ;;  %v5538_v21 = vunpack.c.2.s8 %v4546_v24  ;;  %v6298_v30 = vcvt.s32.f32 %v5274_v35  ;;  %v6434_v51 = vcvt.s32.f32 %v5410_v63  ;;  %v5546_v16 = vunpack.c.3.s8 %v4546_v24  ;;  %v4506_v63 = vld [vmem:[#allocation7 + $0x670] sm:$0xff] }
 0x4fb   :  { %v6442_v48 = vcvt.s32.f32 %v5418_v5  ;;  %7832 = vmatpush.bf16.msrb.mxu3 %v7106_v56  ;;  %v6898_v31 = vpack.c.bf16 %v6170_v49, %v6162_v12  ;;  %v5122_v8 = vunpack.c.2.s8 %v4442_v62  ;;  %v5130_v52 = vunpack.c.3.s8 %v4442_v62 }
 0x4fc   :  { %v6562_v37 = vcvt.s32.f32 %v5538_v21  ;;  %v6962_v53 = vpack.c.bf16 %v6298_v30, %v6290_v3  ;;  %v6570_v54 = vcvt.s32.f32 %v5546_v16  ;;  %v5250_v46 = vunpack.c.2.s8 %v4474_v19  ;;  %v4538_v16 = vld [vmem:[#allocation7 + $0x770] sm:$0xff] }
 0x4fd   :  { %v7034_v61 = vpack.c.bf16 %v6442_v48, %v6434_v51  ;;  %7795 = vmatpush.bf16.msrb.mxu0 %v6898_v31  ;;  %v6146_v7 = vcvt.s32.f32 %v5122_v8  ;;  %v6154_v29 = vcvt.s32.f32 %v5130_v52  ;;  %v5258_v44 = vunpack.c.3.s8 %v4474_v19  ;;  %v4434_v52 = vld [vmem:[#allocation7 + $0x430] sm:$0xff] }
 0x4fe   :  { %v5394_v13 = vunpack.c.0.s8 %v4514_v14  ;;  %7808 = vmatpush.bf16.msrb.mxu1 %v6962_v53  ;;  %v7098_v60 = vpack.c.bf16 %v6570_v54, %v6562_v37  ;;  %v6274_v20 = vcvt.s32.f32 %v5250_v46  ;;  %v5402_v25 = vunpack.c.1.s8 %v4514_v14  ;;  %v4466_v46 = vld [vmem:[#allocation7 + $0x530] sm:$0xff] }
 0x4ff   :  { %7820 = vmatpush.bf16.msrb.mxu2 %v7034_v61  ;;  %v5522_v47 = vunpack.c.0.s8 %v4546_v24  ;;  %v6890_v18 = vpack.c.bf16 %v6154_v29, %v6146_v7  ;;  %v6282_v10 = vcvt.s32.f32 %v5258_v44  ;;  %v5530_v35 = vunpack.c.1.s8 %v4546_v24  ;;  %v11211_v7 = vpop.f32.mrf.mxu0 }
 0x500   :  { %v6418_v12 = vcvt.s32.f32 %v5394_v13  ;;  %7833 = vmatpush.bf16.msrb.mxu3 %v7098_v60  ;;  %v6426_v5 = vcvt.s32.f32 %v5402_v25  ;;  %v5106_v49 = vunpack.c.0.s8 %v4442_v62  ;;  %v5114_v3 = vunpack.c.1.s8 %v4442_v62  ;;  %v11213_v62 = vpop.f32.mrf.mxu1 }
 0x501   :  { %v6546_v56 = vcvt.s32.f32 %v5522_v47  ;;  %7796 = vmatpush.bf16.msrb.mxu0 %v6890_v18  ;;  %v6954_v21 = vpack.c.bf16 %v6282_v10, %v6274_v20  ;;  %v6554_v30 = vcvt.s32.f32 %v5530_v35  ;;  %v5234_v51 = vunpack.c.0.s8 %v4474_v19 }
 0x502   :  { %v5242_v48 = vunpack.c.1.s8 %v4474_v19  ;;  %v7026_v31 = vpack.c.bf16 %v6426_v5, %v6418_v12  ;;  %v6130_v37 = vcvt.s32.f32 %v5106_v49  ;;  %v6138_v14 = vcvt.s32.f32 %v5114_v3 }
 0x503   :  { %v5378_v8 = vunpack.c.2.s8 %v4506_v63  ;;  %7809 = vmatpush.bf16.msrb.mxu1 %v6954_v21  ;;  %v7090_v53 = vpack.c.bf16 %v6554_v30, %v6546_v56  ;;  %v6258_v24 = vcvt.s32.f32 %v5234_v51  ;;  %v5386_v54 = vunpack.c.3.s8 %v4506_v63 }
 0x504   :  { %v6266_v61 = vcvt.s32.f32 %v5242_v48  ;;  %7821 = vmatpush.bf16.msrb.mxu2 %v7026_v31  ;;  %v6882_v29 = vpack.c.bf16 %v6138_v14, %v6130_v37  ;;  %v5506_v19 = vunpack.c.2.s8 %v4538_v16  ;;  %v5514_v13 = vunpack.c.3.s8 %v4538_v16 }
 0x505   :  { %v6402_v44 = vcvt.s32.f32 %v5378_v8  ;;  %7834 = vmatpush.bf16.msrb.mxu3 %v7090_v53  ;;  %v6410_v20 = vcvt.s32.f32 %v5386_v54  ;;  %v7568_v25 = vadd.f32 %v11199_v26, %v11208_v23  ;;  %v5090_v47 = vunpack.c.2.s8 %v4434_v52 }
 0x506   :  { %v6946_v60 = vpack.c.bf16 %v6266_v61, %v6258_v24  ;;  %7797 = vmatpush.bf16.msrb.mxu0 %v6882_v29  ;;  %v6530_v18 = vcvt.s32.f32 %v5506_v19  ;;  %v6538_v10 = vcvt.s32.f32 %v5514_v13  ;;  %v5098_v12 = vunpack.c.3.s8 %v4434_v52  ;;  %v4331_v61 = vld [vmem:[#allocation7 + $0xf8] sm:$0xff] }
 0x507   :  { %v5218_v35 = vunpack.c.2.s8 %v4466_v46  ;;  %v7018_v5 = vpack.c.bf16 %v6410_v20, %v6402_v44  ;;  %v11218_v56 = vadd.f32 %v11201_v57, %v7568_v25  ;;  %v6114_v49 = vcvt.s32.f32 %v5090_v47  ;;  %v4363_v19 = vld [vmem:[#allocation7 + $0x1f8] sm:$0xff]  ;;  %v7595_v13 = vpop.f32.mrf.mxu0 }
 0x508   :  { %7810 = vmatpush.bf16.msrb.mxu1 %v6946_v60  ;;  %v5226_v3 = vunpack.c.3.s8 %v4466_v46  ;;  %v7082_v21 = vpack.c.bf16 %v6538_v10, %v6530_v18  ;;  %v6122_v30 = vcvt.s32.f32 %v5098_v12  ;;  %v5362_v48 = vunpack.c.0.s8 %v4506_v63  ;;  %v7608_v60 = vpop.f32.mrf.mxu1  ;;  %v4498_v18 = vld [vmem:[#allocation7 + $0x630] sm:$0xff] }
 0x509   :  { %v6242_v51 = vcvt.s32.f32 %v5218_v35  ;;  %7822 = vmatpush.bf16.msrb.mxu2 %v7018_v5  ;;  %v5370_v26 = vunpack.c.1.s8 %v4506_v63  ;;  %v5490_v23 = vunpack.c.0.s8 %v4538_v16  ;;  %v5498_v37 = vunpack.c.1.s8 %v4538_v16 }
 0x50a   :  { %v6250_v31 = vcvt.s32.f32 %v5226_v3  ;;  %7835 = vmatpush.bf16.msrb.mxu3 %v7082_v21  ;;  %v6874_v14 = vpack.c.bf16 %v6122_v30, %v6114_v49  ;;  %v6386_v8 = vcvt.s32.f32 %v5362_v48  ;;  %v5074_v53 = vunpack.c.0.s8 %v4434_v52 }
 0x50b   :  { %v5082_v24 = vunpack.c.1.s8 %v4434_v52  ;;  %v6394_v57 = vcvt.s32.f32 %v5370_v26  ;;  %v6514_v29 = vcvt.s32.f32 %v5490_v23  ;;  %v6522_v44 = vcvt.s32.f32 %v5498_v37  ;;  %v4530_v52 = vld [vmem:[#allocation7 + $0x730] sm:$0xff] }
 0x50c   :  { %v6938_v54 = vpack.c.bf16 %v6250_v31, %v6242_v51  ;;  %7798 = vmatpush.bf16.msrb.mxu0 %v6874_v14  ;;  %v6098_v20 = vcvt.s32.f32 %v5074_v53  ;;  %v5202_v47 = vunpack.c.0.s8 %v4466_v46  ;;  %v5210_v63 = vunpack.c.1.s8 %v4466_v46 }
 0x50d   :  { %v6106_v25 = vcvt.s32.f32 %v5082_v24  ;;  %v7010_v16 = vpack.c.bf16 %v6394_v57, %v6386_v8  ;;  %v7074_v10 = vpack.c.bf16 %v6522_v44, %v6514_v29  ;;  %v4675_v12 = vunpack.c.2.s8 %v4331_v61 }
 0x50e   :  { %7811 = vmatpush.bf16.msrb.mxu1 %v6938_v54  ;;  %v4683_v35 = vunpack.c.3.s8 %v4331_v61  ;;  %v6226_v49 = vcvt.s32.f32 %v5202_v47  ;;  %v6234_v3 = vcvt.s32.f32 %v5210_v63  ;;  %v4803_v21 = vunpack.c.2.s8 %v4363_v19  ;;  %v11220_v47 = vpop.f32.mrf.mxu2  ;;  %v11222_v63 = vpop.f32.mrf.mxu3 }
 0x50f   :  { %v6866_v5 = vpack.c.bf16 %v6106_v25, %v6098_v20  ;;  %7823 = vmatpush.bf16.msrb.mxu2 %v7010_v16  ;;  %7836 = vmatpush.bf16.msrb.mxu3 %v7074_v10  ;;  %v5699_v30 = vcvt.s32.f32 %v4675_v12  ;;  %v4811_v48 = vunpack.c.3.s8 %v4363_v19  ;;  %v5346_v31 = vunpack.c.2.s8 %v4498_v18 }
 0x510   :  { %v5707_v51 = vcvt.s32.f32 %v4683_v35  ;;  %v6930_v26 = vpack.c.bf16 %v6234_v3, %v6226_v49  ;;  %v5827_v46 = vcvt.s32.f32 %v4803_v21  ;;  %v5354_v23 = vunpack.c.3.s8 %v4498_v18 }
 0x511   :  { %7799 = vmatpush.bf16.msrb.mxu0 %v6866_v5  ;;  %v5474_v37 = vunpack.c.2.s8 %v4530_v52  ;;  %v5835_v8 = vcvt.s32.f32 %v4811_v48  ;;  %v6370_v53 = vcvt.s32.f32 %v5346_v31  ;;  %v5482_v24 = vunpack.c.3.s8 %v4530_v52  ;;  %v4395_v5 = vld [vmem:[#allocation7 + $0x2f8] sm:$0xff] }
 0x512   :  { %v6667_v14 = vpack.c.bf16 %v5707_v51, %v5699_v30  ;;  %7812 = vmatpush.bf16.msrb.mxu1 %v6930_v26  ;;  %v6378_v54 = vcvt.s32.f32 %v5354_v23  ;;  %v4659_v29 = vunpack.c.0.s8 %v4331_v61  ;;  %v4667_v44 = vunpack.c.1.s8 %v4331_v61  ;;  %v4427_v30 = vld [vmem:[#allocation7 + $0x3f8] sm:$0xff] }
 0x513   :  { %v6498_v57 = vcvt.s32.f32 %v5474_v37  ;;  %v6731_v13 = vpack.c.bf16 %v5835_v8, %v5827_v46  ;;  %v6506_v60 = vcvt.s32.f32 %v5482_v24  ;;  %v4787_v20 = vunpack.c.0.s8 %v4363_v19  ;;  %v11226_v26 = vld [vmem:[#allocation7 + $0xb8] sm:$0xff] }
 0x514   :  { %v4795_v25 = vunpack.c.1.s8 %v4363_v19  ;;  %v7002_v16 = vpack.c.bf16 %v6378_v54, %v6370_v53  ;;  %7800 = vmatmul.bf16.vlgmr.msrb.gmra.mxu0 %v10656_v17  ;;  %v5683_v10 = vcvt.s32.f32 %v4659_v29  ;;  %v5691_v12 = vcvt.s32.f32 %v4667_v44  ;;  %v4355_v54 = vld [vmem:[#allocation7 + $0x1b8] sm:$0xff] }
 0x515   :  { %7844 = vmatpush.bf16.msra.mxu0 %v6667_v14  ;;  %v5330_v35 = vunpack.c.0.s8 %v4498_v18  ;;  %v7066_v49 = vpack.c.bf16 %v6506_v60, %v6498_v57  ;;  %v5811_v3 = vcvt.s32.f32 %v4787_v20  ;;  %v5338_v21 = vunpack.c.1.s8 %v4498_v18  ;;  %7813 = vmatmul.bf16.vlgmr.msrb.gmra.mxu1 %v10805_v33 }
 0x516   :  { %7857 = vmatpush.bf16.msra.mxu1 %v6731_v13  ;;  %v5819_v61 = vcvt.s32.f32 %v4795_v25  ;;  %7824 = vmatpush.bf16.msrb.mxu2 %v7002_v16  ;;  %v6659_v19 = vpack.c.bf16 %v5691_v12, %v5683_v10  ;;  %v5458_v48 = vunpack.c.0.s8 %v4530_v52  ;;  %v5466_v31 = vunpack.c.1.s8 %v4530_v52 }
 0x517   :  { %v6354_v51 = vcvt.s32.f32 %v5330_v35  ;;  %7837 = vmatpush.bf16.msrb.mxu3 %v7066_v49  ;;  %v6362_v23 = vcvt.s32.f32 %v5338_v21  ;;  %v4931_v37 = vunpack.c.2.s8 %v4395_v5  ;;  %v4939_v14 = vunpack.c.3.s8 %v4395_v5  ;;  %v7621_v49 = vpop.f32.mrf.mxu2 }
 0x518   :  { %v6723_v46 = vpack.c.bf16 %v5819_v61, %v5811_v3  ;;  %v6482_v8 = vcvt.s32.f32 %v5458_v48  ;;  %v6490_v53 = vcvt.s32.f32 %v5466_v31  ;;  %v5059_v24 = vunpack.c.2.s8 %v4427_v30  ;;  %v7634_v3 = vpop.f32.mrf.mxu3 }
 0x519   :  { %7845 = vmatpush.bf16.msra.mxu0 %v6659_v19  ;;  %v5067_v18 = vunpack.c.3.s8 %v4427_v30  ;;  %v6994_v57 = vpack.c.bf16 %v6362_v23, %v6354_v51  ;;  %v5955_v29 = vcvt.s32.f32 %v4931_v37  ;;  %v5963_v44 = vcvt.s32.f32 %v4939_v14  ;;  %v4347_v3 = vld [vmem:[#allocation7 + $0x178] sm:$0xff] }
 0x51a   :  { %7858 = vmatpush.bf16.msra.mxu1 %v6723_v46  ;;  %v4643_v13 = vunpack.c.2.s8 %v11226_v26  ;;  %v7058_v52 = vpack.c.bf16 %v6490_v53, %v6482_v8  ;;  %v6083_v60 = vcvt.s32.f32 %v5059_v24  ;;  %v4651_v25 = vunpack.c.3.s8 %v11226_v26  ;;  %v4387_v24 = vld [vmem:[#allocation7 + $0x2b8] sm:$0xff] }
 0x51b   :  { %v6091_v20 = vcvt.s32.f32 %v5067_v18  ;;  %7825 = vmatpush.bf16.msrb.mxu2 %v6994_v57  ;;  %v6795_v16 = vpack.c.bf16 %v5963_v44, %v5955_v29  ;;  %v4771_v12 = vunpack.c.2.s8 %v4355_v54  ;;  %v4779_v35 = vunpack.c.3.s8 %v4355_v54  ;;  %v4419_v44 = vld [vmem:[#allocation7 + $0x3b8] sm:$0xff] }
 0x51c   :  { %v5667_v10 = vcvt.s32.f32 %v4643_v13  ;;  %7838 = vmatpush.bf16.msrb.mxu3 %v7058_v52  ;;  %v5675_v21 = vcvt.s32.f32 %v4651_v25  ;;  %v4915_v19 = vunpack.c.0.s8 %v4395_v5  ;;  %v4923_v51 = vunpack.c.1.s8 %v4395_v5 }
 0x51d   :  { %v6859_v61 = vpack.c.bf16 %v6091_v20, %v6083_v60  ;;  %v5795_v48 = vcvt.s32.f32 %v4771_v12  ;;  %v5803_v31 = vcvt.s32.f32 %v4779_v35  ;;  %v5043_v46 = vunpack.c.0.s8 %v4427_v30  ;;  %v4315_v20 = vld [vmem:[#allocation7 + $0x78] sm:$0xff] }
 0x51e   :  { %v5051_v23 = vunpack.c.1.s8 %v4427_v30  ;;  %7826 = vmatmul.bf16.vlgmr.msrb.gmra.mxu2 %v10924_v4  ;;  %v6651_v37 = vpack.c.bf16 %v5675_v21, %v5667_v10  ;;  %v5939_v14 = vcvt.s32.f32 %v4915_v19  ;;  %v5947_v8 = vcvt.s32.f32 %v4923_v51 }
 0x51f   :  { %7870 = vmatpush.bf16.msra.mxu2 %v6795_v16  ;;  %v7594_v53 = vadd.f32 %v11211_v7, %v11218_v56  ;;  %7839 = vmatmul.bf16.vlgmr.msrb.gmra.mxu3 %v10926_v0  ;;  %v6715_v18 = vpack.c.bf16 %v5803_v31, %v5795_v48  ;;  %v6067_v57 = vcvt.s32.f32 %v5043_v46  ;;  %v4627_v29 = vunpack.c.0.s8 %v11226_v26 }
 0x520   :  { %7883 = vmatpush.bf16.msra.mxu3 %v6859_v61  ;;  %v6075_v5 = vcvt.s32.f32 %v5051_v23  ;;  %7846 = vmatpush.bf16.msra.mxu0 %v6651_v37  ;;  %v6787_v30 = vpack.c.bf16 %v5947_v8, %v5939_v14  ;;  %v4635_v52 = vunpack.c.1.s8 %v11226_v26  ;;  %v4755_v60 = vunpack.c.0.s8 %v4355_v54 }
 0x521   :  { %v11236_v13 = vadd.f32 %v11213_v62, %v7594_v53  ;;  %7859 = vmatpush.bf16.msra.mxu1 %v6715_v18  ;;  %v5651_v56 = vcvt.s32.f32 %v4627_v29  ;;  %v4763_v25 = vunpack.c.1.s8 %v4355_v54  ;;  %v4899_v16 = vunpack.c.2.s8 %v4387_v24 }
 0x522   :  { %v6851_v7 = vpack.c.bf16 %v6075_v5, %v6067_v57  ;;  %v5659_v10 = vcvt.s32.f32 %v4635_v52  ;;  %v5779_v12 = vcvt.s32.f32 %v4755_v60  ;;  %v4907_v35 = vunpack.c.3.s8 %v4387_v24 }
 0x523   :  { %7871 = vmatpush.bf16.msra.mxu2 %v6787_v30  ;;  %v5027_v49 = vunpack.c.2.s8 %v4419_v44  ;;  %v5787_v61 = vcvt.s32.f32 %v4763_v25  ;;  %v5923_v21 = vcvt.s32.f32 %v4899_v16  ;;  %v5035_v62 = vunpack.c.3.s8 %v4419_v44  ;;  %v4379_v25 = vld [vmem:[#allocation7 + $0x278] sm:$0xff] }
 0x524   :  { %7884 = vmatpush.bf16.msra.mxu3 %v6851_v7  ;;  %v4611_v19 = vunpack.c.2.s8 %v4315_v20  ;;  %v6643_v51 = vpack.c.bf16 %v5659_v10, %v5651_v56  ;;  %v5931_v26 = vcvt.s32.f32 %v4907_v35  ;;  %v4619_v31 = vunpack.c.3.s8 %v4315_v20 }
 0x525   :  { %v6051_v48 = vcvt.s32.f32 %v5027_v49  ;;  %v6707_v46 = vpack.c.bf16 %v5787_v61, %v5779_v12  ;;  %v6059_v23 = vcvt.s32.f32 %v5035_v62  ;;  %v4739_v54 = vunpack.c.2.s8 %v4347_v3 }
 0x526   :  { %v5635_v37 = vcvt.s32.f32 %v4611_v19  ;;  %7847 = vmatpush.bf16.msra.mxu0 %v6643_v51  ;;  %v6779_v14 = vpack.c.bf16 %v5931_v26, %v5923_v21  ;;  %v5643_v8 = vcvt.s32.f32 %v4619_v31  ;;  %v4747_v53 = vunpack.c.3.s8 %v4347_v3  ;;  %v4411_v19 = vld [vmem:[#allocation7 + $0x378] sm:$0xff] }
 0x527   :  { %v4883_v18 = vunpack.c.0.s8 %v4387_v24  ;;  %7860 = vmatpush.bf16.msra.mxu1 %v6707_v46  ;;  %v6843_v57 = vpack.c.bf16 %v6059_v23, %v6051_v48  ;;  %v5763_v5 = vcvt.s32.f32 %v4739_v54  ;;  %v4891_v29 = vunpack.c.1.s8 %v4387_v24 }
 0x528   :  { %v5011_v30 = vunpack.c.0.s8 %v4419_v44  ;;  %7872 = vmatpush.bf16.msra.mxu2 %v6779_v14  ;;  %v6635_v52 = vpack.c.bf16 %v5643_v8, %v5635_v37  ;;  %v5771_v60 = vcvt.s32.f32 %v4747_v53  ;;  %v5019_v56 = vunpack.c.1.s8 %v4419_v44  ;;  %v4307_v37 = vld [vmem:[#allocation7 + $0x38] sm:$0xff] }
 0x529   :  { %v5907_v7 = vcvt.s32.f32 %v4883_v18  ;;  %7885 = vmatpush.bf16.msra.mxu3 %v6843_v57  ;;  %v5915_v16 = vcvt.s32.f32 %v4891_v29  ;;  %v4595_v12 = vunpack.c.0.s8 %v4315_v20  ;;  %v4603_v35 = vunpack.c.1.s8 %v4315_v20  ;;  %v4339_v53 = vld [vmem:[#allocation7 + $0x138] sm:$0xff]  ;;  %v11243_v29 = vpop.f32.mrf.mxu1 }
 0x52a   :  { %v6035_v10 = vcvt.s32.f32 %v5011_v30  ;;  %7848 = vmatpush.bf16.msra.mxu0 %v6635_v52  ;;  %v6699_v49 = vpack.c.bf16 %v5771_v60, %v5763_v5  ;;  %v6043_v61 = vcvt.s32.f32 %v5019_v56  ;;  %v4723_v21 = vunpack.c.0.s8 %v4347_v3  ;;  %v11241_v5 = vpop.f32.mrf.mxu0 }
 0x52b   :  { %v4731_v62 = vunpack.c.1.s8 %v4347_v3  ;;  %v6771_v51 = vpack.c.bf16 %v5915_v16, %v5907_v7  ;;  %v5619_v24 = vcvt.s32.f32 %v4595_v12  ;;  %v5627_v26 = vcvt.s32.f32 %v4603_v35 }
 0x52c   :  { %v4867_v48 = vunpack.c.2.s8 %v4379_v25  ;;  %7861 = vmatpush.bf16.msra.mxu1 %v6699_v49  ;;  %v6835_v31 = vpack.c.bf16 %v6043_v61, %v6035_v10  ;;  %v5747_v46 = vcvt.s32.f32 %v4723_v21  ;;  %v4875_v23 = vunpack.c.3.s8 %v4379_v25 }
 0x52d   :  { %v5755_v44 = vcvt.s32.f32 %v4731_v62  ;;  %7873 = vmatpush.bf16.msra.mxu2 %v6771_v51  ;;  %v6627_v54 = vpack.c.bf16 %v5627_v26, %v5619_v24  ;;  %v4995_v20 = vunpack.c.2.s8 %v4411_v19  ;;  %v5003_v8 = vunpack.c.3.s8 %v4411_v19 }
 0x52e   :  { %v5891_v14 = vcvt.s32.f32 %v4867_v48  ;;  %7886 = vmatpush.bf16.msra.mxu3 %v6835_v31  ;;  %v5899_v3 = vcvt.s32.f32 %v4875_v23  ;;  %v7620_v57 = vadd.f32 %v11220_v47, %v11236_v13  ;;  %v4579_v60 = vunpack.c.2.s8 %v4307_v37 }
 0x52f   :  { %v6691_v18 = vpack.c.bf16 %v5755_v44, %v5747_v46  ;;  %7849 = vmatpush.bf16.msra.mxu0 %v6627_v54  ;;  %v6019_v30 = vcvt.s32.f32 %v4995_v20  ;;  %v6027_v52 = vcvt.s32.f32 %v5003_v8  ;;  %v4587_v16 = vunpack.c.3.s8 %v4307_v37  ;;  %v4491_v20 = vld [vmem:[#allocation7 + $0x5f8] sm:$0xff] }
 0x530   :  { %v6763_v7 = vpack.c.bf16 %v5899_v3, %v5891_v14  ;;  %v11246_v56 = vadd.f32 %v11222_v63, %v7620_v57  ;;  %v4707_v10 = vunpack.c.2.s8 %v4339_v53  ;;  %v5603_v35 = vcvt.s32.f32 %v4579_v60  ;;  %v4459_v63 = vld [vmem:[#allocation7 + $0x4f8] sm:$0xff] }
 0x531   :  { %7862 = vmatpush.bf16.msra.mxu1 %v6691_v18  ;;  %v6827_v12 = vpack.c.bf16 %v6027_v52, %v6019_v30  ;;  %v4715_v49 = vunpack.c.3.s8 %v4339_v53  ;;  %v4851_v61 = vunpack.c.0.s8 %v4379_v25  ;;  %v5611_v47 = vcvt.s32.f32 %v4587_v16  ;;  %v4371_v57 = vld [vmem:[#allocation7 + $0x238] sm:$0xff]  ;;  %v7660_v30 = vpop.f32.mrf.mxu1 }
 0x532   :  { %7874 = vmatpush.bf16.msra.mxu2 %v6763_v7  ;;  %v5731_v13 = vcvt.s32.f32 %v4707_v10  ;;  %v4859_v21 = vunpack.c.1.s8 %v4379_v25  ;;  %v4979_v24 = vunpack.c.0.s8 %v4411_v19  ;;  %v4987_v26 = vunpack.c.1.s8 %v4411_v19  ;;  %v7647_v25 = vpop.f32.mrf.mxu0  ;;  %v11250_v30 = vpop.f32.mrf.mxu3 }
 0x533   :  { %7887 = vmatpush.bf16.msra.mxu3 %v6827_v12  ;;  %v5739_v62 = vcvt.s32.f32 %v4715_v49  ;;  %v5875_v51 = vcvt.s32.f32 %v4851_v61  ;;  %v6619_v48 = vpack.c.bf16 %v5611_v47, %v5603_v35  ;;  %v4563_v46 = vunpack.c.0.s8 %v4307_v37  ;;  %v4403_v49 = vld [vmem:[#allocation7 + $0x338] sm:$0xff]  ;;  %v11248_v25 = vpop.f32.mrf.mxu2 }
 0x534   :  { %v5883_v31 = vcvt.s32.f32 %v4859_v21  ;;  %v6003_v23 = vcvt.s32.f32 %v4979_v24  ;;  %v6011_v54 = vcvt.s32.f32 %v4987_v26  ;;  %v4571_v14 = vunpack.c.1.s8 %v4307_v37 }
 0x535   :  { %v6683_v44 = vpack.c.bf16 %v5739_v62, %v5731_v13  ;;  %7850 = vmatpush.bf16.msra.mxu0 %v6619_v48  ;;  %v5587_v18 = vcvt.s32.f32 %v4563_v46  ;;  %v4691_v3 = vunpack.c.0.s8 %v4339_v53  ;;  %v4699_v19 = vunpack.c.1.s8 %v4339_v53 }
 0x536   :  { %v6755_v8 = vpack.c.bf16 %v5883_v31, %v5875_v51  ;;  %v6819_v52 = vpack.c.bf16 %v6011_v54, %v6003_v23  ;;  %v5595_v60 = vcvt.s32.f32 %v4571_v14  ;;  %v5187_v7 = vunpack.c.2.s8 %v4459_v63 }
 0x537   :  { %7863 = vmatpush.bf16.msra.mxu1 %v6683_v44  ;;  %v5715_v16 = vcvt.s32.f32 %v4691_v3  ;;  %v5195_v10 = vunpack.c.3.s8 %v4459_v63  ;;  %v5315_v12 = vunpack.c.2.s8 %v4491_v20  ;;  %v5323_v35 = vunpack.c.3.s8 %v4491_v20 }
 0x538   :  { %7875 = vmatpush.bf16.msra.mxu2 %v6755_v8  ;;  %7888 = vmatpush.bf16.msra.mxu3 %v6819_v52  ;;  %v6611_v37 = vpack.c.bf16 %v5595_v60, %v5587_v18  ;;  %v5723_v61 = vcvt.s32.f32 %v4699_v19  ;;  %v6211_v47 = vcvt.s32.f32 %v5187_v7  ;;  %v4835_v13 = vunpack.c.2.s8 %v4371_v57 }
 0x539   :  { %v6219_v21 = vcvt.s32.f32 %v5195_v10  ;;  %v6339_v62 = vcvt.s32.f32 %v5315_v12  ;;  %v6347_v51 = vcvt.s32.f32 %v5323_v35  ;;  %v4843_v24 = vunpack.c.3.s8 %v4371_v57 }
 0x53a   :  { %7851 = vmatpush.bf16.msra.mxu0 %v6611_v37  ;;  %v6675_v26 = vpack.c.bf16 %v5723_v61, %v5715_v16  ;;  %v5859_v48 = vcvt.s32.f32 %v4835_v13  ;;  %v4963_v53 = vunpack.c.2.s8 %v4403_v49  ;;  %v4971_v31 = vunpack.c.3.s8 %v4403_v49  ;;  %v4523_v16 = vld [vmem:[#allocation7 + $0x6f8] sm:$0xff] }
 0x53b   :  { %v6923_v46 = vpack.c.bf16 %v6219_v21, %v6211_v47  ;;  %v6987_v44 = vpack.c.bf16 %v6347_v51, %v6339_v62  ;;  %v5867_v23 = vcvt.s32.f32 %v4843_v24  ;;  %v5171_v54 = vunpack.c.0.s8 %v4459_v63  ;;  %v4555_v61 = vld [vmem:[#allocation7 + $0x7f8] sm:$0xff] }
 0x53c   :  { %7864 = vmatpush.bf16.msra.mxu1 %v6675_v26  ;;  %v5987_v14 = vcvt.s32.f32 %v4963_v53  ;;  %v5995_v8 = vcvt.s32.f32 %v4971_v31  ;;  %v5179_v18 = vunpack.c.1.s8 %v4459_v63  ;;  %v5299_v3 = vunpack.c.0.s8 %v4491_v20  ;;  %v4451_v26 = vld [vmem:[#allocation7 + $0x4b8] sm:$0xff] }
 0x53d   :  { %v6747_v52 = vpack.c.bf16 %v5867_v23, %v5859_v48  ;;  %v6195_v60 = vcvt.s32.f32 %v5171_v54  ;;  %v5307_v19 = vunpack.c.1.s8 %v4491_v20  ;;  %v4819_v7 = vunpack.c.0.s8 %v4371_v57  ;;  %7852 = vmatmul.bf16.vlgmr.msra.gmra.mxu0 %v10196_v27 }
 0x53e   :  { %7896 = vmatpush.bf16.msrb.mxu0 %v6923_v46  ;;  %v6811_v10 = vpack.c.bf16 %v5995_v8, %v5987_v14  ;;  %v6203_v12 = vcvt.s32.f32 %v5179_v18  ;;  %v6323_v35 = vcvt.s32.f32 %v5299_v3  ;;  %v4827_v37 = vunpack.c.1.s8 %v4371_v57  ;;  %v4483_v46 = vld [vmem:[#allocation7 + $0x5b8] sm:$0xff] }
 0x53f   :  { %7876 = vmatpush.bf16.msra.mxu2 %v6747_v52  ;;  %7865 = vmatmul.bf16.vlgmr.msra.gmra.mxu1 %v10318_v1  ;;  %v6331_v63 = vcvt.s32.f32 %v5307_v19  ;;  %v5843_v47 = vcvt.s32.f32 %v4819_v7  ;;  %v4947_v13 = vunpack.c.0.s8 %v4403_v49  ;;  %v4955_v21 = vunpack.c.1.s8 %v4403_v49  ;;  %v7673_v19 = vpop.f32.mrf.mxu2  ;;  %v7686_v7 = vpop.f32.mrf.mxu3 }
 0x540   :  { %7909 = vmatpush.bf16.msrb.mxu1 %v6987_v44  ;;  %7889 = vmatpush.bf16.msra.mxu3 %v6811_v10  ;;  %v6915_v62 = vpack.c.bf16 %v6203_v12, %v6195_v60  ;;  %v5851_v51 = vcvt.s32.f32 %v4827_v37  ;;  %v5443_v20 = vunpack.c.2.s8 %v4523_v16  ;;  %v5451_v24 = vunpack.c.3.s8 %v4523_v16 }
 0x541   :  { %v6979_v48 = vpack.c.bf16 %v6331_v63, %v6323_v35  ;;  %v5971_v53 = vcvt.s32.f32 %v4947_v13  ;;  %v5979_v27 = vcvt.s32.f32 %v4955_v21  ;;  %v5571_v31 = vunpack.c.2.s8 %v4555_v61 }
 0x542   :  { %7897 = vmatpush.bf16.msrb.mxu0 %v6915_v62  ;;  %v6739_v57 = vpack.c.bf16 %v5851_v51, %v5843_v47  ;;  %v6467_v44 = vcvt.s32.f32 %v5443_v20  ;;  %v6475_v23 = vcvt.s32.f32 %v5451_v24  ;;  %v5579_v1 = vunpack.c.3.s8 %v4555_v61 }
 0x543   :  { %v6803_v54 = vpack.c.bf16 %v5979_v27, %v5971_v53  ;;  %v6595_v14 = vcvt.s32.f32 %v5571_v31  ;;  %v5155_v49 = vunpack.c.2.s8 %v4451_v26  ;;  %v5163_v8 = vunpack.c.3.s8 %v4451_v26 }
 0x544   :  { %7910 = vmatpush.bf16.msrb.mxu1 %v6979_v48  ;;  %7877 = vmatpush.bf16.msra.mxu2 %v6739_v57  ;;  %v7051_v18 = vpack.c.bf16 %v6475_v23, %v6467_v44  ;;  %v6603_v3 = vcvt.s32.f32 %v5579_v1  ;;  %v5283_v52 = vunpack.c.2.s8 %v4483_v46  ;;  %v5291_v60 = vunpack.c.3.s8 %v4483_v46  ;;  %v4515_v48 = vld [vmem:[#allocation7 + $0x6b8] sm:$0xff] }
 0x545   :  { %7890 = vmatpush.bf16.msra.mxu3 %v6803_v54  ;;  %v6179_v10 = vcvt.s32.f32 %v5155_v49  ;;  %v6187_v12 = vcvt.s32.f32 %v5163_v8  ;;  %v5427_v35 = vunpack.c.0.s8 %v4523_v16  ;;  %v5435_v37 = vunpack.c.1.s8 %v4523_v16  ;;  %v4547_v57 = vld [vmem:[#allocation7 + $0x7b8] sm:$0xff] }
 0x546   :  { %v7115_v63 = vpack.c.bf16 %v6603_v3, %v6595_v14  ;;  %v6307_v47 = vcvt.s32.f32 %v5283_v52  ;;  %v6315_v13 = vcvt.s32.f32 %v5291_v60  ;;  %v5555_v21 = vunpack.c.0.s8 %v4555_v61  ;;  %v4443_v8 = vld [vmem:[#allocation7 + $0x478] sm:$0xff] }
 0x547   :  { %7878 = vmatmul.bf16.vlgmr.msra.gmra.mxu2 %v10485_v41  ;;  %v6907_v62 = vpack.c.bf16 %v6187_v12, %v6179_v10  ;;  %v6451_v51 = vcvt.s32.f32 %v5427_v35  ;;  %v6459_v20 = vcvt.s32.f32 %v5435_v37  ;;  %v5563_v24 = vunpack.c.1.s8 %v4555_v61  ;;  %v4475_v52 = vld [vmem:[#allocation7 + $0x578] sm:$0xff] }
 0x548   :  { %7922 = vmatpush.bf16.msrb.mxu2 %v7051_v18  ;;  %v6971_v53 = vpack.c.bf16 %v6315_v13, %v6307_v47  ;;  %v6579_v27 = vcvt.s32.f32 %v5555_v21  ;;  %v11257_v31 = vadd.f32 %v11243_v29, %v11241_v5  ;;  %v5139_v16 = vunpack.c.0.s8 %v4451_v26  ;;  %7891 = vmatmul.bf16.vlgmr.msra.gmra.mxu3 %v10487_v39 }
 0x549   :  { %7935 = vmatpush.bf16.msrb.mxu3 %v7115_v63  ;;  %7898 = vmatpush.bf16.msrb.mxu0 %v6907_v62  ;;  %v7043_v44 = vpack.c.bf16 %v6459_v20, %v6451_v51  ;;  %v6587_v23 = vcvt.s32.f32 %v5563_v24  ;;  %v5147_v41 = vunpack.c.1.s8 %v4451_v26  ;;  %v5267_v1 = vunpack.c.0.s8 %v4483_v46 }
 0x54a   :  { %7911 = vmatpush.bf16.msrb.mxu1 %v6971_v53  ;;  %v6163_v54 = vcvt.s32.f32 %v5139_v16  ;;  %v5275_v61 = vunpack.c.1.s8 %v4483_v46  ;;  %v5411_v14 = vunpack.c.2.s8 %v4515_v48  ;;  %v5419_v49 = vunpack.c.3.s8 %v4515_v48 }
 0x54b   :  { %v7107_v18 = vpack.c.bf16 %v6587_v23, %v6579_v27  ;;  %v6171_v3 = vcvt.s32.f32 %v5147_v41  ;;  %v6291_v5 = vcvt.s32.f32 %v5267_v1  ;;  %v5539_v29 = vunpack.c.2.s8 %v4547_v57  ;;  %v11260_v1 = vld [vmem:[#allocation7 + $0x678] sm:$0xff] }
 0x54c   :  { %7923 = vmatpush.bf16.msrb.mxu2 %v7043_v44  ;;  %v6299_v60 = vcvt.s32.f32 %v5275_v61  ;;  %v6435_v19 = vcvt.s32.f32 %v5411_v14  ;;  %v6443_v39 = vcvt.s32.f32 %v5419_v49  ;;  %v5547_v7 = vunpack.c.3.s8 %v4547_v57 }
 0x54d   :  { %7936 = vmatpush.bf16.msrb.mxu3 %v7107_v18  ;;  %v6899_v10 = vpack.c.bf16 %v6171_v3, %v6163_v54  ;;  %v6563_v26 = vcvt.s32.f32 %v5539_v29  ;;  %v5123_v12 = vunpack.c.2.s8 %v4443_v8  ;;  %v5131_v35 = vunpack.c.3.s8 %v4443_v8  ;;  %v11262_v18 = vpop.f32.mrf.mxu0  ;;  %v11264_v3 = vpop.f32.mrf.mxu1 }
 0x54e   :  { %v6963_v37 = vpack.c.bf16 %v6299_v60, %v6291_v5  ;;  %v7035_v46 = vpack.c.bf16 %v6443_v39, %v6435_v19  ;;  %v6571_v63 = vcvt.s32.f32 %v5547_v7  ;;  %v5251_v47 = vunpack.c.2.s8 %v4475_v52  ;;  %v4539_v19 = vld [vmem:[#allocation7 + $0x778] sm:$0xff] }
 0x54f   :  { %7899 = vmatpush.bf16.msrb.mxu0 %v6899_v10  ;;  %v6147_v13 = vcvt.s32.f32 %v5123_v12  ;;  %v6155_v21 = vcvt.s32.f32 %v5131_v35  ;;  %v5259_v62 = vunpack.c.3.s8 %v4475_v52  ;;  %v5395_v51 = vunpack.c.0.s8 %v4515_v48 }
 0x550   :  { %7912 = vmatpush.bf16.msrb.mxu1 %v6963_v37  ;;  %7924 = vmatpush.bf16.msrb.mxu2 %v7035_v46  ;;  %v7099_v20 = vpack.c.bf16 %v6571_v63, %v6563_v26  ;;  %v6275_v24 = vcvt.s32.f32 %v5251_v47  ;;  %v5403_v53 = vunpack.c.1.s8 %v4515_v48  ;;  %v5523_v27 = vunpack.c.0.s8 %v4547_v57  ;;  %v4435_v26 = vld [vmem:[#allocation7 + $0x438] sm:$0xff] }
 0x551   :  { %v6891_v16 = vpack.c.bf16 %v6155_v21, %v6147_v13  ;;  %v6283_v44 = vcvt.s32.f32 %v5259_v62  ;;  %v6419_v23 = vcvt.s32.f32 %v5395_v51  ;;  %v5531_v41 = vunpack.c.1.s8 %v4547_v57  ;;  %v4467_v46 = vld [vmem:[#allocation7 + $0x538] sm:$0xff] }
 0x552   :  { %7937 = vmatpush.bf16.msrb.mxu3 %v7099_v20  ;;  %v6427_v54 = vcvt.s32.f32 %v5403_v53  ;;  %v6547_v61 = vcvt.s32.f32 %v5523_v27  ;;  %v5107_v14 = vunpack.c.0.s8 %v4443_v8  ;;  %v5115_v49 = vunpack.c.1.s8 %v4443_v8 }
 0x553   :  { %7900 = vmatpush.bf16.msrb.mxu0 %v6891_v16  ;;  %v6955_v5 = vpack.c.bf16 %v6283_v44, %v6275_v24  ;;  %v6555_v29 = vcvt.s32.f32 %v5531_v41  ;;  %v5235_v48 = vunpack.c.0.s8 %v4475_v52  ;;  %v5243_v60 = vunpack.c.1.s8 %v4475_v52 }
 0x554   :  { %v7027_v39 = vpack.c.bf16 %v6427_v54, %v6419_v23  ;;  %v6131_v7 = vcvt.s32.f32 %v5107_v14  ;;  %v6139_v57 = vcvt.s32.f32 %v5115_v49  ;;  %v5379_v10 = vunpack.c.2.s8 %v11260_v1 }
 0x555   :  { %7913 = vmatpush.bf16.msrb.mxu1 %v6955_v5  ;;  %v7091_v12 = vpack.c.bf16 %v6555_v29, %v6547_v61  ;;  %v6259_v35 = vcvt.s32.f32 %v5235_v48  ;;  %v6267_v8 = vcvt.s32.f32 %v5243_v60  ;;  %v5387_v37 = vunpack.c.3.s8 %v11260_v1  ;;  %v7699_v29 = vpop.f32.mrf.mxu0  ;;  %v7712_v48 = vpop.f32.mrf.mxu1 }
 0x556   :  { %7925 = vmatpush.bf16.msrb.mxu2 %v7027_v39  ;;  %v6883_v63 = vpack.c.bf16 %v6139_v57, %v6131_v7  ;;  %v6403_v47 = vcvt.s32.f32 %v5379_v10  ;;  %v5507_v13 = vunpack.c.2.s8 %v4539_v19  ;;  %v5515_v21 = vunpack.c.3.s8 %v4539_v19 }
 0x557   :  { %7938 = vmatpush.bf16.msrb.mxu3 %v7091_v12  ;;  %v6947_v52 = vpack.c.bf16 %v6267_v8, %v6259_v35  ;;  %v6411_v62 = vcvt.s32.f32 %v5387_v37  ;;  %v7672_v51 = vadd.f32 %v11248_v25, %v11257_v31  ;;  %v5091_v20 = vunpack.c.2.s8 %v4435_v26  ;;  %v4499_v12 = vld [vmem:[#allocation7 + $0x638] sm:$0xff] }
 0x558   :  { %7901 = vmatpush.bf16.msrb.mxu0 %v6883_v63  ;;  %v6531_v24 = vcvt.s32.f32 %v5507_v13  ;;  %v6539_v53 = vcvt.s32.f32 %v5515_v21  ;;  %v5099_v27 = vunpack.c.3.s8 %v4435_v26  ;;  %v5219_v16 = vunpack.c.2.s8 %v4467_v46 }
 0x559   :  { %7914 = vmatpush.bf16.msrb.mxu1 %v6947_v52  ;;  %v7019_v44 = vpack.c.bf16 %v6411_v62, %v6403_v47  ;;  %v7685_v23 = vadd.f32 %v11250_v30, %v7672_v51  ;;  %v6115_v41 = vcvt.s32.f32 %v5091_v20  ;;  %v5227_v54 = vunpack.c.3.s8 %v4467_v46  ;;  %v4531_v47 = vld [vmem:[#allocation7 + $0x738] sm:$0xff]  ;;  %v7723_v51 = vpop.f32.mrf.mxu2 }
 0x55a   :  { %v7083_v61 = vpack.c.bf16 %v6539_v53, %v6531_v24  ;;  %v6123_v14 = vcvt.s32.f32 %v5099_v27  ;;  %v6243_v49 = vcvt.s32.f32 %v5219_v16  ;;  %v5363_v5 = vunpack.c.0.s8 %v11260_v1 }
 0x55b   :  { %7926 = vmatpush.bf16.msrb.mxu2 %v7019_v44  ;;  %v6251_v25 = vcvt.s32.f32 %v5227_v54  ;;  %v5371_v31 = vunpack.c.1.s8 %v11260_v1  ;;  %v5491_v60 = vunpack.c.0.s8 %v4539_v19  ;;  %v5499_v39 = vunpack.c.1.s8 %v4539_v19  ;;  %v7736_v1 = vpop.f32.mrf.mxu3  ;;  %v8023_v44 = vld [vmem:[%s12155_s10 + $0x78] sm:$0xff] }
 0x55c   :  { %7939 = vmatpush.bf16.msrb.mxu3 %v7083_v61  ;;  %v6875_v7 = vpack.c.bf16 %v6123_v14, %v6115_v41  ;;  %v6387_v57 = vcvt.s32.f32 %v5363_v5  ;;  %v5075_v10 = vunpack.c.0.s8 %v4435_v26  ;;  %v5083_v30 = vunpack.c.1.s8 %v4435_v26  ;;  %v8039_v5 = vld [vmem:[%s12155_s10 + $0xf8] sm:$0xff] }
 0x55d   :  { %v6939_v35 = vpack.c.bf16 %v6251_v25, %v6243_v49  ;;  %v6395_v8 = vcvt.s32.f32 %v5371_v31  ;;  %v6515_v37 = vcvt.s32.f32 %v5491_v60  ;;  %v6523_v63 = vcvt.s32.f32 %v5499_v39 }
 0x55e   :  { %7902 = vmatpush.bf16.msrb.mxu0 %v6875_v7  ;;  %v6099_v13 = vcvt.s32.f32 %v5075_v10  ;;  %v6107_v21 = vcvt.s32.f32 %v5083_v30  ;;  %v5203_v52 = vunpack.c.0.s8 %v4467_v46  ;;  %v5211_v62 = vunpack.c.1.s8 %v4467_v46 }
 0x55f   :  { %7915 = vmatpush.bf16.msrb.mxu1 %v6939_v35  ;;  %v7011_v19 = vpack.c.bf16 %v6395_v8, %v6387_v57  ;;  %v7075_v20 = vpack.c.bf16 %v6523_v63, %v6515_v37  ;;  %v5347_v24 = vunpack.c.2.s8 %v4499_v12  ;;  %v5355_v53 = vunpack.c.3.s8 %v4499_v12  ;;  %v8022_v8 = vld [vmem:[%s12155_s10 + $0x70] sm:$0xff] }
 0x560   :  { %v6867_v27 = vpack.c.bf16 %v6107_v21, %v6099_v13  ;;  %v6227_v26 = vcvt.s32.f32 %v5203_v52  ;;  %v6235_v16 = vcvt.s32.f32 %v5211_v62  ;;  %v5475_v41 = vunpack.c.2.s8 %v4531_v47  ;;  %v8036_v62 = vld [vmem:[%s12155_s10 + $0xe0] sm:$0xff] }
 0x561   :  { %7927 = vmatpush.bf16.msrb.mxu2 %v7011_v19  ;;  %7940 = vmatpush.bf16.msrb.mxu3 %v7075_v20  ;;  %v6371_v54 = vcvt.s32.f32 %v5347_v24  ;;  %v6379_v61 = vcvt.s32.f32 %v5355_v53  ;;  %v5483_v46 = vunpack.c.3.s8 %v4531_v47  ;;  %v5331_v14 = vunpack.c.0.s8 %v4499_v12  ;;  %v7725_v13 = vpop.f32.mrf.mxu2  ;;  %v8071_v19 = vld [vmem:[%s12155_s10 + $0x1f8] sm:$0xff]  ;;  %v8054_v53 = vld [vmem:[%s12155_s10 + $0x170] sm:$0xff] }
 0x562   :  { %7903 = vmatpush.bf16.msrb.mxu0 %v6867_v27  ;;  %v6931_v49 = vpack.c.bf16 %v6235_v16, %v6227_v26  ;;  %v6499_v29 = vcvt.s32.f32 %v5475_v41  ;;  %v5339_v48 = vunpack.c.1.s8 %v4499_v12  ;;  %v5459_v25 = vunpack.c.0.s8 %v4531_v47  ;;  %v8038_v12 = vld [vmem:[%s12155_s10 + $0xf0] sm:$0xff]  ;;  %v8035_v24 = vld [vmem:[%s12155_s10 + $0xd8] sm:$0xff]  ;;  %v8053_v16 = vld [vmem:[%s12155_s10 + $0x168] sm:$0xff] }
 0x563   :  { %v7003_v31 = vpack.c.bf16 %v6379_v61, %v6371_v54  ;;  %v6507_v60 = vcvt.s32.f32 %v5483_v46  ;;  %v6355_v39 = vcvt.s32.f32 %v5331_v14  ;;  %v5467_v7 = vunpack.c.1.s8 %v4531_v47  ;;  %v7738_v21 = vpop.f32.mrf.mxu3  ;;  %v8018_v27 = vld [vmem:[%s12155_s10 + $0x50] sm:$0xff]  ;;  %v8052_v41 = vld [vmem:[%s12155_s10 + $0x160] sm:$0xff]  ;;  %v8051_v14 = vld [vmem:[%s12155_s10 + $0x158] sm:$0xff] }
 0x564   :  { %7916 = vmatpush.bf16.msrb.mxu1 %v6931_v49  ;;  %v6363_v57 = vcvt.s32.f32 %v5339_v48  ;;  %v6483_v10 = vcvt.s32.f32 %v5459_v25  ;;  %v7698_v30 = vadd.f32 %v11262_v18, %v7685_v23  ;;  %v8021_v18 = vld [vmem:[%s12155_s10 + $0x68] sm:$0xff]  ;;  %v8034_v26 = vld [vmem:[%s12155_s10 + $0xd0] sm:$0xff]  ;;  %v8068_v54 = vld [vmem:[%s12155_s10 + $0x1e0] sm:$0xff] }
 0x565   :  { %7928 = vmatpush.bf16.msrb.mxu2 %v7003_v31  ;;  %v7067_v35 = vpack.c.bf16 %v6507_v60, %v6499_v29  ;;  %v6491_v37 = vcvt.s32.f32 %v5467_v7  ;;  %7904 = vmatmul.bf16.vlgmr.msrb.gmra.mxu0 %v10656_v17  ;;  %v8037_v23 = vld [vmem:[%s12155_s10 + $0xe8] sm:$0xff]  ;;  %v8055_v17 = vld [vmem:[%s12155_s10 + $0x178] sm:$0xff]  ;;  %v8016_v61 = vld [vmem:[%s12155_s10 + $0x40] sm:$0xff] }
 0x566   :  { %8140 = vmatpush.msra.mxu0 %v8023_v44  ;;  %v6995_v63 = vpack.c.bf16 %v6363_v57, %v6355_v39  ;;  %v7711_v47 = vadd.f32 %v11264_v3, %v7698_v30  ;;  %v8017_v44 = vld [vmem:[%s12155_s10 + $0x48] sm:$0xff]  ;;  %v8032_v46 = vld [vmem:[%s12155_s10 + $0xc0] sm:$0xff]  ;;  %v8067_v29 = vld [vmem:[%s12155_s10 + $0x1d8] sm:$0xff] }
 0x567   :  { %7941 = vmatpush.bf16.msrb.mxu3 %v7067_v35  ;;  %7917 = vmatmul.bf16.vlgmr.msrb.gmra.mxu1 %v10805_v33  ;;  %v7059_v52 = vpack.c.bf16 %v6491_v37, %v6483_v10  ;;  %v8020_v33 = vld [vmem:[%s12155_s10 + $0x60] sm:$0xff]  ;;  %v8015_v48 = vld [vmem:[%s12155_s10 + $0x38] sm:$0xff]  ;;  %v8050_v60 = vld [vmem:[%s12155_s10 + $0x150] sm:$0xff] }
 0x568   :  { %8160 = vmatpush.msra.mxu1 %v8039_v5  ;;  %8141 = vmatpush.msra.mxu0 %v8022_v8  ;;  %v7724_v3 = vadd.f32 %v7723_v51, %v7711_v47  ;;  %v8019_v51 = vld [vmem:[%s12155_s10 + $0x58] sm:$0xff]  ;;  %v7749_v49 = vpop.f32.mrf.mxu0  ;;  %v8066_v7 = vld [vmem:[%s12155_s10 + $0x1d0] sm:$0xff]  ;;  %v8049_v30 = vld [vmem:[%s12155_s10 + $0x148] sm:$0xff] }
 0x569   :  { %7929 = vmatpush.bf16.msrb.mxu2 %v6995_v63  ;;  %v8031_v31 = vld [vmem:[%s12155_s10 + $0xb8] sm:$0xff]  ;;  %v8014_v57 = vld [vmem:[%s12155_s10 + $0x30] sm:$0xff]  ;;  %v8065_v35 = vld [vmem:[%s12155_s10 + $0x1c8] sm:$0xff] }
 0x56a   :  { %8161 = vmatpush.msra.mxu1 %v8038_v12  ;;  %8142 = vmatpush.msra.mxu0 %v8021_v18  ;;  %v11307_v20 = vadd.f32 %v7736_v1, %v7724_v3  ;;  %v8070_v1 = vld [vmem:[%s12155_s10 + $0x1f0] sm:$0xff]  ;;  %v7762_v5 = vpop.f32.mrf.mxu1  ;;  %v11368_v39 = vld [vmem:[#allocation4] sm:$0xff]  ;;  %v8013_v8 = vld [vmem:[%s12155_s10 + $0x28] sm:$0xff] }
 0x56b   :  { %7942 = vmatpush.bf16.msrb.mxu3 %v7059_v52  ;;  %v7763_v25 = vadd.f32 %v7762_v5, %v7749_v49  ;;  %v8030_v10 = vld [vmem:[%s12155_s10 + $0xb0] sm:$0xff]  ;;  %v4242_v12 = vperm.slane %v11368_v39, 0  ;;  %v8029_v37 = vld [vmem:[%s12155_s10 + $0xa8] sm:$0xff]  ;;  %v8048_v63 = vld [vmem:[%s12155_s10 + $0x140] sm:$0xff]  ;;  %v4243_v13 = vperm.slane %v11368_v39, 1 }
 0x56c   :  { %8162 = vmatpush.msra.mxu1 %v8037_v23  ;;  %8143 = vmatpush.msra.mxu0 %v8020_v33  ;;  %v11395_v47 = vld [vmem:[#allocation6] sm:$0xff]  ;;  %v8047_v52 = vld [vmem:[%s12155_s10 + $0x138] sm:$0xff]  ;;  %v8025_v49 = vld [vmem:[%s12155_s10 + $0x88] sm:$0xff] }
 0x56d   :  { %8180 = vmatpush.msra.mxu2 %v8055_v17  ;;  %v8064_v21 = vld [vmem:[%s12155_s10 + $0x1c0] sm:$0xff]  ;;  %v8063_v33 = vld [vmem:[%s12155_s10 + $0x1b8] sm:$0xff] }
 0x56e   :  { %8163 = vmatpush.msra.mxu1 %v8036_v62  ;;  %7930 = vmatmul.bf16.vlgmr.msrb.gmra.mxu2 %v10924_v4  ;;  %v8069_v4 = vld [vmem:[%s12155_s10 + $0x1e8] sm:$0xff]  ;;  %v8012_v18 = vld [vmem:[%s12155_s10 + $0x20] sm:$0xff]  ;;  %v8011_v62 = vld [vmem:[%s12155_s10 + $0x18] sm:$0xff] }
 0x56f   :  { %8200 = vmatpush.msra.mxu3 %v8071_v19  ;;  %8144 = vmatpush.msra.mxu0 %v8019_v51  ;;  %v8028_v23 = vld [vmem:[%s12155_s10 + $0xa0] sm:$0xff]  ;;  %v4258_v19 = vmul.f32 %v4242_v12, %v10188_v11  ;;  %v4268_v51 = vperm.slane %v11395_v47, 0  ;;  %v8062_v11 = vld [vmem:[%s12155_s10 + $0x1b0] sm:$0xff]  ;;  %v4271_v12 = vperm.slane %v11395_v47, 3 }
 0x570   :  { %7943 = vmatmul.bf16.vlgmr.msrb.gmra.mxu3 %v10926_v0  ;;  %8164 = vmatpush.msra.mxu1 %v8035_v24  ;;  %v8033_v0 = vld [vmem:[%s12155_s10 + $0xc8] sm:$0xff]  ;;  %v7751_v17 = vpop.f32.mrf.mxu0  ;;  %v8027_v24 = vld [vmem:[%s12155_s10 + $0x98] sm:$0xff]  ;;  %v8044_v5 = vld [vmem:[%s12155_s10 + $0x120] sm:$0xff] }
 0x571   :  { %8181 = vmatpush.msra.mxu2 %v8054_v53  ;;  %8201 = vmatpush.msra.mxu3 %v8070_v1  ;;  %v8046_v53 = vld [vmem:[%s12155_s10 + $0x130] sm:$0xff]  ;;  %v4259_v1 = vmul.f32 %v4243_v13, %v10321_v55  ;;  %v8045_v55 = vld [vmem:[%s12155_s10 + $0x128] sm:$0xff] }
 0x572   :  { %8145 = vmatpush.msra.mxu0 %v8018_v27  ;;  %8165 = vmatpush.msra.mxu1 %v8034_v26  ;;  %v7764_v3 = vpop.f32.mrf.mxu1  ;;  %v4269_v27 = vperm.slane %v11395_v47, 1  ;;  %v8010_v26 = vld [vmem:[%s12155_s10 + $0x10] sm:$0xff] }
 0x573   :  { %8182 = vmatpush.msra.mxu2 %v8053_v16  ;;  %8202 = vmatpush.msra.mxu3 %v8069_v4  ;;  %v8026_v16 = vld [vmem:[%s12155_s10 + $0x90] sm:$0xff]  ;;  %v8041_v3 = vld [vmem:[%s12155_s10 + $0x108] sm:$0xff] }
 0x574   :  { %8146 = vmatpush.msra.mxu0 %v8017_v44  ;;  %8166 = vmatpush.msra.mxu1 %v8033_v0  ;;  %v4244_v0 = vperm.slane %v11368_v39, 2  ;;  %v8042_v13 = vld [vmem:[%s12155_s10 + $0x110] sm:$0xff] }
 0x575   :  { %8183 = vmatpush.msra.mxu2 %v8052_v41  ;;  %8203 = vmatpush.msra.mxu3 %v8068_v54  ;;  %v8061_v41 = vld [vmem:[%s12155_s10 + $0x1a8] sm:$0xff]  ;;  %v8102_v17 = vld [vmem:[%s12155_s10 + $0x2f0] sm:$0xff] }
 0x576   :  { %8147 = vmatpush.msra.mxu0 %v8016_v61  ;;  %8167 = vmatpush.msra.mxu1 %v8032_v46  ;;  %v8009_v54 = vld [vmem:[%s12155_s10 + $0x8] sm:$0xff]  ;;  %v4284_v46 = vadd.f32 %v4268_v51, %v4258_v19 }
 0x577   :  { %8184 = vmatpush.msra.mxu2 %v8051_v14  ;;  %8204 = vmatpush.msra.mxu3 %v8067_v29  ;;  %v4245_v14 = vperm.slane %v11368_v39, 3  ;;  %v4285_v29 = vadd.f32 %v4269_v27, %v4259_v1  ;;  %v8085_v19 = vld [vmem:[%s12155_s10 + $0x268] sm:$0xff]  ;;  %v8084_v27 = vld [vmem:[%s12155_s10 + $0x260] sm:$0xff] }
 0x578   :  { %8148 = vmatpush.msra.mxu0 %v8015_v48  ;;  %8168 = vmatpush.msra.mxu1 %v8031_v31  ;;  %v7775_v4 = vpop.f32.mrf.mxu2  ;;  %v8060_v48 = vld [vmem:[%s12155_s10 + $0x1a0] sm:$0xff]  ;;  %v8101_v51 = vld [vmem:[%s12155_s10 + $0x2e8] sm:$0xff] }
 0x579   :  { %8185 = vmatpush.msra.mxu2 %v8050_v60  ;;  %8205 = vmatpush.msra.mxu3 %v8066_v7  ;;  %v7788_v44 = vpop.f32.mrf.mxu3  ;;  %v7776_v61 = vadd.f32 %v7775_v4, %v7763_v25  ;;  %v8008_v25 = vld [vmem:[%s12155_s10] sm:$0xff]  ;;  %v8043_v7 = vld [vmem:[%s12155_s10 + $0x118] sm:$0xff] }
 0x57a   :  { %8149 = vmatpush.msra.mxu0 %v8014_v57  ;;  %8169 = vmatpush.msra.mxu1 %v8030_v10  ;;  %v8024_v60 = vld [vmem:[%s12155_s10 + $0x80] sm:$0xff]  ;;  %v4260_v57 = vmul.f32 %v4244_v0, %v10481_v15  ;;  %v4270_v10 = vperm.slane %v11395_v47, 2  ;;  %v4293_v15 = vmax.f32 %v4285_v29, 0.0  ;;  %v8083_v4 = vld [vmem:[%s12155_s10 + $0x258] sm:$0xff]  ;;  %v8118_v0 = vld [vmem:[%s12155_s10 + $0x370] sm:$0xff] }
 0x57b   :  { %8186 = vmatpush.msra.mxu2 %v8049_v30  ;;  %8206 = vmatpush.msra.mxu3 %v8065_v35  ;;  %v11458_v31 = vadd.f32 %v7788_v44, %v7776_v61  ;;  %v8059_v30 = vld [vmem:[%s12155_s10 + $0x198] sm:$0xff]  ;;  %v4292_v35 = vmax.f32 %v4284_v46, 0.0  ;;  %v8098_v61 = vld [vmem:[%s12155_s10 + $0x2d0] sm:$0xff]  ;;  %v8117_v46 = vld [vmem:[%s12155_s10 + $0x368] sm:$0xff] }
 0x57c   :  { %8150 = vmatpush.msra.mxu0 %v8013_v8  ;;  %8170 = vmatpush.msra.mxu1 %v8029_v37  ;;  %v4261_v8 = vmul.f32 %v4245_v14, %v10643_v28  ;;  %v8087_v37 = vld [vmem:[%s12155_s10 + $0x278] sm:$0xff]  ;;  %v8058_v28 = vld [vmem:[%s12155_s10 + $0x190] sm:$0xff]  ;;  %v8133_v14 = vld [vmem:[%s12155_s10 + $0x3e8] sm:$0xff] }
 0x57d   :  { %8187 = vmatpush.msra.mxu2 %v8048_v63  ;;  %8207 = vmatpush.msra.mxu3 %v8064_v21  ;;  %v8103_v63 = vld [vmem:[%s12155_s10 + $0x2f8] sm:$0xff]  ;;  %v8086_v21 = vld [vmem:[%s12155_s10 + $0x270] sm:$0xff]  ;;  %v8116_v29 = vld [vmem:[%s12155_s10 + $0x360] sm:$0xff] }
 0x57e   :  { %8151 = vmatpush.msra.mxu0 %v8012_v18  ;;  %8171 = vmatpush.msra.mxu1 %v8028_v23  ;;  %v8099_v44 = vld [vmem:[%s12155_s10 + $0x2d8] sm:$0xff] }
 0x57f   :  { %8188 = vmatpush.msra.mxu2 %v8047_v52  ;;  %8208 = vmatpush.msra.mxu3 %v8063_v33  ;;  %v4286_v52 = vadd.f32 %v4270_v10, %v4260_v57  ;;  %v4287_v33 = vadd.f32 %v4271_v12, %v4261_v8  ;;  %v8096_v10 = vld [vmem:[%s12155_s10 + $0x2c0] sm:$0xff]  ;;  %v8095_v12 = vld [vmem:[%s12155_s10 + $0x2b8] sm:$0xff] }
 0x580   :  { %8152 = vmatpush.msra.mxu0 %v8011_v62  ;;  %8172 = vmatpush.msra.mxu1 %v8027_v24  ;;  %v7777_v18 = vpop.f32.mrf.mxu2  ;;  %v8057_v62 = vld [vmem:[%s12155_s10 + $0x188] sm:$0xff]  ;;  %v8040_v24 = vld [vmem:[%s12155_s10 + $0x100] sm:$0xff] }
 0x581   :  { %8189 = vmatpush.msra.mxu2 %v8046_v53  ;;  %8209 = vmatpush.msra.mxu3 %v8062_v11  ;;  %v7790_v23 = vpop.f32.mrf.mxu3  ;;  %v8056_v53 = vld [vmem:[%s12155_s10 + $0x180] sm:$0xff]  ;;  %v4294_v1 = vmax.f32 %v4286_v52, 0.0  ;;  %v4295_v11 = vmax.f32 %v4287_v33, 0.0  ;;  %v8077_v18 = vld [vmem:[%s12155_s10 + $0x228] sm:$0xff] }
 0x582   :  { %8153 = vmatpush.msra.mxu0 %v8010_v26  ;;  %8173 = vmatpush.msra.mxu1 %v8026_v16  ;;  %v8100_v26 = vld [vmem:[%s12155_s10 + $0x2e0] sm:$0xff]  ;;  %v8119_v16 = vld [vmem:[%s12155_s10 + $0x378] sm:$0xff]  ;;  %v4246_v23 = vperm.slane %v11368_v39, 4  ;;  %v8093_v52 = vld [vmem:[%s12155_s10 + $0x2a8] sm:$0xff] }
 0x583   :  { %8190 = vmatpush.msra.mxu2 %v8045_v55  ;;  %8210 = vmatpush.msra.mxu3 %v8061_v41  ;;  %v8135_v55 = vld [vmem:[%s12155_s10 + $0x3f8] sm:$0xff]  ;;  %v8134_v41 = vld [vmem:[%s12155_s10 + $0x3f0] sm:$0xff] }
 0x584   :  { %8154 = vmatpush.msra.mxu0 %v8009_v54  ;;  %8174 = vmatpush.msra.mxu1 %v8025_v49  ;;  %v8082_v54 = vld [vmem:[%s12155_s10 + $0x250] sm:$0xff]  ;;  %v8081_v49 = vld [vmem:[%s12155_s10 + $0x248] sm:$0xff] }
 0x585   :  { %8191 = vmatpush.msra.mxu2 %v8044_v5  ;;  %8211 = vmatpush.msra.mxu3 %v8060_v48  ;;  %v8097_v5 = vld [vmem:[%s12155_s10 + $0x2c8] sm:$0xff] }
 0x586   :  { %8155 = vmatpush.msra.mxu0 %v8008_v25  ;;  %8175 = vmatpush.msra.mxu1 %v8024_v60  ;;  %v8132_v60 = vld [vmem:[%s12155_s10 + $0x3e0] sm:$0xff] }
 0x587   :  { %8192 = vmatpush.msra.mxu2 %v8043_v7  ;;  %8212 = vmatpush.msra.mxu3 %v8059_v30  ;;  %v8080_v7 = vld [vmem:[%s12155_s10 + $0x240] sm:$0xff]  ;;  %v8115_v30 = vld [vmem:[%s12155_s10 + $0x358] sm:$0xff] }
 0x588   :  { %8156 = vmatmul.f32.vlgmr.msra.gmra.mxu0 %v4292_v35  ;;  %8176 = vmatmul.f32.vlgmr.msra.gmra.mxu1 %v4293_v15  ;;  %v8131_v35 = vld [vmem:[%s12155_s10 + $0x3d8] sm:$0xff]  ;;  %v8130_v15 = vld [vmem:[%s12155_s10 + $0x3d0] sm:$0xff] }
 0x589   :  { %8220 = vmatpush.msrb.mxu0 %v8087_v37  ;;  %8240 = vmatpush.msrb.mxu1 %v8103_v63  ;;  %v8114_v37 = vld [vmem:[%s12155_s10 + $0x350] sm:$0xff] }
 0x58a   :  { %8193 = vmatpush.msra.mxu2 %v8042_v13  ;;  %8213 = vmatpush.msra.mxu3 %v8058_v28  ;;  %v8078_v63 = vld [vmem:[%s12155_s10 + $0x230] sm:$0xff]  ;;  %v8113_v28 = vld [vmem:[%s12155_s10 + $0x348] sm:$0xff] }
 0x58b   :  { %8221 = vmatpush.msrb.mxu0 %v8086_v21  ;;  %8241 = vmatpush.msrb.mxu1 %v8102_v17  ;;  %v8094_v13 = vld [vmem:[%s12155_s10 + $0x2b0] sm:$0xff]  ;;  %v8129_v21 = vld [vmem:[%s12155_s10 + $0x3c8] sm:$0xff]  ;;  %v8112_v17 = vld [vmem:[%s12155_s10 + $0x340] sm:$0xff] }
 0x58c   :  { %8194 = vmatpush.msra.mxu2 %v8041_v3  ;;  %8214 = vmatpush.msra.mxu3 %v8057_v62  ;;  %v4247_v62 = vperm.slane %v11368_v39, 5 }
 0x58d   :  { %8222 = vmatpush.msrb.mxu0 %v8085_v19  ;;  %8242 = vmatpush.msrb.mxu1 %v8101_v51  ;;  %v8128_v19 = vld [vmem:[%s12155_s10 + $0x3c0] sm:$0xff] }
 0x58e   :  { %8195 = vmatpush.msra.mxu2 %v8040_v24  ;;  %8215 = vmatpush.msra.mxu3 %v8056_v53  ;;  %v8076_v51 = vld [vmem:[%s12155_s10 + $0x220] sm:$0xff]  ;;  %v8111_v53 = vld [vmem:[%s12155_s10 + $0x338] sm:$0xff] }
 0x58f   :  { %8196 = vmatmul.f32.vlgmr.msra.gmra.mxu2 %v4294_v1  ;;  %8216 = vmatmul.f32.vlgmr.msra.gmra.mxu3 %v4295_v11  ;;  %v8092_v24 = vld [vmem:[%s12155_s10 + $0x2a0] sm:$0xff]  ;;  %v8127_v1 = vld [vmem:[%s12155_s10 + $0x3b8] sm:$0xff]  ;;  %v4262_v11 = vmul.f32 %v4246_v23, %v10801_v50  ;;  %v8126_v50 = vld [vmem:[%s12155_s10 + $0x3b0] sm:$0xff] }
 0x590   :  { %8223 = vmatpush.msrb.mxu0 %v8084_v27  ;;  %8243 = vmatpush.msrb.mxu1 %v8100_v26  ;;  %v8075_v27 = vld [vmem:[%s12155_s10 + $0x218] sm:$0xff]  ;;  %v4272_v26 = vperm.slane %v11395_v47, 4 }
 0x591   :  { %8260 = vmatpush.msrb.mxu2 %v8119_v16  ;;  %8280 = vmatpush.msrb.mxu3 %v8135_v55  ;;  %v7801_v48 = vpop.f32.mrf.mxu0  ;;  %v8091_v16 = vld [vmem:[%s12155_s10 + $0x298] sm:$0xff]  ;;  %v8110_v55 = vld [vmem:[%s12155_s10 + $0x330] sm:$0xff] }
 0x592   :  { %8224 = vmatpush.msrb.mxu0 %v8083_v4  ;;  %8244 = vmatpush.msrb.mxu1 %v8099_v44  ;;  %v7814_v25 = vpop.f32.mrf.mxu1  ;;  %v7802_v57 = vadd.f32 %v7801_v48, %v11458_v31  ;;  %v8079_v31 = vld [vmem:[%s12155_s10 + $0x238] sm:$0xff]  ;;  %v4263_v4 = vmul.f32 %v4247_v62, %v10920_v2  ;;  %v4273_v44 = vperm.slane %v11395_v47, 5  ;;  %v8109_v2 = vld [vmem:[%s12155_s10 + $0x328] sm:$0xff]  ;;  %v4249_v48 = vperm.slane %v11368_v39, 7 }
 0x593   :  { %8261 = vmatpush.msrb.mxu2 %v8118_v0  ;;  %8281 = vmatpush.msrb.mxu3 %v8134_v41  ;;  %v8074_v0 = vld [vmem:[%s12155_s10 + $0x210] sm:$0xff]  ;;  %v8121_v62 = vld [vmem:[%s12155_s10 + $0x388] sm:$0xff] }
 0x594   :  { %8225 = vmatpush.msrb.mxu0 %v8082_v54  ;;  %8245 = vmatpush.msrb.mxu1 %v8098_v61  ;;  %v7815_v8 = vadd.f32 %v7814_v25, %v7802_v57  ;;  %v8090_v41 = vld [vmem:[%s12155_s10 + $0x290] sm:$0xff]  ;;  %v4248_v61 = vperm.slane %v11368_v39, 6  ;;  %v8089_v25 = vld [vmem:[%s12155_s10 + $0x288] sm:$0xff]  ;;  %v8124_v57 = vld [vmem:[%s12155_s10 + $0x3a0] sm:$0xff] }
 0x595   :  { %8262 = vmatpush.msrb.mxu2 %v8117_v46  ;;  %8282 = vmatpush.msrb.mxu3 %v8133_v14  ;;  %v8125_v46 = vld [vmem:[%s12155_s10 + $0x3a8] sm:$0xff]  ;;  %v8072_v39 = vld [vmem:[%s12155_s10 + $0x200] sm:$0xff] }
 0x596   :  { %8226 = vmatpush.msrb.mxu0 %v8081_v49  ;;  %8246 = vmatpush.msrb.mxu1 %v8097_v5  ;;  %v8073_v14 = vld [vmem:[%s12155_s10 + $0x208] sm:$0xff] }
 0x597   :  { %8263 = vmatpush.msrb.mxu2 %v8116_v29  ;;  %8283 = vmatpush.msrb.mxu3 %v8132_v60  ;;  %v4288_v29 = vadd.f32 %v4272_v26, %v4262_v11  ;;  %v8108_v60 = vld [vmem:[%s12155_s10 + $0x320] sm:$0xff] }
 0x598   :  { %8227 = vmatpush.msrb.mxu0 %v8080_v7  ;;  %8247 = vmatpush.msrb.mxu1 %v8096_v10  ;;  %v4289_v7 = vadd.f32 %v4273_v44, %v4263_v4  ;;  %v8328_v26 = vld [vmem:[%s12157_s12 + $0xe0] sm:$0xff]  ;;  %v8311_v4 = vld [vmem:[%s12157_s12 + $0x58] sm:$0xff] }
 0x599   :  { %8264 = vmatpush.msrb.mxu2 %v8115_v30  ;;  %8284 = vmatpush.msrb.mxu3 %v8131_v35  ;;  %v7803_v3 = vpop.f32.mrf.mxu0  ;;  %v8088_v30 = vld [vmem:[%s12155_s10 + $0x280] sm:$0xff]  ;;  %v8107_v35 = vld [vmem:[%s12155_s10 + $0x318] sm:$0xff] }
 0x59a   :  { %8228 = vmatpush.msrb.mxu0 %v8079_v31  ;;  %8248 = vmatpush.msrb.mxu1 %v8095_v12  ;;  %v7816_v33 = vpop.f32.mrf.mxu1  ;;  %v4264_v31 = vmul.f32 %v4248_v61, %v10977_v40  ;;  %v8123_v12 = vld [vmem:[%s12155_s10 + $0x398] sm:$0xff]  ;;  %v4297_v40 = vmax.f32 %v4289_v7, 0.0  ;;  %v8361_v61 = vld [vmem:[%s12157_s12 + $0x1e8] sm:$0xff] }
 0x59b   :  { %8265 = vmatpush.msrb.mxu2 %v8114_v37  ;;  %8285 = vmatpush.msrb.mxu3 %v8130_v15  ;;  %v4296_v37 = vmax.f32 %v4288_v29, 0.0  ;;  %v4265_v15 = vmul.f32 %v4249_v48, %v11026_v34  ;;  %v8122_v34 = vld [vmem:[%s12155_s10 + $0x390] sm:$0xff]  ;;  %v8327_v44 = vld [vmem:[%s12157_s12 + $0xd8] sm:$0xff]  ;;  %v8324_v29 = vld [vmem:[%s12157_s12 + $0xc0] sm:$0xff] }
 0x59c   :  { %8229 = vmatpush.msrb.mxu0 %v8078_v63  ;;  %8249 = vmatpush.msrb.mxu1 %v8094_v13  ;;  %v4275_v63 = vperm.slane %v11395_v47, 7  ;;  %v8315_v13 = vld [vmem:[%s12157_s12 + $0x78] sm:$0xff] }
 0x59d   :  { %8266 = vmatpush.msrb.mxu2 %v8113_v28  ;;  %8286 = vmatpush.msrb.mxu3 %v8129_v21  ;;  %v8331_v28 = vld [vmem:[%s12157_s12 + $0xf8] sm:$0xff]  ;;  %v8106_v21 = vld [vmem:[%s12155_s10 + $0x310] sm:$0xff] }
 0x59e   :  { %8230 = vmatpush.msrb.mxu0 %v8077_v18  ;;  %8250 = vmatpush.msrb.mxu1 %v8093_v52  ;;  %v8330_v52 = vld [vmem:[%s12157_s12 + $0xf0] sm:$0xff]  ;;  %v4291_v33 = vadd.f32 %v4275_v63, %v4265_v15  ;;  %v8343_v48 = vld [vmem:[%s12157_s12 + $0x158] sm:$0xff] }
 0x59f   :  { %8267 = vmatpush.msrb.mxu2 %v8112_v17  ;;  %8287 = vmatpush.msrb.mxu3 %v8128_v19  ;;  %v8105_v17 = vld [vmem:[%s12155_s10 + $0x308] sm:$0xff]  ;;  %v8307_v7 = vld [vmem:[%s12157_s12 + $0x38] sm:$0xff] }
 0x5a0   :  { %8231 = vmatpush.msrb.mxu0 %v8076_v51  ;;  %8251 = vmatpush.msrb.mxu1 %v8092_v24  ;;  %v8313_v19 = vld [vmem:[%s12157_s12 + $0x68] sm:$0xff]  ;;  %v8104_v24 = vld [vmem:[%s12155_s10 + $0x300] sm:$0xff]  ;;  %v4299_v11 = vmax.f32 %v4291_v33, 0.0  ;;  %v8303_v33 = vld [vmem:[%s12157_s12 + $0x18] sm:$0xff] }
 0x5a1   :  { %8268 = vmatpush.msrb.mxu2 %v8111_v53  ;;  %8288 = vmatpush.msrb.mxu3 %v8127_v1  ;;  %v7827_v54 = vpop.f32.mrf.mxu2  ;;  %v8329_v51 = vld [vmem:[%s12157_s12 + $0xe8] sm:$0xff]  ;;  %v8120_v53 = vld [vmem:[%s12155_s10 + $0x380] sm:$0xff] }
 0x5a2   :  { %8232 = vmatpush.msrb.mxu0 %v8075_v27  ;;  %8252 = vmatpush.msrb.mxu1 %v8091_v16  ;;  %v7828_v49 = vadd.f32 %v7827_v54, %v7815_v8  ;;  %v7840_v5 = vpop.f32.mrf.mxu3  ;;  %v4274_v8 = vperm.slane %v11395_v47, 6  ;;  %v8314_v47 = vld [vmem:[%s12157_s12 + $0x70] sm:$0xff]  ;;  %v8312_v27 = vld [vmem:[%s12157_s12 + $0x60] sm:$0xff]  ;;  %v8347_v16 = vld [vmem:[%s12157_s12 + $0x178] sm:$0xff] }
 0x5a3   :  { %8269 = vmatpush.msrb.mxu2 %v8110_v55  ;;  %8289 = vmatpush.msrb.mxu3 %v8126_v50  ;;  %v8363_v55 = vld [vmem:[%s12157_s12 + $0x1f8] sm:$0xff]  ;;  %v8346_v50 = vld [vmem:[%s12157_s12 + $0x170] sm:$0xff] }
 0x5a4   :  { %8233 = vmatpush.msrb.mxu0 %v8074_v0  ;;  %8253 = vmatpush.msrb.mxu1 %v8090_v41  ;;  %v11665_v10 = vadd.f32 %v7840_v5, %v7828_v49  ;;  %v4290_v23 = vadd.f32 %v4274_v8, %v4264_v31  ;;  %v7347_v0 = vadd.f32 %v11121_v42, %v11119_v9  ;;  %v8362_v41 = vld [vmem:[%s12157_s12 + $0x1f0] sm:$0xff]  ;;  %v8345_v9 = vld [vmem:[%s12157_s12 + $0x168] sm:$0xff]  ;;  %v8360_v49 = vld [vmem:[%s12157_s12 + $0x1e0] sm:$0xff] }
 0x5a5   :  { %8270 = vmatpush.msrb.mxu2 %v8109_v2  ;;  %8290 = vmatpush.msrb.mxu3 %v8125_v46  ;;  %v8310_v2 = vld [vmem:[%s12157_s12 + $0x50] sm:$0xff]  ;;  %v8309_v46 = vld [vmem:[%s12157_s12 + $0x48] sm:$0xff]  ;;  %v8308_v5 = vld [vmem:[%s12157_s12 + $0x40] sm:$0xff] }
 0x5a6   :  { %8234 = vmatpush.msrb.mxu0 %v8073_v14  ;;  %8254 = vmatpush.msrb.mxu1 %v8089_v25  ;;  %v4298_v1 = vmax.f32 %v4290_v23, 0.0  ;;  %v8326_v54 = vld [vmem:[%s12157_s12 + $0xd0] sm:$0xff]  ;;  %v7360_v42 = vadd.f32 %v11126_v45, %v7347_v0  ;;  %v8325_v14 = vld [vmem:[%s12157_s12 + $0xc8] sm:$0xff]  ;;  %v8344_v45 = vld [vmem:[%s12157_s12 + $0x160] sm:$0xff] }
 0x5a7   :  { %8271 = vmatpush.msrb.mxu2 %v8108_v60  ;;  %8291 = vmatpush.msrb.mxu3 %v8124_v57  ;;  %v8359_v60 = vld [vmem:[%s12157_s12 + $0x1d8] sm:$0xff]  ;;  %v8306_v31 = vld [vmem:[%s12157_s12 + $0x30] sm:$0xff]  ;;  %v8304_v23 = vld [vmem:[%s12157_s12 + $0x20] sm:$0xff] }
 0x5a8   :  { %8235 = vmatpush.msrb.mxu0 %v8072_v39  ;;  %8255 = vmatpush.msrb.mxu1 %v8088_v30  ;;  %v7373_v25 = vadd.f32 %v11128_v32, %v7360_v42  ;;  %v8323_v57 = vld [vmem:[%s12157_s12 + $0xb8] sm:$0xff]  ;;  %v8342_v32 = vld [vmem:[%s12157_s12 + $0x150] sm:$0xff]  ;;  %v11789_v39 = vld [vmem:[#allocation9] sm:$0xff] }
 0x5a9   :  { %8272 = vmatpush.msrb.mxu2 %v8107_v35  ;;  %8292 = vmatpush.msrb.mxu3 %v8123_v12  ;;  %v7829_v18 = vpop.f32.mrf.mxu2  ;;  %v8358_v35 = vld [vmem:[%s12157_s12 + $0x1d0] sm:$0xff]  ;;  %v8357_v12 = vld [vmem:[%s12157_s12 + $0x1c8] sm:$0xff]  ;;  %v7950_v63 = vperm.slane %v11789_v39, 0  ;;  %v8336_v0 = vld [vmem:[%s12157_s12 + $0x120] sm:$0xff] }
 0x5aa   :  { %8236 = vmatmul.f32.vlgmr.msrb.gmra.mxu0 %v4296_v37  ;;  %8256 = vmatmul.f32.vlgmr.msrb.gmra.mxu1 %v4297_v40  ;;  %v7842_v3 = vpop.f32.mrf.mxu3  ;;  %v7386_v30 = vadd.f32 %v11134_v43, %v7373_v25  ;;  %v8322_v8 = vld [vmem:[%s12157_s12 + $0xb0] sm:$0xff]  ;;  %v8341_v43 = vld [vmem:[%s12157_s12 + $0x148] sm:$0xff]  ;;  %v8340_v40 = vld [vmem:[%s12157_s12 + $0x140] sm:$0xff] }
 0x5ab   :  { %8432 = vmatpush.msra.mxu0 %v8315_v13  ;;  %8452 = vmatpush.msra.mxu1 %v8331_v28  ;;  %v8305_v37 = vld [vmem:[%s12157_s12 + $0x28] sm:$0xff]  ;;  %v8356_v18 = vld [vmem:[%s12157_s12 + $0x1c0] sm:$0xff]  ;;  %v8355_v3 = vld [vmem:[%s12157_s12 + $0x1b8] sm:$0xff] }
 0x5ac   :  { %8273 = vmatpush.msrb.mxu2 %v8106_v21  ;;  %8293 = vmatpush.msrb.mxu3 %v8122_v34  ;;  %v8321_v13 = vld [vmem:[%s12157_s12 + $0xa8] sm:$0xff]  ;;  %v11821_v21 = vld [vmem:[#allocation10] sm:$0xff]  ;;  %v7951_v34 = vperm.slane %v11789_v39, 1  ;;  %v8316_v42 = vld [vmem:[%s12157_s12 + $0x80] sm:$0xff] }
 0x5ad   :  { %8433 = vmatpush.msra.mxu0 %v8314_v47  ;;  %8453 = vmatpush.msra.mxu1 %v8330_v52  ;;  %v7399_v47 = vadd.f32 %v11136_v6, %v7386_v30  ;;  %v8320_v52 = vld [vmem:[%s12157_s12 + $0xa0] sm:$0xff]  ;;  %v8339_v6 = vld [vmem:[%s12157_s12 + $0x138] sm:$0xff] }
 0x5ae   :  { %8274 = vmatpush.msrb.mxu2 %v8105_v17  ;;  %8294 = vmatpush.msrb.mxu3 %v8121_v62  ;;  %v7966_v62 = vmul.f32 %v7950_v63, %v11075_v59  ;;  %v8354_v59 = vld [vmem:[%s12157_s12 + $0x1b0] sm:$0xff]  ;;  %v8393_v63 = vld [vmem:[%s12157_s12 + $0x2e8] sm:$0xff] }
 0x5af   :  { %8434 = vmatpush.msra.mxu0 %v8313_v19  ;;  %8454 = vmatpush.msra.mxu1 %v8329_v51  ;;  %v7412_v17 = vadd.f32 %v11138_v58, %v7399_v47  ;;  %v7976_v19 = vperm.slane %v11821_v21, 0  ;;  %v8319_v58 = vld [vmem:[%s12157_s12 + $0x98] sm:$0xff]  ;;  %v8338_v51 = vld [vmem:[%s12157_s12 + $0x130] sm:$0xff]  ;;  %v8376_v47 = vld [vmem:[%s12157_s12 + $0x260] sm:$0xff] }
 0x5b0   :  { %8275 = vmatpush.msrb.mxu2 %v8104_v24  ;;  %8295 = vmatpush.msrb.mxu3 %v8120_v53  ;;  %v7967_v24 = vmul.f32 %v7951_v34, %v11124_v38  ;;  %v7977_v53 = vperm.slane %v11821_v21, 1  ;;  %v8337_v38 = vld [vmem:[%s12157_s12 + $0x128] sm:$0xff] }
 0x5b1   :  { %8276 = vmatmul.f32.vlgmr.msrb.gmra.mxu2 %v4298_v1  ;;  %8296 = vmatmul.f32.vlgmr.msrb.gmra.mxu3 %v4299_v11  ;;  %v8302_v1 = vld [vmem:[%s12157_s12 + $0x10] sm:$0xff]  ;;  %v7425_v11 = vadd.f32 %v11140_v36, %v7412_v17  ;;  %v8317_v36 = vld [vmem:[%s12157_s12 + $0x88] sm:$0xff]  ;;  %v8427_v17 = vld [vmem:[%s12157_s12 + $0x3f8] sm:$0xff] }
 0x5b2   :  { %8435 = vmatpush.msra.mxu0 %v8312_v27  ;;  %8455 = vmatpush.msra.mxu1 %v8328_v26  ;;  %v8318_v27 = vld [vmem:[%s12157_s12 + $0x90] sm:$0xff]  ;;  %v7952_v26 = vperm.slane %v11789_v39, 2 }
 0x5b3   :  { %8472 = vmatpush.msra.mxu2 %v8347_v16  ;;  %8492 = vmatpush.msra.mxu3 %v8363_v55  ;;  %v8353_v16 = vld [vmem:[%s12157_s12 + $0x1a8] sm:$0xff] }
 0x5b4   :  { %8436 = vmatpush.msra.mxu0 %v8311_v4  ;;  %8456 = vmatpush.msra.mxu1 %v8327_v44  ;;  %v8301_v55 = vld [vmem:[%s12157_s12 + $0x8] sm:$0xff]  ;;  %v7992_v44 = vadd.f32 %v7976_v19, %v7966_v62  ;;  %v8374_v19 = vld [vmem:[%s12157_s12 + $0x250] sm:$0xff] }
 0x5b5   :  { %8473 = vmatpush.msra.mxu2 %v8346_v50  ;;  %8493 = vmatpush.msra.mxu3 %v8362_v41  ;;  %v7953_v50 = vperm.slane %v11789_v39, 3 }
 0x5b6   :  { %8437 = vmatpush.msra.mxu0 %v8310_v2  ;;  %8457 = vmatpush.msra.mxu1 %v8326_v54  ;;  %v7993_v2 = vadd.f32 %v7977_v53, %v7967_v24  ;;  %v8352_v54 = vld [vmem:[%s12157_s12 + $0x1a0] sm:$0xff]  ;;  %v8409_v24 = vld [vmem:[%s12157_s12 + $0x368] sm:$0xff] }
 0x5b7   :  { %8474 = vmatpush.msra.mxu2 %v8345_v9  ;;  %8494 = vmatpush.msra.mxu3 %v8361_v61  ;;  %v8300_v9 = vld [vmem:[%s12157_s12] sm:$0xff]  ;;  %v8335_v61 = vld [vmem:[%s12157_s12 + $0x118] sm:$0xff] }
 0x5b8   :  { %8438 = vmatpush.msra.mxu0 %v8309_v46  ;;  %8458 = vmatpush.msra.mxu1 %v8325_v14  ;;  %v7968_v46 = vmul.f32 %v7952_v26, %v7425_v11  ;;  %v7978_v14 = vperm.slane %v11821_v21, 2  ;;  %v8001_v25 = vmax.f32 %v7993_v2, 0.0  ;;  %v8372_v11 = vld [vmem:[%s12157_s12 + $0x240] sm:$0xff]  ;;  %v8386_v2 = vld [vmem:[%s12157_s12 + $0x2b0] sm:$0xff] }
 0x5b9   :  { %8475 = vmatpush.msra.mxu2 %v8344_v45  ;;  %8495 = vmatpush.msra.mxu3 %v8360_v49  ;;  %v8351_v45 = vld [vmem:[%s12157_s12 + $0x198] sm:$0xff]  ;;  %v8000_v49 = vmax.f32 %v7992_v44, 0.0  ;;  %v8424_v26 = vld [vmem:[%s12157_s12 + $0x3e0] sm:$0xff] }
 0x5ba   :  { %8439 = vmatpush.msra.mxu0 %v8308_v5  ;;  %8459 = vmatpush.msra.mxu1 %v8324_v29  ;;  %v11810_v15 = vpop.f32.mrf.mxu0  ;;  %v7969_v5 = vmul.f32 %v7953_v50, %v11197_v22  ;;  %v7979_v29 = vperm.slane %v11821_v21, 3  ;;  %v8350_v22 = vld [vmem:[%s12157_s12 + $0x190] sm:$0xff]  ;;  %v7994_v30 = vadd.f32 %v7978_v14, %v7968_v46  ;;  %v8423_v44 = vld [vmem:[%s12157_s12 + $0x3d8] sm:$0xff]  ;;  %v7955_v46 = vperm.slane %v11789_v39, 5  ;;  %v8385_v14 = vld [vmem:[%s12157_s12 + $0x2a8] sm:$0xff] }
 0x5bb   :  { %8476 = vmatpush.msra.mxu2 %v8343_v48  ;;  %8496 = vmatpush.msra.mxu3 %v8359_v60  ;;  %v8379_v48 = vld [vmem:[%s12157_s12 + $0x278] sm:$0xff] }
 0x5bc   :  { %8440 = vmatpush.msra.mxu0 %v8307_v7  ;;  %8460 = vmatpush.msra.mxu1 %v8323_v57  ;;  %v11819_v28 = vpop.f32.mrf.mxu1  ;;  %v8395_v60 = vld [vmem:[%s12157_s12 + $0x2f8] sm:$0xff]  ;;  %v8334_v7 = vld [vmem:[%s12157_s12 + $0x110] sm:$0xff]  ;;  %v8002_v34 = vmax.f32 %v7994_v30, 0.0  ;;  %v7981_v30 = vperm.slane %v11821_v21, 5 }
 0x5bd   :  { %8477 = vmatpush.msra.mxu2 %v8342_v32  ;;  %8497 = vmatpush.msra.mxu3 %v8358_v35  ;;  %v8378_v57 = vld [vmem:[%s12157_s12 + $0x270] sm:$0xff]  ;;  %v8387_v50 = vld [vmem:[%s12157_s12 + $0x2b8] sm:$0xff] }
 0x5be   :  { %8441 = vmatpush.msra.mxu0 %v8306_v31  ;;  %8461 = vmatpush.msra.mxu1 %v8322_v8  ;;  %v8394_v35 = vld [vmem:[%s12157_s12 + $0x2f0] sm:$0xff]  ;;  %v8333_v31 = vld [vmem:[%s12157_s12 + $0x108] sm:$0xff]  ;;  %v7995_v8 = vadd.f32 %v7979_v29, %v7969_v5  ;;  %v8420_v5 = vld [vmem:[%s12157_s12 + $0x3c0] sm:$0xff] }
 0x5bf   :  { %8478 = vmatpush.msra.mxu2 %v8341_v43  ;;  %8498 = vmatpush.msra.mxu3 %v8357_v12  ;;  %v8349_v43 = vld [vmem:[%s12157_s12 + $0x188] sm:$0xff]  ;;  %v8384_v29 = vld [vmem:[%s12157_s12 + $0x2a0] sm:$0xff] }
 0x5c0   :  { %8442 = vmatpush.msra.mxu0 %v8305_v37  ;;  %8462 = vmatpush.msra.mxu1 %v8321_v13  ;;  %v8377_v12 = vld [vmem:[%s12157_s12 + $0x268] sm:$0xff]  ;;  %v8332_v13 = vld [vmem:[%s12157_s12 + $0x100] sm:$0xff] }
 0x5c1   :  { %8479 = vmatpush.msra.mxu2 %v8340_v40  ;;  %8499 = vmatpush.msra.mxu3 %v8356_v18  ;;  %v8348_v40 = vld [vmem:[%s12157_s12 + $0x180] sm:$0xff]  ;;  %v8003_v18 = vmax.f32 %v7995_v8, 0.0  ;;  %v7867_v8 = vadd.f32 %v11819_v28, %v11810_v15  ;;  %v8401_v15 = vld [vmem:[%s12157_s12 + $0x328] sm:$0xff] }
 0x5c2   :  { %8443 = vmatpush.msra.mxu0 %v8304_v23  ;;  %8463 = vmatpush.msra.mxu1 %v8320_v52  ;;  %v7855_v4 = vpop.f32.mrf.mxu0  ;;  %v8392_v23 = vld [vmem:[%s12157_s12 + $0x2e0] sm:$0xff]  ;;  %v8411_v52 = vld [vmem:[%s12157_s12 + $0x378] sm:$0xff] }
 0x5c3   :  { %8480 = vmatpush.msra.mxu2 %v8339_v6  ;;  %8500 = vmatpush.msra.mxu3 %v8355_v3  ;;  %v8375_v6 = vld [vmem:[%s12157_s12 + $0x258] sm:$0xff] }
 0x5c4   :  { %8444 = vmatpush.msra.mxu0 %v8303_v33  ;;  %8464 = vmatpush.msra.mxu1 %v8319_v58  ;;  %v7868_v41 = vpop.f32.mrf.mxu1  ;;  %v8391_v3 = vld [vmem:[%s12157_s12 + $0x2d8] sm:$0xff]  ;;  %v8410_v33 = vld [vmem:[%s12157_s12 + $0x370] sm:$0xff] }
 0x5c5   :  { %8481 = vmatpush.msra.mxu2 %v8338_v51  ;;  %8501 = vmatpush.msra.mxu3 %v8354_v59  ;;  %v8426_v58 = vld [vmem:[%s12157_s12 + $0x3f0] sm:$0xff]  ;;  %v8373_v59 = vld [vmem:[%s12157_s12 + $0x248] sm:$0xff]  ;;  %v8371_v4 = vld [vmem:[%s12157_s12 + $0x238] sm:$0xff] }
 0x5c6   :  { %8445 = vmatpush.msra.mxu0 %v8302_v1  ;;  %8465 = vmatpush.msra.mxu1 %v8318_v27  ;;  %v8390_v51 = vld [vmem:[%s12157_s12 + $0x2d0] sm:$0xff]  ;;  %v8425_v1 = vld [vmem:[%s12157_s12 + $0x3e8] sm:$0xff] }
 0x5c7   :  { %8482 = vmatpush.msra.mxu2 %v8337_v38  ;;  %8502 = vmatpush.msra.mxu3 %v8353_v16  ;;  %v8389_v27 = vld [vmem:[%s12157_s12 + $0x2c8] sm:$0xff]  ;;  %v8408_v38 = vld [vmem:[%s12157_s12 + $0x360] sm:$0xff]  ;;  %v8422_v41 = vld [vmem:[%s12157_s12 + $0x3d0] sm:$0xff] }
 0x5c8   :  { %8446 = vmatpush.msra.mxu0 %v8301_v55  ;;  %8466 = vmatpush.msra.mxu1 %v8317_v36  ;;  %v8388_v16 = vld [vmem:[%s12157_s12 + $0x2c0] sm:$0xff]  ;;  %v8407_v55 = vld [vmem:[%s12157_s12 + $0x358] sm:$0xff]  ;;  %v8406_v36 = vld [vmem:[%s12157_s12 + $0x350] sm:$0xff] }
 0x5c9   :  { %8483 = vmatpush.msra.mxu2 %v8336_v0  ;;  %8503 = vmatpush.msra.mxu3 %v8352_v54  ;;  %v8370_v0 = vld [vmem:[%s12157_s12 + $0x230] sm:$0xff]  ;;  %v8405_v54 = vld [vmem:[%s12157_s12 + $0x348] sm:$0xff] }
 0x5ca   :  { %8447 = vmatpush.msra.mxu0 %v8300_v9  ;;  %8467 = vmatpush.msra.mxu1 %v8316_v42  ;;  %v11914_v32 = vpop.f32.mrf.mxu2  ;;  %v8369_v9 = vld [vmem:[%s12157_s12 + $0x228] sm:$0xff] }
 0x5cb   :  { %8484 = vmatpush.msra.mxu2 %v8335_v61  ;;  %8504 = vmatpush.msra.mxu3 %v8351_v45  ;;  %v11928_v37 = vpop.f32.mrf.mxu3  ;;  %v8421_v42 = vld [vmem:[%s12157_s12 + $0x3c8] sm:$0xff]  ;;  %v7954_v61 = vperm.slane %v11789_v39, 4  ;;  %v8404_v45 = vld [vmem:[%s12157_s12 + $0x340] sm:$0xff] }
 0x5cc   :  { %8448 = vmatmul.f32.vlgmr.msra.gmra.mxu0 %v8000_v49  ;;  %8468 = vmatmul.f32.vlgmr.msra.gmra.mxu1 %v8001_v25  ;;  %v8368_v49 = vld [vmem:[%s12157_s12 + $0x220] sm:$0xff]  ;;  %v8367_v25 = vld [vmem:[%s12157_s12 + $0x218] sm:$0xff] }
 0x5cd   :  { %8512 = vmatpush.msrb.mxu0 %v8379_v48  ;;  %8532 = vmatpush.msrb.mxu1 %v8395_v60  ;;  %v8403_v48 = vld [vmem:[%s12157_s12 + $0x338] sm:$0xff] }
 0x5ce   :  { %8485 = vmatpush.msra.mxu2 %v8334_v7  ;;  %8505 = vmatpush.msra.mxu3 %v8350_v22  ;;  %v8419_v60 = vld [vmem:[%s12157_s12 + $0x3b8] sm:$0xff]  ;;  %v7970_v7 = vmul.f32 %v7954_v61, %v11246_v56  ;;  %v7980_v22 = vperm.slane %v11821_v21, 4  ;;  %v8366_v56 = vld [vmem:[%s12157_s12 + $0x210] sm:$0xff] }
 0x5cf   :  { %8513 = vmatpush.msrb.mxu0 %v8378_v57  ;;  %8533 = vmatpush.msrb.mxu1 %v8394_v35  ;;  %v7971_v57 = vmul.f32 %v7955_v46, %v11307_v20  ;;  %v8383_v35 = vld [vmem:[%s12157_s12 + $0x298] sm:$0xff] }
 0x5d0   :  { %8486 = vmatpush.msra.mxu2 %v8333_v31  ;;  %8506 = vmatpush.msra.mxu3 %v8349_v43  ;;  %v8402_v31 = vld [vmem:[%s12157_s12 + $0x330] sm:$0xff] }
 0x5d1   :  { %8514 = vmatpush.msrb.mxu0 %v8377_v12  ;;  %8534 = vmatpush.msrb.mxu1 %v8393_v63  ;;  %v8418_v43 = vld [vmem:[%s12157_s12 + $0x3b0] sm:$0xff]  ;;  %v7956_v12 = vperm.slane %v11789_v39, 6 }
 0x5d2   :  { %8487 = vmatpush.msra.mxu2 %v8332_v13  ;;  %8507 = vmatpush.msra.mxu3 %v8348_v40  ;;  %v7881_v62 = vpop.f32.mrf.mxu2  ;;  %v8382_v63 = vld [vmem:[%s12157_s12 + $0x290] sm:$0xff]  ;;  %v7880_v13 = vadd.f32 %v11914_v32, %v7867_v8  ;;  %v8365_v40 = vld [vmem:[%s12157_s12 + $0x208] sm:$0xff]  ;;  %v8400_v32 = vld [vmem:[%s12157_s12 + $0x320] sm:$0xff] }
 0x5d3   :  { %8488 = vmatmul.f32.vlgmr.msra.gmra.mxu2 %v8002_v34  ;;  %8508 = vmatmul.f32.vlgmr.msra.gmra.mxu3 %v8003_v18  ;;  %v7894_v53 = vpop.f32.mrf.mxu3  ;;  %v8417_v34 = vld [vmem:[%s12157_s12 + $0x3a8] sm:$0xff]  ;;  %v7997_v18 = vadd.f32 %v7981_v30, %v7971_v57  ;;  %v8399_v62 = vld [vmem:[%s12157_s12 + $0x318] sm:$0xff] }
 0x5d4   :  { %8515 = vmatpush.msrb.mxu0 %v8376_v47  ;;  %8535 = vmatpush.msrb.mxu1 %v8392_v23  ;;  %v7996_v47 = vadd.f32 %v7980_v22, %v7970_v7  ;;  %v8381_v23 = vld [vmem:[%s12157_s12 + $0x288] sm:$0xff] }
 0x5d5   :  { %8552 = vmatpush.msrb.mxu2 %v8411_v52  ;;  %8572 = vmatpush.msrb.mxu3 %v8427_v17  ;;  %v8364_v52 = vld [vmem:[%s12157_s12 + $0x200] sm:$0xff]  ;;  %v7972_v17 = vmul.f32 %v7956_v12, %v11665_v10  ;;  %v8398_v10 = vld [vmem:[%s12157_s12 + $0x310] sm:$0xff] }
 0x5d6   :  { %8516 = vmatpush.msrb.mxu0 %v8375_v6  ;;  %8536 = vmatpush.msrb.mxu1 %v8391_v3  ;;  %v8416_v6 = vld [vmem:[%s12157_s12 + $0x3a0] sm:$0xff]  ;;  %v7982_v3 = vperm.slane %v11821_v21, 6 }
 0x5d7   :  { %8553 = vmatpush.msrb.mxu2 %v8410_v33  ;;  %8573 = vmatpush.msrb.mxu3 %v8426_v58  ;;  %v8380_v33 = vld [vmem:[%s12157_s12 + $0x280] sm:$0xff]  ;;  %v8004_v58 = vmax.f32 %v7996_v47, 0.0 }
 0x5d8   :  { %8517 = vmatpush.msrb.mxu0 %v8374_v19  ;;  %8537 = vmatpush.msrb.mxu1 %v8390_v51  ;;  %v7893_v19 = vadd.f32 %v11928_v37, %v7880_v13  ;;  %v8005_v51 = vmax.f32 %v7997_v18, 0.0  ;;  %v8397_v37 = vld [vmem:[%s12157_s12 + $0x308] sm:$0xff] }
 0x5d9   :  { %8554 = vmatpush.msrb.mxu2 %v8409_v24  ;;  %8574 = vmatpush.msrb.mxu3 %v8425_v1  ;;  %v8415_v24 = vld [vmem:[%s12157_s12 + $0x398] sm:$0xff]  ;;  %v7998_v1 = vadd.f32 %v7982_v3, %v7972_v17 }
 0x5da   :  { %8518 = vmatpush.msrb.mxu0 %v8373_v59  ;;  %8538 = vmatpush.msrb.mxu1 %v8389_v27 }
 0x5db   :  { %8555 = vmatpush.msrb.mxu2 %v8408_v38  ;;  %8575 = vmatpush.msrb.mxu3 %v8424_v26  ;;  %v8414_v38 = vld [vmem:[%s12157_s12 + $0x390] sm:$0xff]  ;;  %v8413_v26 = vld [vmem:[%s12157_s12 + $0x388] sm:$0xff] }
 0x5dc   :  { %8519 = vmatpush.msrb.mxu0 %v8372_v11  ;;  %8539 = vmatpush.msrb.mxu1 %v8388_v16  ;;  %v8396_v11 = vld [vmem:[%s12157_s12 + $0x300] sm:$0xff] }
 0x5dd   :  { %8556 = vmatpush.msrb.mxu2 %v8407_v55  ;;  %8576 = vmatpush.msrb.mxu3 %v8423_v44  ;;  %v8006_v55 = vmax.f32 %v7998_v1, 0.0  ;;  %v8412_v44 = vld [vmem:[%s12157_s12 + $0x380] sm:$0xff] }
 0x5de   :  { %8520 = vmatpush.msrb.mxu0 %v8371_v4  ;;  %8540 = vmatpush.msrb.mxu1 %v8387_v50 }
 0x5df   :  { %8557 = vmatpush.msrb.mxu2 %v8406_v36  ;;  %8577 = vmatpush.msrb.mxu3 %v8422_v41 }
 0x5e0   :  { %8521 = vmatpush.msrb.mxu0 %v8370_v0  ;;  %8541 = vmatpush.msrb.mxu1 %v8386_v2  ;;  %v7957_v0 = vperm.slane %v11789_v39, 7  ;;  %v7983_v2 = vperm.slane %v11821_v21, 7 }
 0x5e1   :  { %8558 = vmatpush.msrb.mxu2 %v8405_v54  ;;  %8578 = vmatpush.msrb.mxu3 %v8421_v42 }
 0x5e2   :  { %8522 = vmatpush.msrb.mxu0 %v8369_v9  ;;  %8542 = vmatpush.msrb.mxu1 %v8385_v14  ;;  %v7905_v20 = vpop.f32.mrf.mxu0  ;;  %v8659_v14 = vld [vmem:[%s12156_s11] ss:$0 sm:$0xff] }
 0x5e3   :  { %8559 = vmatpush.msrb.mxu2 %v8404_v45  ;;  %8579 = vmatpush.msrb.mxu3 %v8420_v5  ;;  %v7906_v53 = vadd.f32 %v7905_v20, %v7893_v19 }
 0x5e4   :  { %8523 = vmatpush.msrb.mxu0 %v8368_v49  ;;  %8543 = vmatpush.msrb.mxu1 %v8384_v29  ;;  %v7918_v28 = vpop.f32.mrf.mxu1 }
 0x5e5   :  { %8560 = vmatpush.msrb.mxu2 %v8403_v48  ;;  %8580 = vmatpush.msrb.mxu3 %v8419_v60  ;;  %v7919_v16 = vadd.f32 %v7918_v28, %v7906_v53  ;;  %v8660_v28 = vld [vmem:[%s12158_s13] ss:$0 sm:$0xff] }
 0x5e6   :  { %8524 = vmatpush.msrb.mxu0 %v8367_v25  ;;  %8544 = vmatpush.msrb.mxu1 %v8383_v35  ;;  %v132_v35 = vld [vmem:[%s12146_s1] sm:$0x1] }
 0x5e7   :  { %8561 = vmatpush.msrb.mxu2 %v8402_v31  ;;  %8581 = vmatpush.msrb.mxu3 %v8418_v43  ;;  %v133_v20 = vsub.f32 1.0, %v132_v35 }
 0x5e8   :  { %8525 = vmatpush.msrb.mxu0 %v8366_v56  ;;  %8545 = vmatpush.msrb.mxu1 %v8382_v63 }
 0x5e9   :  { %8562 = vmatpush.msrb.mxu2 %v8401_v15  ;;  %8582 = vmatpush.msrb.mxu3 %v8417_v34  ;;  %v8594_v43 = vperm.slane %v133_v20, 0 }
 0x5ea   :  { %8526 = vmatpush.msrb.mxu0 %v8365_v40  ;;  %8546 = vmatpush.msrb.mxu1 %v8381_v23  ;;  %v7907_v59 = vpop.f32.mrf.mxu0 }
 0x5eb   :  { %8563 = vmatpush.msrb.mxu2 %v8400_v32  ;;  %8583 = vmatpush.msrb.mxu3 %v8416_v6  ;;  %v8667_v59 = vld [vmem:[%s12145_s0] sm:$0xff] }
 0x5ec   :  { %8527 = vmatpush.msrb.mxu0 %v8364_v52  ;;  %8547 = vmatpush.msrb.mxu1 %v8380_v33  ;;  %v7920_v27 = vpop.f32.mrf.mxu1 }
 0x5ed   :  { %8564 = vmatpush.msrb.mxu2 %v8399_v62  ;;  %8528 = vmatmul.f32.vlgmr.msrb.gmra.mxu0 %v8004_v58 }
 0x5ee   :  { %8548 = vmatmul.f32.vlgmr.msrb.gmra.mxu1 %v8005_v51  ;;  %8584 = vmatpush.msrb.mxu3 %v8415_v24 }
 0x5ef   :  { %8565 = vmatpush.msrb.mxu2 %v8398_v10 }
 0x5f0   :  { %8585 = vmatpush.msrb.mxu3 %v8414_v38 }
 0x5f1   :  { %8566 = vmatpush.msrb.mxu2 %v8397_v37  ;;  %v7931_v4 = vpop.f32.mrf.mxu2 }
 0x5f2   :  { %v7932_v50 = vadd.f32 %v7931_v4, %v7919_v16  ;;  %8586 = vmatpush.msrb.mxu3 %v8413_v26 }
 0x5f3   :  { %8567 = vmatpush.msrb.mxu2 %v8396_v11  ;;  %v7944_v36 = vpop.f32.mrf.mxu3 }
 0x5f4   :  { %8568 = vmatmul.f32.vlgmr.msrb.gmra.mxu2 %v8006_v55  ;;  %v7945_v41 = vadd.f32 %v7944_v36, %v7932_v50  ;;  %8587 = vmatpush.msrb.mxu3 %v8412_v44 }
 0x5f6   :  { %v7973_v54 = vmul.f32 %v7957_v0, %v7945_v41 }
 0x5f8   :  { %v7999_v9 = vadd.f32 %v7983_v2, %v7973_v54 }
 0x5f9   :  { %v7933_v42 = vpop.f32.mrf.mxu2 }
 0x5fa   :  { %v8007_v61 = vmax.f32 %v7999_v9, 0.0 }
 0x5fb   :  { %v7946_v46 = vpop.f32.mrf.mxu3 }
 0x5fc   :  { %8588 = vmatmul.f32.vlgmr.msrb.gmra.mxu3 %v8007_v61 }
 0x605   :  { %v8157_v45 = vpop.f32.mrf.mxu0  ;;  %v8177_v5 = vpop.f32.mrf.mxu1 }
 0x606   :  { %v8158_v49 = vadd.f32 %v8659_v14, %v8157_v45 }
 0x608   :  { %v8178_v29 = vadd.f32 %v8177_v5, %v8158_v49 }
 0x612   :  { %v8197_v39 = vpop.f32.mrf.mxu2  ;;  %v8217_v25 = vpop.f32.mrf.mxu3 }
 0x613   :  { %v8198_v48 = vadd.f32 %v8197_v39, %v8178_v29 }
 0x615   :  { %v8218_v21 = vadd.f32 %v8217_v25, %v8198_v48 }
 0x627   :  { %v8237_v60 = vpop.f32.mrf.mxu0  ;;  %v8257_v22 = vpop.f32.mrf.mxu1 }
 0x628   :  { %v8238_v7 = vadd.f32 %v8237_v60, %v8218_v21 }
 0x62a   :  { %v8258_v57 = vadd.f32 %v8257_v22, %v8238_v7 }
 0x634   :  { %v8277_v30 = vpop.f32.mrf.mxu2  ;;  %v8297_v8 = vpop.f32.mrf.mxu3 }
 0x635   :  { %v8278_v31 = vadd.f32 %v8277_v30, %v8258_v57 }
 0x637   :  { %v8298_v56 = vadd.f32 %v8297_v8, %v8278_v31 }
 0x639   :  { %8661 = vtanh.f32 %v8298_v56 }
 0x63f   :  { %v8662_v12 = vpop.eup %8661 }
 0x640   :  { %v8596_v63 = vmul.f32 %v8662_v12, %v8594_v43 }
 0x642   :  { %v8602_v15 = vsel %vm203_vm1, %v8596_v63, 0.0  ;;  %v8598_v3 = vmul.f32 1.442695, %v8596_v63 }
 0x643   :  { %8603 = vadd.xlane.f32.xlu0 %v8602_v15 }
 0x644   :  { %8663 = vpow2.f32 %v8598_v3 }
 0x649   :  { %v8449_v13 = vpop.f32.mrf.mxu0  ;;  %v8469_v34 = vpop.f32.mrf.mxu1 }
 0x64a   :  { %v8450_v40 = vadd.f32 %v8660_v28, %v8449_v13  ;;  %v8664_v24 = vpop.eup %8663 }
 0x64b   :  { %v8600_v1 = vmul.f32 %v8667_v59, %v8664_v24 }
 0x64c   :  { %v8470_v18 = vadd.f32 %v8469_v34, %v8450_v40 }
 0x656   :  { %v8489_v47 = vpop.f32.mrf.mxu2  ;;  %v8509_v32 = vpop.f32.mrf.mxu3 }
 0x657   :  { %v8490_v23 = vadd.f32 %v8489_v47, %v8470_v18 }
 0x659   :  { %v8510_v6 = vadd.f32 %v8509_v32, %v8490_v23 }
 0x66a   :  { %v8529_v52 = vpop.f32.mrf.mxu0 }
 0x66b   :  { %v8530_v17 = vadd.f32 %v8529_v52, %v8510_v6  ;;  %v8549_v33 = vpop.f32.mrf.mxu1 }
 0x66d   :  { %v8550_v19 = vadd.f32 %v8549_v33, %v8530_v17 }
 0x677   :  { %v8569_v62 = vpop.f32.mrf.mxu2 }
 0x678   :  { %v8570_v51 = vadd.f32 %v8569_v62, %v8550_v19 }
 0x67f   :  { %v8589_v58 = vpop.f32.mrf.mxu3 }
 0x680   :  { %v8590_v10 = vadd.f32 %v8589_v58, %v8570_v51 }
 0x682   :  { %v8597_v53 = vmul.f32 %v8594_v43, %v8590_v10 }
 0x684   :  { %v8601_v37 = vadd.f32 %v8600_v1, %v8597_v53 }
 0x6b6   :  { %v8604_v27 = vpop.xlane.xlu0 %8603 }
 0x6b7   :  { %v8605_v38 = vsel %vm203_vm1, %v8601_v37, %v8604_v27 }
 0x6b8   :  { %v8607_v11 = vsel %vm8606_vm2, %v8605_v38, 0.0 }
 0x6b9   :  { %8609 = vst.msk [vmem:[%s12159_s14] sm:$0xff] %vm8608_vm3, %v8607_v11 }
 0x6ba   :  { %8614 = vsyncpa [#allocation3], 1 }
 0x6bb   :  { %8615 = vsyncpa [#allocation5], 1 }
 0x6bc   :  { %8616 = vsyncpa [#allocation8], 1 }
 0x6bd   :  { %8617 = vsyncpa [#allocation11], 1 }

</bundles_post_ra>
